<compile_context>
chip_gen: v7x
topology: tpu7x:2x2x1
jax: 0.10.0
libtpu: 0.0.40
codegen_flags: <defaults>
</compile_context>

<pallas_src>
import functools

import numpy as np
import jax
import jax.numpy as jnp
from jax.experimental import pallas as pl
from jax.experimental.pallas import tpu as pltpu


# ----------------------------------------------------------------------------
# Pallas kernel: fused multi-input matmul + bias + optional SiLU
# ----------------------------------------------------------------------------
def _fused_matmul_kernel(*refs, n_in, act):
    x_refs = refs[:n_in]
    w_refs = refs[n_in:2 * n_in]
    b_ref = refs[2 * n_in]
    o_ref = refs[2 * n_in + 1]
    acc = jnp.dot(x_refs[0][...], w_refs[0][...],
                  preferred_element_type=jnp.float32)
    for i in range(1, n_in):
        acc = acc + jnp.dot(x_refs[i][...], w_refs[i][...],
                            preferred_element_type=jnp.float32)
    acc = acc + b_ref[...]
    if act:
        acc = acc * jax.nn.sigmoid(acc)          # SiLU in f32
    o_ref[...] = acc.astype(o_ref.dtype)


def _pick_tile(dim, prefer):
    if dim <= prefer:
        return dim                                # full-extent block (always legal)
    for t in (prefer, 128):
        if dim % t == 0:
            return t
    return dim


def fused_matmul(xs, ws, b, act=True, out_dtype=jnp.bfloat16):
    """sum_i xs[i] @ ws[i] + b (+SiLU).  xs[i]: [M, K_i], ws[i]: [K_i, N], b: [1, N]."""
    xs = [x.astype(jnp.bfloat16) for x in xs]
    ws = [w.astype(jnp.bfloat16) for w in ws]
    M = xs[0].shape[0]
    N = ws[0].shape[1]
    TM = _pick_tile(M, 256)      # 256-wide M tiles fill the v6e/v7x MXU
    TN = _pick_tile(N, 256)      # N tiling also gives v7x a 2nd parallel step
    n_in = len(xs)

    in_specs = []
    for x in xs:
        K = x.shape[1]
        in_specs.append(pl.BlockSpec((TM, K), lambda i, j: (i, 0)))
    for w in ws:
        K = w.shape[0]
        in_specs.append(pl.BlockSpec((K, TN), lambda i, j: (0, j)))
    in_specs.append(pl.BlockSpec((1, TN), lambda i, j: (0, j)))

    return pl.pallas_call(
        functools.partial(_fused_matmul_kernel, n_in=n_in, act=act),
        out_shape=jax.ShapeDtypeStruct((M, N), out_dtype),
        grid_spec=pltpu.PrefetchScalarGridSpec(
            num_scalar_prefetch=0,
            grid=(M // TM, N // TN),
            in_specs=in_specs,
            out_specs=pl.BlockSpec((TM, TN), lambda i, j: (i, j)),
        ),
        compiler_params=pltpu.CompilerParams(
            dimension_semantics=("parallel", "parallel")),
    )(*xs, *ws, b)


# ----------------------------------------------------------------------------
# Conv / C2f building blocks (YOLO-style Conv = Conv2d(bias=False)+BN+SiLU).
# BN is at-init identity; its scale is folded into the weight, its shift is the
# bias fed to the kernel.  Weights are stored pre-reshaped to (K, N) in bf16.
# ----------------------------------------------------------------------------
_BN_EPS = 1e-3
_BN_SCALE = 1.0 / (1.0 + _BN_EPS) ** 0.5


def init_conv(key, c_in, c_out, k):
    fan_in = c_in * k * k
    w = jax.random.normal(key, (k, k, c_in, c_out), jnp.float32) * (1.0 / fan_in) ** 0.5
    w = (w * _BN_SCALE).reshape(k * k * c_in, c_out).astype(jnp.bfloat16)
    return {"w": w, "b": jnp.zeros((1, c_out), jnp.float32)}


def im2col(x, k, s):
    # x: [N,H,W,C] bf16 -> patches [N*Ho*Wo, k*k*C] (tap-major, channel-minor)
    # TODO(synk): fold the patch extraction into the Pallas kernel (9 shifted tap
    # matmuls on a VMEM-resident tile) instead of materializing the patch matrix.
    n, h, w, c = x.shape
    p = k // 2
    xp = jnp.pad(x, ((0, 0), (p, p), (p, p), (0, 0)))
    ho = (h + 2 * p - k) // s + 1
    wo = (w + 2 * p - k) // s + 1
    cols = []
    for dy in range(k):
        for dx in range(k):
            cols.append(xp[:, dy:dy + s * ho:s, dx:dx + s * wo:s, :])
    patches = jnp.concatenate(cols, axis=-1)
    return patches.reshape(n * ho * wo, k * k * c), ho, wo


def conv2d(x, params, k, s=1, act=True, out_dtype=jnp.bfloat16):
    n = x.shape[0]
    if k == 1 and s == 1:
        h, w = x.shape[1], x.shape[2]
        out = fused_matmul([x.reshape(n * h * w, x.shape[3])], [params["w"]],
                           params["b"], act=act, out_dtype=out_dtype)
        return out.reshape(n, h, w, -1)
    patches, ho, wo = im2col(x.astype(jnp.bfloat16), k, s)
    out = fused_matmul([patches], [params["w"]], params["b"], act=act,
                       out_dtype=out_dtype)
    return out.reshape(n, ho, wo, -1)


def conv1x1_multi(xs, params, act=True, out_dtype=jnp.bfloat16):
    """1x1 Conv-BN-SiLU over an implicit channel-concat of xs (never built)."""
    n, h, w = xs[0].shape[:3]
    xs2d = [x.reshape(n * h * w, x.shape[-1]) for x in xs]
    ws, off = [], 0
    for x2 in xs2d:
        kdim = x2.shape[1]
        ws.append(params["w"][off:off + kdim])
        off += kdim
    out = fused_matmul(xs2d, ws, params["b"], act=act, out_dtype=out_dtype)
    return out.reshape(n, h, w, -1)


def init_c2f(key, c1, c2):
    c = c2 // 2
    k1, k2, k3, k4 = jax.random.split(key, 4)
    return {
        "cv1": init_conv(k1, c1, 2 * c, 1),
        "cv2": init_conv(k2, (2 + 1) * c, c2, 1),   # n = 1
        "m_cv1": init_conv(k3, c, c, 3),
        "m_cv2": init_conv(k4, c, c, 3),
    }


def c2f(p, *xs):
    # xs are the (not yet concatenated) inputs of the preceding Concat; the
    # concat is folded into cv1's K-partitioned matmul.
    y = conv1x1_multi(list(xs), p["cv1"])
    c = y.shape[-1] // 2
    y2 = y[..., c:]
    m = conv2d(conv2d(y2, p["m_cv1"], 3, 1), p["m_cv2"], 3, 1)  # Bottleneck, shortcut=False
    # concat([y1, y2, m]) @ W  ==  y @ W[:2c] + m @ W[2c:]
    return conv1x1_multi([y, m], p["cv2"])


# ----------------------------------------------------------------------------
# Upsample / PixelShuffle glue (pure layout / interpolation, plain JAX)
# ----------------------------------------------------------------------------
def _interp_matrix(size_in, size_out):
    # static align_corners=True bilinear interpolation matrix (numpy constant)
    if size_in == 1:
        return jnp.ones((size_out, 1), jnp.float32)
    pos = np.arange(size_out, dtype=np.float64) * (size_in - 1) / (size_out - 1)
    lo = np.minimum(np.floor(pos).astype(np.int64), size_in - 2)
    frac = (pos - lo).astype(np.float32)
    m = np.zeros((size_out, size_in), np.float32)
    rows = np.arange(size_out)
    m[rows, lo] = 1.0 - frac
    m[rows, lo + 1] += frac
    return jnp.asarray(m)


def upsample_bilinear_2x(x):
    # nn.Upsample(scale_factor=2, mode='bilinear', align_corners=True), NHWC.
    # Two small static interpolation-matrix contractions (no XLA gathers).
    n, h, w, c = x.shape
    ah = _interp_matrix(h, 2 * h)
    aw = _interp_matrix(w, 2 * w)
    xf = x.astype(jnp.float32)
    t = jnp.einsum("ih,nhwc->niwc", ah, xf)
    return jnp.einsum("jw,niwc->nijc", aw, t)


def pixel_shuffle(x, r):
    # NCHW PixelShuffle semantics, applied to NHWC layout
    n, h, w, crr = x.shape
    c = crr // (r * r)
    x = x.reshape(n, h, w, c, r, r)
    x = jnp.transpose(x, (0, 1, 4, 2, 5, 3))
    return x.reshape(n, h * r, w * r, c)


# ----------------------------------------------------------------------------
# Backbone / head
# ----------------------------------------------------------------------------
# TODO(synk): MN4 (MobileNetV4) internals are not given with the module; using a
# simplified strided Conv-BN-SiLU backbone producing features with channels
# (80, 160, 256) at strides (8, 16, 32), which is what the decoder channel
# arithmetic (416/336/384/512 concats) implies.
def init_mn4(key):
    ks = jax.random.split(key, 5)
    return {
        "c1": init_conv(ks[0], 3, 16, 3),
        "c2": init_conv(ks[1], 16, 32, 3),
        "c3": init_conv(ks[2], 32, 80, 3),
        "c4": init_conv(ks[3], 80, 160, 3),
        "c5": init_conv(ks[4], 160, 256, 3),
    }


def mn4(x, p):
    x = conv2d(x, p["c1"], 3, 2)
    x = conv2d(x, p["c2"], 3, 2)
    f1 = conv2d(x, p["c3"], 3, 2)     # stride 8,  80 ch
    f2 = conv2d(f1, p["c4"], 3, 2)    # stride 16, 160 ch
    f3 = conv2d(f2, p["c5"], 3, 2)    # stride 32, 256 ch
    return f1, f2, f3


# TODO(synk): LastConv definition is not provided; assuming Conv(32,32,3,1)
# (Conv-BN-SiLU) followed by a 1x1 conv to num_classes with no activation.
def init_lastconv(key, c_in, num_classes):
    k1, k2 = jax.random.split(key)
    return {"c1": init_conv(k1, c_in, c_in, 3),
            "c2": init_conv(k2, c_in, num_classes, 1)}


def lastconv(x, p):
    x = conv2d(x, p["c1"], 3, 1)
    return conv2d(x, p["c2"], 1, 1, act=False, out_dtype=jnp.float32)


def init_model(key, num_classes):
    ks = jax.random.split(key, 8)
    return {
        "mn4": init_mn4(ks[0]),
        "C2f_5": init_c2f(ks[1], 416, 256),
        "C2f_6": init_c2f(ks[2], 336, 128),
        "C2f_7": init_c2f(ks[3], 384, 256),
        "C2f_8": init_c2f(ks[4], 512, 512),
        "Conv_6": init_conv(ks[5], 128, 128, 3),
        "Conv_7": init_conv(ks[6], 256, 256, 3),
        "lastConv": init_lastconv(ks[7], 32, num_classes),
    }


def seg_no_ffm_forward(params, x_nhwc):
    x = x_nhwc.astype(jnp.bfloat16)
    s1, s2, s3 = mn4(x, params["mn4"])
    s2 = c2f(params["C2f_5"], s2, upsample_bilinear_2x(s3))      # 160+256 -> 256
    s1 = c2f(params["C2f_6"], s1, upsample_bilinear_2x(s2))      # 80+256  -> 128
    s2 = c2f(params["C2f_7"], conv2d(s1, params["Conv_6"], 3, 2), s2)  # 128+256 -> 256
    s3 = c2f(params["C2f_8"], conv2d(s2, params["Conv_7"], 3, 2), s3)  # 256+256 -> 512
    out = pixel_shuffle(s3, 4)                                   # -> 32 ch, x4 spatial
    out = lastconv(out, params["lastConv"])                      # -> num_classes (f32)
    out = upsample_bilinear_2x(upsample_bilinear_2x(upsample_bilinear_2x(out)))
    return out


if __name__ == "__main__":
    num_classes = 4
    key = jax.random.PRNGKey(0)
    kp, kx = jax.random.split(key)
    params = init_model(kp, num_classes)

    # PyTorch input would be NCHW [1, 3, 64, 64]; convert to NHWC for the kernel.
    x_nchw = jax.random.normal(kx, (1, 3, 64, 64), jnp.float32)
    x_nhwc = jnp.transpose(x_nchw, (0, 2, 3, 1))

    fwd = jax.jit(seg_no_ffm_forward)
    out_nhwc = fwd(params, x_nhwc)
    out_nchw = jnp.transpose(out_nhwc, (0, 3, 1, 2))
    out_nchw = jax.block_until_ready(out_nchw)

    assert out_nchw.shape == (1, num_classes, 64, 64), out_nchw.shape
    assert bool(jnp.all(jnp.isfinite(out_nchw)))
    print("KERNEL_OK")
</pallas_src>

<mosaic_0001>
module attributes {stable_mosaic.version = 11 : i64} {
  func.func @_fused_matmul_kernel(%arg0: i32, %arg1: i32, %arg2: memref<256x27xbf16, #tpu.memory_space<vmem>>, %arg3: memref<27x16xbf16, #tpu.memory_space<vmem>>, %arg4: memref<1x16xf32, #tpu.memory_space<vmem>>, %arg5: memref<256x16xbf16, #tpu.memory_space<vmem>>) attributes {dimension_semantics = [#tpu.dimension_semantics<parallel>, #tpu.dimension_semantics<parallel>], iteration_bounds = array<i64: 4, 1>, scalar_prefetch = 0 : i64, scratch_operands = 0 : i64, tpu.core_type = #tpu.core_type<tc>, window_params = [{transform_indices = @transform_0, window_bounds = array<i64: 256, 27>}, {transform_indices = @transform_1, window_bounds = array<i64: 27, 16>}, {transform_indices = @transform_2, window_bounds = array<i64: 1, 16>}, {transform_indices = @transform_3, window_bounds = array<i64: 256, 16>}]} {
    %c0 = arith.constant 0 : index
    %c0_0 = arith.constant 0 : index
    %0 = vector.load %arg2[%c0, %c0_0] : memref<256x27xbf16, #tpu.memory_space<vmem>>, vector<256x27xbf16>
    %c0_1 = arith.constant 0 : index
    %c0_2 = arith.constant 0 : index
    %1 = vector.load %arg3[%c0_1, %c0_2] : memref<27x16xbf16, #tpu.memory_space<vmem>>, vector<27x16xbf16>
    %cst = arith.constant dense<0.000000e+00> : vector<256x16xf32>
    %2 = tpu.matmul %0, %1, %cst {dimension_numbers = #tpu.dot_dimension_numbers<[1], [0], [0], [1], [0, 0, 1, 1], [], []>} : vector<256x27xbf16>, vector<27x16xbf16>, vector<256x16xf32> -> vector<256x16xf32>
    %c0_3 = arith.constant 0 : index
    %c0_4 = arith.constant 0 : index
    %3 = vector.load %arg4[%c0_3, %c0_4] : memref<1x16xf32, #tpu.memory_space<vmem>>, vector<1x16xf32>
    %4 = vector.broadcast %3 : vector<1x16xf32> to vector<256x16xf32>
    %5 = arith.addf %2, %4 : vector<256x16xf32>
    %6 = arith.negf %5 : vector<256x16xf32>
    %7 = math.exp %6 : vector<256x16xf32>
    %cst_5 = arith.constant 1.000000e+00 : f32
    %8 = vector.broadcast %cst_5 : f32 to vector<256x16xf32>
    %9 = arith.addf %8, %7 : vector<256x16xf32>
    %10 = arith.divf %8, %9 : vector<256x16xf32>
    %11 = arith.mulf %5, %10 : vector<256x16xf32>
    %12 = arith.truncf %11 : vector<256x16xf32> to vector<256x16xbf16>
    %c0_6 = arith.constant 0 : index
    %c0_7 = arith.constant 0 : index
    %13 = vector.load %arg5[%c0_6, %c0_7] : memref<256x16xbf16, #tpu.memory_space<vmem>>, vector<256x16xbf16>
    tpu.vector_store %arg5[%c0_6, %c0_7], %12 {strides = array<i32>} : memref<256x16xbf16, #tpu.memory_space<vmem>>, vector<256x16xbf16>,
    return
  }
  func.func @transform_0(%arg0: i32, %arg1: i32) -> (i32, i32) {
    %c0_i32 = arith.constant 0 : i32
    %c0_i32_0 = arith.constant 0 : i32
    return %arg0, %c0_i32 : i32, i32
  }
  func.func @transform_1(%arg0: i32, %arg1: i32) -> (i32, i32) {
    %c0_i32 = arith.constant 0 : i32
    %c0_i32_0 = arith.constant 0 : i32
    return %c0_i32, %arg1 : i32, i32
  }
  func.func @transform_2(%arg0: i32, %arg1: i32) -> (i32, i32) {
    %c0_i32 = arith.constant 0 : i32
    %c0_i32_0 = arith.constant 0 : i32
    return %c0_i32, %arg1 : i32, i32
  }
  func.func @transform_3(%arg0: i32, %arg1: i32) -> (i32, i32) {
    %c0_i32 = arith.constant 0 : i32
    return %arg0, %arg1 : i32, i32
  }
}

module attributes {stable_mosaic.version = 11 : i64} {
  func.func @_fused_matmul_kernel(%arg0: i32, %arg1: i32, %arg2: memref<256x144xbf16, #tpu.memory_space<vmem>>, %arg3: memref<144x32xbf16, #tpu.memory_space<vmem>>, %arg4: memref<1x32xf32, #tpu.memory_space<vmem>>, %arg5: memref<256x32xbf16, #tpu.memory_space<vmem>>) attributes {dimension_semantics = [#tpu.dimension_semantics<parallel>, #tpu.dimension_semantics<parallel>], iteration_bounds = array<i64: 1, 1>, scalar_prefetch = 0 : i64, scratch_operands = 0 : i64, tpu.core_type = #tpu.core_type<tc>, window_params = [{transform_indices = @transform_0, window_bounds = array<i64: 256, 144>}, {transform_indices = @transform_1, window_bounds = array<i64: 144, 32>}, {transform_indices = @transform_2, window_bounds = array<i64: 1, 32>}, {transform_indices = @transform_3, window_bounds = array<i64: 256, 32>}]} {
    %c0 = arith.constant 0 : index
    %c0_0 = arith.constant 0 : index
    %0 = vector.load %arg2[%c0, %c0_0] : memref<256x144xbf16, #tpu.memory_space<vmem>>, vector<256x144xbf16>
    %c0_1 = arith.constant 0 : index
    %c0_2 = arith.constant 0 : index
    %1 = vector.load %arg3[%c0_1, %c0_2] : memref<144x32xbf16, #tpu.memory_space<vmem>>, vector<144x32xbf16>
    %cst = arith.constant dense<0.000000e+00> : vector<256x32xf32>
    %2 = tpu.matmul %0, %1, %cst {dimension_numbers = #tpu.dot_dimension_numbers<[1], [0], [0], [1], [0, 0, 1, 1], [], []>} : vector<256x144xbf16>, vector<144x32xbf16>, vector<256x32xf32> -> vector<256x32xf32>
    %c0_3 = arith.constant 0 : index
    %c0_4 = arith.constant 0 : index
    %3 = vector.load %arg4[%c0_3, %c0_4] : memref<1x32xf32, #tpu.memory_space<vmem>>, vector<1x32xf32>
    %4 = vector.broadcast %3 : vector<1x32xf32> to vector<256x32xf32>
    %5 = arith.addf %2, %4 : vector<256x32xf32>
    %6 = arith.negf %5 : vector<256x32xf32>
    %7 = math.exp %6 : vector<256x32xf32>
    %cst_5 = arith.constant 1.000000e+00 : f32
    %8 = vector.broadcast %cst_5 : f32 to vector<256x32xf32>
    %9 = arith.addf %8, %7 : vector<256x32xf32>
    %10 = arith.divf %8, %9 : vector<256x32xf32>
    %11 = arith.mulf %5, %10 : vector<256x32xf32>
    %12 = arith.truncf %11 : vector<256x32xf32> to vector<256x32xbf16>
    %c0_6 = arith.constant 0 : index
    %c0_7 = arith.constant 0 : index
    %13 = vector.load %arg5[%c0_6, %c0_7] : memref<256x32xbf16, #tpu.memory_space<vmem>>, vector<256x32xbf16>
    tpu.vector_store %arg5[%c0_6, %c0_7], %12 {strides = array<i32>} : memref<256x32xbf16, #tpu.memory_space<vmem>>, vector<256x32xbf16>,
    return
  }
  func.func @transform_0(%arg0: i32, %arg1: i32) -> (i32, i32) {
    %c0_i32 = arith.constant 0 : i32
    %c0_i32_0 = arith.constant 0 : i32
    return %arg0, %c0_i32 : i32, i32
  }
  func.func @transform_1(%arg0: i32, %arg1: i32) -> (i32, i32) {
    %c0_i32 = arith.constant 0 : i32
    %c0_i32_0 = arith.constant 0 : i32
    return %c0_i32, %arg1 : i32, i32
  }
  func.func @transform_2(%arg0: i32, %arg1: i32) -> (i32, i32) {
    %c0_i32 = arith.constant 0 : i32
    %c0_i32_0 = arith.constant 0 : i32
    return %c0_i32, %arg1 : i32, i32
  }
  func.func @transform_3(%arg0: i32, %arg1: i32) -> (i32, i32) {
    %c0_i32 = arith.constant 0 : i32
    return %arg0, %arg1 : i32, i32
  }
}

module attributes {stable_mosaic.version = 11 : i64} {
  func.func @_fused_matmul_kernel(%arg0: i32, %arg1: i32, %arg2: memref<64x288xbf16, #tpu.memory_space<vmem>>, %arg3: memref<288x80xbf16, #tpu.memory_space<vmem>>, %arg4: memref<1x80xf32, #tpu.memory_space<vmem>>, %arg5: memref<64x80xbf16, #tpu.memory_space<vmem>>) attributes {dimension_semantics = [#tpu.dimension_semantics<parallel>, #tpu.dimension_semantics<parallel>], iteration_bounds = array<i64: 1, 1>, scalar_prefetch = 0 : i64, scratch_operands = 0 : i64, tpu.core_type = #tpu.core_type<tc>, window_params = [{transform_indices = @transform_0, window_bounds = array<i64: 64, 288>}, {transform_indices = @transform_1, window_bounds = array<i64: 288, 80>}, {transform_indices = @transform_2, window_bounds = array<i64: 1, 80>}, {transform_indices = @transform_3, window_bounds = array<i64: 64, 80>}]} {
    %c0 = arith.constant 0 : index
    %c0_0 = arith.constant 0 : index
    %0 = vector.load %arg2[%c0, %c0_0] : memref<64x288xbf16, #tpu.memory_space<vmem>>, vector<64x288xbf16>
    %c0_1 = arith.constant 0 : index
    %c0_2 = arith.constant 0 : index
    %1 = vector.load %arg3[%c0_1, %c0_2] : memref<288x80xbf16, #tpu.memory_space<vmem>>, vector<288x80xbf16>
    %cst = arith.constant dense<0.000000e+00> : vector<64x80xf32>
    %2 = tpu.matmul %0, %1, %cst {dimension_numbers = #tpu.dot_dimension_numbers<[1], [0], [0], [1], [0, 0, 1, 1], [], []>} : vector<64x288xbf16>, vector<288x80xbf16>, vector<64x80xf32> -> vector<64x80xf32>
    %c0_3 = arith.constant 0 : index
    %c0_4 = arith.constant 0 : index
    %3 = vector.load %arg4[%c0_3, %c0_4] : memref<1x80xf32, #tpu.memory_space<vmem>>, vector<1x80xf32>
    %4 = vector.broadcast %3 : vector<1x80xf32> to vector<64x80xf32>
    %5 = arith.addf %2, %4 : vector<64x80xf32>
    %6 = arith.negf %5 : vector<64x80xf32>
    %7 = math.exp %6 : vector<64x80xf32>
    %cst_5 = arith.constant 1.000000e+00 : f32
    %8 = vector.broadcast %cst_5 : f32 to vector<64x80xf32>
    %9 = arith.addf %8, %7 : vector<64x80xf32>
    %10 = arith.divf %8, %9 : vector<64x80xf32>
    %11 = arith.mulf %5, %10 : vector<64x80xf32>
    %12 = arith.truncf %11 : vector<64x80xf32> to vector<64x80xbf16>
    %c0_6 = arith.constant 0 : index
    %c0_7 = arith.constant 0 : index
    %13 = vector.load %arg5[%c0_6, %c0_7] : memref<64x80xbf16, #tpu.memory_space<vmem>>, vector<64x80xbf16>
    tpu.vector_store %arg5[%c0_6, %c0_7], %12 {strides = array<i32>} : memref<64x80xbf16, #tpu.memory_space<vmem>>, vector<64x80xbf16>,
    return
  }
  func.func @transform_0(%arg0: i32, %arg1: i32) -> (i32, i32) {
    %c0_i32 = arith.constant 0 : i32
    %c0_i32_0 = arith.constant 0 : i32
    return %arg0, %c0_i32 : i32, i32
  }
  func.func @transform_1(%arg0: i32, %arg1: i32) -> (i32, i32) {
    %c0_i32 = arith.constant 0 : i32
    %c0_i32_0 = arith.constant 0 : i32
    return %c0_i32, %arg1 : i32, i32
  }
  func.func @transform_2(%arg0: i32, %arg1: i32) -> (i32, i32) {
    %c0_i32 = arith.constant 0 : i32
    %c0_i32_0 = arith.constant 0 : i32
    return %c0_i32, %arg1 : i32, i32
  }
  func.func @transform_3(%arg0: i32, %arg1: i32) -> (i32, i32) {
    %c0_i32 = arith.constant 0 : i32
    return %arg0, %arg1 : i32, i32
  }
}

module attributes {stable_mosaic.version = 11 : i64} {
  func.func @_fused_matmul_kernel(%arg0: i32, %arg1: i32, %arg2: memref<16x720xbf16, #tpu.memory_space<vmem>>, %arg3: memref<720x160xbf16, #tpu.memory_space<vmem>>, %arg4: memref<1x160xf32, #tpu.memory_space<vmem>>, %arg5: memref<16x160xbf16, #tpu.memory_space<vmem>>) attributes {dimension_semantics = [#tpu.dimension_semantics<parallel>, #tpu.dimension_semantics<parallel>], iteration_bounds = array<i64: 1, 1>, scalar_prefetch = 0 : i64, scratch_operands = 0 : i64, tpu.core_type = #tpu.core_type<tc>, window_params = [{transform_indices = @transform_0, window_bounds = array<i64: 16, 720>}, {transform_indices = @transform_1, window_bounds = array<i64: 720, 160>}, {transform_indices = @transform_2, window_bounds = array<i64: 1, 160>}, {transform_indices = @transform_3, window_bounds = array<i64: 16, 160>}]} {
    %c0 = arith.constant 0 : index
    %c0_0 = arith.constant 0 : index
    %0 = vector.load %arg2[%c0, %c0_0] : memref<16x720xbf16, #tpu.memory_space<vmem>>, vector<16x720xbf16>
    %c0_1 = arith.constant 0 : index
    %c0_2 = arith.constant 0 : index
    %1 = vector.load %arg3[%c0_1, %c0_2] : memref<720x160xbf16, #tpu.memory_space<vmem>>, vector<720x160xbf16>
    %cst = arith.constant dense<0.000000e+00> : vector<16x160xf32>
    %2 = tpu.matmul %0, %1, %cst {dimension_numbers = #tpu.dot_dimension_numbers<[1], [0], [0], [1], [0, 0, 1, 1], [], []>} : vector<16x720xbf16>, vector<720x160xbf16>, vector<16x160xf32> -> vector<16x160xf32>
    %c0_3 = arith.constant 0 : index
    %c0_4 = arith.constant 0 : index
    %3 = vector.load %arg4[%c0_3, %c0_4] : memref<1x160xf32, #tpu.memory_space<vmem>>, vector<1x160xf32>
    %4 = vector.broadcast %3 : vector<1x160xf32> to vector<16x160xf32>
    %5 = arith.addf %2, %4 : vector<16x160xf32>
    %6 = arith.negf %5 : vector<16x160xf32>
    %7 = math.exp %6 : vector<16x160xf32>
    %cst_5 = arith.constant 1.000000e+00 : f32
    %8 = vector.broadcast %cst_5 : f32 to vector<16x160xf32>
    %9 = arith.addf %8, %7 : vector<16x160xf32>
    %10 = arith.divf %8, %9 : vector<16x160xf32>
    %11 = arith.mulf %5, %10 : vector<16x160xf32>
    %12 = arith.truncf %11 : vector<16x160xf32> to vector<16x160xbf16>
    %c0_6 = arith.constant 0 : index
    %c0_7 = arith.constant 0 : index
    %13 = vector.load %arg5[%c0_6, %c0_7] : memref<16x160xbf16, #tpu.memory_space<vmem>>, vector<16x160xbf16>
    tpu.vector_store %arg5[%c0_6, %c0_7], %12 {strides = array<i32>} : memref<16x160xbf16, #tpu.memory_space<vmem>>, vector<16x160xbf16>,
    return
  }
  func.func @transform_0(%arg0: i32, %arg1: i32) -> (i32, i32) {
    %c0_i32 = arith.constant 0 : i32
    %c0_i32_0 = arith.constant 0 : i32
    return %arg0, %c0_i32 : i32, i32
  }
  func.func @transform_1(%arg0: i32, %arg1: i32) -> (i32, i32) {
    %c0_i32 = arith.constant 0 : i32
    %c0_i32_0 = arith.constant 0 : i32
    return %c0_i32, %arg1 : i32, i32
  }
  func.func @transform_2(%arg0: i32, %arg1: i32) -> (i32, i32) {
    %c0_i32 = arith.constant 0 : i32
    %c0_i32_0 = arith.constant 0 : i32
    return %c0_i32, %arg1 : i32, i32
  }
  func.func @transform_3(%arg0: i32, %arg1: i32) -> (i32, i32) {
    %c0_i32 = arith.constant 0 : i32
    return %arg0, %arg1 : i32, i32
  }
}

module attributes {stable_mosaic.version = 11 : i64} {
  func.func @_fused_matmul_kernel(%arg0: i32, %arg1: i32, %arg2: memref<4x1440xbf16, #tpu.memory_space<vmem>>, %arg3: memref<1440x256xbf16, #tpu.memory_space<vmem>>, %arg4: memref<1x256xf32, #tpu.memory_space<vmem>>, %arg5: memref<4x256xbf16, #tpu.memory_space<vmem>>) attributes {dimension_semantics = [#tpu.dimension_semantics<parallel>, #tpu.dimension_semantics<parallel>], iteration_bounds = array<i64: 1, 1>, scalar_prefetch = 0 : i64, scratch_operands = 0 : i64, tpu.core_type = #tpu.core_type<tc>, window_params = [{transform_indices = @transform_0, window_bounds = array<i64: 4, 1440>}, {transform_indices = @transform_1, window_bounds = array<i64: 1440, 256>}, {transform_indices = @transform_2, window_bounds = array<i64: 1, 256>}, {transform_indices = @transform_3, window_bounds = array<i64: 4, 256>}]} {
    %c0 = arith.constant 0 : index
    %c0_0 = arith.constant 0 : index
    %0 = vector.load %arg2[%c0, %c0_0] : memref<4x1440xbf16, #tpu.memory_space<vmem>>, vector<4x1440xbf16>
    %c0_1 = arith.constant 0 : index
    %c0_2 = arith.constant 0 : index
    %1 = vector.load %arg3[%c0_1, %c0_2] : memref<1440x256xbf16, #tpu.memory_space<vmem>>, vector<1440x256xbf16>
    %cst = arith.constant dense<0.000000e+00> : vector<4x256xf32>
    %2 = tpu.matmul %0, %1, %cst {dimension_numbers = #tpu.dot_dimension_numbers<[1], [0], [0], [1], [0, 0, 1, 1], [], []>} : vector<4x1440xbf16>, vector<1440x256xbf16>, vector<4x256xf32> -> vector<4x256xf32>
    %c0_3 = arith.constant 0 : index
    %c0_4 = arith.constant 0 : index
    %3 = vector.load %arg4[%c0_3, %c0_4] : memref<1x256xf32, #tpu.memory_space<vmem>>, vector<1x256xf32>
    %4 = vector.broadcast %3 : vector<1x256xf32> to vector<4x256xf32>
    %5 = arith.addf %2, %4 : vector<4x256xf32>
    %6 = arith.negf %5 : vector<4x256xf32>
    %7 = math.exp %6 : vector<4x256xf32>
    %cst_5 = arith.constant 1.000000e+00 : f32
    %8 = vector.broadcast %cst_5 : f32 to vector<4x256xf32>
    %9 = arith.addf %8, %7 : vector<4x256xf32>
    %10 = arith.divf %8, %9 : vector<4x256xf32>
    %11 = arith.mulf %5, %10 : vector<4x256xf32>
    %12 = arith.truncf %11 : vector<4x256xf32> to vector<4x256xbf16>
    %c0_6 = arith.constant 0 : index
    %c0_7 = arith.constant 0 : index
    %13 = vector.load %arg5[%c0_6, %c0_7] : memref<4x256xbf16, #tpu.memory_space<vmem>>, vector<4x256xbf16>
    tpu.vector_store %arg5[%c0_6, %c0_7], %12 {strides = array<i32>} : memref<4x256xbf16, #tpu.memory_space<vmem>>, vector<4x256xbf16>,
    return
  }
  func.func @transform_0(%arg0: i32, %arg1: i32) -> (i32, i32) {
    %c0_i32 = arith.constant 0 : i32
    %c0_i32_0 = arith.constant 0 : i32
    return %arg0, %c0_i32 : i32, i32
  }
  func.func @transform_1(%arg0: i32, %arg1: i32) -> (i32, i32) {
    %c0_i32 = arith.constant 0 : i32
    %c0_i32_0 = arith.constant 0 : i32
    return %c0_i32, %arg1 : i32, i32
  }
  func.func @transform_2(%arg0: i32, %arg1: i32) -> (i32, i32) {
    %c0_i32 = arith.constant 0 : i32
    %c0_i32_0 = arith.constant 0 : i32
    return %c0_i32, %arg1 : i32, i32
  }
  func.func @transform_3(%arg0: i32, %arg1: i32) -> (i32, i32) {
    %c0_i32 = arith.constant 0 : i32
    return %arg0, %arg1 : i32, i32
  }
}

module attributes {stable_mosaic.version = 11 : i64} {
  func.func @_fused_matmul_kernel(%arg0: i32, %arg1: i32, %arg2: memref<16x160xbf16, #tpu.memory_space<vmem>>, %arg3: memref<16x256xbf16, #tpu.memory_space<vmem>>, %arg4: memref<160x256xbf16, #tpu.memory_space<vmem>>, %arg5: memref<256x256xbf16, #tpu.memory_space<vmem>>, %arg6: memref<1x256xf32, #tpu.memory_space<vmem>>, %arg7: memref<16x256xbf16, #tpu.memory_space<vmem>>) attributes {dimension_semantics = [#tpu.dimension_semantics<parallel>, #tpu.dimension_semantics<parallel>], iteration_bounds = array<i64: 1, 1>, scalar_prefetch = 0 : i64, scratch_operands = 0 : i64, tpu.core_type = #tpu.core_type<tc>, window_params = [{transform_indices = @transform_0, window_bounds = array<i64: 16, 160>}, {transform_indices = @transform_1, window_bounds = array<i64: 16, 256>}, {transform_indices = @transform_2, window_bounds = array<i64: 160, 256>}, {transform_indices = @transform_3, window_bounds = array<i64: 256, 256>}, {transform_indices = @transform_4, window_bounds = array<i64: 1, 256>}, {transform_indices = @transform_5, window_bounds = array<i64: 16, 256>}]} {
    %c0 = arith.constant 0 : index
    %c0_0 = arith.constant 0 : index
    %0 = vector.load %arg2[%c0, %c0_0] : memref<16x160xbf16, #tpu.memory_space<vmem>>, vector<16x160xbf16>
    %c0_1 = arith.constant 0 : index
    %c0_2 = arith.constant 0 : index
    %1 = vector.load %arg4[%c0_1, %c0_2] : memref<160x256xbf16, #tpu.memory_space<vmem>>, vector<160x256xbf16>
    %cst = arith.constant dense<0.000000e+00> : vector<16x256xf32>
    %2 = tpu.matmul %0, %1, %cst {dimension_numbers = #tpu.dot_dimension_numbers<[1], [0], [0], [1], [0, 0, 1, 1], [], []>} : vector<16x160xbf16>, vector<160x256xbf16>, vector<16x256xf32> -> vector<16x256xf32>
    %c0_3 = arith.constant 0 : index
    %c0_4 = arith.constant 0 : index
    %3 = vector.load %arg3[%c0_3, %c0_4] : memref<16x256xbf16, #tpu.memory_space<vmem>>, vector<16x256xbf16>
    %c0_5 = arith.constant 0 : index
    %c0_6 = arith.constant 0 : index
    %4 = vector.load %arg5[%c0_5, %c0_6] : memref<256x256xbf16, #tpu.memory_space<vmem>>, vector<256x256xbf16>
    %cst_7 = arith.constant dense<0.000000e+00> : vector<16x256xf32>
    %5 = tpu.matmul %3, %4, %cst_7 {dimension_numbers = #tpu.dot_dimension_numbers<[1], [0], [0], [1], [0, 0, 1, 1], [], []>} : vector<16x256xbf16>, vector<256x256xbf16>, vector<16x256xf32> -> vector<16x256xf32>
    %6 = arith.addf %2, %5 : vector<16x256xf32>
    %c0_8 = arith.constant 0 : index
    %c0_9 = arith.constant 0 : index
    %7 = vector.load %arg6[%c0_8, %c0_9] : memref<1x256xf32, #tpu.memory_space<vmem>>, vector<1x256xf32>
    %8 = vector.broadcast %7 : vector<1x256xf32> to vector<16x256xf32>
    %9 = arith.addf %6, %8 : vector<16x256xf32>
    %10 = arith.negf %9 : vector<16x256xf32>
    %11 = math.exp %10 : vector<16x256xf32>
    %cst_10 = arith.constant 1.000000e+00 : f32
    %12 = vector.broadcast %cst_10 : f32 to vector<16x256xf32>
    %13 = arith.addf %12, %11 : vector<16x256xf32>
    %14 = arith.divf %12, %13 : vector<16x256xf32>
    %15 = arith.mulf %9, %14 : vector<16x256xf32>
    %16 = arith.truncf %15 : vector<16x256xf32> to vector<16x256xbf16>
    %c0_11 = arith.constant 0 : index
    %c0_12 = arith.constant 0 : index
    %17 = vector.load %arg7[%c0_11, %c0_12] : memref<16x256xbf16, #tpu.memory_space<vmem>>, vector<16x256xbf16>
    tpu.vector_store %arg7[%c0_11, %c0_12], %16 {strides = array<i32>} : memref<16x256xbf16, #tpu.memory_space<vmem>>, vector<16x256xbf16>,
    return
  }
  func.func @transform_0(%arg0: i32, %arg1: i32) -> (i32, i32) {
    %c0_i32 = arith.constant 0 : i32
    %c0_i32_0 = arith.constant 0 : i32
    return %arg0, %c0_i32 : i32, i32
  }
  func.func @transform_1(%arg0: i32, %arg1: i32) -> (i32, i32) {
    %c0_i32 = arith.constant 0 : i32
    %c0_i32_0 = arith.constant 0 : i32
    return %arg0, %c0_i32 : i32, i32
  }
  func.func @transform_2(%arg0: i32, %arg1: i32) -> (i32, i32) {
    %c0_i32 = arith.constant 0 : i32
    %c0_i32_0 = arith.constant 0 : i32
    return %c0_i32, %arg1 : i32, i32
  }
  func.func @transform_3(%arg0: i32, %arg1: i32) -> (i32, i32) {
    %c0_i32 = arith.constant 0 : i32
    %c0_i32_0 = arith.constant 0 : i32
    return %c0_i32, %arg1 : i32, i32
  }
  func.func @transform_4(%arg0: i32, %arg1: i32) -> (i32, i32) {
    %c0_i32 = arith.constant 0 : i32
    %c0_i32_0 = arith.constant 0 : i32
    return %c0_i32, %arg1 : i32, i32
  }
  func.func @transform_5(%arg0: i32, %arg1: i32) -> (i32, i32) {
    %c0_i32 = arith.constant 0 : i32
    return %arg0, %arg1 : i32, i32
  }
}

module attributes {stable_mosaic.version = 11 : i64} {
  func.func @_fused_matmul_kernel(%arg0: i32, %arg1: i32, %arg2: memref<16x1152xbf16, #tpu.memory_space<vmem>>, %arg3: memref<1152x128xbf16, #tpu.memory_space<vmem>>, %arg4: memref<1x128xf32, #tpu.memory_space<vmem>>, %arg5: memref<16x128xbf16, #tpu.memory_space<vmem>>) attributes {dimension_semantics = [#tpu.dimension_semantics<parallel>, #tpu.dimension_semantics<parallel>], iteration_bounds = array<i64: 1, 1>, scalar_prefetch = 0 : i64, scratch_operands = 0 : i64, tpu.core_type = #tpu.core_type<tc>, window_params = [{transform_indices = @transform_0, window_bounds = array<i64: 16, 1152>}, {transform_indices = @transform_1, window_bounds = array<i64: 1152, 128>}, {transform_indices = @transform_2, window_bounds = array<i64: 1, 128>}, {transform_indices = @transform_3, window_bounds = array<i64: 16, 128>}]} {
    %c0 = arith.constant 0 : index
    %c0_0 = arith.constant 0 : index
    %0 = vector.load %arg2[%c0, %c0_0] : memref<16x1152xbf16, #tpu.memory_space<vmem>>, vector<16x1152xbf16>
    %c0_1 = arith.constant 0 : index
    %c0_2 = arith.constant 0 : index
    %1 = vector.load %arg3[%c0_1, %c0_2] : memref<1152x128xbf16, #tpu.memory_space<vmem>>, vector<1152x128xbf16>
    %cst = arith.constant dense<0.000000e+00> : vector<16x128xf32>
    %2 = tpu.matmul %0, %1, %cst {dimension_numbers = #tpu.dot_dimension_numbers<[1], [0], [0], [1], [0, 0, 1, 1], [], []>} : vector<16x1152xbf16>, vector<1152x128xbf16>, vector<16x128xf32> -> vector<16x128xf32>
    %c0_3 = arith.constant 0 : index
    %c0_4 = arith.constant 0 : index
    %3 = vector.load %arg4[%c0_3, %c0_4] : memref<1x128xf32, #tpu.memory_space<vmem>>, vector<1x128xf32>
    %4 = vector.broadcast %3 : vector<1x128xf32> to vector<16x128xf32>
    %5 = arith.addf %2, %4 : vector<16x128xf32>
    %6 = arith.negf %5 : vector<16x128xf32>
    %7 = math.exp %6 : vector<16x128xf32>
    %cst_5 = arith.constant 1.000000e+00 : f32
    %8 = vector.broadcast %cst_5 : f32 to vector<16x128xf32>
    %9 = arith.addf %8, %7 : vector<16x128xf32>
    %10 = arith.divf %8, %9 : vector<16x128xf32>
    %11 = arith.mulf %5, %10 : vector<16x128xf32>
    %12 = arith.truncf %11 : vector<16x128xf32> to vector<16x128xbf16>
    %c0_6 = arith.constant 0 : index
    %c0_7 = arith.constant 0 : index
    %13 = vector.load %arg5[%c0_6, %c0_7] : memref<16x128xbf16, #tpu.memory_space<vmem>>, vector<16x128xbf16>
    tpu.vector_store %arg5[%c0_6, %c0_7], %12 {strides = array<i32>} : memref<16x128xbf16, #tpu.memory_space<vmem>>, vector<16x128xbf16>,
    return
  }
  func.func @transform_0(%arg0: i32, %arg1: i32) -> (i32, i32) {
    %c0_i32 = arith.constant 0 : i32
    %c0_i32_0 = arith.constant 0 : i32
    return %arg0, %c0_i32 : i32, i32
  }
  func.func @transform_1(%arg0: i32, %arg1: i32) -> (i32, i32) {
    %c0_i32 = arith.constant 0 : i32
    %c0_i32_0 = arith.constant 0 : i32
    return %c0_i32, %arg1 : i32, i32
  }
  func.func @transform_2(%arg0: i32, %arg1: i32) -> (i32, i32) {
    %c0_i32 = arith.constant 0 : i32
    %c0_i32_0 = arith.constant 0 : i32
    return %c0_i32, %arg1 : i32, i32
  }
  func.func @transform_3(%arg0: i32, %arg1: i32) -> (i32, i32) {
    %c0_i32 = arith.constant 0 : i32
    return %arg0, %arg1 : i32, i32
  }
}

module attributes {stable_mosaic.version = 11 : i64} {
  func.func @_fused_matmul_kernel(%arg0: i32, %arg1: i32, %arg2: memref<16x256xbf16, #tpu.memory_space<vmem>>, %arg3: memref<16x128xbf16, #tpu.memory_space<vmem>>, %arg4: memref<256x256xbf16, #tpu.memory_space<vmem>>, %arg5: memref<128x256xbf16, #tpu.memory_space<vmem>>, %arg6: memref<1x256xf32, #tpu.memory_space<vmem>>, %arg7: memref<16x256xbf16, #tpu.memory_space<vmem>>) attributes {dimension_semantics = [#tpu.dimension_semantics<parallel>, #tpu.dimension_semantics<parallel>], iteration_bounds = array<i64: 1, 1>, scalar_prefetch = 0 : i64, scratch_operands = 0 : i64, tpu.core_type = #tpu.core_type<tc>, window_params = [{transform_indices = @transform_0, window_bounds = array<i64: 16, 256>}, {transform_indices = @transform_1, window_bounds = array<i64: 16, 128>}, {transform_indices = @transform_2, window_bounds = array<i64: 256, 256>}, {transform_indices = @transform_3, window_bounds = array<i64: 128, 256>}, {transform_indices = @transform_4, window_bounds = array<i64: 1, 256>}, {transform_indices = @transform_5, window_bounds = array<i64: 16, 256>}]} {
    %c0 = arith.constant 0 : index
    %c0_0 = arith.constant 0 : index
    %0 = vector.load %arg2[%c0, %c0_0] : memref<16x256xbf16, #tpu.memory_space<vmem>>, vector<16x256xbf16>
    %c0_1 = arith.constant 0 : index
    %c0_2 = arith.constant 0 : index
    %1 = vector.load %arg4[%c0_1, %c0_2] : memref<256x256xbf16, #tpu.memory_space<vmem>>, vector<256x256xbf16>
    %cst = arith.constant dense<0.000000e+00> : vector<16x256xf32>
    %2 = tpu.matmul %0, %1, %cst {dimension_numbers = #tpu.dot_dimension_numbers<[1], [0], [0], [1], [0, 0, 1, 1], [], []>} : vector<16x256xbf16>, vector<256x256xbf16>, vector<16x256xf32> -> vector<16x256xf32>
    %c0_3 = arith.constant 0 : index
    %c0_4 = arith.constant 0 : index
    %3 = vector.load %arg3[%c0_3, %c0_4] : memref<16x128xbf16, #tpu.memory_space<vmem>>, vector<16x128xbf16>
    %c0_5 = arith.constant 0 : index
    %c0_6 = arith.constant 0 : index
    %4 = vector.load %arg5[%c0_5, %c0_6] : memref<128x256xbf16, #tpu.memory_space<vmem>>, vector<128x256xbf16>
    %cst_7 = arith.constant dense<0.000000e+00> : vector<16x256xf32>
    %5 = tpu.matmul %3, %4, %cst_7 {dimension_numbers = #tpu.dot_dimension_numbers<[1], [0], [0], [1], [0, 0, 1, 1], [], []>} : vector<16x128xbf16>, vector<128x256xbf16>, vector<16x256xf32> -> vector<16x256xf32>
    %6 = arith.addf %2, %5 : vector<16x256xf32>
    %c0_8 = arith.constant 0 : index
    %c0_9 = arith.constant 0 : index
    %7 = vector.load %arg6[%c0_8, %c0_9] : memref<1x256xf32, #tpu.memory_space<vmem>>, vector<1x256xf32>
    %8 = vector.broadcast %7 : vector<1x256xf32> to vector<16x256xf32>
    %9 = arith.addf %6, %8 : vector<16x256xf32>
    %10 = arith.negf %9 : vector<16x256xf32>
    %11 = math.exp %10 : vector<16x256xf32>
    %cst_10 = arith.constant 1.000000e+00 : f32
    %12 = vector.broadcast %cst_10 : f32 to vector<16x256xf32>
    %13 = arith.addf %12, %11 : vector<16x256xf32>
    %14 = arith.divf %12, %13 : vector<16x256xf32>
    %15 = arith.mulf %9, %14 : vector<16x256xf32>
    %16 = arith.truncf %15 : vector<16x256xf32> to vector<16x256xbf16>
    %c0_11 = arith.constant 0 : index
    %c0_12 = arith.constant 0 : index
    %17 = vector.load %arg7[%c0_11, %c0_12] : memref<16x256xbf16, #tpu.memory_space<vmem>>, vector<16x256xbf16>
    tpu.vector_store %arg7[%c0_11, %c0_12], %16 {strides = array<i32>} : memref<16x256xbf16, #tpu.memory_space<vmem>>, vector<16x256xbf16>,
    return
  }
  func.func @transform_0(%arg0: i32, %arg1: i32) -> (i32, i32) {
    %c0_i32 = arith.constant 0 : i32
    %c0_i32_0 = arith.constant 0 : i32
    return %arg0, %c0_i32 : i32, i32
  }
  func.func @transform_1(%arg0: i32, %arg1: i32) -> (i32, i32) {
    %c0_i32 = arith.constant 0 : i32
    %c0_i32_0 = arith.constant 0 : i32
    return %arg0, %c0_i32 : i32, i32
  }
  func.func @transform_2(%arg0: i32, %arg1: i32) -> (i32, i32) {
    %c0_i32 = arith.constant 0 : i32
    %c0_i32_0 = arith.constant 0 : i32
    return %c0_i32, %arg1 : i32, i32
  }
  func.func @transform_3(%arg0: i32, %arg1: i32) -> (i32, i32) {
    %c0_i32 = arith.constant 0 : i32
    %c0_i32_0 = arith.constant 0 : i32
    return %c0_i32, %arg1 : i32, i32
  }
  func.func @transform_4(%arg0: i32, %arg1: i32) -> (i32, i32) {
    %c0_i32 = arith.constant 0 : i32
    %c0_i32_0 = arith.constant 0 : i32
    return %c0_i32, %arg1 : i32, i32
  }
  func.func @transform_5(%arg0: i32, %arg1: i32) -> (i32, i32) {
    %c0_i32 = arith.constant 0 : i32
    return %arg0, %arg1 : i32, i32
  }
}

module attributes {stable_mosaic.version = 11 : i64} {
  func.func @_fused_matmul_kernel(%arg0: i32, %arg1: i32, %arg2: memref<64x80xbf16, #tpu.memory_space<vmem>>, %arg3: memref<64x256xbf16, #tpu.memory_space<vmem>>, %arg4: memref<80x128xbf16, #tpu.memory_space<vmem>>, %arg5: memref<256x128xbf16, #tpu.memory_space<vmem>>, %arg6: memref<1x128xf32, #tpu.memory_space<vmem>>, %arg7: memref<64x128xbf16, #tpu.memory_space<vmem>>) attributes {dimension_semantics = [#tpu.dimension_semantics<parallel>, #tpu.dimension_semantics<parallel>], iteration_bounds = array<i64: 1, 1>, scalar_prefetch = 0 : i64, scratch_operands = 0 : i64, tpu.core_type = #tpu.core_type<tc>, window_params = [{transform_indices = @transform_0, window_bounds = array<i64: 64, 80>}, {transform_indices = @transform_1, window_bounds = array<i64: 64, 256>}, {transform_indices = @transform_2, window_bounds = array<i64: 80, 128>}, {transform_indices = @transform_3, window_bounds = array<i64: 256, 128>}, {transform_indices = @transform_4, window_bounds = array<i64: 1, 128>}, {transform_indices = @transform_5, window_bounds = array<i64: 64, 128>}]} {
    %c0 = arith.constant 0 : index
    %c0_0 = arith.constant 0 : index
    %0 = vector.load %arg2[%c0, %c0_0] : memref<64x80xbf16, #tpu.memory_space<vmem>>, vector<64x80xbf16>
    %c0_1 = arith.constant 0 : index
    %c0_2 = arith.constant 0 : index
    %1 = vector.load %arg4[%c0_1, %c0_2] : memref<80x128xbf16, #tpu.memory_space<vmem>>, vector<80x128xbf16>
    %cst = arith.constant dense<0.000000e+00> : vector<64x128xf32>
    %2 = tpu.matmul %0, %1, %cst {dimension_numbers = #tpu.dot_dimension_numbers<[1], [0], [0], [1], [0, 0, 1, 1], [], []>} : vector<64x80xbf16>, vector<80x128xbf16>, vector<64x128xf32> -> vector<64x128xf32>
    %c0_3 = arith.constant 0 : index
    %c0_4 = arith.constant 0 : index
    %3 = vector.load %arg3[%c0_3, %c0_4] : memref<64x256xbf16, #tpu.memory_space<vmem>>, vector<64x256xbf16>
    %c0_5 = arith.constant 0 : index
    %c0_6 = arith.constant 0 : index
    %4 = vector.load %arg5[%c0_5, %c0_6] : memref<256x128xbf16, #tpu.memory_space<vmem>>, vector<256x128xbf16>
    %cst_7 = arith.constant dense<0.000000e+00> : vector<64x128xf32>
    %5 = tpu.matmul %3, %4, %cst_7 {dimension_numbers = #tpu.dot_dimension_numbers<[1], [0], [0], [1], [0, 0, 1, 1], [], []>} : vector<64x256xbf16>, vector<256x128xbf16>, vector<64x128xf32> -> vector<64x128xf32>
    %6 = arith.addf %2, %5 : vector<64x128xf32>
    %c0_8 = arith.constant 0 : index
    %c0_9 = arith.constant 0 : index
    %7 = vector.load %arg6[%c0_8, %c0_9] : memref<1x128xf32, #tpu.memory_space<vmem>>, vector<1x128xf32>
    %8 = vector.broadcast %7 : vector<1x128xf32> to vector<64x128xf32>
    %9 = arith.addf %6, %8 : vector<64x128xf32>
    %10 = arith.negf %9 : vector<64x128xf32>
    %11 = math.exp %10 : vector<64x128xf32>
    %cst_10 = arith.constant 1.000000e+00 : f32
    %12 = vector.broadcast %cst_10 : f32 to vector<64x128xf32>
    %13 = arith.addf %12, %11 : vector<64x128xf32>
    %14 = arith.divf %12, %13 : vector<64x128xf32>
    %15 = arith.mulf %9, %14 : vector<64x128xf32>
    %16 = arith.truncf %15 : vector<64x128xf32> to vector<64x128xbf16>
    %c0_11 = arith.constant 0 : index
    %c0_12 = arith.constant 0 : index
    %17 = vector.load %arg7[%c0_11, %c0_12] : memref<64x128xbf16, #tpu.memory_space<vmem>>, vector<64x128xbf16>
    tpu.vector_store %arg7[%c0_11, %c0_12], %16 {strides = array<i32>} : memref<64x128xbf16, #tpu.memory_space<vmem>>, vector<64x128xbf16>,
    return
  }
  func.func @transform_0(%arg0: i32, %arg1: i32) -> (i32, i32) {
    %c0_i32 = arith.constant 0 : i32
    %c0_i32_0 = arith.constant 0 : i32
    return %arg0, %c0_i32 : i32, i32
  }
  func.func @transform_1(%arg0: i32, %arg1: i32) -> (i32, i32) {
    %c0_i32 = arith.constant 0 : i32
    %c0_i32_0 = arith.constant 0 : i32
    return %arg0, %c0_i32 : i32, i32
  }
  func.func @transform_2(%arg0: i32, %arg1: i32) -> (i32, i32) {
    %c0_i32 = arith.constant 0 : i32
    %c0_i32_0 = arith.constant 0 : i32
    return %c0_i32, %arg1 : i32, i32
  }
  func.func @transform_3(%arg0: i32, %arg1: i32) -> (i32, i32) {
    %c0_i32 = arith.constant 0 : i32
    %c0_i32_0 = arith.constant 0 : i32
    return %c0_i32, %arg1 : i32, i32
  }
  func.func @transform_4(%arg0: i32, %arg1: i32) -> (i32, i32) {
    %c0_i32 = arith.constant 0 : i32
    %c0_i32_0 = arith.constant 0 : i32
    return %c0_i32, %arg1 : i32, i32
  }
  func.func @transform_5(%arg0: i32, %arg1: i32) -> (i32, i32) {
    %c0_i32 = arith.constant 0 : i32
    return %arg0, %arg1 : i32, i32
  }
}

module attributes {stable_mosaic.version = 11 : i64} {
  func.func @_fused_matmul_kernel(%arg0: i32, %arg1: i32, %arg2: memref<64x576xbf16, #tpu.memory_space<vmem>>, %arg3: memref<576x64xbf16, #tpu.memory_space<vmem>>, %arg4: memref<1x64xf32, #tpu.memory_space<vmem>>, %arg5: memref<64x64xbf16, #tpu.memory_space<vmem>>) attributes {dimension_semantics = [#tpu.dimension_semantics<parallel>, #tpu.dimension_semantics<parallel>], iteration_bounds = array<i64: 1, 1>, scalar_prefetch = 0 : i64, scratch_operands = 0 : i64, tpu.core_type = #tpu.core_type<tc>, window_params = [{transform_indices = @transform_0, window_bounds = array<i64: 64, 576>}, {transform_indices = @transform_1, window_bounds = array<i64: 576, 64>}, {transform_indices = @transform_2, window_bounds = array<i64: 1, 64>}, {transform_indices = @transform_3, window_bounds = array<i64: 64, 64>}]} {
    %c0 = arith.constant 0 : index
    %c0_0 = arith.constant 0 : index
    %0 = vector.load %arg2[%c0, %c0_0] : memref<64x576xbf16, #tpu.memory_space<vmem>>, vector<64x576xbf16>
    %c0_1 = arith.constant 0 : index
    %c0_2 = arith.constant 0 : index
    %1 = vector.load %arg3[%c0_1, %c0_2] : memref<576x64xbf16, #tpu.memory_space<vmem>>, vector<576x64xbf16>
    %cst = arith.constant dense<0.000000e+00> : vector<64x64xf32>
    %2 = tpu.matmul %0, %1, %cst {dimension_numbers = #tpu.dot_dimension_numbers<[1], [0], [0], [1], [0, 0, 1, 1], [], []>} : vector<64x576xbf16>, vector<576x64xbf16>, vector<64x64xf32> -> vector<64x64xf32>
    %c0_3 = arith.constant 0 : index
    %c0_4 = arith.constant 0 : index
    %3 = vector.load %arg4[%c0_3, %c0_4] : memref<1x64xf32, #tpu.memory_space<vmem>>, vector<1x64xf32>
    %4 = vector.broadcast %3 : vector<1x64xf32> to vector<64x64xf32>
    %5 = arith.addf %2, %4 : vector<64x64xf32>
    %6 = arith.negf %5 : vector<64x64xf32>
    %7 = math.exp %6 : vector<64x64xf32>
    %cst_5 = arith.constant 1.000000e+00 : f32
    %8 = vector.broadcast %cst_5 : f32 to vector<64x64xf32>
    %9 = arith.addf %8, %7 : vector<64x64xf32>
    %10 = arith.divf %8, %9 : vector<64x64xf32>
    %11 = arith.mulf %5, %10 : vector<64x64xf32>
    %12 = arith.truncf %11 : vector<64x64xf32> to vector<64x64xbf16>
    %c0_6 = arith.constant 0 : index
    %c0_7 = arith.constant 0 : index
    %13 = vector.load %arg5[%c0_6, %c0_7] : memref<64x64xbf16, #tpu.memory_space<vmem>>, vector<64x64xbf16>
    tpu.vector_store %arg5[%c0_6, %c0_7], %12 {strides = array<i32>} : memref<64x64xbf16, #tpu.memory_space<vmem>>, vector<64x64xbf16>,
    return
  }
  func.func @transform_0(%arg0: i32, %arg1: i32) -> (i32, i32) {
    %c0_i32 = arith.constant 0 : i32
    %c0_i32_0 = arith.constant 0 : i32
    return %arg0, %c0_i32 : i32, i32
  }
  func.func @transform_1(%arg0: i32, %arg1: i32) -> (i32, i32) {
    %c0_i32 = arith.constant 0 : i32
    %c0_i32_0 = arith.constant 0 : i32
    return %c0_i32, %arg1 : i32, i32
  }
  func.func @transform_2(%arg0: i32, %arg1: i32) -> (i32, i32) {
    %c0_i32 = arith.constant 0 : i32
    %c0_i32_0 = arith.constant 0 : i32
    return %c0_i32, %arg1 : i32, i32
  }
  func.func @transform_3(%arg0: i32, %arg1: i32) -> (i32, i32) {
    %c0_i32 = arith.constant 0 : i32
    return %arg0, %arg1 : i32, i32
  }
}

module attributes {stable_mosaic.version = 11 : i64} {
  func.func @_fused_matmul_kernel(%arg0: i32, %arg1: i32, %arg2: memref<64x128xbf16, #tpu.memory_space<vmem>>, %arg3: memref<64x64xbf16, #tpu.memory_space<vmem>>, %arg4: memref<128x128xbf16, #tpu.memory_space<vmem>>, %arg5: memref<64x128xbf16, #tpu.memory_space<vmem>>, %arg6: memref<1x128xf32, #tpu.memory_space<vmem>>, %arg7: memref<64x128xbf16, #tpu.memory_space<vmem>>) attributes {dimension_semantics = [#tpu.dimension_semantics<parallel>, #tpu.dimension_semantics<parallel>], iteration_bounds = array<i64: 1, 1>, scalar_prefetch = 0 : i64, scratch_operands = 0 : i64, tpu.core_type = #tpu.core_type<tc>, window_params = [{transform_indices = @transform_0, window_bounds = array<i64: 64, 128>}, {transform_indices = @transform_1, window_bounds = array<i64: 64, 64>}, {transform_indices = @transform_2, window_bounds = array<i64: 128, 128>}, {transform_indices = @transform_3, window_bounds = array<i64: 64, 128>}, {transform_indices = @transform_4, window_bounds = array<i64: 1, 128>}, {transform_indices = @transform_5, window_bounds = array<i64: 64, 128>}]} {
    %c0 = arith.constant 0 : index
    %c0_0 = arith.constant 0 : index
    %0 = vector.load %arg2[%c0, %c0_0] : memref<64x128xbf16, #tpu.memory_space<vmem>>, vector<64x128xbf16>
    %c0_1 = arith.constant 0 : index
    %c0_2 = arith.constant 0 : index
    %1 = vector.load %arg4[%c0_1, %c0_2] : memref<128x128xbf16, #tpu.memory_space<vmem>>, vector<128x128xbf16>
    %cst = arith.constant dense<0.000000e+00> : vector<64x128xf32>
    %2 = tpu.matmul %0, %1, %cst {dimension_numbers = #tpu.dot_dimension_numbers<[1], [0], [0], [1], [0, 0, 1, 1], [], []>} : vector<64x128xbf16>, vector<128x128xbf16>, vector<64x128xf32> -> vector<64x128xf32>
    %c0_3 = arith.constant 0 : index
    %c0_4 = arith.constant 0 : index
    %3 = vector.load %arg3[%c0_3, %c0_4] : memref<64x64xbf16, #tpu.memory_space<vmem>>, vector<64x64xbf16>
    %c0_5 = arith.constant 0 : index
    %c0_6 = arith.constant 0 : index
    %4 = vector.load %arg5[%c0_5, %c0_6] : memref<64x128xbf16, #tpu.memory_space<vmem>>, vector<64x128xbf16>
    %cst_7 = arith.constant dense<0.000000e+00> : vector<64x128xf32>
    %5 = tpu.matmul %3, %4, %cst_7 {dimension_numbers = #tpu.dot_dimension_numbers<[1], [0], [0], [1], [0, 0, 1, 1], [], []>} : vector<64x64xbf16>, vector<64x128xbf16>, vector<64x128xf32> -> vector<64x128xf32>
    %6 = arith.addf %2, %5 : vector<64x128xf32>
    %c0_8 = arith.constant 0 : index
    %c0_9 = arith.constant 0 : index
    %7 = vector.load %arg6[%c0_8, %c0_9] : memref<1x128xf32, #tpu.memory_space<vmem>>, vector<1x128xf32>
    %8 = vector.broadcast %7 : vector<1x128xf32> to vector<64x128xf32>
    %9 = arith.addf %6, %8 : vector<64x128xf32>
    %10 = arith.negf %9 : vector<64x128xf32>
    %11 = math.exp %10 : vector<64x128xf32>
    %cst_10 = arith.constant 1.000000e+00 : f32
    %12 = vector.broadcast %cst_10 : f32 to vector<64x128xf32>
    %13 = arith.addf %12, %11 : vector<64x128xf32>
    %14 = arith.divf %12, %13 : vector<64x128xf32>
    %15 = arith.mulf %9, %14 : vector<64x128xf32>
    %16 = arith.truncf %15 : vector<64x128xf32> to vector<64x128xbf16>
    %c0_11 = arith.constant 0 : index
    %c0_12 = arith.constant 0 : index
    %17 = vector.load %arg7[%c0_11, %c0_12] : memref<64x128xbf16, #tpu.memory_space<vmem>>, vector<64x128xbf16>
    tpu.vector_store %arg7[%c0_11, %c0_12], %16 {strides = array<i32>} : memref<64x128xbf16, #tpu.memory_space<vmem>>, vector<64x128xbf16>,
    return
  }
  func.func @transform_0(%arg0: i32, %arg1: i32) -> (i32, i32) {
    %c0_i32 = arith.constant 0 : i32
    %c0_i32_0 = arith.constant 0 : i32
    return %arg0, %c0_i32 : i32, i32
  }
  func.func @transform_1(%arg0: i32, %arg1: i32) -> (i32, i32) {
    %c0_i32 = arith.constant 0 : i32
    %c0_i32_0 = arith.constant 0 : i32
    return %arg0, %c0_i32 : i32, i32
  }
  func.func @transform_2(%arg0: i32, %arg1: i32) -> (i32, i32) {
    %c0_i32 = arith.constant 0 : i32
    %c0_i32_0 = arith.constant 0 : i32
    return %c0_i32, %arg1 : i32, i32
  }
  func.func @transform_3(%arg0: i32, %arg1: i32) -> (i32, i32) {
    %c0_i32 = arith.constant 0 : i32
    %c0_i32_0 = arith.constant 0 : i32
    return %c0_i32, %arg1 : i32, i32
  }
  func.func @transform_4(%arg0: i32, %arg1: i32) -> (i32, i32) {
    %c0_i32 = arith.constant 0 : i32
    %c0_i32_0 = arith.constant 0 : i32
    return %c0_i32, %arg1 : i32, i32
  }
  func.func @transform_5(%arg0: i32, %arg1: i32) -> (i32, i32) {
    %c0_i32 = arith.constant 0 : i32
    return %arg0, %arg1 : i32, i32
  }
}

module attributes {stable_mosaic.version = 11 : i64} {
  func.func @_fused_matmul_kernel(%arg0: i32, %arg1: i32, %arg2: memref<16x128xbf16, #tpu.memory_space<vmem>>, %arg3: memref<16x256xbf16, #tpu.memory_space<vmem>>, %arg4: memref<128x256xbf16, #tpu.memory_space<vmem>>, %arg5: memref<256x256xbf16, #tpu.memory_space<vmem>>, %arg6: memref<1x256xf32, #tpu.memory_space<vmem>>, %arg7: memref<16x256xbf16, #tpu.memory_space<vmem>>) attributes {dimension_semantics = [#tpu.dimension_semantics<parallel>, #tpu.dimension_semantics<parallel>], iteration_bounds = array<i64: 1, 1>, scalar_prefetch = 0 : i64, scratch_operands = 0 : i64, tpu.core_type = #tpu.core_type<tc>, window_params = [{transform_indices = @transform_0, window_bounds = array<i64: 16, 128>}, {transform_indices = @transform_1, window_bounds = array<i64: 16, 256>}, {transform_indices = @transform_2, window_bounds = array<i64: 128, 256>}, {transform_indices = @transform_3, window_bounds = array<i64: 256, 256>}, {transform_indices = @transform_4, window_bounds = array<i64: 1, 256>}, {transform_indices = @transform_5, window_bounds = array<i64: 16, 256>}]} {
    %c0 = arith.constant 0 : index
    %c0_0 = arith.constant 0 : index
    %0 = vector.load %arg2[%c0, %c0_0] : memref<16x128xbf16, #tpu.memory_space<vmem>>, vector<16x128xbf16>
    %c0_1 = arith.constant 0 : index
    %c0_2 = arith.constant 0 : index
    %1 = vector.load %arg4[%c0_1, %c0_2] : memref<128x256xbf16, #tpu.memory_space<vmem>>, vector<128x256xbf16>
    %cst = arith.constant dense<0.000000e+00> : vector<16x256xf32>
    %2 = tpu.matmul %0, %1, %cst {dimension_numbers = #tpu.dot_dimension_numbers<[1], [0], [0], [1], [0, 0, 1, 1], [], []>} : vector<16x128xbf16>, vector<128x256xbf16>, vector<16x256xf32> -> vector<16x256xf32>
    %c0_3 = arith.constant 0 : index
    %c0_4 = arith.constant 0 : index
    %3 = vector.load %arg3[%c0_3, %c0_4] : memref<16x256xbf16, #tpu.memory_space<vmem>>, vector<16x256xbf16>
    %c0_5 = arith.constant 0 : index
    %c0_6 = arith.constant 0 : index
    %4 = vector.load %arg5[%c0_5, %c0_6] : memref<256x256xbf16, #tpu.memory_space<vmem>>, vector<256x256xbf16>
    %cst_7 = arith.constant dense<0.000000e+00> : vector<16x256xf32>
    %5 = tpu.matmul %3, %4, %cst_7 {dimension_numbers = #tpu.dot_dimension_numbers<[1], [0], [0], [1], [0, 0, 1, 1], [], []>} : vector<16x256xbf16>, vector<256x256xbf16>, vector<16x256xf32> -> vector<16x256xf32>
    %6 = arith.addf %2, %5 : vector<16x256xf32>
    %c0_8 = arith.constant 0 : index
    %c0_9 = arith.constant 0 : index
    %7 = vector.load %arg6[%c0_8, %c0_9] : memref<1x256xf32, #tpu.memory_space<vmem>>, vector<1x256xf32>
    %8 = vector.broadcast %7 : vector<1x256xf32> to vector<16x256xf32>
    %9 = arith.addf %6, %8 : vector<16x256xf32>
    %10 = arith.negf %9 : vector<16x256xf32>
    %11 = math.exp %10 : vector<16x256xf32>
    %cst_10 = arith.constant 1.000000e+00 : f32
    %12 = vector.broadcast %cst_10 : f32 to vector<16x256xf32>
    %13 = arith.addf %12, %11 : vector<16x256xf32>
    %14 = arith.divf %12, %13 : vector<16x256xf32>
    %15 = arith.mulf %9, %14 : vector<16x256xf32>
    %16 = arith.truncf %15 : vector<16x256xf32> to vector<16x256xbf16>
    %c0_11 = arith.constant 0 : index
    %c0_12 = arith.constant 0 : index
    %17 = vector.load %arg7[%c0_11, %c0_12] : memref<16x256xbf16, #tpu.memory_space<vmem>>, vector<16x256xbf16>
    tpu.vector_store %arg7[%c0_11, %c0_12], %16 {strides = array<i32>} : memref<16x256xbf16, #tpu.memory_space<vmem>>, vector<16x256xbf16>,
    return
  }
  func.func @transform_0(%arg0: i32, %arg1: i32) -> (i32, i32) {
    %c0_i32 = arith.constant 0 : i32
    %c0_i32_0 = arith.constant 0 : i32
    return %arg0, %c0_i32 : i32, i32
  }
  func.func @transform_1(%arg0: i32, %arg1: i32) -> (i32, i32) {
    %c0_i32 = arith.constant 0 : i32
    %c0_i32_0 = arith.constant 0 : i32
    return %arg0, %c0_i32 : i32, i32
  }
  func.func @transform_2(%arg0: i32, %arg1: i32) -> (i32, i32) {
    %c0_i32 = arith.constant 0 : i32
    %c0_i32_0 = arith.constant 0 : i32
    return %c0_i32, %arg1 : i32, i32
  }
  func.func @transform_3(%arg0: i32, %arg1: i32) -> (i32, i32) {
    %c0_i32 = arith.constant 0 : i32
    %c0_i32_0 = arith.constant 0 : i32
    return %c0_i32, %arg1 : i32, i32
  }
  func.func @transform_4(%arg0: i32, %arg1: i32) -> (i32, i32) {
    %c0_i32 = arith.constant 0 : i32
    %c0_i32_0 = arith.constant 0 : i32
    return %c0_i32, %arg1 : i32, i32
  }
  func.func @transform_5(%arg0: i32, %arg1: i32) -> (i32, i32) {
    %c0_i32 = arith.constant 0 : i32
    return %arg0, %arg1 : i32, i32
  }
}

module attributes {stable_mosaic.version = 11 : i64} {
  func.func @_fused_matmul_kernel(%arg0: i32, %arg1: i32, %arg2: memref<4x2304xbf16, #tpu.memory_space<vmem>>, %arg3: memref<2304x256xbf16, #tpu.memory_space<vmem>>, %arg4: memref<1x256xf32, #tpu.memory_space<vmem>>, %arg5: memref<4x256xbf16, #tpu.memory_space<vmem>>) attributes {dimension_semantics = [#tpu.dimension_semantics<parallel>, #tpu.dimension_semantics<parallel>], iteration_bounds = array<i64: 1, 1>, scalar_prefetch = 0 : i64, scratch_operands = 0 : i64, tpu.core_type = #tpu.core_type<tc>, window_params = [{transform_indices = @transform_0, window_bounds = array<i64: 4, 2304>}, {transform_indices = @transform_1, window_bounds = array<i64: 2304, 256>}, {transform_indices = @transform_2, window_bounds = array<i64: 1, 256>}, {transform_indices = @transform_3, window_bounds = array<i64: 4, 256>}]} {
    %c0 = arith.constant 0 : index
    %c0_0 = arith.constant 0 : index
    %0 = vector.load %arg2[%c0, %c0_0] : memref<4x2304xbf16, #tpu.memory_space<vmem>>, vector<4x2304xbf16>
    %c0_1 = arith.constant 0 : index
    %c0_2 = arith.constant 0 : index
    %1 = vector.load %arg3[%c0_1, %c0_2] : memref<2304x256xbf16, #tpu.memory_space<vmem>>, vector<2304x256xbf16>
    %cst = arith.constant dense<0.000000e+00> : vector<4x256xf32>
    %2 = tpu.matmul %0, %1, %cst {dimension_numbers = #tpu.dot_dimension_numbers<[1], [0], [0], [1], [0, 0, 1, 1], [], []>} : vector<4x2304xbf16>, vector<2304x256xbf16>, vector<4x256xf32> -> vector<4x256xf32>
    %c0_3 = arith.constant 0 : index
    %c0_4 = arith.constant 0 : index
    %3 = vector.load %arg4[%c0_3, %c0_4] : memref<1x256xf32, #tpu.memory_space<vmem>>, vector<1x256xf32>
    %4 = vector.broadcast %3 : vector<1x256xf32> to vector<4x256xf32>
    %5 = arith.addf %2, %4 : vector<4x256xf32>
    %6 = arith.negf %5 : vector<4x256xf32>
    %7 = math.exp %6 : vector<4x256xf32>
    %cst_5 = arith.constant 1.000000e+00 : f32
    %8 = vector.broadcast %cst_5 : f32 to vector<4x256xf32>
    %9 = arith.addf %8, %7 : vector<4x256xf32>
    %10 = arith.divf %8, %9 : vector<4x256xf32>
    %11 = arith.mulf %5, %10 : vector<4x256xf32>
    %12 = arith.truncf %11 : vector<4x256xf32> to vector<4x256xbf16>
    %c0_6 = arith.constant 0 : index
    %c0_7 = arith.constant 0 : index
    %13 = vector.load %arg5[%c0_6, %c0_7] : memref<4x256xbf16, #tpu.memory_space<vmem>>, vector<4x256xbf16>
    tpu.vector_store %arg5[%c0_6, %c0_7], %12 {strides = array<i32>} : memref<4x256xbf16, #tpu.memory_space<vmem>>, vector<4x256xbf16>,
    return
  }
  func.func @transform_0(%arg0: i32, %arg1: i32) -> (i32, i32) {
    %c0_i32 = arith.constant 0 : i32
    %c0_i32_0 = arith.constant 0 : i32
    return %arg0, %c0_i32 : i32, i32
  }
  func.func @transform_1(%arg0: i32, %arg1: i32) -> (i32, i32) {
    %c0_i32 = arith.constant 0 : i32
    %c0_i32_0 = arith.constant 0 : i32
    return %c0_i32, %arg1 : i32, i32
  }
  func.func @transform_2(%arg0: i32, %arg1: i32) -> (i32, i32) {
    %c0_i32 = arith.constant 0 : i32
    %c0_i32_0 = arith.constant 0 : i32
    return %c0_i32, %arg1 : i32, i32
  }
  func.func @transform_3(%arg0: i32, %arg1: i32) -> (i32, i32) {
    %c0_i32 = arith.constant 0 : i32
    return %arg0, %arg1 : i32, i32
  }
}

module attributes {stable_mosaic.version = 11 : i64} {
  func.func @_fused_matmul_kernel(%arg0: i32, %arg1: i32, %arg2: memref<4x256xbf16, #tpu.memory_space<vmem>>, %arg3: memref<4x256xbf16, #tpu.memory_space<vmem>>, %arg4: memref<256x256xbf16, #tpu.memory_space<vmem>>, %arg5: memref<256x256xbf16, #tpu.memory_space<vmem>>, %arg6: memref<1x256xf32, #tpu.memory_space<vmem>>, %arg7: memref<4x256xbf16, #tpu.memory_space<vmem>>) attributes {dimension_semantics = [#tpu.dimension_semantics<parallel>, #tpu.dimension_semantics<parallel>], iteration_bounds = array<i64: 1, 2>, scalar_prefetch = 0 : i64, scratch_operands = 0 : i64, tpu.core_type = #tpu.core_type<tc>, window_params = [{transform_indices = @transform_0, window_bounds = array<i64: 4, 256>}, {transform_indices = @transform_1, window_bounds = array<i64: 4, 256>}, {transform_indices = @transform_2, window_bounds = array<i64: 256, 256>}, {transform_indices = @transform_3, window_bounds = array<i64: 256, 256>}, {transform_indices = @transform_4, window_bounds = array<i64: 1, 256>}, {transform_indices = @transform_5, window_bounds = array<i64: 4, 256>}]} {
    %c0 = arith.constant 0 : index
    %c0_0 = arith.constant 0 : index
    %0 = vector.load %arg2[%c0, %c0_0] : memref<4x256xbf16, #tpu.memory_space<vmem>>, vector<4x256xbf16>
    %c0_1 = arith.constant 0 : index
    %c0_2 = arith.constant 0 : index
    %1 = vector.load %arg4[%c0_1, %c0_2] : memref<256x256xbf16, #tpu.memory_space<vmem>>, vector<256x256xbf16>
    %cst = arith.constant dense<0.000000e+00> : vector<4x256xf32>
    %2 = tpu.matmul %0, %1, %cst {dimension_numbers = #tpu.dot_dimension_numbers<[1], [0], [0], [1], [0, 0, 1, 1], [], []>} : vector<4x256xbf16>, vector<256x256xbf16>, vector<4x256xf32> -> vector<4x256xf32>
    %c0_3 = arith.constant 0 : index
    %c0_4 = arith.constant 0 : index
    %3 = vector.load %arg3[%c0_3, %c0_4] : memref<4x256xbf16, #tpu.memory_space<vmem>>, vector<4x256xbf16>
    %c0_5 = arith.constant 0 : index
    %c0_6 = arith.constant 0 : index
    %4 = vector.load %arg5[%c0_5, %c0_6] : memref<256x256xbf16, #tpu.memory_space<vmem>>, vector<256x256xbf16>
    %cst_7 = arith.constant dense<0.000000e+00> : vector<4x256xf32>
    %5 = tpu.matmul %3, %4, %cst_7 {dimension_numbers = #tpu.dot_dimension_numbers<[1], [0], [0], [1], [0, 0, 1, 1], [], []>} : vector<4x256xbf16>, vector<256x256xbf16>, vector<4x256xf32> -> vector<4x256xf32>
    %6 = arith.addf %2, %5 : vector<4x256xf32>
    %c0_8 = arith.constant 0 : index
    %c0_9 = arith.constant 0 : index
    %7 = vector.load %arg6[%c0_8, %c0_9] : memref<1x256xf32, #tpu.memory_space<vmem>>, vector<1x256xf32>
    %8 = vector.broadcast %7 : vector<1x256xf32> to vector<4x256xf32>
    %9 = arith.addf %6, %8 : vector<4x256xf32>
    %10 = arith.negf %9 : vector<4x256xf32>
    %11 = math.exp %10 : vector<4x256xf32>
    %cst_10 = arith.constant 1.000000e+00 : f32
    %12 = vector.broadcast %cst_10 : f32 to vector<4x256xf32>
    %13 = arith.addf %12, %11 : vector<4x256xf32>
    %14 = arith.divf %12, %13 : vector<4x256xf32>
    %15 = arith.mulf %9, %14 : vector<4x256xf32>
    %16 = arith.truncf %15 : vector<4x256xf32> to vector<4x256xbf16>
    %c0_11 = arith.constant 0 : index
    %c0_12 = arith.constant 0 : index
    %17 = vector.load %arg7[%c0_11, %c0_12] : memref<4x256xbf16, #tpu.memory_space<vmem>>, vector<4x256xbf16>
    tpu.vector_store %arg7[%c0_11, %c0_12], %16 {strides = array<i32>} : memref<4x256xbf16, #tpu.memory_space<vmem>>, vector<4x256xbf16>,
    return
  }
  func.func @transform_0(%arg0: i32, %arg1: i32) -> (i32, i32) {
    %c0_i32 = arith.constant 0 : i32
    %c0_i32_0 = arith.constant 0 : i32
    return %arg0, %c0_i32 : i32, i32
  }
  func.func @transform_1(%arg0: i32, %arg1: i32) -> (i32, i32) {
    %c0_i32 = arith.constant 0 : i32
    %c0_i32_0 = arith.constant 0 : i32
    return %arg0, %c0_i32 : i32, i32
  }
  func.func @transform_2(%arg0: i32, %arg1: i32) -> (i32, i32) {
    %c0_i32 = arith.constant 0 : i32
    %c0_i32_0 = arith.constant 0 : i32
    return %c0_i32, %arg1 : i32, i32
  }
  func.func @transform_3(%arg0: i32, %arg1: i32) -> (i32, i32) {
    %c0_i32 = arith.constant 0 : i32
    %c0_i32_0 = arith.constant 0 : i32
    return %c0_i32, %arg1 : i32, i32
  }
  func.func @transform_4(%arg0: i32, %arg1: i32) -> (i32, i32) {
    %c0_i32 = arith.constant 0 : i32
    %c0_i32_0 = arith.constant 0 : i32
    return %c0_i32, %arg1 : i32, i32
  }
  func.func @transform_5(%arg0: i32, %arg1: i32) -> (i32, i32) {
    %c0_i32 = arith.constant 0 : i32
    return %arg0, %arg1 : i32, i32
  }
}

module attributes {stable_mosaic.version = 11 : i64} {
  func.func @_fused_matmul_kernel(%arg0: i32, %arg1: i32, %arg2: memref<4x512xbf16, #tpu.memory_space<vmem>>, %arg3: memref<4x256xbf16, #tpu.memory_space<vmem>>, %arg4: memref<512x256xbf16, #tpu.memory_space<vmem>>, %arg5: memref<256x256xbf16, #tpu.memory_space<vmem>>, %arg6: memref<1x256xf32, #tpu.memory_space<vmem>>, %arg7: memref<4x256xbf16, #tpu.memory_space<vmem>>) attributes {dimension_semantics = [#tpu.dimension_semantics<parallel>, #tpu.dimension_semantics<parallel>], iteration_bounds = array<i64: 1, 2>, scalar_prefetch = 0 : i64, scratch_operands = 0 : i64, tpu.core_type = #tpu.core_type<tc>, window_params = [{transform_indices = @transform_0, window_bounds = array<i64: 4, 512>}, {transform_indices = @transform_1, window_bounds = array<i64: 4, 256>}, {transform_indices = @transform_2, window_bounds = array<i64: 512, 256>}, {transform_indices = @transform_3, window_bounds = array<i64: 256, 256>}, {transform_indices = @transform_4, window_bounds = array<i64: 1, 256>}, {transform_indices = @transform_5, window_bounds = array<i64: 4, 256>}]} {
    %c0 = arith.constant 0 : index
    %c0_0 = arith.constant 0 : index
    %0 = vector.load %arg2[%c0, %c0_0] : memref<4x512xbf16, #tpu.memory_space<vmem>>, vector<4x512xbf16>
    %c0_1 = arith.constant 0 : index
    %c0_2 = arith.constant 0 : index
    %1 = vector.load %arg4[%c0_1, %c0_2] : memref<512x256xbf16, #tpu.memory_space<vmem>>, vector<512x256xbf16>
    %cst = arith.constant dense<0.000000e+00> : vector<4x256xf32>
    %2 = tpu.matmul %0, %1, %cst {dimension_numbers = #tpu.dot_dimension_numbers<[1], [0], [0], [1], [0, 0, 1, 1], [], []>} : vector<4x512xbf16>, vector<512x256xbf16>, vector<4x256xf32> -> vector<4x256xf32>
    %c0_3 = arith.constant 0 : index
    %c0_4 = arith.constant 0 : index
    %3 = vector.load %arg3[%c0_3, %c0_4] : memref<4x256xbf16, #tpu.memory_space<vmem>>, vector<4x256xbf16>
    %c0_5 = arith.constant 0 : index
    %c0_6 = arith.constant 0 : index
    %4 = vector.load %arg5[%c0_5, %c0_6] : memref<256x256xbf16, #tpu.memory_space<vmem>>, vector<256x256xbf16>
    %cst_7 = arith.constant dense<0.000000e+00> : vector<4x256xf32>
    %5 = tpu.matmul %3, %4, %cst_7 {dimension_numbers = #tpu.dot_dimension_numbers<[1], [0], [0], [1], [0, 0, 1, 1], [], []>} : vector<4x256xbf16>, vector<256x256xbf16>, vector<4x256xf32> -> vector<4x256xf32>
    %6 = arith.addf %2, %5 : vector<4x256xf32>
    %c0_8 = arith.constant 0 : index
    %c0_9 = arith.constant 0 : index
    %7 = vector.load %arg6[%c0_8, %c0_9] : memref<1x256xf32, #tpu.memory_space<vmem>>, vector<1x256xf32>
    %8 = vector.broadcast %7 : vector<1x256xf32> to vector<4x256xf32>
    %9 = arith.addf %6, %8 : vector<4x256xf32>
    %10 = arith.negf %9 : vector<4x256xf32>
    %11 = math.exp %10 : vector<4x256xf32>
    %cst_10 = arith.constant 1.000000e+00 : f32
    %12 = vector.broadcast %cst_10 : f32 to vector<4x256xf32>
    %13 = arith.addf %12, %11 : vector<4x256xf32>
    %14 = arith.divf %12, %13 : vector<4x256xf32>
    %15 = arith.mulf %9, %14 : vector<4x256xf32>
    %16 = arith.truncf %15 : vector<4x256xf32> to vector<4x256xbf16>
    %c0_11 = arith.constant 0 : index
    %c0_12 = arith.constant 0 : index
    %17 = vector.load %arg7[%c0_11, %c0_12] : memref<4x256xbf16, #tpu.memory_space<vmem>>, vector<4x256xbf16>
    tpu.vector_store %arg7[%c0_11, %c0_12], %16 {strides = array<i32>} : memref<4x256xbf16, #tpu.memory_space<vmem>>, vector<4x256xbf16>,
    return
  }
  func.func @transform_0(%arg0: i32, %arg1: i32) -> (i32, i32) {
    %c0_i32 = arith.constant 0 : i32
    %c0_i32_0 = arith.constant 0 : i32
    return %arg0, %c0_i32 : i32, i32
  }
  func.func @transform_1(%arg0: i32, %arg1: i32) -> (i32, i32) {
    %c0_i32 = arith.constant 0 : i32
    %c0_i32_0 = arith.constant 0 : i32
    return %arg0, %c0_i32 : i32, i32
  }
  func.func @transform_2(%arg0: i32, %arg1: i32) -> (i32, i32) {
    %c0_i32 = arith.constant 0 : i32
    %c0_i32_0 = arith.constant 0 : i32
    return %c0_i32, %arg1 : i32, i32
  }
  func.func @transform_3(%arg0: i32, %arg1: i32) -> (i32, i32) {
    %c0_i32 = arith.constant 0 : i32
    %c0_i32_0 = arith.constant 0 : i32
    return %c0_i32, %arg1 : i32, i32
  }
  func.func @transform_4(%arg0: i32, %arg1: i32) -> (i32, i32) {
    %c0_i32 = arith.constant 0 : i32
    %c0_i32_0 = arith.constant 0 : i32
    return %c0_i32, %arg1 : i32, i32
  }
  func.func @transform_5(%arg0: i32, %arg1: i32) -> (i32, i32) {
    %c0_i32 = arith.constant 0 : i32
    return %arg0, %arg1 : i32, i32
  }
}

module attributes {stable_mosaic.version = 11 : i64} {
  func.func @_fused_matmul_kernel(%arg0: i32, %arg1: i32, %arg2: memref<64x288xbf16, #tpu.memory_space<vmem>>, %arg3: memref<288x32xbf16, #tpu.memory_space<vmem>>, %arg4: memref<1x32xf32, #tpu.memory_space<vmem>>, %arg5: memref<64x32xbf16, #tpu.memory_space<vmem>>) attributes {dimension_semantics = [#tpu.dimension_semantics<parallel>, #tpu.dimension_semantics<parallel>], iteration_bounds = array<i64: 1, 1>, scalar_prefetch = 0 : i64, scratch_operands = 0 : i64, tpu.core_type = #tpu.core_type<tc>, window_params = [{transform_indices = @transform_0, window_bounds = array<i64: 64, 288>}, {transform_indices = @transform_1, window_bounds = array<i64: 288, 32>}, {transform_indices = @transform_2, window_bounds = array<i64: 1, 32>}, {transform_indices = @transform_3, window_bounds = array<i64: 64, 32>}]} {
    %c0 = arith.constant 0 : index
    %c0_0 = arith.constant 0 : index
    %0 = vector.load %arg2[%c0, %c0_0] : memref<64x288xbf16, #tpu.memory_space<vmem>>, vector<64x288xbf16>
    %c0_1 = arith.constant 0 : index
    %c0_2 = arith.constant 0 : index
    %1 = vector.load %arg3[%c0_1, %c0_2] : memref<288x32xbf16, #tpu.memory_space<vmem>>, vector<288x32xbf16>
    %cst = arith.constant dense<0.000000e+00> : vector<64x32xf32>
    %2 = tpu.matmul %0, %1, %cst {dimension_numbers = #tpu.dot_dimension_numbers<[1], [0], [0], [1], [0, 0, 1, 1], [], []>} : vector<64x288xbf16>, vector<288x32xbf16>, vector<64x32xf32> -> vector<64x32xf32>
    %c0_3 = arith.constant 0 : index
    %c0_4 = arith.constant 0 : index
    %3 = vector.load %arg4[%c0_3, %c0_4] : memref<1x32xf32, #tpu.memory_space<vmem>>, vector<1x32xf32>
    %4 = vector.broadcast %3 : vector<1x32xf32> to vector<64x32xf32>
    %5 = arith.addf %2, %4 : vector<64x32xf32>
    %6 = arith.negf %5 : vector<64x32xf32>
    %7 = math.exp %6 : vector<64x32xf32>
    %cst_5 = arith.constant 1.000000e+00 : f32
    %8 = vector.broadcast %cst_5 : f32 to vector<64x32xf32>
    %9 = arith.addf %8, %7 : vector<64x32xf32>
    %10 = arith.divf %8, %9 : vector<64x32xf32>
    %11 = arith.mulf %5, %10 : vector<64x32xf32>
    %12 = arith.truncf %11 : vector<64x32xf32> to vector<64x32xbf16>
    %c0_6 = arith.constant 0 : index
    %c0_7 = arith.constant 0 : index
    %13 = vector.load %arg5[%c0_6, %c0_7] : memref<64x32xbf16, #tpu.memory_space<vmem>>, vector<64x32xbf16>
    tpu.vector_store %arg5[%c0_6, %c0_7], %12 {strides = array<i32>} : memref<64x32xbf16, #tpu.memory_space<vmem>>, vector<64x32xbf16>,
    return
  }
  func.func @transform_0(%arg0: i32, %arg1: i32) -> (i32, i32) {
    %c0_i32 = arith.constant 0 : i32
    %c0_i32_0 = arith.constant 0 : i32
    return %arg0, %c0_i32 : i32, i32
  }
  func.func @transform_1(%arg0: i32, %arg1: i32) -> (i32, i32) {
    %c0_i32 = arith.constant 0 : i32
    %c0_i32_0 = arith.constant 0 : i32
    return %c0_i32, %arg1 : i32, i32
  }
  func.func @transform_2(%arg0: i32, %arg1: i32) -> (i32, i32) {
    %c0_i32 = arith.constant 0 : i32
    %c0_i32_0 = arith.constant 0 : i32
    return %c0_i32, %arg1 : i32, i32
  }
  func.func @transform_3(%arg0: i32, %arg1: i32) -> (i32, i32) {
    %c0_i32 = arith.constant 0 : i32
    return %arg0, %arg1 : i32, i32
  }
}

module attributes {stable_mosaic.version = 11 : i64} {
  func.func @_fused_matmul_kernel(%arg0: i32, %arg1: i32, %arg2: memref<64x32xbf16, #tpu.memory_space<vmem>>, %arg3: memref<32x4xbf16, #tpu.memory_space<vmem>>, %arg4: memref<1x4xf32, #tpu.memory_space<vmem>>, %arg5: memref<64x4xf32, #tpu.memory_space<vmem>>) attributes {dimension_semantics = [#tpu.dimension_semantics<parallel>, #tpu.dimension_semantics<parallel>], iteration_bounds = array<i64: 1, 1>, scalar_prefetch = 0 : i64, scratch_operands = 0 : i64, tpu.core_type = #tpu.core_type<tc>, window_params = [{transform_indices = @transform_0, window_bounds = array<i64: 64, 32>}, {transform_indices = @transform_1, window_bounds = array<i64: 32, 4>}, {transform_indices = @transform_2, window_bounds = array<i64: 1, 4>}, {transform_indices = @transform_3, window_bounds = array<i64: 64, 4>}]} {
    %c0 = arith.constant 0 : index
    %c0_0 = arith.constant 0 : index
    %0 = vector.load %arg2[%c0, %c0_0] : memref<64x32xbf16, #tpu.memory_space<vmem>>, vector<64x32xbf16>
    %c0_1 = arith.constant 0 : index
    %c0_2 = arith.constant 0 : index
    %1 = vector.load %arg3[%c0_1, %c0_2] : memref<32x4xbf16, #tpu.memory_space<vmem>>, vector<32x4xbf16>
    %cst = arith.constant dense<0.000000e+00> : vector<64x4xf32>
    %2 = tpu.matmul %0, %1, %cst {dimension_numbers = #tpu.dot_dimension_numbers<[1], [0], [0], [1], [0, 0, 1, 1], [], []>} : vector<64x32xbf16>, vector<32x4xbf16>, vector<64x4xf32> -> vector<64x4xf32>
    %c0_3 = arith.constant 0 : index
    %c0_4 = arith.constant 0 : index
    %3 = vector.load %arg4[%c0_3, %c0_4] : memref<1x4xf32, #tpu.memory_space<vmem>>, vector<1x4xf32>
    %4 = vector.broadcast %3 : vector<1x4xf32> to vector<64x4xf32>
    %5 = arith.addf %2, %4 : vector<64x4xf32>
    %c0_5 = arith.constant 0 : index
    %c0_6 = arith.constant 0 : index
    %6 = vector.load %arg5[%c0_5, %c0_6] : memref<64x4xf32, #tpu.memory_space<vmem>>, vector<64x4xf32>
    tpu.vector_store %arg5[%c0_5, %c0_6], %5 {strides = array<i32>} : memref<64x4xf32, #tpu.memory_space<vmem>>, vector<64x4xf32>,
    return
  }
  func.func @transform_0(%arg0: i32, %arg1: i32) -> (i32, i32) {
    %c0_i32 = arith.constant 0 : i32
    %c0_i32_0 = arith.constant 0 : i32
    return %arg0, %c0_i32 : i32, i32
  }
  func.func @transform_1(%arg0: i32, %arg1: i32) -> (i32, i32) {
    %c0_i32 = arith.constant 0 : i32
    %c0_i32_0 = arith.constant 0 : i32
    return %c0_i32, %arg1 : i32, i32
  }
  func.func @transform_2(%arg0: i32, %arg1: i32) -> (i32, i32) {
    %c0_i32 = arith.constant 0 : i32
    %c0_i32_0 = arith.constant 0 : i32
    return %c0_i32, %arg1 : i32, i32
  }
  func.func @transform_3(%arg0: i32, %arg1: i32) -> (i32, i32) {
    %c0_i32 = arith.constant 0 : i32
    return %arg0, %arg1 : i32, i32
  }
}

</mosaic_0001>

<bundles_post_ra>
// kernel: seg_no_ffm_forward.25
= control target key start
LH: loop header
LB: loop body
LE: loop exit
PB: predicated region body
PF: predicated region fallthrough
CT: control target
= control target key end

     0   :  { %s1482_s12 = smov 0   ;;  %s1484_s13 = smov 0   ;;  %s1814_s0 = inlined_call_operand.vmem [shape: bf16[1024,27], index: 0, kind: input, shape index: {}]   ;;  %s1815_s1 = inlined_call_operand.vmem [shape: bf16[27,16], index: 1, kind: input, shape index: {}]   ;;  %s1816_s2 = inlined_call_operand.vmem [shape: f32[1,16], index: 2, kind: input, shape index: {}]   ;;  %s1817_s3 = inlined_call_operand.vmem [shape: bf16[1024,16], index: 3, kind: output, shape index: {}]  }
   0x1   :  { %s1486_s14 = smov 0  }
   0x2 LB: > { %s25_s15 = sadd.s32 1, %s1455_s13  ;;  %p1070_p0 = scmp.ge.s32.totalorder %s1459_s14, 1  ;;  %s1459_s14 = sphi %s1486_s14, %s13_s14   ;;  %s1455_s13 = sphi %s1484_s13, %s1819_s13   ;;  %s1451_s12 = sphi %s1482_s12, %s1818_s12  }
   0x3   : > { %p27_p1 = scmp.ge.s32.totalorder %s25_s15, 4  ;;  %p169_p2 = scmp.lt.s32.totalorder %s1459_s14, 5 }
   0x5   : > { %s1821_s15 = smov (%p27_p1, %s25_s15), 0  ;;  %p170_p3 = pnand %p1070_p0, %p169_p2 }
   0x6   : > { %v1291_v0 = vld [vmem:[%s1815_s1] sm:$0xff] (!%p170_p3)   ;;  %vm409_vm0 = vcmask (!%p170_p3), 1044480   ;;  %v1292_v1 = vld [vmem:[%s1815_s1 + $0x8] sm:$0x3f] (!%p170_p3)   ;;  %vm410_vm1 = vcmask (!%p170_p3), 1045504   ;;  %s1071_s20 = sshll.u32 (!%p170_p3), %s1451_s12, 5 }
   0x7   : > { %173 = sbr.rel (%p170_p3) target bundleno = 323 (0x143), region = 32  ;;  %1226 = vmatprep.subr.bf16.mxu0 (!%p170_p3), %v1291_v0  ;;  %1262 = vmatprep.subr.bf16.mxu1 (!%p170_p3), %v1291_v0  ;;  %v1461_v2 = vmov (!%p170_p3), 65535   ;;  %p204_p4 = scmp.lt.s32.totalorder (!%p170_p3), %s1071_s20, 127  ;;  %vm360_vm2 = vcmask (!%p170_p3), 220160   ;;  %v1551_v22 = vld [vmem:[%s1816_s2] ss:$0 sm:$0xff] (!%p170_p3) }
   0x8   : > { %1227 = vmatpush3.bf16.msra.mxu0 (!%p170_p3), %v1291_v0  ;;  %1264 = vmatpush3.bf16.msra.mxu1 (!%p170_p3), %v1291_v0  ;;  %v411_v3 = vsel (!%p170_p3), %vm409_vm0, 4294967295, %v1461_v2  ;;  %vm929_vm3 = vcmask (!%p170_p3), 125952  }
   0x9   : > { %v412_v4 = vsel (!%p170_p3), %vm410_vm1, %v411_v3, 0 }
   0xa   : > { %v414_v5 = vand.u32 (!%p170_p3), %v1292_v1, %v412_v4 }
   0xc   : > { %1228 = vmatprep.subr.bf16.mxu0 (!%p170_p3), %v414_v5  ;;  %1263 = vmatprep.subr.bf16.mxu1 (!%p170_p3), %v414_v5 }
   0xd   : > { %1229 = vmatpush3.bf16.msra.mxu0 (!%p170_p3), %v414_v5  ;;  %1265 = vmatpush3.bf16.msra.mxu1 (!%p170_p3), %v414_v5 }
   0xe   : > { %s1823_s20 = smov (!%p204_p4, %s1071_s20), 127 }
   0xf   : > { %s1072_s21 = sshll.u32 %s1823_s20, 2 }
  0x10   : > { %s1514_s24 = scalar_lea.vmem %s1814_s0, %s1072_s21  ;;  %s1658_s29 = scalar_lea.vmem %s1817_s3, %s1072_s21 }
  0x11   : > { %v1293_v6 = vld [vmem:[%s1514_s24] sm:$0xff]   ;;  %v1295_v8 = vld [vmem:[%s1514_s24 + $0x8] sm:$0xff]   ;;  %v1297_v10 = vld [vmem:[%s1514_s24 + $0x10] sm:$0xff]  }
  0x12   : > { %v1294_v7 = vld [vmem:[%s1514_s24 + $0x40] sm:$0xff]   ;;  %1230 = vmatprep.mubr.msk.bf16.mxu0 %vm360_vm2, %v1293_v6  ;;  %v1296_v9 = vld [vmem:[%s1514_s24 + $0x48] sm:$0xff]   ;;  %v1298_v11 = vld [vmem:[%s1514_s24 + $0x50] sm:$0xff]  }
  0x13   : > { %1246 = vmatprep.mubr.msk.bf16.mxu1 %vm360_vm2, %v1294_v7  ;;  %1231 = vmatmul.mubr.msk.bf16.vlgmr.msra.gmra.mrb[0].mxu0 %vm360_vm2, %v1295_v8  ;;  %v1299_v12 = vld [vmem:[%s1514_s24 + $0x18] sm:$0xff]   ;;  %v1301_v14 = vld [vmem:[%s1514_s24 + $0x20] sm:$0xff]   ;;  %v1303_v16 = vld [vmem:[%s1514_s24 + $0x28] sm:$0xff]  }
  0x14   : > { %1247 = vmatmul.mubr.msk.bf16.vlgmr.msra.gmra.mrb[0].mxu1 %vm360_vm2, %v1296_v9  ;;  %1234 = vmatprep.mubr.msk.bf16.mxu0 %vm360_vm2, %v1297_v10  ;;  %v1300_v13 = vld [vmem:[%s1514_s24 + $0x58] sm:$0xff]   ;;  %v1302_v15 = vld [vmem:[%s1514_s24 + $0x60] sm:$0xff]   ;;  %v1304_v17 = vld [vmem:[%s1514_s24 + $0x68] sm:$0xff]  }
  0x15   : > { %1250 = vmatprep.mubr.msk.bf16.mxu1 %vm360_vm2, %v1298_v11  ;;  %v1305_v18 = vld [vmem:[%s1514_s24 + $0x30] sm:$0xff]   ;;  %v1307_v20 = vld [vmem:[%s1514_s24 + $0x38] sm:$0xff]  }
  0x16   : > { %v1306_v19 = vld [vmem:[%s1514_s24 + $0x70] sm:$0xff]   ;;  %v1308_v21 = vld [vmem:[%s1514_s24 + $0x78] sm:$0xff]  }
  0x1b   : > { %1235 = vmatmul.mubr.msk.bf16.gmra.mrb[4].mxu0 %vm360_vm2, %v1299_v12 }
  0x1c   : > { %1251 = vmatmul.mubr.msk.bf16.gmra.mrb[4].mxu1 %vm360_vm2, %v1300_v13  ;;  %1238 = vmatprep.mubr.msk.bf16.mxu0 %vm360_vm2, %v1301_v14 }
  0x1d   : > { %1254 = vmatprep.mubr.msk.bf16.mxu1 %vm360_vm2, %v1302_v15 }
  0x23   : > { %1239 = vmatmul.mubr.msk.bf16.gmra.mrb[8].mxu0 %vm360_vm2, %v1303_v16 }
  0x24   : > { %1255 = vmatmul.mubr.msk.bf16.gmra.mrb[8].mxu1 %vm360_vm2, %v1304_v17  ;;  %1242 = vmatprep.mubr.msk.bf16.mxu0 %vm360_vm2, %v1305_v18 }
  0x25   : > { %1258 = vmatprep.mubr.msk.bf16.mxu1 %vm360_vm2, %v1306_v19 }
  0x2b   : > { %1243 = vmatmul.mubr.msk.bf16.gmra.mrb[12].mxu0 %vm360_vm2, %v1307_v20 }
  0x2c   : > { %1259 = vmatmul.mubr.msk.bf16.gmra.mrb[12].mxu1 %vm360_vm2, %v1308_v21 }
  0xe6   : > { %v1232_v23 = vpop.f32.mrb[0].mxu0 }
  0xe7   : > { %v1554_v24 = vadd.f32 %v1232_v23, %v1551_v22  ;;  %v1248_v25 = vpop.f32.mrb[0].mxu1  ;;  %v450_v26 = vpop.f32.mrb[1].mxu0 }
  0xe8   : > { %v1557_v27 = vadd.f32 %v1248_v25, %v1551_v22  ;;  %v1560_v28 = vadd.f32 %v1551_v22, %v450_v26  ;;  %v514_v29 = vpop.f32.mrb[1].mxu1  ;;  %v1233_v30 = vpop.f32.mrb[2].mxu0 }
  0xe9   : > { %v1112_v31 = vmul.f32 -1.442695, %v1554_v24  ;;  %v1564_v32 = vadd.f32 %v1551_v22, %v514_v29  ;;  %v1567_v33 = vadd.f32 %v1233_v30, %v1551_v22  ;;  %v1249_v34 = vpop.f32.mrb[2].mxu1  ;;  %v453_v35 = vpop.f32.mrb[3].mxu0 }
  0xea   : > { %v1128_v36 = vmul.f32 -1.442695, %v1557_v27  ;;  %v1110_v37 = vmul.f32 -1.442695, %v1560_v28  ;;  %v1572_v38 = vadd.f32 %v1249_v34, %v1551_v22  ;;  %v1575_v39 = vadd.f32 %v1551_v22, %v453_v35  ;;  %v517_v40 = vpop.f32.mrb[3].mxu1 }
  0xeb   : > { %1309 = vpow2.f32 %v1112_v31  ;;  %v1126_v41 = vmul.f32 -1.442695, %v1564_v32  ;;  %v1113_v42 = vmul.f32 -1.442695, %v1567_v33  ;;  %v1580_v43 = vadd.f32 %v1551_v22, %v517_v40 }
  0xec   : > { %1311 = vpow2.f32 %v1128_v36  ;;  %v1129_v44 = vmul.f32 -1.442695, %v1572_v38  ;;  %v1111_v45 = vmul.f32 -1.442695, %v1575_v39 }
  0xed   : > { %1313 = vpow2.f32 %v1110_v37  ;;  %v1127_v46 = vmul.f32 -1.442695, %v1580_v43 }
  0xee   : > { %1315 = vpow2.f32 %v1126_v41  ;;  %v1236_v47 = vpop.f32.mrb[4].mxu0 }
  0xef   : > { %1317 = vpow2.f32 %v1113_v42  ;;  %v1586_v48 = vadd.f32 %v1236_v47, %v1551_v22  ;;  %v1252_v49 = vpop.f32.mrb[4].mxu1  ;;  %v466_v50 = vpop.f32.mrb[5].mxu0 }
  0xf0   : > { %1319 = vpow2.f32 %v1129_v44  ;;  %v1589_v51 = vadd.f32 %v1252_v49, %v1551_v22  ;;  %v1592_v52 = vadd.f32 %v1551_v22, %v466_v50  ;;  %v530_v53 = vpop.f32.mrb[5].mxu1  ;;  %v1237_v54 = vpop.f32.mrb[6].mxu0 }
  0xf1   : > { %1321 = vpow2.f32 %v1111_v45  ;;  %v1116_v55 = vmul.f32 -1.442695, %v1586_v48  ;;  %v1596_v56 = vadd.f32 %v1551_v22, %v530_v53  ;;  %v1599_v57 = vadd.f32 %v1237_v54, %v1551_v22  ;;  %v1253_v58 = vpop.f32.mrb[6].mxu1  ;;  %v469_v59 = vpop.f32.mrb[7].mxu0 }
  0xf2   : > { %1323 = vpow2.f32 %v1127_v46  ;;  %v1132_v60 = vmul.f32 -1.442695, %v1589_v51  ;;  %v1114_v61 = vmul.f32 -1.442695, %v1592_v52  ;;  %v533_v62 = vpop.f32.mrb[7].mxu1  ;;  %v1608_v23 = vadd.f32 %v1253_v58, %v1551_v22 }
  0xf3   : > { %1325 = vpow2.f32 %v1116_v55  ;;  %v1130_v63 = vmul.f32 -1.442695, %v1596_v56  ;;  %v1117_v0 = vmul.f32 -1.442695, %v1599_v57  ;;  %v1611_v29 = vadd.f32 %v1551_v22, %v469_v59 }
  0xf4   : > { %1327 = vpow2.f32 %v1132_v60  ;;  %v1614_v34 = vadd.f32 %v1551_v22, %v533_v62  ;;  %v1133_v45 = vmul.f32 -1.442695, %v1608_v23 }
  0xf5   : > { %v1310_v1 = vpop.eup %1309  ;;  %1329 = vpow2.f32 %v1114_v61  ;;  %v1115_v54 = vmul.f32 -1.442695, %v1611_v29 }
  0xf6   : > { %v1312_v2 = vpop.eup %1311  ;;  %v675_v3 = vadd.f32 1.0, %v1310_v1  ;;  %1331 = vpow2.f32 %v1130_v63  ;;  %v1240_v4 = vpop.f32.mrb[8].mxu0  ;;  %v1131_v62 = vmul.f32 -1.442695, %v1614_v34 }
  0xf7   : > { %v1314_v5 = vpop.eup %1313  ;;  %v691_v6 = vadd.f32 1.0, %v1312_v2  ;;  %1333 = vpow2.f32 %v1117_v0  ;;  %v1256_v7 = vpop.f32.mrb[8].mxu1  ;;  %v1617_v37 = vadd.f32 %v1240_v4, %v1551_v22 }
  0xf8   : > { %v482_v8 = vpop.f32.mrb[9].mxu0  ;;  %v1316_v9 = vpop.eup %1315  ;;  %1335 = vrcp.f32 %v675_v3  ;;  %v673_v10 = vadd.f32 1.0, %v1314_v5  ;;  %v1620_v40 = vadd.f32 %v1256_v7, %v1551_v22 }
  0xf9   : > { %v546_v11 = vpop.f32.mrb[9].mxu1  ;;  %v1241_v12 = vpop.f32.mrb[10].mxu0  ;;  %1337 = vrcp.f32 %v691_v6  ;;  %v689_v14 = vadd.f32 1.0, %v1316_v9  ;;  %v1624_v46 = vadd.f32 %v1551_v22, %v482_v8  ;;  %v1120_v4 = vmul.f32 -1.442695, %v1617_v37 }
  0xfa   : > { %v1318_v13 = vpop.eup %1317  ;;  %v1257_v15 = vpop.f32.mrb[10].mxu1  ;;  %1339 = vrcp.f32 %v673_v10  ;;  %v1630_v55 = vadd.f32 %v1551_v22, %v546_v11  ;;  %v1638_v63 = vadd.f32 %v1241_v12, %v1551_v22  ;;  %v1136_v5 = vmul.f32 -1.442695, %v1620_v40 }
  0xfb   : > { %v485_v16 = vpop.f32.mrb[11].mxu0  ;;  %v1320_v17 = vpop.eup %1319  ;;  %v676_v18 = vadd.f32 1.0, %v1318_v13  ;;  %1341 = vrcp.f32 %v689_v14  ;;  %v1118_v9 = vmul.f32 -1.442695, %v1624_v46  ;;  %v1651_v10 = vadd.f32 %v1257_v15, %v1551_v22 }
  0xfc   : > { %v1605_v19 = vpop.f32.mrb[11].mxu1  ;;  %v1322_v20 = vpop.eup %1321  ;;  %v692_v21 = vadd.f32 1.0, %v1320_v17  ;;  %v1134_v13 = vmul.f32 -1.442695, %v1630_v55 }
  0xfd   : > { %v1324_v25 = vpop.eup %1323  ;;  %1343 = vrcp.f32 %v676_v18  ;;  %v674_v26 = vadd.f32 1.0, %v1322_v20  ;;  %v1121_v18 = vmul.f32 -1.442695, %v1638_v63 }
  0xfe   : > { %v1326_v30 = vpop.eup %1325  ;;  %1345 = vrcp.f32 %v692_v21  ;;  %v690_v31 = vadd.f32 1.0, %v1324_v25  ;;  %v1244_v41 = vpop.f32.mrb[12].mxu0 }
  0xff   : > { %v1328_v35 = vpop.eup %1327  ;;  %1347 = vrcp.f32 %v674_v26  ;;  %v679_v36 = vadd.f32 1.0, %v1326_v30  ;;  %v1260_v47 = vpop.f32.mrb[12].mxu1 }
 0x100   : > { %v1330_v42 = vpop.eup %1329  ;;  %1349 = vrcp.f32 %v690_v31  ;;  %v695_v44 = vadd.f32 1.0, %v1328_v35  ;;  %v1626_v49 = vpop.f32.mrb[13].mxu0 }
 0x101   : > { %v1332_v50 = vpop.eup %1331  ;;  %1351 = vrcp.f32 %v679_v36  ;;  %v677_v53 = vadd.f32 1.0, %v1330_v42  ;;  %v1632_v58 = vpop.f32.mrb[13].mxu1 }
 0x102   : > { %v1634_v59 = vpop.f32.mrb[14].mxu0  ;;  %v1334_v60 = vpop.eup %1333  ;;  %1353 = vrcp.f32 %v695_v44  ;;  %v693_v61 = vadd.f32 1.0, %v1332_v50  ;;  %v1686_v44 = vadd.f32 %v1260_v47, %v1551_v22 }
 0x103   : > { %v1640_v0 = vpop.f32.mrb[14].mxu1  ;;  %v1642_v1 = vpop.f32.mrb[15].mxu0  ;;  %1355 = vrcp.f32 %v677_v53  ;;  %v680_v3 = vadd.f32 1.0, %v1334_v60 }
 0x104   : > { %v1336_v2 = vpop.eup %1335  ;;  %v1646_v6 = vpop.f32.mrb[15].mxu1  ;;  %1357 = vrcp.f32 %v693_v61 }
 0x105   : > { %v1338_v7 = vpop.eup %1337  ;;  %v771_v8 = vmul.f32 %v1336_v2, %v1554_v24  ;;  %1359 = vrcp.f32 %v680_v3  ;;  %v1663_v24 = vadd.f32 %v1551_v22, %v485_v16 }
 0x106   : > { %v1340_v11 = vpop.eup %1339  ;;  %v787_v12 = vmul.f32 %v1338_v7, %v1557_v27  ;;  %1361 = vpow2.f32 %v1133_v45  ;;  %v1670_v27 = vadd.f32 %v1551_v22, %v1605_v19  ;;  %v1680_v19 = vadd.f32 %v1244_v41, %v1551_v22 }
 0x107   : > { %v1342_v14 = vpop.eup %1341  ;;  %v1178_v17 = vpack.c.bf16 %v771_v8, %v771_v8  ;;  %v769_v15 = vmul.f32 %v1340_v11, %v1560_v28  ;;  %1363 = vpow2.f32 %v1115_v54  ;;  %v1137_v28 = vmul.f32 -1.442695, %v1651_v10 }
 0x108   : > { %v1344_v20 = vpop.eup %1343  ;;  %v1194_v21 = vpack.c.bf16 %v787_v12, %v787_v12  ;;  %v785_v25 = vmul.f32 %v1342_v14, %v1564_v32  ;;  %1365 = vpow2.f32 %v1131_v62  ;;  %v1119_v41 = vmul.f32 -1.442695, %v1663_v24 }
 0x109   : > { %v1346_v16 = vpop.eup %1345  ;;  %932 = vst.msk [vmem:[%s1658_s29 + $0x8] sm:$0xf] %vm929_vm3, %v1178_v17  ;;  %v1176_v26 = vpack.c.bf16 %v769_v15, %v769_v15  ;;  %v772_v30 = vmul.f32 %v1344_v20, %v1567_v33  ;;  %1367 = vpow2.f32 %v1120_v4  ;;  %v1135_v47 = vmul.f32 -1.442695, %v1670_v27 }
 0x10a   : > { %v1348_v31 = vpop.eup %1347  ;;  %948 = vst.msk [vmem:[%s1658_s29 + $0x48] sm:$0xf] %vm929_vm3, %v1194_v21  ;;  %v1192_v32 = vpack.c.bf16 %v785_v25, %v785_v25  ;;  %v788_v35 = vmul.f32 %v1346_v16, %v1572_v38  ;;  %1369 = vpow2.f32 %v1136_v5  ;;  %v1124_v62 = vmul.f32 -1.442695, %v1680_v19 }
 0x10b   : > { %v1350_v36 = vpop.eup %1349  ;;  %930 = vst.msk [vmem:[%s1658_s29] sm:$0xf] %vm929_vm3, %v1176_v26  ;;  %v1179_v42 = vpack.c.bf16 %v772_v30, %v772_v30  ;;  %v770_v33 = vmul.f32 %v1348_v31, %v1575_v39  ;;  %1371 = vpow2.f32 %v1118_v9  ;;  %v1140_v4 = vmul.f32 -1.442695, %v1686_v44 }
 0x10c   : > { %v1352_v45 = vpop.eup %1351  ;;  %946 = vst.msk [vmem:[%s1658_s29 + $0x40] sm:$0xf] %vm929_vm3, %v1192_v32  ;;  %v1195_v38 = vpack.c.bf16 %v788_v35, %v788_v35  ;;  %v786_v50 = vmul.f32 %v1350_v36, %v1580_v43  ;;  %1373 = vpow2.f32 %v1134_v13  ;;  %v1720_v35 = vadd.f32 %v1551_v22, %v1626_v49 }
 0x10d   : > { %v1354_v53 = vpop.eup %1353  ;;  %933 = vst.msk [vmem:[%s1658_s29 + $0xc] sm:$0xf] %vm929_vm3, %v1179_v42  ;;  %v1177_v54 = vpack.c.bf16 %v770_v33, %v770_v33  ;;  %v775_v39 = vmul.f32 %v1352_v45, %v1586_v48  ;;  %1375 = vpow2.f32 %v1121_v18  ;;  %v1724_v33 = vadd.f32 %v1551_v22, %v1632_v58 }
 0x10e   : > { %v1356_v60 = vpop.eup %1355  ;;  %949 = vst.msk [vmem:[%s1658_s29 + $0x4c] sm:$0xf] %vm929_vm3, %v1195_v38  ;;  %v1193_v61 = vpack.c.bf16 %v786_v50, %v786_v50  ;;  %v791_v43 = vmul.f32 %v1354_v53, %v1589_v51  ;;  %1377 = vpow2.f32 %v1137_v28  ;;  %v1728_v50 = vadd.f32 %v1634_v59, %v1551_v22 }
 0x10f   : > { %v1358_v2 = vpop.eup %1357  ;;  %931 = vst.msk [vmem:[%s1658_s29 + $0x4] sm:$0xf] %vm929_vm3, %v1177_v54  ;;  %v1182_v3 = vpack.c.bf16 %v775_v39, %v775_v39  ;;  %v773_v48 = vmul.f32 %v1356_v60, %v1592_v52  ;;  %1379 = vpow2.f32 %v1119_v41  ;;  %v1732_v49 = vadd.f32 %v1640_v0, %v1551_v22 }
 0x110   : > { %v1360_v5 = vpop.eup %1359  ;;  %947 = vst.msk [vmem:[%s1658_s29 + $0x44] sm:$0xf] %vm929_vm3, %v1193_v61  ;;  %v1198_v7 = vpack.c.bf16 %v791_v43, %v791_v43  ;;  %v789_v51 = vmul.f32 %v1358_v2, %v1596_v56  ;;  %1381 = vpow2.f32 %v1135_v47  ;;  %v1122_v58 = vmul.f32 -1.442695, %v1720_v35 }
 0x111   : > { %v1362_v8 = vpop.eup %1361  ;;  %936 = vst.msk [vmem:[%s1658_s29 + $0x18] sm:$0xf] %vm929_vm3, %v1182_v3  ;;  %v1180_v9 = vpack.c.bf16 %v773_v48, %v773_v48  ;;  %v776_v11 = vmul.f32 %v1360_v5, %v1599_v57  ;;  %1383 = vpow2.f32 %v1124_v62  ;;  %v1737_v47 = vadd.f32 %v1551_v22, %v1642_v1 }
 0x112   : > { %v1364_v52 = vpop.eup %1363  ;;  %952 = vst.msk [vmem:[%s1658_s29 + $0x58] sm:$0xf] %vm929_vm3, %v1198_v7  ;;  %v1196_v12 = vpack.c.bf16 %v789_v51, %v789_v51  ;;  %v696_v13 = vadd.f32 1.0, %v1362_v8  ;;  %1385 = vpow2.f32 %v1140_v4  ;;  %v1138_v61 = vmul.f32 -1.442695, %v1724_v33 }
 0x113   : > { %v1366_v14 = vpop.eup %1365  ;;  %934 = vst.msk [vmem:[%s1658_s29 + $0x10] sm:$0xf] %vm929_vm3, %v1180_v9  ;;  %v1183_v56 = vpack.c.bf16 %v776_v11, %v776_v11  ;;  %v678_v17 = vadd.f32 1.0, %v1364_v52  ;;  %v1742_v43 = vadd.f32 %v1551_v22, %v1646_v6  ;;  %v1125_v2 = vmul.f32 -1.442695, %v1728_v50 }
 0x114   : > { %v1368_v15 = vpop.eup %1367  ;;  %950 = vst.msk [vmem:[%s1658_s29 + $0x50] sm:$0xf] %vm929_vm3, %v1196_v12  ;;  %1387 = vrcp.f32 %v696_v13  ;;  %v694_v18 = vadd.f32 1.0, %v1366_v14  ;;  %v1141_v48 = vmul.f32 -1.442695, %v1732_v49 }
 0x115   : > { %v1370_v57 = vpop.eup %1369  ;;  %937 = vst.msk [vmem:[%s1658_s29 + $0x1c] sm:$0xf] %vm929_vm3, %v1183_v56  ;;  %1389 = vrcp.f32 %v678_v17  ;;  %v683_v20 = vadd.f32 1.0, %v1368_v15  ;;  %v1123_v22 = vmul.f32 -1.442695, %v1737_v47 }
 0x116   : > { %v1372_v21 = vpop.eup %1371  ;;  %1391 = vrcp.f32 %v694_v18  ;;  %v699_v25 = vadd.f32 1.0, %v1370_v57  ;;  %v1139_v8 = vmul.f32 -1.442695, %v1742_v43 }
 0x117   : > { %v1374_v16 = vpop.eup %1373  ;;  %1393 = vrcp.f32 %v683_v20  ;;  %v681_v26 = vadd.f32 1.0, %v1372_v21 }
 0x118   : > { %v1376_v30 = vpop.eup %1375  ;;  %1395 = vrcp.f32 %v699_v25  ;;  %v697_v28 = vadd.f32 1.0, %v1374_v16 }
 0x119   : > { %v1378_v31 = vpop.eup %1377  ;;  %1397 = vrcp.f32 %v681_v26  ;;  %v684_v32 = vadd.f32 1.0, %v1376_v30 }
 0x11a   : > { %v1380_v36 = vpop.eup %1379  ;;  %1399 = vrcp.f32 %v697_v28  ;;  %v700_v42 = vadd.f32 1.0, %v1378_v31 }
 0x11b   : > { %v1382_v45 = vpop.eup %1381  ;;  %1401 = vrcp.f32 %v684_v32  ;;  %v682_v38 = vadd.f32 1.0, %v1380_v36 }
 0x11c   : > { %v1384_v41 = vpop.eup %1383  ;;  %1403 = vrcp.f32 %v700_v42  ;;  %v698_v53 = vadd.f32 1.0, %v1382_v45 }
 0x11d   : > { %v1386_v54 = vpop.eup %1385  ;;  %1405 = vrcp.f32 %v682_v38  ;;  %v687_v39 = vadd.f32 1.0, %v1384_v41 }
 0x11e   : > { %v1388_v60 = vpop.eup %1387  ;;  %1407 = vrcp.f32 %v698_v53  ;;  %v703_v59 = vadd.f32 1.0, %v1386_v54 }
 0x11f   : > { %v1390_v0 = vpop.eup %1389  ;;  %v792_v62 = vmul.f32 %v1388_v60, %v1608_v23  ;;  %1409 = vrcp.f32 %v687_v39 }
 0x120   : > { %v1392_v3 = vpop.eup %1391  ;;  %v774_v1 = vmul.f32 %v1390_v0, %v1611_v29  ;;  %1411 = vrcp.f32 %v703_v59 }
 0x121   : > { %v1394_v4 = vpop.eup %1393  ;;  %v1199_v5 = vpack.c.bf16 %v792_v62, %v792_v62  ;;  %v790_v7 = vmul.f32 %v1392_v3, %v1614_v34  ;;  %1413 = vpow2.f32 %v1122_v58 }
 0x122   : > { %v1396_v6 = vpop.eup %1395  ;;  %v1181_v23 = vpack.c.bf16 %v774_v1, %v774_v1  ;;  %v779_v51 = vmul.f32 %v1394_v4, %v1617_v37  ;;  %1415 = vpow2.f32 %v1138_v61 }
 0x123   : > { %v1398_v29 = vpop.eup %1397  ;;  %953 = vst.msk [vmem:[%s1658_s29 + $0x5c] sm:$0xf] %vm929_vm3, %v1199_v5  ;;  %v1197_v9 = vpack.c.bf16 %v790_v7, %v790_v7  ;;  %v795_v11 = vmul.f32 %v1396_v6, %v1620_v40  ;;  %1417 = vpow2.f32 %v1125_v2 }
 0x124   : > { %v1400_v34 = vpop.eup %1399  ;;  %935 = vst.msk [vmem:[%s1658_s29 + $0x14] sm:$0xf] %vm929_vm3, %v1181_v23  ;;  %v1186_v52 = vpack.c.bf16 %v779_v51, %v779_v51  ;;  %v777_v12 = vmul.f32 %v1398_v29, %v1624_v46  ;;  %1419 = vpow2.f32 %v1141_v48 }
 0x125   : > { %v1402_v37 = vpop.eup %1401  ;;  %951 = vst.msk [vmem:[%s1658_s29 + $0x54] sm:$0xf] %vm929_vm3, %v1197_v9  ;;  %v1202_v13 = vpack.c.bf16 %v795_v11, %v795_v11  ;;  %v793_v14 = vmul.f32 %v1400_v34, %v1630_v55  ;;  %1421 = vpow2.f32 %v1123_v22 }
 0x126   : > { %v1404_v56 = vpop.eup %1403  ;;  %940 = vst.msk [vmem:[%s1658_s29 + $0x28] sm:$0xf] %vm929_vm3, %v1186_v52  ;;  %v1184_v40 = vpack.c.bf16 %v777_v12, %v777_v12  ;;  %v780_v17 = vmul.f32 %v1402_v37, %v1638_v63  ;;  %1423 = vpow2.f32 %v1139_v8 }
 0x127   : > { %v1406_v15 = vpop.eup %1405  ;;  %956 = vst.msk [vmem:[%s1658_s29 + $0x68] sm:$0xf] %vm929_vm3, %v1202_v13  ;;  %v1200_v46 = vpack.c.bf16 %v793_v14, %v793_v14  ;;  %v796_v18 = vmul.f32 %v1404_v56, %v1651_v10 }
 0x128   : > { %v1408_v57 = vpop.eup %1407  ;;  %938 = vst.msk [vmem:[%s1658_s29 + $0x20] sm:$0xf] %vm929_vm3, %v1184_v40  ;;  %v1187_v55 = vpack.c.bf16 %v780_v17, %v780_v17  ;;  %v778_v20 = vmul.f32 %v1406_v15, %v1663_v24 }
 0x129   : > { %v1410_v21 = vpop.eup %1409  ;;  %954 = vst.msk [vmem:[%s1658_s29 + $0x60] sm:$0xf] %vm929_vm3, %v1200_v46  ;;  %v1203_v63 = vpack.c.bf16 %v796_v18, %v796_v18  ;;  %v794_v25 = vmul.f32 %v1408_v57, %v1670_v27 }
 0x12a   : > { %v1412_v16 = vpop.eup %1411  ;;  %941 = vst.msk [vmem:[%s1658_s29 + $0x2c] sm:$0xf] %vm929_vm3, %v1187_v55  ;;  %v1185_v26 = vpack.c.bf16 %v778_v20, %v778_v20  ;;  %v783_v10 = vmul.f32 %v1410_v21, %v1680_v19 }
 0x12b   : > { %v1414_v30 = vpop.eup %1413  ;;  %957 = vst.msk [vmem:[%s1658_s29 + $0x6c] sm:$0xf] %vm929_vm3, %v1203_v63  ;;  %v1201_v28 = vpack.c.bf16 %v794_v25, %v794_v25  ;;  %v799_v24 = vmul.f32 %v1412_v16, %v1686_v44 }
 0x12c   : > { %v1416_v31 = vpop.eup %1415  ;;  %939 = vst.msk [vmem:[%s1658_s29 + $0x24] sm:$0xf] %vm929_vm3, %v1185_v26  ;;  %v1190_v32 = vpack.c.bf16 %v783_v10, %v783_v10  ;;  %v685_v36 = vadd.f32 1.0, %v1414_v30 }
 0x12d   : > { %v1418_v27 = vpop.eup %1417  ;;  %955 = vst.msk [vmem:[%s1658_s29 + $0x64] sm:$0xf] %vm929_vm3, %v1201_v28  ;;  %v1206_v42 = vpack.c.bf16 %v799_v24, %v799_v24  ;;  %v701_v45 = vadd.f32 1.0, %v1416_v31 }
 0x12e   : > { %v1420_v38 = vpop.eup %1419  ;;  %944 = vst.msk [vmem:[%s1658_s29 + $0x38] sm:$0xf] %vm929_vm3, %v1190_v32  ;;  %1425 = vrcp.f32 %v685_v36  ;;  %v688_v19 = vadd.f32 1.0, %v1418_v27 }
 0x12f   : > { %v1422_v41 = vpop.eup %1421  ;;  %960 = vst.msk [vmem:[%s1658_s29 + $0x78] sm:$0xf] %vm929_vm3, %v1206_v42  ;;  %1427 = vrcp.f32 %v701_v45  ;;  %v704_v44 = vadd.f32 1.0, %v1420_v38 }
 0x130   : > { %v1424_v53 = vpop.eup %1423  ;;  %1429 = vrcp.f32 %v688_v19  ;;  %v686_v54 = vadd.f32 1.0, %v1422_v41 }
 0x131   : > { %1431 = vrcp.f32 %v704_v44  ;;  %v702_v39 = vadd.f32 1.0, %v1424_v53 }
 0x132   : > { %1433 = vrcp.f32 %v686_v54 }
 0x133   : > { %1435 = vrcp.f32 %v702_v39 }
 0x138   : > { %v1426_v58 = vpop.eup %1425 }
 0x139   : > { %v1428_v60 = vpop.eup %1427  ;;  %v781_v59 = vmul.f32 %v1426_v58, %v1720_v35 }
 0x13a   : > { %v1430_v61 = vpop.eup %1429  ;;  %v797_v0 = vmul.f32 %v1428_v60, %v1724_v33 }
 0x13b   : > { %v1432_v62 = vpop.eup %1431  ;;  %v1188_v2 = vpack.c.bf16 %v781_v59, %v781_v59  ;;  %v784_v3 = vmul.f32 %v1430_v61, %v1728_v50 }
 0x13c   : > { %v1434_v1 = vpop.eup %1433  ;;  %v1204_v48 = vpack.c.bf16 %v797_v0, %v797_v0  ;;  %v800_v4 = vmul.f32 %v1432_v62, %v1732_v49 }
 0x13d   : > { %v1436_v5 = vpop.eup %1435  ;;  %942 = vst.msk [vmem:[%s1658_s29 + $0x30] sm:$0xf] %vm929_vm3, %v1188_v2  ;;  %v1191_v7 = vpack.c.bf16 %v784_v3, %v784_v3  ;;  %v782_v35 = vmul.f32 %v1434_v1, %v1737_v47 }
 0x13e   : > { %958 = vst.msk [vmem:[%s1658_s29 + $0x70] sm:$0xf] %vm929_vm3, %v1204_v48  ;;  %v1207_v33 = vpack.c.bf16 %v800_v4, %v800_v4  ;;  %v798_v22 = vmul.f32 %v1436_v5, %v1742_v43 }
 0x13f   : > { %945 = vst.msk [vmem:[%s1658_s29 + $0x3c] sm:$0xf] %vm929_vm3, %v1191_v7  ;;  %v1189_v6 = vpack.c.bf16 %v782_v35, %v782_v35 }
 0x140   : > { %961 = vst.msk [vmem:[%s1658_s29 + $0x7c] sm:$0xf] %vm929_vm3, %v1207_v33  ;;  %v1205_v50 = vpack.c.bf16 %v798_v22, %v798_v22 }
 0x141   : > { %943 = vst.msk [vmem:[%s1658_s29 + $0x34] sm:$0xf] %vm929_vm3, %v1189_v6 }
 0x142   : > { %959 = vst.msk [vmem:[%s1658_s29 + $0x74] sm:$0xf] %vm929_vm3, %v1205_v50 }
 0x143 PF: > { %s13_s14 = sadd.s32 1, %s1459_s14   ;;  %s1818_s12 = smov %s1455_s13 }
 0x144   : > { %p10_p5 = scmp.ge.s32.totalorder %s13_s14, 6   ;;  %s1819_s13 = smov %s1821_s15 }
 0x146   :  { %12 = sbr.rel (!%p10_p5) target bundleno = 2 (0x2), region = 68 }

// kernel: seg_no_ffm_forward.26
= control target key start
LH: loop header
LB: loop body
LE: loop exit
PB: predicated region body
PF: predicated region fallthrough
CT: control target
= control target key end

     0   :  { %v1227_v0 = vmov 0   ;;  %vm270_vm0 = vcmask 130048   ;;  %vm832_vm1 = vcmask 257024   ;;  %s1680_s1 = inlined_call_operand.vmem [shape: bf16[144,32], index: 1, kind: input, shape index: {}]   ;;  %s1681_s0 = inlined_call_operand.vmem [shape: bf16[256,144], index: 0, kind: input, shape index: {}]   ;;  %s1682_s2 = inlined_call_operand.vmem [shape: f32[1,32], index: 2, kind: input, shape index: {}]   ;;  %s1683_s3 = inlined_call_operand.vmem [shape: bf16[256,32], index: 3, kind: output, shape index: {}]  }
   0x1   :  { %319 = vmatprep.subr.bf16.mxu0 %v1227_v0  ;;  %1023 = vmatprep.subr.bf16.mxu1 %v1227_v0  ;;  %v1042_v1 = vld [vmem:[%s1680_s1] sm:$0xff]   ;;  %v1043_v2 = vld [vmem:[%s1680_s1 + $0x8] sm:$0xff]   ;;  %v1044_v3 = vld [vmem:[%s1680_s1 + $0x10] sm:$0xff]  }
   0x2   :  { %320 = vmatpush1.bf16.msra.mxu0 %v1042_v1  ;;  %1032 = vmatpush1.bf16.msra.mxu1 %v1042_v1  ;;  %v1045_v4 = vld [vmem:[%s1680_s1 + $0x18] sm:$0xff]   ;;  %v1053_v5 = vld [vmem:[%s1681_s0 + $0x4] ss:$8 sps:$4 sm:$0xff]   ;;  %v1048_v9 = vld [vmem:[%s1680_s1 + $0x30] sm:$0xff]  }
   0x3   :  { %321 = vmatprep.subr.bf16.mxu0 %v1227_v0  ;;  %1024 = vmatprep.subr.bf16.mxu1 %v1227_v0  ;;  %v1056_v6 = vld [vmem:[%s1681_s0 + $0x84] ss:$8 sps:$4 sm:$0xff]   ;;  %v1049_v10 = vld [vmem:[%s1680_s1 + $0x38] sm:$0xff]   ;;  %v1051_v12 = vld [vmem:[%s1681_s0] ss:$8 sps:$4 sm:$0xff]  }
   0x4   :  { %911 = vmatprep.mubr.msk.bf16.mxu0 %vm270_vm0, %v1053_v5  ;;  %919 = vmatprep.mubr.msk.bf16.mxu1 %vm270_vm0, %v1056_v6  ;;  %v1046_v7 = vld [vmem:[%s1680_s1 + $0x20] sm:$0xff]   ;;  %v1047_v8 = vld [vmem:[%s1680_s1 + $0x28] sm:$0xff]   ;;  %v1057_v14 = vld [vmem:[%s1681_s0 + $0x14] ss:$8 sps:$4 sm:$0xff]  }
   0x5   :  { %v1050_v11 = vld [vmem:[%s1680_s1 + $0x40] sm:$0xff]   ;;  %v1059_v15 = vld [vmem:[%s1681_s0 + $0x94] ss:$8 sps:$4 sm:$0xff]   ;;  %v1061_v16 = vld [vmem:[%s1681_s0 + $0x10] ss:$8 sps:$4 sm:$0xff]  }
   0x6   :  { %322 = vmatpush1.bf16.msra.mxu0 %v1043_v2  ;;  %1033 = vmatpush1.bf16.msra.mxu1 %v1043_v2  ;;  %v1054_v13 = vld [vmem:[%s1681_s0 + $0x80] ss:$8 sps:$4 sm:$0xff]   ;;  %v1062_v17 = vld [vmem:[%s1681_s0 + $0x90] ss:$8 sps:$4 sm:$0xff]   ;;  %v1063_v18 = vld [vmem:[%s1681_s0 + $0x24] ss:$8 sps:$4 sm:$0xff]  }
   0x7   :  { %323 = vmatprep.subr.bf16.mxu0 %v1227_v0  ;;  %1025 = vmatprep.subr.bf16.mxu1 %v1227_v0  ;;  %v1065_v19 = vld [vmem:[%s1681_s0 + $0xa4] ss:$8 sps:$4 sm:$0xff]   ;;  %v1067_v20 = vld [vmem:[%s1681_s0 + $0x20] ss:$8 sps:$4 sm:$0xff]   ;;  %v1069_v22 = vld [vmem:[%s1681_s0 + $0x34] ss:$8 sps:$4 sm:$0xff]  }
   0x8   :  { %v1068_v21 = vld [vmem:[%s1681_s0 + $0xa0] ss:$8 sps:$4 sm:$0xff]   ;;  %v1071_v23 = vld [vmem:[%s1681_s0 + $0xb4] ss:$8 sps:$4 sm:$0xff]   ;;  %v1073_v24 = vld [vmem:[%s1681_s0 + $0x30] ss:$8 sps:$4 sm:$0xff]  }
   0x9   :  { %v1074_v25 = vld [vmem:[%s1681_s0 + $0xb0] ss:$8 sps:$4 sm:$0xff]   ;;  %v1075_v26 = vld [vmem:[%s1681_s0 + $0x44] ss:$8 sps:$4 sm:$0xff]   ;;  %v1079_v28 = vld [vmem:[%s1681_s0 + $0x40] ss:$8 sps:$4 sm:$0xff]  }
   0xa   :  { %324 = vmatpush1.bf16.msra.mxu0 %v1044_v3  ;;  %1034 = vmatpush1.bf16.msra.mxu1 %v1044_v3  ;;  %v1077_v27 = vld [vmem:[%s1681_s0 + $0xc4] ss:$8 sps:$4 sm:$0xff]   ;;  %v1080_v29 = vld [vmem:[%s1681_s0 + $0xc0] ss:$8 sps:$4 sm:$0xff]   ;;  %v1081_v30 = vld [vmem:[%s1681_s0 + $0x54] ss:$8 sps:$4 sm:$0xff]  }
   0xb   :  { %325 = vmatprep.subr.bf16.mxu0 %v1227_v0  ;;  %1026 = vmatprep.subr.bf16.mxu1 %v1227_v0  ;;  %v1083_v31 = vld [vmem:[%s1681_s0 + $0xd4] ss:$8 sps:$4 sm:$0xff]   ;;  %v1085_v32 = vld [vmem:[%s1681_s0 + $0x50] ss:$8 sps:$4 sm:$0xff]   ;;  %v1087_v34 = vld [vmem:[%s1681_s0 + $0x64] ss:$8 sps:$4 sm:$0xff]  }
   0xc   :  { %v1086_v33 = vld [vmem:[%s1681_s0 + $0xd0] ss:$8 sps:$4 sm:$0xff]   ;;  %v1089_v35 = vld [vmem:[%s1681_s0 + $0xe4] ss:$8 sps:$4 sm:$0xff]   ;;  %v1091_v36 = vld [vmem:[%s1681_s0 + $0x60] ss:$8 sps:$4 sm:$0xff]  }
   0xd   :  { %v1092_v37 = vld [vmem:[%s1681_s0 + $0xe0] ss:$8 sps:$4 sm:$0xff]   ;;  %v1093_v38 = vld [vmem:[%s1681_s0 + $0x74] ss:$8 sps:$4 sm:$0xff]   ;;  %v1097_v40 = vld [vmem:[%s1681_s0 + $0x70] ss:$8 sps:$4 sm:$0xff]  }
   0xe   :  { %326 = vmatpush1.bf16.msra.mxu0 %v1045_v4  ;;  %1035 = vmatpush1.bf16.msra.mxu1 %v1045_v4  ;;  %v1095_v39 = vld [vmem:[%s1681_s0 + $0xf4] ss:$8 sps:$4 sm:$0xff]   ;;  %v1098_v41 = vld [vmem:[%s1681_s0 + $0xf0] ss:$8 sps:$4 sm:$0xff]   ;;  %v1390_v42 = vld [vmem:[%s1682_s2] ss:$0 sm:$0xff] }
   0xf   :  { %327 = vmatprep.subr.bf16.mxu0 %v1227_v0  ;;  %1027 = vmatprep.subr.bf16.mxu1 %v1227_v0 }
  0x12   :  { %328 = vmatpush1.bf16.msra.mxu0 %v1046_v7  ;;  %1036 = vmatpush1.bf16.msra.mxu1 %v1046_v7 }
  0x13   :  { %329 = vmatprep.subr.bf16.mxu0 %v1227_v0  ;;  %1028 = vmatprep.subr.bf16.mxu1 %v1227_v0 }
  0x16   :  { %330 = vmatpush1.bf16.msra.mxu0 %v1047_v8  ;;  %1037 = vmatpush1.bf16.msra.mxu1 %v1047_v8 }
  0x17   :  { %331 = vmatprep.subr.bf16.mxu0 %v1227_v0  ;;  %1029 = vmatprep.subr.bf16.mxu1 %v1227_v0 }
  0x1a   :  { %332 = vmatpush1.bf16.msra.mxu0 %v1048_v9  ;;  %1038 = vmatpush1.bf16.msra.mxu1 %v1048_v9 }
  0x1b   :  { %333 = vmatprep.subr.bf16.mxu0 %v1227_v0  ;;  %1030 = vmatprep.subr.bf16.mxu1 %v1227_v0 }
  0x1e   :  { %334 = vmatpush1.bf16.msra.mxu0 %v1049_v10  ;;  %1039 = vmatpush1.bf16.msra.mxu1 %v1049_v10 }
  0x1f   :  { %335 = vmatprep.subr.bf16.mxu0 %v1227_v0  ;;  %1031 = vmatprep.subr.bf16.mxu1 %v1227_v0 }
  0x22   :  { %336 = vmatpush1.bf16.msra.mxu0 %v1050_v11  ;;  %1040 = vmatpush1.bf16.msra.mxu1 %v1050_v11 }
  0x25   :  { %352 = vmatmul.mubr.bf16.vlgmr.msra.gmra.mrb[0].mxu0 %v1051_v12  ;;  %416 = vmatmul.mubr.bf16.vlgmr.msra.gmra.mrb[0].mxu1 %v1054_v13 }
  0x26   :  { %912 = vmatprep.mubr.msk.bf16.mxu0 %vm270_vm0, %v1057_v14  ;;  %920 = vmatprep.mubr.msk.bf16.mxu1 %vm270_vm0, %v1059_v15 }
  0x2d   :  { %360 = vmatmul.mubr.bf16.gmra.mrb[4].mxu0 %v1061_v16  ;;  %424 = vmatmul.mubr.bf16.gmra.mrb[4].mxu1 %v1062_v17 }
  0x2e   :  { %913 = vmatprep.mubr.msk.bf16.mxu0 %vm270_vm0, %v1063_v18  ;;  %921 = vmatprep.mubr.msk.bf16.mxu1 %vm270_vm0, %v1065_v19 }
  0x35   :  { %368 = vmatmul.mubr.bf16.gmra.mrb[8].mxu0 %v1067_v20  ;;  %432 = vmatmul.mubr.bf16.gmra.mrb[8].mxu1 %v1068_v21 }
  0x36   :  { %914 = vmatprep.mubr.msk.bf16.mxu0 %vm270_vm0, %v1069_v22  ;;  %922 = vmatprep.mubr.msk.bf16.mxu1 %vm270_vm0, %v1071_v23 }
  0x3d   :  { %376 = vmatmul.mubr.bf16.gmra.mrb[12].mxu0 %v1073_v24  ;;  %440 = vmatmul.mubr.bf16.gmra.mrb[12].mxu1 %v1074_v25 }
  0x3e   :  { %915 = vmatprep.mubr.msk.bf16.mxu0 %vm270_vm0, %v1075_v26  ;;  %923 = vmatprep.mubr.msk.bf16.mxu1 %vm270_vm0, %v1077_v27 }
  0x45   :  { %384 = vmatmul.mubr.bf16.gmra.mrb[16].mxu0 %v1079_v28  ;;  %448 = vmatmul.mubr.bf16.gmra.mrb[16].mxu1 %v1080_v29 }
  0x46   :  { %916 = vmatprep.mubr.msk.bf16.mxu0 %vm270_vm0, %v1081_v30  ;;  %924 = vmatprep.mubr.msk.bf16.mxu1 %vm270_vm0, %v1083_v31 }
  0x4d   :  { %392 = vmatmul.mubr.bf16.gmra.mrb[20].mxu0 %v1085_v32  ;;  %456 = vmatmul.mubr.bf16.gmra.mrb[20].mxu1 %v1086_v33 }
  0x4e   :  { %917 = vmatprep.mubr.msk.bf16.mxu0 %vm270_vm0, %v1087_v34  ;;  %925 = vmatprep.mubr.msk.bf16.mxu1 %vm270_vm0, %v1089_v35 }
  0x55   :  { %400 = vmatmul.mubr.bf16.gmra.mrb[24].mxu0 %v1091_v36  ;;  %464 = vmatmul.mubr.bf16.gmra.mrb[24].mxu1 %v1092_v37 }
  0x56   :  { %918 = vmatprep.mubr.msk.bf16.mxu0 %vm270_vm0, %v1093_v38  ;;  %926 = vmatprep.mubr.msk.bf16.mxu1 %vm270_vm0, %v1095_v39 }
  0x5d   :  { %408 = vmatmul.mubr.bf16.gmra.mrb[28].mxu0 %v1097_v40  ;;  %472 = vmatmul.mubr.bf16.gmra.mrb[28].mxu1 %v1098_v41 }
  0xf8   :  { %v353_v43 = vpop.f32.mrb[0].mxu0  ;;  %v417_v44 = vpop.f32.mrb[0].mxu1 }
  0xf9   :  { %v1393_v45 = vadd.f32 %v1390_v42, %v353_v43  ;;  %v1396_v46 = vadd.f32 %v1390_v42, %v417_v44  ;;  %v355_v47 = vpop.f32.mrb[1].mxu0  ;;  %v419_v48 = vpop.f32.mrb[1].mxu1 }
  0xfa   :  { %v356_v49 = vpop.f32.mrb[2].mxu0  ;;  %v420_v50 = vpop.f32.mrb[2].mxu1 }
  0xfb   :  { %v927_v51 = vmul.f32 -1.442695, %v1393_v45  ;;  %v943_v52 = vmul.f32 -1.442695, %v1396_v46  ;;  %v1401_v53 = vadd.f32 %v1390_v42, %v356_v49  ;;  %v1404_v54 = vadd.f32 %v1390_v42, %v420_v50  ;;  %v358_v55 = vpop.f32.mrb[3].mxu0  ;;  %v422_v56 = vpop.f32.mrb[3].mxu1 }
  0xfd   :  { %1099 = vpow2.f32 %v927_v51  ;;  %v928_v57 = vmul.f32 -1.442695, %v1401_v53  ;;  %v944_v58 = vmul.f32 -1.442695, %v1404_v54 }
  0xfe   :  { %1101 = vpow2.f32 %v943_v52 }
  0xff   :  { %1103 = vpow2.f32 %v928_v57 }
 0x100   :  { %1105 = vpow2.f32 %v944_v58  ;;  %v361_v59 = vpop.f32.mrb[4].mxu0  ;;  %v425_v60 = vpop.f32.mrb[4].mxu1 }
 0x101   :  { %v1409_v61 = vadd.f32 %v1390_v42, %v361_v59  ;;  %v1412_v62 = vadd.f32 %v1390_v42, %v425_v60  ;;  %v363_v63 = vpop.f32.mrb[5].mxu0  ;;  %v427_v0 = vpop.f32.mrb[5].mxu1 }
 0x102   :  { %v364_v1 = vpop.f32.mrb[6].mxu0  ;;  %v428_v2 = vpop.f32.mrb[6].mxu1 }
 0x103   :  { %v929_v3 = vmul.f32 -1.442695, %v1409_v61  ;;  %v945_v4 = vmul.f32 -1.442695, %v1412_v62  ;;  %v1417_v5 = vadd.f32 %v1390_v42, %v364_v1  ;;  %v1420_v6 = vadd.f32 %v1390_v42, %v428_v2  ;;  %v366_v7 = vpop.f32.mrb[7].mxu0  ;;  %v430_v8 = vpop.f32.mrb[7].mxu1 }
 0x105   :  { %1107 = vpow2.f32 %v929_v3  ;;  %v930_v9 = vmul.f32 -1.442695, %v1417_v5  ;;  %v946_v10 = vmul.f32 -1.442695, %v1420_v6 }
 0x106   :  { %1109 = vpow2.f32 %v945_v4 }
 0x107   :  { %v1100_v11 = vpop.eup %1099  ;;  %1111 = vpow2.f32 %v930_v9 }
 0x108   :  { %v1102_v12 = vpop.eup %1101  ;;  %v576_v13 = vadd.f32 1.0, %v1100_v11  ;;  %1113 = vpow2.f32 %v946_v10  ;;  %v369_v14 = vpop.f32.mrb[8].mxu0 }
 0x109   :  { %v433_v15 = vpop.f32.mrb[8].mxu1  ;;  %v1104_v16 = vpop.eup %1103  ;;  %v592_v17 = vadd.f32 1.0, %v1102_v12  ;;  %v1425_v18 = vadd.f32 %v1390_v42, %v369_v14 }
 0x10a   :  { %v1428_v19 = vadd.f32 %v1390_v42, %v433_v15  ;;  %v371_v20 = vpop.f32.mrb[9].mxu0  ;;  %v435_v21 = vpop.f32.mrb[9].mxu1  ;;  %1115 = vrcp.f32 %v576_v13  ;;  %v577_v23 = vadd.f32 1.0, %v1104_v16 }
 0x10b   :  { %v1106_v22 = vpop.eup %1105  ;;  %v372_v24 = vpop.f32.mrb[10].mxu0  ;;  %1117 = vrcp.f32 %v592_v17  ;;  %v931_v27 = vmul.f32 -1.442695, %v1425_v18 }
 0x10c   :  { %v436_v25 = vpop.f32.mrb[10].mxu1  ;;  %v593_v26 = vadd.f32 1.0, %v1106_v22  ;;  %v947_v28 = vmul.f32 -1.442695, %v1428_v19  ;;  %v374_v29 = vpop.f32.mrb[11].mxu0  ;;  %1119 = vrcp.f32 %v577_v23  ;;  %v1433_v30 = vadd.f32 %v1390_v42, %v372_v24 }
 0x10d   :  { %v1436_v31 = vadd.f32 %v1390_v42, %v436_v25  ;;  %v438_v32 = vpop.f32.mrb[11].mxu1 }
 0x10e   :  { %1121 = vrcp.f32 %v593_v26  ;;  %v932_v33 = vmul.f32 -1.442695, %v1433_v30 }
 0x10f   :  { %1123 = vpow2.f32 %v931_v27  ;;  %v948_v34 = vmul.f32 -1.442695, %v1436_v31  ;;  %v1108_v35 = vpop.eup %1107 }
 0x110   :  { %1125 = vpow2.f32 %v947_v28  ;;  %v1110_v36 = vpop.eup %1109  ;;  %v578_v37 = vadd.f32 1.0, %v1108_v35  ;;  %v377_v38 = vpop.f32.mrb[12].mxu0 }
 0x111   :  { %1127 = vpow2.f32 %v932_v33  ;;  %v441_v39 = vpop.f32.mrb[12].mxu1  ;;  %v1112_v40 = vpop.eup %1111  ;;  %v594_v41 = vadd.f32 1.0, %v1110_v36  ;;  %v1441_v43 = vadd.f32 %v1390_v42, %v377_v38 }
 0x112   :  { %1129 = vpow2.f32 %v948_v34  ;;  %v1444_v44 = vadd.f32 %v1390_v42, %v441_v39  ;;  %v379_v47 = vpop.f32.mrb[13].mxu0  ;;  %v443_v48 = vpop.f32.mrb[13].mxu1  ;;  %v579_v50 = vadd.f32 1.0, %v1112_v40 }
 0x113   :  { %v1114_v49 = vpop.eup %1113  ;;  %1131 = vrcp.f32 %v578_v37  ;;  %v380_v51 = vpop.f32.mrb[14].mxu0  ;;  %v933_v56 = vmul.f32 -1.442695, %v1441_v43 }
 0x114   :  { %v444_v52 = vpop.f32.mrb[14].mxu1  ;;  %1133 = vrcp.f32 %v594_v41  ;;  %v595_v55 = vadd.f32 1.0, %v1114_v49  ;;  %v949_v57 = vmul.f32 -1.442695, %v1444_v44  ;;  %v382_v58 = vpop.f32.mrb[15].mxu0  ;;  %v1449_v60 = vadd.f32 %v1390_v42, %v380_v51 }
 0x115   :  { %v1116_v59 = vpop.eup %1115  ;;  %1135 = vrcp.f32 %v579_v50  ;;  %v1452_v63 = vadd.f32 %v1390_v42, %v444_v52  ;;  %v446_v0 = vpop.f32.mrb[15].mxu1 }
 0x116   :  { %v1118_v1 = vpop.eup %1117  ;;  %v672_v2 = vmul.f32 %v1116_v59, %v1393_v45  ;;  %1137 = vrcp.f32 %v595_v55  ;;  %v934_v7 = vmul.f32 -1.442695, %v1449_v60 }
 0x117   :  { %v1120_v3 = vpop.eup %1119  ;;  %v688_v4 = vmul.f32 %v1118_v1, %v1396_v46  ;;  %1139 = vpow2.f32 %v933_v56  ;;  %v950_v8 = vmul.f32 -1.442695, %v1452_v63 }
 0x118   :  { %v1122_v9 = vpop.eup %1121  ;;  %v991_v10 = vpack.c.bf16 %v672_v2, %v672_v2  ;;  %v673_v11 = vmul.f32 %v1120_v3, %v1401_v53  ;;  %1141 = vpow2.f32 %v949_v57  ;;  %v385_v45 = vpop.f32.mrb[16].mxu0 }
 0x119   :  { %v1124_v12 = vpop.eup %1123  ;;  %v1007_v13 = vpack.c.bf16 %v688_v4, %v688_v4  ;;  %v689_v14 = vmul.f32 %v1122_v9, %v1404_v54  ;;  %1143 = vpow2.f32 %v934_v7  ;;  %v449_v15 = vpop.f32.mrb[16].mxu1  ;;  %v1465_v20 = vadd.f32 %v1390_v42, %v385_v45 }
 0x11a   :  { %v1126_v16 = vpop.eup %1125  ;;  %833 = vst.msk [vmem:[%s1683_s3] sm:$0xf] %vm832_vm1, %v991_v10  ;;  %v992_v46 = vpack.c.bf16 %v673_v11, %v673_v11  ;;  %v580_v17 = vadd.f32 1.0, %v1124_v12  ;;  %1145 = vpow2.f32 %v950_v8  ;;  %v387_v53 = vpop.f32.mrb[17].mxu0  ;;  %v1472_v24 = vadd.f32 %v1390_v42, %v449_v15 }
 0x11b   :  { %v451_v21 = vpop.f32.mrb[17].mxu1  ;;  %v1128_v22 = vpop.eup %1127  ;;  %849 = vst.msk [vmem:[%s1683_s3 + $0x40] sm:$0xf] %vm832_vm1, %v1007_v13  ;;  %v1008_v54 = vpack.c.bf16 %v689_v14, %v689_v14  ;;  %v596_v23 = vadd.f32 1.0, %v1126_v16  ;;  %v935_v29 = vmul.f32 -1.442695, %v1465_v20 }
 0x11c   :  { %v388_v25 = vpop.f32.mrb[18].mxu0  ;;  %v452_v26 = vpop.f32.mrb[18].mxu1  ;;  %834 = vst.msk [vmem:[%s1683_s3 + $0x4] sm:$0xf] %vm832_vm1, %v992_v46  ;;  %1147 = vrcp.f32 %v580_v17  ;;  %v581_v28 = vadd.f32 1.0, %v1128_v22 }
 0x11d   :  { %v1130_v27 = vpop.eup %1129  ;;  %v1480_v32 = vadd.f32 %v1390_v42, %v388_v25  ;;  %v390_v33 = vpop.f32.mrb[19].mxu0  ;;  %850 = vst.msk [vmem:[%s1683_s3 + $0x44] sm:$0xf] %vm832_vm1, %v1008_v54  ;;  %1149 = vrcp.f32 %v596_v23  ;;  %v951_v37 = vmul.f32 -1.442695, %v1472_v24  ;;  %v1488_v38 = vadd.f32 %v1390_v42, %v452_v26 }
 0x11e   :  { %v454_v34 = vpop.f32.mrb[19].mxu1  ;;  %v1132_v35 = vpop.eup %1131  ;;  %v597_v36 = vadd.f32 1.0, %v1130_v27  ;;  %1151 = vrcp.f32 %v581_v28 }
 0x11f   :  { %v1134_v39 = vpop.eup %1133  ;;  %v674_v40 = vmul.f32 %v1132_v35, %v1409_v61  ;;  %v936_v41 = vmul.f32 -1.442695, %v1480_v32  ;;  %v952_v49 = vmul.f32 -1.442695, %v1488_v38 }
 0x120   :  { %v1136_v47 = vpop.eup %1135  ;;  %v690_v48 = vmul.f32 %v1134_v39, %v1412_v62  ;;  %1153 = vrcp.f32 %v597_v36  ;;  %v393_v61 = vpop.f32.mrb[20].mxu0 }
 0x121   :  { %v1138_v50 = vpop.eup %1137  ;;  %v993_v51 = vpack.c.bf16 %v674_v40, %v674_v40  ;;  %v675_v52 = vmul.f32 %v1136_v47, %v1417_v5  ;;  %1155 = vpow2.f32 %v935_v29  ;;  %v457_v58 = vpop.f32.mrb[20].mxu1  ;;  %v1501_v1 = vadd.f32 %v1390_v42, %v393_v61 }
 0x122   :  { %v1140_v55 = vpop.eup %1139  ;;  %v1009_v56 = vpack.c.bf16 %v690_v48, %v690_v48  ;;  %v691_v57 = vmul.f32 %v1138_v50, %v1420_v6  ;;  %1157 = vpow2.f32 %v951_v37  ;;  %v395_v5 = vpop.f32.mrb[21].mxu0  ;;  %v1508_v7 = vadd.f32 %v1390_v42, %v457_v58 }
 0x123   :  { %v1142_v59 = vpop.eup %1141  ;;  %835 = vst.msk [vmem:[%s1683_s3 + $0x8] sm:$0xf] %vm832_vm1, %v993_v51  ;;  %v994_v62 = vpack.c.bf16 %v675_v52, %v675_v52  ;;  %v582_v0 = vadd.f32 1.0, %v1140_v55  ;;  %1159 = vpow2.f32 %v936_v41  ;;  %v459_v2 = vpop.f32.mrb[21].mxu1  ;;  %v937_v12 = vmul.f32 -1.442695, %v1501_v1 }
 0x124   :  { %v1144_v3 = vpop.eup %1143  ;;  %851 = vst.msk [vmem:[%s1683_s3 + $0x48] sm:$0xf] %vm832_vm1, %v1009_v56  ;;  %v1010_v6 = vpack.c.bf16 %v691_v57, %v691_v57  ;;  %v598_v4 = vadd.f32 1.0, %v1142_v59  ;;  %1161 = vpow2.f32 %v952_v49  ;;  %v396_v8 = vpop.f32.mrb[22].mxu0  ;;  %v953_v16 = vmul.f32 -1.442695, %v1508_v7 }
 0x125   :  { %v460_v9 = vpop.f32.mrb[22].mxu1  ;;  %v1146_v10 = vpop.eup %1145  ;;  %836 = vst.msk [vmem:[%s1683_s3 + $0xc] sm:$0xf] %vm832_vm1, %v994_v62  ;;  %1163 = vrcp.f32 %v582_v0  ;;  %v583_v11 = vadd.f32 1.0, %v1144_v3  ;;  %v1516_v13 = vadd.f32 %v1390_v42, %v396_v8 }
 0x126   :  { %v398_v14 = vpop.f32.mrb[23].mxu0  ;;  %v462_v45 = vpop.f32.mrb[23].mxu1  ;;  %852 = vst.msk [vmem:[%s1683_s3 + $0x4c] sm:$0xf] %vm832_vm1, %v1010_v6  ;;  %1165 = vrcp.f32 %v598_v4  ;;  %v599_v15 = vadd.f32 1.0, %v1146_v10  ;;  %v1524_v46 = vadd.f32 %v1390_v42, %v460_v9 }
 0x127   :  { %v1148_v17 = vpop.eup %1147  ;;  %1167 = vrcp.f32 %v583_v11  ;;  %v938_v53 = vmul.f32 -1.442695, %v1516_v13 }
 0x128   :  { %v1150_v21 = vpop.eup %1149  ;;  %v676_v22 = vmul.f32 %v1148_v17, %v1425_v18  ;;  %1169 = vrcp.f32 %v599_v15  ;;  %v954_v54 = vmul.f32 -1.442695, %v1524_v46  ;;  %v401_v29 = vpop.f32.mrb[24].mxu0 }
 0x129   :  { %v1152_v23 = vpop.eup %1151  ;;  %v692_v25 = vmul.f32 %v1150_v21, %v1428_v19  ;;  %1171 = vpow2.f32 %v937_v12  ;;  %v465_v33 = vpop.f32.mrb[24].mxu1  ;;  %v1533_v18 = vadd.f32 %v1390_v42, %v401_v29 }
 0x12a   :  { %v1154_v26 = vpop.eup %1153  ;;  %v995_v27 = vpack.c.bf16 %v676_v22, %v676_v22  ;;  %v677_v28 = vmul.f32 %v1152_v23, %v1433_v30  ;;  %1173 = vpow2.f32 %v953_v16  ;;  %v403_v37 = vpop.f32.mrb[25].mxu0  ;;  %v1540_v41 = vadd.f32 %v1390_v42, %v465_v33 }
 0x12b   :  { %v1156_v34 = vpop.eup %1155  ;;  %v1011_v35 = vpack.c.bf16 %v692_v25, %v692_v25  ;;  %v693_v36 = vmul.f32 %v1154_v26, %v1436_v31  ;;  %1175 = vpow2.f32 %v938_v53  ;;  %v467_v39 = vpop.f32.mrb[25].mxu1  ;;  %v939_v61 = vmul.f32 -1.442695, %v1533_v18 }
 0x12c   :  { %v1158_v40 = vpop.eup %1157  ;;  %837 = vst.msk [vmem:[%s1683_s3 + $0x10] sm:$0xf] %vm832_vm1, %v995_v27  ;;  %v996_v19 = vpack.c.bf16 %v677_v28, %v677_v28  ;;  %v584_v30 = vadd.f32 1.0, %v1156_v34  ;;  %1177 = vpow2.f32 %v954_v54  ;;  %v404_v47 = vpop.f32.mrb[26].mxu0  ;;  %v955_v0 = vmul.f32 -1.442695, %v1540_v41 }
 0x12d   :  { %v468_v31 = vpop.f32.mrb[26].mxu1  ;;  %v1160_v48 = vpop.eup %1159  ;;  %853 = vst.msk [vmem:[%s1683_s3 + $0x50] sm:$0xf] %vm832_vm1, %v1011_v35  ;;  %v1012_v49 = vpack.c.bf16 %v693_v36, %v693_v36  ;;  %v600_v50 = vadd.f32 1.0, %v1158_v40  ;;  %v1547_v51 = vadd.f32 %v1390_v42, %v404_v47 }
 0x12e   :  { %v406_v52 = vpop.f32.mrb[27].mxu0  ;;  %v470_v55 = vpop.f32.mrb[27].mxu1  ;;  %838 = vst.msk [vmem:[%s1683_s3 + $0x14] sm:$0xf] %vm832_vm1, %v996_v19  ;;  %1179 = vrcp.f32 %v584_v30  ;;  %v585_v57 = vadd.f32 1.0, %v1160_v48  ;;  %v1555_v58 = vadd.f32 %v1390_v42, %v468_v31 }
 0x12f   :  { %v1162_v56 = vpop.eup %1161  ;;  %854 = vst.msk [vmem:[%s1683_s3 + $0x54] sm:$0xf] %vm832_vm1, %v1012_v49  ;;  %1181 = vrcp.f32 %v600_v50  ;;  %v940_v3 = vmul.f32 -1.442695, %v1547_v51 }
 0x130   :  { %v1164_v59 = vpop.eup %1163  ;;  %v601_v62 = vadd.f32 1.0, %v1162_v56  ;;  %1183 = vrcp.f32 %v585_v57  ;;  %v956_v8 = vmul.f32 -1.442695, %v1555_v58  ;;  %v409_v12 = vpop.f32.mrb[28].mxu0 }
 0x131   :  { %v1166_v5 = vpop.eup %1165  ;;  %v678_v2 = vmul.f32 %v1164_v59, %v1441_v43  ;;  %v473_v14 = vpop.f32.mrb[28].mxu1  ;;  %v1569_v16 = vadd.f32 %v1390_v42, %v409_v12 }
 0x132   :  { %v1168_v6 = vpop.eup %1167  ;;  %v694_v4 = vmul.f32 %v1166_v5, %v1444_v44  ;;  %1185 = vrcp.f32 %v601_v62  ;;  %v411_v17 = vpop.f32.mrb[29].mxu0  ;;  %v1576_v22 = vadd.f32 %v1390_v42, %v473_v14 }
 0x133   :  { %v1170_v9 = vpop.eup %1169  ;;  %v997_v10 = vpack.c.bf16 %v678_v2, %v678_v2  ;;  %v679_v11 = vmul.f32 %v1168_v6, %v1449_v60  ;;  %1187 = vpow2.f32 %v939_v61  ;;  %v475_v44 = vpop.f32.mrb[29].mxu1  ;;  %v941_v34 = vmul.f32 -1.442695, %v1569_v16 }
 0x134   :  { %v1172_v45 = vpop.eup %1171  ;;  %v1013_v15 = vpack.c.bf16 %v694_v4, %v694_v4  ;;  %v695_v43 = vmul.f32 %v1170_v9, %v1452_v63  ;;  %1189 = vpow2.f32 %v955_v0  ;;  %v412_v54 = vpop.f32.mrb[30].mxu0  ;;  %v957_v37 = vmul.f32 -1.442695, %v1576_v22 }
 0x135   :  { %v1174_v53 = vpop.eup %1173  ;;  %839 = vst.msk [vmem:[%s1683_s3 + $0x18] sm:$0xf] %vm832_vm1, %v997_v10  ;;  %v998_v60 = vpack.c.bf16 %v679_v11, %v679_v11  ;;  %v586_v21 = vadd.f32 1.0, %v1172_v45  ;;  %1191 = vpow2.f32 %v940_v3  ;;  %v476_v63 = vpop.f32.mrb[30].mxu1  ;;  %v1588_v35 = vadd.f32 %v1390_v42, %v412_v54 }
 0x136   :  { %v1176_v23 = vpop.eup %1175  ;;  %855 = vst.msk [vmem:[%s1683_s3 + $0x58] sm:$0xf] %vm832_vm1, %v1013_v15  ;;  %v1014_v25 = vpack.c.bf16 %v695_v43, %v695_v43  ;;  %v602_v26 = vadd.f32 1.0, %v1174_v53  ;;  %1193 = vpow2.f32 %v956_v8  ;;  %v414_v27 = vpop.f32.mrb[31].mxu0  ;;  %v1596_v39 = vadd.f32 %v1390_v42, %v476_v63 }
 0x137   :  { %v478_v28 = vpop.f32.mrb[31].mxu1  ;;  %v1178_v29 = vpop.eup %1177  ;;  %840 = vst.msk [vmem:[%s1683_s3 + $0x1c] sm:$0xf] %vm832_vm1, %v998_v60  ;;  %1195 = vrcp.f32 %v586_v21  ;;  %v587_v33 = vadd.f32 1.0, %v1176_v23  ;;  %v942_v19 = vmul.f32 -1.442695, %v1588_v35 }
 0x138   :  { %856 = vst.msk [vmem:[%s1683_s3 + $0x5c] sm:$0xf] %vm832_vm1, %v1014_v25  ;;  %1197 = vrcp.f32 %v602_v26  ;;  %v603_v36 = vadd.f32 1.0, %v1178_v29  ;;  %v1180_v40 = vpop.eup %1179  ;;  %v958_v31 = vmul.f32 -1.442695, %v1596_v39 }
 0x139   :  { %1199 = vrcp.f32 %v587_v33  ;;  %v1182_v30 = vpop.eup %1181  ;;  %v680_v47 = vmul.f32 %v1180_v40, %v1465_v20 }
 0x13a   :  { %1201 = vrcp.f32 %v603_v36  ;;  %v1184_v48 = vpop.eup %1183  ;;  %v696_v49 = vmul.f32 %v1182_v30, %v1472_v24 }
 0x13b   :  { %1203 = vpow2.f32 %v941_v34  ;;  %v999_v52 = vpack.c.bf16 %v680_v47, %v680_v47  ;;  %v681_v55 = vmul.f32 %v1184_v48, %v1480_v32 }
 0x13c   :  { %v1186_v50 = vpop.eup %1185  ;;  %1205 = vpow2.f32 %v957_v37  ;;  %v1015_v56 = vpack.c.bf16 %v696_v49, %v696_v49 }
 0x13d   :  { %v1188_v42 = vpop.eup %1187  ;;  %v697_v57 = vmul.f32 %v1186_v50, %v1488_v38  ;;  %1207 = vpow2.f32 %v942_v19  ;;  %841 = vst.msk [vmem:[%s1683_s3 + $0x20] sm:$0xf] %vm832_vm1, %v999_v52  ;;  %v1000_v20 = vpack.c.bf16 %v681_v55, %v681_v55 }
 0x13e   :  { %v1190_v61 = vpop.eup %1189  ;;  %v588_v59 = vadd.f32 1.0, %v1188_v42  ;;  %1209 = vpow2.f32 %v958_v31  ;;  %857 = vst.msk [vmem:[%s1683_s3 + $0x60] sm:$0xf] %vm832_vm1, %v1015_v56 }
 0x13f   :  { %v1192_v24 = vpop.eup %1191  ;;  %v1016_v32 = vpack.c.bf16 %v697_v57, %v697_v57  ;;  %v604_v62 = vadd.f32 1.0, %v1190_v61  ;;  %842 = vst.msk [vmem:[%s1683_s3 + $0x24] sm:$0xf] %vm832_vm1, %v1000_v20 }
 0x140   :  { %v1194_v0 = vpop.eup %1193  ;;  %1211 = vrcp.f32 %v588_v59  ;;  %v589_v38 = vadd.f32 1.0, %v1192_v24 }
 0x141   :  { %v1196_v5 = vpop.eup %1195  ;;  %858 = vst.msk [vmem:[%s1683_s3 + $0x64] sm:$0xf] %vm832_vm1, %v1016_v32  ;;  %1213 = vrcp.f32 %v604_v62  ;;  %v605_v2 = vadd.f32 1.0, %v1194_v0 }
 0x142   :  { %v1198_v3 = vpop.eup %1197  ;;  %v682_v6 = vmul.f32 %v1196_v5, %v1501_v1  ;;  %1215 = vrcp.f32 %v589_v38 }
 0x143   :  { %v1200_v4 = vpop.eup %1199  ;;  %v698_v8 = vmul.f32 %v1198_v3, %v1508_v7  ;;  %1217 = vrcp.f32 %v605_v2 }
 0x144   :  { %v1202_v9 = vpop.eup %1201  ;;  %v1001_v10 = vpack.c.bf16 %v682_v6, %v682_v6  ;;  %v683_v11 = vmul.f32 %v1200_v4, %v1516_v13 }
 0x145   :  { %v1204_v12 = vpop.eup %1203  ;;  %v1017_v14 = vpack.c.bf16 %v698_v8, %v698_v8  ;;  %v699_v45 = vmul.f32 %v1202_v9, %v1524_v46 }
 0x146   :  { %v1206_v15 = vpop.eup %1205  ;;  %843 = vst.msk [vmem:[%s1683_s3 + $0x28] sm:$0xf] %vm832_vm1, %v1001_v10  ;;  %v1002_v1 = vpack.c.bf16 %v683_v11, %v683_v11  ;;  %v590_v43 = vadd.f32 1.0, %v1204_v12 }
 0x147   :  { %v1208_v17 = vpop.eup %1207  ;;  %859 = vst.msk [vmem:[%s1683_s3 + $0x68] sm:$0xf] %vm832_vm1, %v1017_v14  ;;  %v1018_v7 = vpack.c.bf16 %v699_v45, %v699_v45  ;;  %v606_v13 = vadd.f32 1.0, %v1206_v15 }
 0x148   :  { %v1210_v44 = vpop.eup %1209  ;;  %844 = vst.msk [vmem:[%s1683_s3 + $0x2c] sm:$0xf] %vm832_vm1, %v1002_v1  ;;  %1219 = vrcp.f32 %v590_v43  ;;  %v591_v46 = vadd.f32 1.0, %v1208_v17 }
 0x149   :  { %860 = vst.msk [vmem:[%s1683_s3 + $0x6c] sm:$0xf] %vm832_vm1, %v1018_v7  ;;  %1221 = vrcp.f32 %v606_v13  ;;  %v607_v53 = vadd.f32 1.0, %v1210_v44 }
 0x14a   :  { %v1212_v60 = vpop.eup %1211  ;;  %1223 = vrcp.f32 %v591_v46 }
 0x14b   :  { %v1214_v21 = vpop.eup %1213  ;;  %v684_v54 = vmul.f32 %v1212_v60, %v1533_v18  ;;  %1225 = vrcp.f32 %v607_v53 }
 0x14c   :  { %v1216_v63 = vpop.eup %1215  ;;  %v700_v23 = vmul.f32 %v1214_v21, %v1540_v41 }
 0x14d   :  { %v1218_v25 = vpop.eup %1217  ;;  %v1003_v26 = vpack.c.bf16 %v684_v54, %v684_v54  ;;  %v685_v27 = vmul.f32 %v1216_v63, %v1547_v51 }
 0x14e   :  { %v1019_v28 = vpack.c.bf16 %v700_v23, %v700_v23  ;;  %v701_v29 = vmul.f32 %v1218_v25, %v1555_v58 }
 0x14f   :  { %845 = vst.msk [vmem:[%s1683_s3 + $0x30] sm:$0xf] %vm832_vm1, %v1003_v26  ;;  %v1004_v33 = vpack.c.bf16 %v685_v27, %v685_v27 }
 0x150   :  { %861 = vst.msk [vmem:[%s1683_s3 + $0x70] sm:$0xf] %vm832_vm1, %v1019_v28  ;;  %v1020_v18 = vpack.c.bf16 %v701_v29, %v701_v29 }
 0x151   :  { %846 = vst.msk [vmem:[%s1683_s3 + $0x34] sm:$0xf] %vm832_vm1, %v1004_v33 }
 0x152   :  { %v1220_v41 = vpop.eup %1219  ;;  %862 = vst.msk [vmem:[%s1683_s3 + $0x74] sm:$0xf] %vm832_vm1, %v1020_v18 }
 0x153   :  { %v1222_v51 = vpop.eup %1221  ;;  %v686_v58 = vmul.f32 %v1220_v41, %v1569_v16 }
 0x154   :  { %v1224_v34 = vpop.eup %1223  ;;  %v702_v36 = vmul.f32 %v1222_v51, %v1576_v22 }
 0x155   :  { %v1226_v37 = vpop.eup %1225  ;;  %v1005_v40 = vpack.c.bf16 %v686_v58, %v686_v58  ;;  %v687_v19 = vmul.f32 %v1224_v34, %v1588_v35 }
 0x156   :  { %v1021_v30 = vpack.c.bf16 %v702_v36, %v702_v36  ;;  %v703_v47 = vmul.f32 %v1226_v37, %v1596_v39 }
 0x157   :  { %847 = vst.msk [vmem:[%s1683_s3 + $0x38] sm:$0xf] %vm832_vm1, %v1005_v40  ;;  %v1006_v31 = vpack.c.bf16 %v687_v19, %v687_v19 }
 0x158   :  { %863 = vst.msk [vmem:[%s1683_s3 + $0x78] sm:$0xf] %vm832_vm1, %v1021_v30  ;;  %v1022_v16 = vpack.c.bf16 %v703_v47, %v703_v47 }
 0x159   :  { %848 = vst.msk [vmem:[%s1683_s3 + $0x3c] sm:$0xf] %vm832_vm1, %v1006_v31 }
 0x15a   :  { %864 = vst.msk [vmem:[%s1683_s3 + $0x7c] sm:$0xf] %vm832_vm1, %v1022_v16 }

// kernel: seg_no_ffm_forward.27
= control target key start
LH: loop header
LB: loop body
LE: loop exit
PB: predicated region body
PF: predicated region fallthrough
CT: control target
= control target key end

     0   :  { %vm242_vm0 = vcmask 261120   ;;  %vm473_vm1 = vcmask 650240   ;;  %s854_s1 = inlined_call_operand.vmem [shape: bf16[288,80], index: 1, kind: input, shape index: {}]   ;;  %s855_s0 = inlined_call_operand.vmem [shape: bf16[64,288], index: 0, kind: input, shape index: {}]   ;;  %s856_s2 = inlined_call_operand.vmem [shape: f32[1,80], index: 2, kind: input, shape index: {}]   ;;  %s857_s3 = inlined_call_operand.vmem [shape: bf16[64,80], index: 3, kind: output, shape index: {}]  }
   0x1   :  { %v619_v0 = vld [vmem:[%s854_s1 + $0x40] sm:$0xff]   ;;  %v621_v2 = vld [vmem:[%s854_s1 + $0x48] sm:$0xff]   ;;  %v623_v4 = vld [vmem:[%s854_s1 + $0x50] sm:$0xff]  }
   0x2   :  { %v620_v1 = vld [vmem:[%s854_s1] sm:$0xff]   ;;  %545 = vmatprep.subr.bf16.mxu0 %v619_v0  ;;  %603 = vmatprep.subr.bf16.mxu1 %v619_v0  ;;  %v622_v3 = vld [vmem:[%s854_s1 + $0x8] sm:$0xff]   ;;  %v624_v5 = vld [vmem:[%s854_s1 + $0x10] sm:$0xff]  }
   0x3   :  { %546 = vmatpush3.bf16.msra.mxu0 %v620_v1  ;;  %611 = vmatpush3.bf16.msra.mxu1 %v620_v1  ;;  %v625_v6 = vld [vmem:[%s854_s1 + $0x58] sm:$0xff]   ;;  %v627_v8 = vld [vmem:[%s854_s1 + $0x60] sm:$0xff]   ;;  %v629_v10 = vld [vmem:[%s854_s1 + $0x68] sm:$0xff]  }
   0x4   :  { %547 = vmatprep.subr.bf16.mxu0 %v621_v2  ;;  %604 = vmatprep.subr.bf16.mxu1 %v621_v2  ;;  %v626_v7 = vld [vmem:[%s854_s1 + $0x18] sm:$0xff]   ;;  %v628_v9 = vld [vmem:[%s854_s1 + $0x20] sm:$0xff]   ;;  %v630_v13 = vld [vmem:[%s854_s1 + $0x28] sm:$0xff]  }
   0x5   :  { %v637_v11 = vld [vmem:[%s855_s0 + $0x4] ss:$12 sps:$4 sm:$0xff]   ;;  %v640_v12 = vld [vmem:[%s855_s0 + $0x4c] ss:$12 sps:$4 sm:$0xff]   ;;  %v638_v20 = vld [vmem:[%s855_s0 + $0x48] ss:$12 sps:$4 sm:$0xff]  }
   0x6   :  { %v631_v14 = vld [vmem:[%s854_s1 + $0x70] sm:$0xff]   ;;  %287 = vmatprep.mubr.bf16.mxu0 %v637_v11  ;;  %311 = vmatprep.mubr.bf16.mxu1 %v640_v12  ;;  %v633_v16 = vld [vmem:[%s854_s1 + $0x78] sm:$0xff]   ;;  %v641_v18 = vld [vmem:[%s854_s1 + $0x80] sm:$0xff]  }
   0x7   :  { %548 = vmatpush3.bf16.msra.mxu0 %v622_v3  ;;  %612 = vmatpush3.bf16.msra.mxu1 %v622_v3  ;;  %v632_v15 = vld [vmem:[%s854_s1 + $0x30] sm:$0xff]   ;;  %v634_v17 = vld [vmem:[%s854_s1 + $0x38] sm:$0xff]   ;;  %v635_v19 = vld [vmem:[%s855_s0] ss:$12 sps:$4 sm:$0xff]  }
   0x8   :  { %549 = vmatprep.subr.bf16.mxu0 %v623_v4  ;;  %605 = vmatprep.subr.bf16.mxu1 %v623_v4  ;;  %v643_v21 = vld [vmem:[%s855_s0 + $0x1c] ss:$12 sps:$4 sm:$0xff]   ;;  %v646_v24 = vld [vmem:[%s855_s0 + $0x18] ss:$12 sps:$4 sm:$0xff]   ;;  %v647_v25 = vld [vmem:[%s855_s0 + $0x20] ss:$12 sps:$4 sm:$0xff]  }
   0x9   :  { %v642_v22 = vld [vmem:[%s854_s1 + $0x88] sm:$0xff]   ;;  %v648_v26 = vld [vmem:[%s855_s0 + $0x34] ss:$12 sps:$4 sm:$0xff]   ;;  %v650_v27 = vld [vmem:[%s855_s0 + $0x38] ss:$12 sps:$4 sm:$0xff]  }
   0xa   :  { %v645_v23 = vld [vmem:[%s855_s0 + $0x8] ss:$12 sps:$4 sm:$0xff]   ;;  %v651_v28 = vld [vmem:[%s855_s0 + $0x30] ss:$12 sps:$4 sm:$0xff]   ;;  %v486_v42 = vld [vmem:[%s856_s2] ss:$0 sm:$0xff] }
   0xb   :  { %550 = vmatpush3.bf16.msra.mxu0 %v624_v5  ;;  %613 = vmatpush3.bf16.msra.mxu1 %v624_v5  ;;  %v652_v29 = vld [vmem:[%s855_s0 + $0x50] ss:$12 sps:$4 sm:$0xff]  }
   0xc   :  { %551 = vmatprep.subr.bf16.mxu0 %v625_v6  ;;  %606 = vmatprep.subr.bf16.mxu1 %v625_v6 }
   0xf   :  { %552 = vmatpush3.bf16.msra.mxu0 %v626_v7  ;;  %614 = vmatpush3.bf16.msra.mxu1 %v626_v7 }
  0x10   :  { %553 = vmatprep.subr.bf16.mxu0 %v627_v8  ;;  %607 = vmatprep.subr.bf16.mxu1 %v627_v8 }
  0x13   :  { %554 = vmatpush3.bf16.msra.mxu0 %v628_v9  ;;  %615 = vmatpush3.bf16.msra.mxu1 %v628_v9 }
  0x14   :  { %555 = vmatprep.subr.bf16.mxu0 %v629_v10  ;;  %608 = vmatprep.subr.bf16.mxu1 %v629_v10 }
  0x17   :  { %556 = vmatpush3.bf16.msra.mxu0 %v630_v13  ;;  %616 = vmatpush3.bf16.msra.mxu1 %v630_v13 }
  0x18   :  { %557 = vmatprep.subr.bf16.mxu0 %v631_v14  ;;  %609 = vmatprep.subr.bf16.mxu1 %v631_v14 }
  0x1b   :  { %558 = vmatpush3.bf16.msra.mxu0 %v632_v15  ;;  %617 = vmatpush3.bf16.msra.mxu1 %v632_v15 }
  0x1c   :  { %559 = vmatprep.subr.bf16.mxu0 %v633_v16  ;;  %610 = vmatprep.subr.bf16.mxu1 %v633_v16 }
  0x1f   :  { %560 = vmatpush3.bf16.msra.mxu0 %v634_v17  ;;  %618 = vmatpush3.bf16.msra.mxu1 %v634_v17 }
  0x20   :  { %591 = vmatprep.subr.bf16.mxu1 %v641_v18 }
  0x22   :  { %288 = vmatmul.mubr.bf16.vlgmr.msra.gmra.mrb[0].mxu0 %v635_v19  ;;  %312 = vmatmul.mubr.bf16.vlgmr.msra.gmra.mrb[0].mxu1 %v638_v20 }
  0x23   :  { %592 = vmatpush3.bf16.msra.mxu1 %v641_v18  ;;  %295 = vmatprep.mubr.bf16.mxu0 %v643_v21 }
  0x24   :  { %593 = vmatprep.subr.bf16.mxu1 %v642_v22  ;;  %595 = vmatprep.mubr.msk.bf16.mxu1 %vm242_vm0, %v645_v23 }
  0x27   :  { %594 = vmatpush3.bf16.msra.mxu1 %v642_v22 }
  0x2a   :  { %296 = vmatmul.mubr.bf16.gmra.mrb[4].mxu0 %v646_v24  ;;  %596 = vmatmul.mubr.msk.bf16.vlgmr.msra.gmra.mrb[4].mxu1 %vm242_vm0, %v647_v25 }
  0x2b   :  { %303 = vmatprep.mubr.bf16.mxu0 %v648_v26  ;;  %599 = vmatprep.mubr.msk.bf16.mxu1 %vm242_vm0, %v650_v27 }
  0x32   :  { %304 = vmatmul.mubr.bf16.gmra.mrb[8].mxu0 %v651_v28  ;;  %600 = vmatmul.mubr.msk.bf16.gmra.mrb[8].mxu1 %vm242_vm0, %v652_v29 }
  0xf5   :  { %v561_v30 = vpop.f32.mrb[0].mxu0  ;;  %v579_v31 = vpop.f32.mrb[0].mxu1 }
  0xf6   :  { %v562_v32 = vpop.f32.mrb[1].mxu0  ;;  %v580_v33 = vpop.f32.mrb[1].mxu1 }
  0xf7   :  { %v563_v34 = vadd.f32 %v562_v32, %v561_v30  ;;  %v564_v35 = vpop.f32.mrb[2].mxu0  ;;  %v581_v36 = vadd.f32 %v580_v33, %v579_v31  ;;  %v582_v37 = vpop.f32.mrb[2].mxu1 }
  0xf8   :  { %v565_v38 = vpop.f32.mrb[3].mxu0  ;;  %v583_v39 = vpop.f32.mrb[3].mxu1 }
  0xf9   :  { %v566_v40 = vadd.f32 %v565_v38, %v564_v35  ;;  %v584_v41 = vadd.f32 %v583_v39, %v582_v37  ;;  %v290_v45 = vadd.f32 %v563_v34, %v486_v42  ;;  %v314_v62 = vadd.f32 %v581_v36, %v486_v42 }
  0xfb   :  { %v293_v52 = vadd.f32 %v566_v40, %v486_v42  ;;  %v317_v6 = vadd.f32 %v584_v41, %v486_v42 }
  0xfd   :  { %v567_v43 = vpop.f32.mrb[4].mxu0  ;;  %v597_v44 = vpop.f32.mrb[4].mxu1 }
  0xfe   :  { %v568_v46 = vpop.f32.mrb[5].mxu0  ;;  %v354_v47 = vpop.f32.mrb[5].mxu1 }
  0xff   :  { %v569_v48 = vadd.f32 %v568_v46, %v567_v43  ;;  %v802_v49 = vadd.f32 %v354_v47, %v290_v45  ;;  %v570_v50 = vpop.f32.mrb[6].mxu0  ;;  %v598_v51 = vpop.f32.mrb[6].mxu1 }
 0x100   :  { %v571_v53 = vpop.f32.mrb[7].mxu0  ;;  %v357_v54 = vpop.f32.mrb[7].mxu1 }
 0x101   :  { %v298_v55 = vadd.f32 %v569_v48, %v486_v42  ;;  %v521_v56 = vmul.f32 -1.442695, %v802_v49  ;;  %v572_v57 = vadd.f32 %v571_v53, %v570_v50  ;;  %v805_v58 = vadd.f32 %v357_v54, %v293_v52 }
 0x103   :  { %v807_v59 = vadd.f32 %v597_v44, %v298_v55  ;;  %653 = vpow2.f32 %v521_v56  ;;  %v301_v60 = vadd.f32 %v572_v57, %v486_v42  ;;  %v522_v61 = vmul.f32 -1.442695, %v805_v58 }
 0x105   :  { %v523_v63 = vmul.f32 -1.442695, %v807_v59  ;;  %v811_v0 = vadd.f32 %v598_v51, %v301_v60  ;;  %655 = vpow2.f32 %v522_v61  ;;  %v573_v1 = vpop.f32.mrb[8].mxu0  ;;  %v601_v2 = vpop.f32.mrb[8].mxu1 }
 0x106   :  { %v813_v3 = vadd.f32 %v601_v2, %v314_v62  ;;  %v574_v4 = vpop.f32.mrb[9].mxu0  ;;  %v370_v5 = vpop.f32.mrb[9].mxu1 }
 0x107   :  { %657 = vpow2.f32 %v523_v63  ;;  %v524_v7 = vmul.f32 -1.442695, %v811_v0  ;;  %v575_v8 = vadd.f32 %v574_v4, %v573_v1  ;;  %v576_v9 = vpop.f32.mrb[10].mxu0  ;;  %v602_v10 = vpop.f32.mrb[10].mxu1 }
 0x108   :  { %v527_v11 = vmul.f32 -1.442695, %v813_v3  ;;  %v382_v12 = vadd.f32 %v602_v10, %v317_v6  ;;  %v577_v13 = vpop.f32.mrb[11].mxu0  ;;  %v373_v14 = vpop.f32.mrb[11].mxu1 }
 0x109   :  { %659 = vpow2.f32 %v524_v7  ;;  %v306_v15 = vadd.f32 %v575_v8, %v486_v42  ;;  %v578_v16 = vadd.f32 %v577_v13, %v576_v9 }
 0x10a   :  { %661 = vpow2.f32 %v527_v11  ;;  %v528_v17 = vmul.f32 -1.442695, %v382_v12 }
 0x10b   :  { %v371_v18 = vadd.f32 %v370_v5, %v306_v15  ;;  %v309_v19 = vadd.f32 %v578_v16, %v486_v42 }
 0x10c   :  { %663 = vpow2.f32 %v528_v17 }
 0x10d   :  { %v654_v20 = vpop.eup %653  ;;  %v525_v21 = vmul.f32 -1.442695, %v371_v18  ;;  %v374_v22 = vadd.f32 %v373_v14, %v309_v19 }
 0x10e   :  { %v409_v23 = vadd.f32 1.0, %v654_v20 }
 0x10f   :  { %v656_v24 = vpop.eup %655  ;;  %665 = vpow2.f32 %v525_v21  ;;  %v526_v25 = vmul.f32 -1.442695, %v374_v22 }
 0x110   :  { %667 = vrcp.f32 %v409_v23  ;;  %v410_v26 = vadd.f32 1.0, %v656_v24 }
 0x111   :  { %v658_v27 = vpop.eup %657  ;;  %669 = vpow2.f32 %v526_v25 }
 0x112   :  { %v411_v28 = vadd.f32 1.0, %v658_v27  ;;  %671 = vrcp.f32 %v410_v26 }
 0x113   :  { %v660_v29 = vpop.eup %659 }
 0x114   :  { %v662_v30 = vpop.eup %661  ;;  %673 = vrcp.f32 %v411_v28  ;;  %v412_v31 = vadd.f32 1.0, %v660_v29 }
 0x115   :  { %v415_v32 = vadd.f32 1.0, %v662_v30 }
 0x116   :  { %v664_v33 = vpop.eup %663  ;;  %675 = vrcp.f32 %v412_v31 }
 0x117   :  { %677 = vrcp.f32 %v415_v32  ;;  %v416_v34 = vadd.f32 1.0, %v664_v33 }
 0x119   :  { %v666_v35 = vpop.eup %665  ;;  %679 = vrcp.f32 %v416_v34 }
 0x11a   :  { %v668_v36 = vpop.eup %667  ;;  %v413_v37 = vadd.f32 1.0, %v666_v35 }
 0x11b   :  { %v670_v38 = vpop.eup %669  ;;  %v433_v39 = vmul.f32 %v668_v36, %v802_v49 }
 0x11c   :  { %v672_v40 = vpop.eup %671  ;;  %681 = vrcp.f32 %v413_v37  ;;  %v414_v41 = vadd.f32 1.0, %v670_v38 }
 0x11d   :  { %v537_v42 = vpack.c.bf16 %v433_v39, %v433_v39  ;;  %v434_v43 = vmul.f32 %v672_v40, %v805_v58 }
 0x11e   :  { %v674_v44 = vpop.eup %673  ;;  %683 = vrcp.f32 %v414_v41 }
 0x11f   :  { %v435_v45 = vmul.f32 %v674_v44, %v807_v59  ;;  %474 = vst.msk [vmem:[%s857_s3] sm:$0xf] %vm473_vm1, %v537_v42  ;;  %v538_v46 = vpack.c.bf16 %v434_v43, %v434_v43 }
 0x120   :  { %v676_v47 = vpop.eup %675 }
 0x121   :  { %v678_v48 = vpop.eup %677  ;;  %v539_v49 = vpack.c.bf16 %v435_v45, %v435_v45  ;;  %v436_v50 = vmul.f32 %v676_v47, %v811_v0  ;;  %475 = vst.msk [vmem:[%s857_s3 + $0x4] sm:$0xf] %vm473_vm1, %v538_v46 }
 0x122   :  { %v439_v51 = vmul.f32 %v678_v48, %v813_v3 }
 0x123   :  { %v680_v52 = vpop.eup %679  ;;  %476 = vst.msk [vmem:[%s857_s3 + $0x8] sm:$0xf] %vm473_vm1, %v539_v49  ;;  %v540_v53 = vpack.c.bf16 %v436_v50, %v436_v50 }
 0x124   :  { %v543_v54 = vpack.c.bf16 %v439_v51, %v439_v51  ;;  %v440_v55 = vmul.f32 %v680_v52, %v382_v12 }
 0x125   :  { %477 = vst.msk [vmem:[%s857_s3 + $0xc] sm:$0xf] %vm473_vm1, %v540_v53 }
 0x126   :  { %v682_v56 = vpop.eup %681  ;;  %480 = vst.msk [vmem:[%s857_s3 + $0x18] sm:$0xf] %vm473_vm1, %v543_v54  ;;  %v544_v57 = vpack.c.bf16 %v440_v55, %v440_v55 }
 0x127   :  { %v437_v58 = vmul.f32 %v682_v56, %v371_v18 }
 0x128   :  { %v684_v59 = vpop.eup %683  ;;  %481 = vst.msk [vmem:[%s857_s3 + $0x1c] sm:$0xf] %vm473_vm1, %v544_v57 }
 0x129   :  { %v541_v60 = vpack.c.bf16 %v437_v58, %v437_v58  ;;  %v438_v61 = vmul.f32 %v684_v59, %v374_v22 }
 0x12b   :  { %478 = vst.msk [vmem:[%s857_s3 + $0x10] sm:$0xf] %vm473_vm1, %v541_v60  ;;  %v542_v62 = vpack.c.bf16 %v438_v61, %v438_v61 }
 0x12d   :  { %479 = vst.msk [vmem:[%s857_s3 + $0x14] sm:$0xf] %vm473_vm1, %v542_v62 }

// kernel: seg_no_ffm_forward.28
= control target key start
LH: loop header
LB: loop body
LE: loop exit
PB: predicated region body
PF: predicated region fallthrough
CT: control target
= control target key end

     0   :  { %vm602_vm0 = vcmask 654336   ;;  %vm775_vm1 = vcmask 1043456   ;;  %vm776_vm2 = vcmask 261124   ;;  %s1378_s1 = inlined_call_operand.vmem [shape: bf16[720,160], index: 1, kind: input, shape index: {}]   ;;  %s1379_s0 = inlined_call_operand.vmem [shape: bf16[16,720], index: 0, kind: input, shape index: {}]   ;;  %s1380_s2 = inlined_call_operand.vmem [shape: f32[1,160], index: 2, kind: input, shape index: {}]   ;;  %s1381_s3 = inlined_call_operand.vmem [shape: bf16[16,160], index: 3, kind: output, shape index: {}]  }
   0x1   :  { %v901_v0 = vld [vmem:[%s1378_s1 + $0x104] ss:$8 sps:$4 sm:$0xff]   ;;  %v903_v1 = vld [vmem:[%s1378_s1 + $0x100] ss:$8 sps:$4 sm:$0xff]   ;;  %v904_v2 = vld [vmem:[%s1378_s1 + $0x114] ss:$8 sps:$4 sm:$0xff]  }
   0x2   :  { %649 = vmatprep.subr.bf16.mxu0 %v901_v0  ;;  %v906_v3 = vld [vmem:[%s1378_s1 + $0x110] ss:$8 sps:$4 sm:$0xff]   ;;  %v907_v4 = vld [vmem:[%s1378_s1 + $0x124] ss:$8 sps:$4 sm:$0xff]   ;;  %v909_v5 = vld [vmem:[%s1378_s1 + $0x120] ss:$8 sps:$4 sm:$0xff]  }
   0x3   :  { %650 = vmatpush1.bf16.msra.mxu0 %v903_v1  ;;  %v910_v6 = vld [vmem:[%s1378_s1 + $0x134] ss:$8 sps:$4 sm:$0xff]   ;;  %v912_v7 = vld [vmem:[%s1378_s1 + $0x130] ss:$8 sps:$4 sm:$0xff]   ;;  %v913_v8 = vld [vmem:[%s1378_s1 + $0x144] ss:$8 sps:$4 sm:$0xff]  }
   0x4   :  { %651 = vmatprep.subr.bf16.mxu0 %v904_v2  ;;  %v915_v9 = vld [vmem:[%s1378_s1 + $0x140] ss:$8 sps:$4 sm:$0xff]   ;;  %v916_v10 = vld [vmem:[%s1378_s1 + $0x154] ss:$8 sps:$4 sm:$0xff]   ;;  %v937_v11 = vld [vmem:[%s1378_s1 + $0x4] ss:$8 sps:$4 sm:$0xff]  }
   0x5   :  { %v939_v12 = vld [vmem:[%s1378_s1] ss:$8 sps:$4 sm:$0xff]   ;;  %v918_v13 = vld [vmem:[%s1378_s1 + $0x150] ss:$8 sps:$4 sm:$0xff]   ;;  %606 = vmatprep.subr.bf16.mxu1 %v937_v11  ;;  %v943_v14 = vld [vmem:[%s1378_s1 + $0x14] ss:$8 sps:$4 sm:$0xff]  }
   0x6   :  { %607 = vmatpush1.bf16.msra.mxu1 %v939_v12  ;;  %v945_v15 = vld [vmem:[%s1378_s1 + $0x10] ss:$8 sps:$4 sm:$0xff]   ;;  %v919_v16 = vld [vmem:[%s1378_s1 + $0x164] ss:$8 sps:$4 sm:$0xff]   ;;  %v921_v17 = vld [vmem:[%s1378_s1 + $0x160] ss:$8 sps:$4 sm:$0xff]  }
   0x7   :  { %652 = vmatpush1.bf16.msra.mxu0 %v906_v3  ;;  %608 = vmatprep.subr.bf16.mxu1 %v943_v14  ;;  %v949_v18 = vld [vmem:[%s1378_s1 + $0x24] ss:$8 sps:$4 sm:$0xff]   ;;  %v922_v19 = vld [vmem:[%s1378_s1 + $0x174] ss:$8 sps:$4 sm:$0xff]   ;;  %v951_v20 = vld [vmem:[%s1378_s1 + $0x20] ss:$8 sps:$4 sm:$0xff]  }
   0x8   :  { %653 = vmatprep.subr.bf16.mxu0 %v907_v4  ;;  %v955_v21 = vld [vmem:[%s1378_s1 + $0x34] ss:$8 sps:$4 sm:$0xff]   ;;  %v924_v22 = vld [vmem:[%s1378_s1 + $0x170] ss:$8 sps:$4 sm:$0xff]   ;;  %v925_v23 = vld [vmem:[%s1378_s1 + $0x184] ss:$8 sps:$4 sm:$0xff]  }
   0x9   :  { %v957_v24 = vld [vmem:[%s1378_s1 + $0x30] ss:$8 sps:$4 sm:$0xff]   ;;  %v961_v25 = vld [vmem:[%s1378_s1 + $0x44] ss:$8 sps:$4 sm:$0xff]   ;;  %v927_v27 = vld [vmem:[%s1378_s1 + $0x180] ss:$8 sps:$4 sm:$0xff]  }
   0xa   :  { %609 = vmatpush1.bf16.msra.mxu1 %v945_v15  ;;  %v966_v26 = vld [vmem:[%s1379_s0 + $0xc] ss:$24 sps:$4 sm:$0xff]   ;;  %v928_v28 = vld [vmem:[%s1378_s1 + $0x194] ss:$8 sps:$4 sm:$0xff]   ;;  %v963_v29 = vld [vmem:[%s1378_s1 + $0x40] ss:$8 sps:$4 sm:$0xff]  }
   0xb   :  { %654 = vmatpush1.bf16.msra.mxu0 %v909_v5  ;;  %610 = vmatprep.subr.bf16.mxu1 %v949_v18  ;;  %v970_v30 = vld [vmem:[%s1378_s1 + $0x54] ss:$8 sps:$4 sm:$0xff]   ;;  %v930_v31 = vld [vmem:[%s1378_s1 + $0x190] ss:$8 sps:$4 sm:$0xff]   ;;  %v931_v32 = vld [vmem:[%s1378_s1 + $0x1a4] ss:$8 sps:$4 sm:$0xff]  }
   0xc   :  { %655 = vmatprep.subr.bf16.mxu0 %v910_v6  ;;  %681 = vmatprep.mubr.bf16.mxu0 %v966_v26  ;;  %v972_v33 = vld [vmem:[%s1378_s1 + $0x50] ss:$8 sps:$4 sm:$0xff]   ;;  %v976_v34 = vld [vmem:[%s1378_s1 + $0x64] ss:$8 sps:$4 sm:$0xff]   ;;  %v933_v35 = vld [vmem:[%s1378_s1 + $0x1a0] ss:$8 sps:$4 sm:$0xff]  }
   0xd   :  { %v934_v36 = vld [vmem:[%s1378_s1 + $0x1b4] ss:$8 sps:$4 sm:$0xff]   ;;  %v978_v37 = vld [vmem:[%s1378_s1 + $0x60] ss:$8 sps:$4 sm:$0xff]   ;;  %v936_v39 = vld [vmem:[%s1378_s1 + $0x1b0] ss:$8 sps:$4 sm:$0xff]  }
   0xe   :  { %611 = vmatpush1.bf16.msra.mxu1 %v951_v20  ;;  %v982_v38 = vld [vmem:[%s1378_s1 + $0x74] ss:$8 sps:$4 sm:$0xff]   ;;  %v940_v40 = vld [vmem:[%s1378_s1 + $0x1c4] ss:$8 sps:$4 sm:$0xff]   ;;  %v984_v41 = vld [vmem:[%s1378_s1 + $0x70] ss:$8 sps:$4 sm:$0xff]  }
   0xf   :  { %656 = vmatpush1.bf16.msra.mxu0 %v912_v7  ;;  %612 = vmatprep.subr.bf16.mxu1 %v955_v21  ;;  %v988_v42 = vld [vmem:[%s1378_s1 + $0x84] ss:$8 sps:$4 sm:$0xff]   ;;  %v942_v43 = vld [vmem:[%s1378_s1 + $0x1c0] ss:$8 sps:$4 sm:$0xff]   ;;  %v946_v44 = vld [vmem:[%s1378_s1 + $0x1d4] ss:$8 sps:$4 sm:$0xff]  }
  0x10   :  { %657 = vmatprep.subr.bf16.mxu0 %v913_v8  ;;  %v990_v45 = vld [vmem:[%s1378_s1 + $0x80] ss:$8 sps:$4 sm:$0xff]   ;;  %v994_v46 = vld [vmem:[%s1378_s1 + $0x94] ss:$8 sps:$4 sm:$0xff]   ;;  %v948_v47 = vld [vmem:[%s1378_s1 + $0x1d0] ss:$8 sps:$4 sm:$0xff]  }
  0x11   :  { %v952_v48 = vld [vmem:[%s1378_s1 + $0x1e4] ss:$8 sps:$4 sm:$0xff]   ;;  %v996_v49 = vld [vmem:[%s1378_s1 + $0x90] ss:$8 sps:$4 sm:$0xff]   ;;  %v954_v51 = vld [vmem:[%s1378_s1 + $0x1e0] ss:$8 sps:$4 sm:$0xff]  }
  0x12   :  { %613 = vmatpush1.bf16.msra.mxu1 %v957_v24  ;;  %v1000_v50 = vld [vmem:[%s1378_s1 + $0xa4] ss:$8 sps:$4 sm:$0xff]   ;;  %v958_v52 = vld [vmem:[%s1378_s1 + $0x1f4] ss:$8 sps:$4 sm:$0xff]   ;;  %v1002_v53 = vld [vmem:[%s1378_s1 + $0xa0] ss:$8 sps:$4 sm:$0xff]  }
  0x13   :  { %658 = vmatpush1.bf16.msra.mxu0 %v915_v9  ;;  %614 = vmatprep.subr.bf16.mxu1 %v961_v25  ;;  %v1006_v54 = vld [vmem:[%s1378_s1 + $0xb4] ss:$8 sps:$4 sm:$0xff]   ;;  %v960_v55 = vld [vmem:[%s1378_s1 + $0x1f0] ss:$8 sps:$4 sm:$0xff]   ;;  %v969_v56 = vld [vmem:[%s1378_s1 + $0x204] ss:$8 sps:$4 sm:$0xff]  }
  0x14   :  { %659 = vmatprep.subr.bf16.mxu0 %v916_v10  ;;  %v1008_v57 = vld [vmem:[%s1378_s1 + $0xb0] ss:$8 sps:$4 sm:$0xff]   ;;  %v1012_v58 = vld [vmem:[%s1378_s1 + $0xc4] ss:$8 sps:$4 sm:$0xff]   ;;  %v964_v60 = vld [vmem:[%s1379_s0 + $0x8] ss:$24 sps:$4 sm:$0xff]  }
  0x15   :  { %v1038_v59 = vld [vmem:[%s1379_s0 + $0x4] ss:$24 sps:$4 sm:$0xff]   ;;  %v967_v61 = vld [vmem:[%s1378_s1 + $0x200] ss:$8 sps:$4 sm:$0xff]   ;;  %v1042_v1 = vld [vmem:[%s1379_s0 + $0x14] ss:$24 sps:$4 sm:$0xff]  }
  0x16   :  { %615 = vmatpush1.bf16.msra.mxu1 %v963_v29  ;;  %v1014_v62 = vld [vmem:[%s1378_s1 + $0xc0] ss:$8 sps:$4 sm:$0xff]   ;;  %v975_v63 = vld [vmem:[%s1378_s1 + $0x214] ss:$8 sps:$4 sm:$0xff]   ;;  %638 = vmatprep.mubr.bf16.mxu1 %v1038_v59  ;;  %v973_v2 = vld [vmem:[%s1378_s1 + $0x210] ss:$8 sps:$4 sm:$0xff]  }
  0x17   :  { %660 = vmatpush1.bf16.msra.mxu0 %v918_v13  ;;  %616 = vmatprep.subr.bf16.mxu1 %v970_v30  ;;  %v1018_v0 = vld [vmem:[%s1378_s1 + $0xd4] ss:$8 sps:$4 sm:$0xff]   ;;  %v1020_v3 = vld [vmem:[%s1378_s1 + $0xd0] ss:$8 sps:$4 sm:$0xff]   ;;  %v981_v4 = vld [vmem:[%s1378_s1 + $0x224] ss:$8 sps:$4 sm:$0xff]  }
  0x18   :  { %661 = vmatprep.subr.bf16.mxu0 %v919_v16  ;;  %v1024_v5 = vld [vmem:[%s1378_s1 + $0xe4] ss:$8 sps:$4 sm:$0xff]   ;;  %v979_v6 = vld [vmem:[%s1378_s1 + $0x220] ss:$8 sps:$4 sm:$0xff]   ;;  %v987_v8 = vld [vmem:[%s1378_s1 + $0x234] ss:$8 sps:$4 sm:$0xff]  }
  0x19   :  { %v1026_v7 = vld [vmem:[%s1378_s1 + $0xe0] ss:$8 sps:$4 sm:$0xff]   ;;  %v1030_v9 = vld [vmem:[%s1378_s1 + $0xf4] ss:$8 sps:$4 sm:$0xff]   ;;  %v985_v10 = vld [vmem:[%s1378_s1 + $0x230] ss:$8 sps:$4 sm:$0xff]  }
  0x1a   :  { %617 = vmatpush1.bf16.msra.mxu1 %v972_v33  ;;  %v1032_v11 = vld [vmem:[%s1378_s1 + $0xf0] ss:$8 sps:$4 sm:$0xff]   ;;  %v993_v12 = vld [vmem:[%s1378_s1 + $0x244] ss:$8 sps:$4 sm:$0xff]   ;;  %v991_v14 = vld [vmem:[%s1378_s1 + $0x240] ss:$8 sps:$4 sm:$0xff]  }
  0x1b   :  { %662 = vmatpush1.bf16.msra.mxu0 %v921_v17  ;;  %618 = vmatprep.subr.bf16.mxu1 %v976_v34  ;;  %v1036_v13 = vld [vmem:[%s1379_s0] ss:$24 sps:$4 sm:$0xff]   ;;  %v999_v15 = vld [vmem:[%s1378_s1 + $0x254] ss:$8 sps:$4 sm:$0xff]   ;;  %v1005_v17 = vld [vmem:[%s1378_s1 + $0x264] ss:$8 sps:$4 sm:$0xff]  }
  0x1c   :  { %663 = vmatprep.subr.bf16.mxu0 %v922_v19  ;;  %v997_v16 = vld [vmem:[%s1378_s1 + $0x250] ss:$8 sps:$4 sm:$0xff]   ;;  %v1003_v18 = vld [vmem:[%s1378_s1 + $0x260] ss:$8 sps:$4 sm:$0xff]   ;;  %v1011_v19 = vld [vmem:[%s1378_s1 + $0x274] ss:$8 sps:$4 sm:$0xff]  }
  0x1d   :  { %v1009_v20 = vld [vmem:[%s1378_s1 + $0x270] ss:$8 sps:$4 sm:$0xff]   ;;  %v1017_v21 = vld [vmem:[%s1378_s1 + $0x284] ss:$8 sps:$4 sm:$0xff]   ;;  %v1027_v26 = vld [vmem:[%s1378_s1 + $0x2a0] ss:$8 sps:$4 sm:$0xff]  }
  0x1e   :  { %619 = vmatpush1.bf16.msra.mxu1 %v978_v37  ;;  %v1021_v24 = vld [vmem:[%s1378_s1 + $0x290] ss:$8 sps:$4 sm:$0xff]   ;;  %v1029_v25 = vld [vmem:[%s1378_s1 + $0x2a4] ss:$8 sps:$4 sm:$0xff]   ;;  %v1039_v30 = vld [vmem:[%s1378_s1 + $0x2c0] ss:$8 sps:$4 sm:$0xff]  }
  0x1f   :  { %664 = vmatpush1.bf16.msra.mxu0 %v924_v22  ;;  %620 = vmatprep.subr.bf16.mxu1 %v982_v38  ;;  %v1015_v22 = vld [vmem:[%s1378_s1 + $0x280] ss:$8 sps:$4 sm:$0xff]   ;;  %v1041_v29 = vld [vmem:[%s1378_s1 + $0x2c4] ss:$8 sps:$4 sm:$0xff]   ;;  %vm777_vm3 = vmor %vm776_vm2, %vm775_vm1 }
  0x20   :  { %665 = vmatprep.subr.bf16.mxu0 %v925_v23  ;;  %v1023_v23 = vld [vmem:[%s1378_s1 + $0x294] ss:$8 sps:$4 sm:$0xff]  }
  0x22   :  { %621 = vmatpush1.bf16.msra.mxu1 %v984_v41 }
  0x23   :  { %666 = vmatpush1.bf16.msra.mxu0 %v927_v27  ;;  %622 = vmatprep.subr.bf16.mxu1 %v988_v42  ;;  %v1035_v27 = vld [vmem:[%s1378_s1 + $0x2b4] ss:$8 sps:$4 sm:$0xff]  }
  0x24   :  { %667 = vmatprep.subr.bf16.mxu0 %v928_v28  ;;  %v1033_v28 = vld [vmem:[%s1378_s1 + $0x2b0] ss:$8 sps:$4 sm:$0xff]  }
  0x26   :  { %623 = vmatpush1.bf16.msra.mxu1 %v990_v45 }
  0x27   :  { %668 = vmatpush1.bf16.msra.mxu0 %v930_v31  ;;  %624 = vmatprep.subr.bf16.mxu1 %v994_v46  ;;  %v1044_v31 = vld [vmem:[%s1379_s0 + $0x10] ss:$24 sps:$4 sm:$0xff]  }
  0x28   :  { %669 = vmatprep.subr.bf16.mxu0 %v931_v32 }
  0x2a   :  { %625 = vmatpush1.bf16.msra.mxu1 %v996_v49 }
  0x2b   :  { %670 = vmatpush1.bf16.msra.mxu0 %v933_v35  ;;  %626 = vmatprep.subr.bf16.mxu1 %v1000_v50 }
  0x2c   :  { %671 = vmatprep.subr.bf16.mxu0 %v934_v36  ;;  %v113_v36 = vlaneseq }
  0x2e   :  { %627 = vmatpush1.bf16.msra.mxu1 %v1002_v53  ;;  %v114_v37 = vshrl.u32 %v113_v36, 7 }
  0x2f   :  { %672 = vmatpush1.bf16.msra.mxu0 %v936_v39  ;;  %628 = vmatprep.subr.bf16.mxu1 %v1006_v54  ;;  %v111_v39 = vld [vmem:[%s1380_s2] sm:$0x3] }
  0x30   :  { %673 = vmatprep.subr.bf16.mxu0 %v940_v40  ;;  %v115_v38 = vsub.s32 0, %v114_v37  ;;  %v119_v40 = vsub.s32 1, %v114_v37 }
  0x32   :  { %629 = vmatpush1.bf16.msra.mxu1 %v1008_v57  ;;  %v116_v41 = vrot.slane %v111_v39, %v115_v38  ;;  %v120_v42 = vrot.slane %v111_v39, %v119_v40 }
  0x33   :  { %674 = vmatpush1.bf16.msra.mxu0 %v942_v43  ;;  %630 = vmatprep.subr.bf16.mxu1 %v1012_v58 }
  0x34   :  { %675 = vmatprep.subr.bf16.mxu0 %v946_v44 }
  0x36   :  { %631 = vmatpush1.bf16.msra.mxu1 %v1014_v62 }
  0x37   :  { %676 = vmatpush1.bf16.msra.mxu0 %v948_v47  ;;  %632 = vmatprep.subr.bf16.mxu1 %v1018_v0 }
  0x38   :  { %677 = vmatprep.subr.bf16.mxu0 %v952_v48 }
  0x3a   :  { %633 = vmatpush1.bf16.msra.mxu1 %v1020_v3 }
  0x3b   :  { %678 = vmatpush1.bf16.msra.mxu0 %v954_v51  ;;  %634 = vmatprep.subr.bf16.mxu1 %v1024_v5 }
  0x3c   :  { %679 = vmatprep.subr.bf16.mxu0 %v958_v52 }
  0x3e   :  { %635 = vmatpush1.bf16.msra.mxu1 %v1026_v7 }
  0x3f   :  { %680 = vmatpush1.bf16.msra.mxu0 %v960_v55  ;;  %636 = vmatprep.subr.bf16.mxu1 %v1030_v9 }
  0x40   :  { %692 = vmatprep.subr.bf16.mxu0 %v969_v56 }
  0x42   :  { %682 = vmatmul.mubr.bf16.vlgmr.msra.gmra.mrb[0].mxu0 %v964_v60  ;;  %637 = vmatpush1.bf16.msra.mxu1 %v1032_v11 }
  0x43   :  { %693 = vmatpush1.bf16.msra.mxu0 %v967_v61  ;;  %880 = vmatprep.mubr.msk.bf16.mxu0 %vm602_vm0, %v1042_v1 }
  0x44   :  { %694 = vmatprep.subr.bf16.mxu0 %v975_v63 }
  0x45   :  { %639 = vmatmul.mubr.bf16.vlgmr.msra.gmra.mrb[0].mxu1 %v1036_v13 }
  0x47   :  { %695 = vmatpush1.bf16.msra.mxu0 %v973_v2 }
  0x48   :  { %696 = vmatprep.subr.bf16.mxu0 %v981_v4 }
  0x4b   :  { %697 = vmatpush1.bf16.msra.mxu0 %v979_v6 }
  0x4c   :  { %698 = vmatprep.subr.bf16.mxu0 %v987_v8 }
  0x4f   :  { %699 = vmatpush1.bf16.msra.mxu0 %v985_v10 }
  0x50   :  { %700 = vmatprep.subr.bf16.mxu0 %v993_v12 }
  0x53   :  { %701 = vmatpush1.bf16.msra.mxu0 %v991_v14 }
  0x54   :  { %702 = vmatprep.subr.bf16.mxu0 %v999_v15 }
  0x57   :  { %703 = vmatpush1.bf16.msra.mxu0 %v997_v16 }
  0x58   :  { %704 = vmatprep.subr.bf16.mxu0 %v1005_v17 }
  0x5b   :  { %705 = vmatpush1.bf16.msra.mxu0 %v1003_v18 }
  0x5c   :  { %706 = vmatprep.subr.bf16.mxu0 %v1011_v19 }
  0x5f   :  { %707 = vmatpush1.bf16.msra.mxu0 %v1009_v20 }
  0x60   :  { %708 = vmatprep.subr.bf16.mxu0 %v1017_v21 }
  0x63   :  { %709 = vmatpush1.bf16.msra.mxu0 %v1015_v22 }
  0x64   :  { %710 = vmatprep.subr.bf16.mxu0 %v1023_v23 }
  0x67   :  { %711 = vmatpush1.bf16.msra.mxu0 %v1021_v24 }
  0x68   :  { %712 = vmatprep.subr.bf16.mxu0 %v1029_v25 }
  0x6b   :  { %713 = vmatpush1.bf16.msra.mxu0 %v1027_v26 }
  0x6c   :  { %714 = vmatprep.subr.bf16.mxu0 %v1035_v27 }
  0x6f   :  { %715 = vmatpush1.bf16.msra.mxu0 %v1033_v28 }
  0x70   :  { %716 = vmatprep.subr.bf16.mxu0 %v1041_v29 }
  0x73   :  { %717 = vmatpush1.bf16.msra.mxu0 %v1039_v30 }
  0x76   :  { %725 = vmatmul.mubr.bf16.vlgmr.msra.gmra.mrb[0].mxu0 %v1044_v31 }
 0x118   :  { %v640_v32 = vpop.f32.mrb[0].mxu1 }
 0x119   :  { %v642_v33 = vpop.f32.mrb[1].mxu1  ;;  %v641_v43 = vadd.f32 %v640_v32, %v116_v41 }
 0x11a   :  { %v644_v34 = vpop.f32.mrb[2].mxu1  ;;  %v643_v44 = vadd.f32 %v642_v33, %v120_v42 }
 0x11b   :  { %v646_v35 = vpop.f32.mrb[3].mxu1  ;;  %v645_v46 = vadd.f32 %v644_v34, %v116_v41 }
 0x11c   :  { %v647_v49 = vadd.f32 %v646_v35, %v120_v42 }
 0x149   :  { %v726_v45 = vpop.f32.mrb[0].mxu0 }
 0x14a   :  { %v890_v47 = vadd.f32 %v726_v45, %v641_v43  ;;  %v728_v48 = vpop.f32.mrb[1].mxu0 }
 0x14b   :  { %v892_v50 = vadd.f32 %v728_v48, %v643_v44  ;;  %v730_v51 = vpop.f32.mrb[2].mxu0 }
 0x14c   :  { %v881_v52 = vmul.f32 -1.442695, %v890_v47  ;;  %v894_v53 = vadd.f32 %v730_v51, %v645_v46  ;;  %v732_v54 = vpop.f32.mrb[3].mxu0 }
 0x14d   :  { %v882_v55 = vmul.f32 -1.442695, %v892_v50  ;;  %v896_v56 = vadd.f32 %v732_v54, %v647_v49 }
 0x14e   :  { %1045 = vpow2.f32 %v881_v52  ;;  %v883_v57 = vmul.f32 -1.442695, %v894_v53 }
 0x14f   :  { %1047 = vpow2.f32 %v882_v55  ;;  %v884_v58 = vmul.f32 -1.442695, %v896_v56 }
 0x150   :  { %1049 = vpow2.f32 %v883_v57 }
 0x151   :  { %1051 = vpow2.f32 %v884_v58 }
 0x158   :  { %v1046_v59 = vpop.eup %1045 }
 0x159   :  { %v1048_v60 = vpop.eup %1047  ;;  %v747_v61 = vadd.f32 1.0, %v1046_v59 }
 0x15a   :  { %v1050_v62 = vpop.eup %1049  ;;  %v748_v63 = vadd.f32 1.0, %v1048_v60 }
 0x15b   :  { %v1052_v0 = vpop.eup %1051  ;;  %1053 = vrcp.f32 %v747_v61  ;;  %v749_v1 = vadd.f32 1.0, %v1050_v62 }
 0x15c   :  { %1055 = vrcp.f32 %v748_v63  ;;  %v750_v2 = vadd.f32 1.0, %v1052_v0 }
 0x15d   :  { %1057 = vrcp.f32 %v749_v1 }
 0x15e   :  { %1059 = vrcp.f32 %v750_v2 }
 0x165   :  { %v1054_v3 = vpop.eup %1053 }
 0x166   :  { %v1056_v4 = vpop.eup %1055  ;;  %v759_v5 = vmul.f32 %v1054_v3, %v890_v47 }
 0x167   :  { %v1058_v6 = vpop.eup %1057  ;;  %v760_v7 = vmul.f32 %v1056_v4, %v892_v50 }
 0x168   :  { %v1060_v8 = vpop.eup %1059  ;;  %v761_v9 = vmul.f32 %v1058_v6, %v894_v53 }
 0x169   :  { %v887_v10 = vpack.c.bf16 %v760_v7, %v759_v5  ;;  %v762_v11 = vmul.f32 %v1060_v8, %v896_v56 }
 0x16b   :  { %778 = vst.msk [vmem:[%s1381_s3] sm:$0xff] %vm777_vm3, %v887_v10  ;;  %v888_v12 = vpack.c.bf16 %v762_v11, %v761_v9 }
 0x16d   :  { %779 = vst.msk [vmem:[%s1381_s3 + $0x8] sm:$0xff] %vm777_vm3, %v888_v12 }

// kernel: seg_no_ffm_forward.30
= control target key start
LH: loop header
LB: loop body
LE: loop exit
PB: predicated region body
PF: predicated region fallthrough
CT: control target
= control target key end

     0   :  { %vm399_vm0 = vcmask 261120   ;;  %v448_v59 = vlaneseq  ;;  %s884_s3 = inlined_call_operand.vmem [shape: bf16[256,256], index: 3, kind: input, shape index: {}]   ;;  %s885_s2 = inlined_call_operand.vmem [shape: bf16[160,256], index: 2, kind: input, shape index: {}]   ;;  %s886_s0 = inlined_call_operand.vmem [shape: bf16[16,160], index: 0, kind: input, shape index: {}]   ;;  %s887_s1 = inlined_call_operand.vmem [shape: bf16[16,256], index: 1, kind: input, shape index: {}]   ;;  %s888_s4 = inlined_call_operand.vmem [shape: f32[1,256], index: 4, kind: input, shape index: {}]   ;;  %s889_s5 = inlined_call_operand.vmem [shape: bf16[16,256], index: 5, kind: output, shape index: {}]  }
   0x1   :  { %v577_v0 = vld [vmem:[%s884_s3 + $0x4] ss:$8 sps:$4 sm:$0xff]   ;;  %v579_v1 = vld [vmem:[%s884_s3] ss:$8 sps:$4 sm:$0xff]   ;;  %v580_v2 = vld [vmem:[%s884_s3 + $0x14] ss:$8 sps:$4 sm:$0xff]  }
   0x2   :  { %247 = vmatprep.subr.bf16.mxu1 %v577_v0  ;;  %v582_v3 = vld [vmem:[%s884_s3 + $0x10] ss:$8 sps:$4 sm:$0xff]   ;;  %v583_v4 = vld [vmem:[%s884_s3 + $0x24] ss:$8 sps:$4 sm:$0xff]   ;;  %v585_v5 = vld [vmem:[%s884_s3 + $0x20] ss:$8 sps:$4 sm:$0xff]  }
   0x3   :  { %248 = vmatpush1.bf16.msra.mxu1 %v579_v1  ;;  %v586_v6 = vld [vmem:[%s884_s3 + $0x34] ss:$8 sps:$4 sm:$0xff]   ;;  %v595_v7 = vld [vmem:[%s885_s2 + $0x4] ss:$8 sps:$4 sm:$0xff]   ;;  %v597_v8 = vld [vmem:[%s885_s2] ss:$8 sps:$4 sm:$0xff]  }
   0x4   :  { %249 = vmatprep.subr.bf16.mxu1 %v580_v2  ;;  %v588_v9 = vld [vmem:[%s884_s3 + $0x30] ss:$8 sps:$4 sm:$0xff]   ;;  %403 = vmatprep.subr.bf16.mxu0 %v595_v7  ;;  %v601_v10 = vld [vmem:[%s885_s2 + $0x14] ss:$8 sps:$4 sm:$0xff]   ;;  %v589_v12 = vld [vmem:[%s884_s3 + $0x44] ss:$8 sps:$4 sm:$0xff]  }
   0x5   :  { %404 = vmatpush1.bf16.msra.mxu0 %v597_v8  ;;  %v603_v11 = vld [vmem:[%s885_s2 + $0x10] ss:$8 sps:$4 sm:$0xff]   ;;  %v591_v13 = vld [vmem:[%s884_s3 + $0x40] ss:$8 sps:$4 sm:$0xff]   ;;  %v607_v14 = vld [vmem:[%s885_s2 + $0x24] ss:$8 sps:$4 sm:$0xff]  }
   0x6   :  { %405 = vmatprep.subr.bf16.mxu0 %v601_v10  ;;  %v592_v15 = vld [vmem:[%s884_s3 + $0x54] ss:$8 sps:$4 sm:$0xff]   ;;  %v609_v16 = vld [vmem:[%s885_s2 + $0x20] ss:$8 sps:$4 sm:$0xff]   ;;  %v594_v18 = vld [vmem:[%s884_s3 + $0x50] ss:$8 sps:$4 sm:$0xff]  }
   0x7   :  { %250 = vmatpush1.bf16.msra.mxu1 %v582_v3  ;;  %v613_v17 = vld [vmem:[%s885_s2 + $0x34] ss:$8 sps:$4 sm:$0xff]   ;;  %v598_v19 = vld [vmem:[%s884_s3 + $0x64] ss:$8 sps:$4 sm:$0xff]   ;;  %v615_v20 = vld [vmem:[%s885_s2 + $0x30] ss:$8 sps:$4 sm:$0xff]  }
   0x8   :  { %251 = vmatprep.subr.bf16.mxu1 %v583_v4  ;;  %v619_v21 = vld [vmem:[%s885_s2 + $0x44] ss:$8 sps:$4 sm:$0xff]   ;;  %v600_v22 = vld [vmem:[%s884_s3 + $0x60] ss:$8 sps:$4 sm:$0xff]   ;;  %v604_v23 = vld [vmem:[%s884_s3 + $0x74] ss:$8 sps:$4 sm:$0xff]  }
   0x9   :  { %406 = vmatpush1.bf16.msra.mxu0 %v603_v11  ;;  %v621_v24 = vld [vmem:[%s885_s2 + $0x40] ss:$8 sps:$4 sm:$0xff]   ;;  %v625_v25 = vld [vmem:[%s885_s2 + $0x54] ss:$8 sps:$4 sm:$0xff]   ;;  %v606_v26 = vld [vmem:[%s884_s3 + $0x70] ss:$8 sps:$4 sm:$0xff]  }
   0xa   :  { %407 = vmatprep.subr.bf16.mxu0 %v607_v14  ;;  %v610_v27 = vld [vmem:[%s884_s3 + $0x84] ss:$8 sps:$4 sm:$0xff]   ;;  %v627_v28 = vld [vmem:[%s885_s2 + $0x50] ss:$8 sps:$4 sm:$0xff]   ;;  %v612_v30 = vld [vmem:[%s884_s3 + $0x80] ss:$8 sps:$4 sm:$0xff]  }
   0xb   :  { %252 = vmatpush1.bf16.msra.mxu1 %v585_v5  ;;  %v631_v29 = vld [vmem:[%s885_s2 + $0x64] ss:$8 sps:$4 sm:$0xff]   ;;  %v616_v31 = vld [vmem:[%s884_s3 + $0x94] ss:$8 sps:$4 sm:$0xff]   ;;  %v633_v32 = vld [vmem:[%s885_s2 + $0x60] ss:$8 sps:$4 sm:$0xff]  }
   0xc   :  { %253 = vmatprep.subr.bf16.mxu1 %v586_v6  ;;  %v637_v33 = vld [vmem:[%s885_s2 + $0x74] ss:$8 sps:$4 sm:$0xff]   ;;  %v618_v34 = vld [vmem:[%s884_s3 + $0x90] ss:$8 sps:$4 sm:$0xff]   ;;  %v622_v35 = vld [vmem:[%s884_s3 + $0xa4] ss:$8 sps:$4 sm:$0xff]  }
   0xd   :  { %408 = vmatpush1.bf16.msra.mxu0 %v609_v16  ;;  %v639_v36 = vld [vmem:[%s885_s2 + $0x70] ss:$8 sps:$4 sm:$0xff]   ;;  %v656_v37 = vld [vmem:[%s886_s0 + $0x4] ss:$8 sps:$4 sm:$0xff]   ;;  %v624_v40 = vld [vmem:[%s884_s3 + $0xa0] ss:$8 sps:$4 sm:$0xff]  }
   0xe   :  { %409 = vmatprep.subr.bf16.mxu0 %v613_v17  ;;  %v643_v38 = vld [vmem:[%s885_s2 + $0x84] ss:$8 sps:$4 sm:$0xff]   ;;  %564 = vmatprep.mubr.msk.bf16.mxu0 %vm399_vm0, %v656_v37  ;;  %v645_v41 = vld [vmem:[%s885_s2 + $0x80] ss:$8 sps:$4 sm:$0xff]   ;;  %v628_v42 = vld [vmem:[%s884_s3 + $0xb4] ss:$8 sps:$4 sm:$0xff]  }
   0xf   :  { %254 = vmatpush1.bf16.msra.mxu1 %v588_v9  ;;  %v660_v39 = vld [vmem:[%s887_s1 + $0x4] ss:$8 sps:$4 sm:$0xff]   ;;  %v649_v43 = vld [vmem:[%s885_s2 + $0x94] ss:$8 sps:$4 sm:$0xff]   ;;  %v630_v44 = vld [vmem:[%s884_s3 + $0xb0] ss:$8 sps:$4 sm:$0xff]  }
  0x10   :  { %255 = vmatprep.subr.bf16.mxu1 %v589_v12  ;;  %279 = vmatprep.mubr.bf16.mxu1 %v660_v39  ;;  %v651_v45 = vld [vmem:[%s885_s2 + $0x90] ss:$8 sps:$4 sm:$0xff]   ;;  %v634_v46 = vld [vmem:[%s884_s3 + $0xc4] ss:$8 sps:$4 sm:$0xff]   ;;  %v654_v47 = vld [vmem:[%s886_s0] ss:$8 sps:$4 sm:$0xff]  }
  0x11   :  { %410 = vmatpush1.bf16.msra.mxu0 %v615_v20  ;;  %v636_v48 = vld [vmem:[%s884_s3 + $0xc0] ss:$8 sps:$4 sm:$0xff]   ;;  %v640_v49 = vld [vmem:[%s884_s3 + $0xd4] ss:$8 sps:$4 sm:$0xff]   ;;  %v642_v50 = vld [vmem:[%s884_s3 + $0xd0] ss:$8 sps:$4 sm:$0xff]  }
  0x12   :  { %411 = vmatprep.subr.bf16.mxu0 %v619_v21  ;;  %v646_v51 = vld [vmem:[%s884_s3 + $0xe4] ss:$8 sps:$4 sm:$0xff]   ;;  %v648_v52 = vld [vmem:[%s884_s3 + $0xe0] ss:$8 sps:$4 sm:$0xff]   ;;  %v652_v53 = vld [vmem:[%s884_s3 + $0xf4] ss:$8 sps:$4 sm:$0xff]  }
  0x13   :  { %256 = vmatpush1.bf16.msra.mxu1 %v591_v13  ;;  %v657_v54 = vld [vmem:[%s884_s3 + $0xf0] ss:$8 sps:$4 sm:$0xff]   ;;  %v658_v55 = vld [vmem:[%s887_s1] ss:$8 sps:$4 sm:$0xff]   ;;  %v449_v61 = vshrl.u32 %v448_v59, 7 }
  0x14   :  { %257 = vmatprep.subr.bf16.mxu1 %v592_v15  ;;  %v446_v63 = vld [vmem:[%s888_s4] sm:$0x3] }
  0x15   :  { %412 = vmatpush1.bf16.msra.mxu0 %v621_v24  ;;  %v450_v62 = vsub.s32 0, %v449_v61  ;;  %v454_v0 = vsub.s32 1, %v449_v61 }
  0x16   :  { %413 = vmatprep.subr.bf16.mxu0 %v625_v25 }
  0x17   :  { %258 = vmatpush1.bf16.msra.mxu1 %v594_v18  ;;  %v451_v1 = vrot.slane %v446_v63, %v450_v62  ;;  %v455_v3 = vrot.slane %v446_v63, %v454_v0 }
  0x18   :  { %259 = vmatprep.subr.bf16.mxu1 %v598_v19 }
  0x19   :  { %414 = vmatpush1.bf16.msra.mxu0 %v627_v28 }
  0x1a   :  { %415 = vmatprep.subr.bf16.mxu0 %v631_v29 }
  0x1b   :  { %260 = vmatpush1.bf16.msra.mxu1 %v600_v22 }
  0x1c   :  { %261 = vmatprep.subr.bf16.mxu1 %v604_v23 }
  0x1d   :  { %416 = vmatpush1.bf16.msra.mxu0 %v633_v32 }
  0x1e   :  { %417 = vmatprep.subr.bf16.mxu0 %v637_v33 }
  0x1f   :  { %262 = vmatpush1.bf16.msra.mxu1 %v606_v26 }
  0x20   :  { %263 = vmatprep.subr.bf16.mxu1 %v610_v27 }
  0x21   :  { %418 = vmatpush1.bf16.msra.mxu0 %v639_v36 }
  0x22   :  { %419 = vmatprep.subr.bf16.mxu0 %v643_v38 }
  0x23   :  { %264 = vmatpush1.bf16.msra.mxu1 %v612_v30 }
  0x24   :  { %265 = vmatprep.subr.bf16.mxu1 %v616_v31 }
  0x25   :  { %420 = vmatpush1.bf16.msra.mxu0 %v645_v41 }
  0x26   :  { %421 = vmatprep.subr.bf16.mxu0 %v649_v43 }
  0x27   :  { %266 = vmatpush1.bf16.msra.mxu1 %v618_v34 }
  0x28   :  { %267 = vmatprep.subr.bf16.mxu1 %v622_v35 }
  0x29   :  { %422 = vmatpush1.bf16.msra.mxu0 %v651_v45 }
  0x2b   :  { %268 = vmatpush1.bf16.msra.mxu1 %v624_v40 }
  0x2c   :  { %269 = vmatprep.subr.bf16.mxu1 %v628_v42  ;;  %436 = vmatmul.mubr.bf16.vlgmr.msra.gmra.mrb[0].mxu0 %v654_v47 }
  0x2f   :  { %270 = vmatpush1.bf16.msra.mxu1 %v630_v44 }
  0x30   :  { %271 = vmatprep.subr.bf16.mxu1 %v634_v46 }
  0x33   :  { %272 = vmatpush1.bf16.msra.mxu1 %v636_v48 }
  0x34   :  { %273 = vmatprep.subr.bf16.mxu1 %v640_v49 }
  0x37   :  { %274 = vmatpush1.bf16.msra.mxu1 %v642_v50 }
  0x38   :  { %275 = vmatprep.subr.bf16.mxu1 %v646_v51 }
  0x3b   :  { %276 = vmatpush1.bf16.msra.mxu1 %v648_v52 }
  0x3c   :  { %277 = vmatprep.subr.bf16.mxu1 %v652_v53 }
  0x3f   :  { %278 = vmatpush1.bf16.msra.mxu1 %v657_v54 }
  0x42   :  { %280 = vmatmul.mubr.bf16.vlgmr.msra.gmra.mrb[0].mxu1 %v658_v55 }
  0xff   :  { %v437_v56 = vpop.f32.mrb[0].mxu0 }
 0x100   :  { %v439_v57 = vpop.f32.mrb[1].mxu0 }
 0x101   :  { %v441_v58 = vpop.f32.mrb[2].mxu0 }
 0x102   :  { %v443_v60 = vpop.f32.mrb[3].mxu0 }
 0x115   :  { %v281_v2 = vpop.f32.mrb[0].mxu1 }
 0x116   :  { %v438_v4 = vadd.f32 %v437_v56, %v281_v2  ;;  %v283_v5 = vpop.f32.mrb[1].mxu1 }
 0x117   :  { %v440_v6 = vadd.f32 %v439_v57, %v283_v5  ;;  %v285_v7 = vpop.f32.mrb[2].mxu1 }
 0x118   :  { %v458_v8 = vadd.f32 %v451_v1, %v438_v4  ;;  %v442_v9 = vadd.f32 %v441_v58, %v285_v7  ;;  %v287_v10 = vpop.f32.mrb[3].mxu1 }
 0x119   :  { %v459_v11 = vadd.f32 %v455_v3, %v440_v6  ;;  %v444_v12 = vadd.f32 %v443_v60, %v287_v10 }
 0x11a   :  { %v565_v13 = vmul.f32 -1.442695, %v458_v8  ;;  %v460_v14 = vadd.f32 %v451_v1, %v442_v9 }
 0x11b   :  { %v566_v15 = vmul.f32 -1.442695, %v459_v11  ;;  %v461_v16 = vadd.f32 %v455_v3, %v444_v12 }
 0x11c   :  { %661 = vpow2.f32 %v565_v13  ;;  %v567_v17 = vmul.f32 -1.442695, %v460_v14 }
 0x11d   :  { %663 = vpow2.f32 %v566_v15  ;;  %v568_v18 = vmul.f32 -1.442695, %v461_v16 }
 0x11e   :  { %665 = vpow2.f32 %v567_v17 }
 0x11f   :  { %667 = vpow2.f32 %v568_v18 }
 0x126   :  { %v662_v19 = vpop.eup %661 }
 0x127   :  { %v664_v20 = vpop.eup %663  ;;  %v474_v21 = vadd.f32 1.0, %v662_v19 }
 0x128   :  { %v666_v22 = vpop.eup %665  ;;  %v475_v23 = vadd.f32 1.0, %v664_v20 }
 0x129   :  { %v668_v24 = vpop.eup %667  ;;  %669 = vrcp.f32 %v474_v21  ;;  %v476_v25 = vadd.f32 1.0, %v666_v22 }
 0x12a   :  { %671 = vrcp.f32 %v475_v23  ;;  %v477_v26 = vadd.f32 1.0, %v668_v24 }
 0x12b   :  { %673 = vrcp.f32 %v476_v25 }
 0x12c   :  { %675 = vrcp.f32 %v477_v26 }
 0x133   :  { %v670_v27 = vpop.eup %669 }
 0x134   :  { %v672_v28 = vpop.eup %671  ;;  %v486_v29 = vmul.f32 %v670_v27, %v458_v8 }
 0x135   :  { %v674_v30 = vpop.eup %673  ;;  %v487_v31 = vmul.f32 %v672_v28, %v459_v11 }
 0x136   :  { %v676_v32 = vpop.eup %675  ;;  %v488_v33 = vmul.f32 %v674_v30, %v460_v14 }
 0x137   :  { %v571_v34 = vpack.c.bf16 %v487_v31, %v486_v29  ;;  %v489_v35 = vmul.f32 %v676_v32, %v461_v16 }
 0x139   :  { %502 = vst [vmem:[%s889_s5] sm:$0xff] %v571_v34  ;;  %v572_v36 = vpack.c.bf16 %v489_v35, %v488_v33 }
 0x13b   :  { %503 = vst [vmem:[%s889_s5 + $0x8] sm:$0xff] %v572_v36 }

// kernel: seg_no_ffm_forward.29
= control target key start
LH: loop header
LB: loop body
LE: loop exit
PB: predicated region body
PF: predicated region fallthrough
CT: control target
= control target key end

     0   :  { %v200_v36 = vlaneseq  ;;  %v1944_v37 = vmov 1983009808   ;;  %vm1175_vm0 = vcmask 261120   ;;  %s2558_s1 = inlined_call_operand.vmem [shape: bf16[1440,256], index: 1, kind: input, shape index: {}]   ;;  %s2559_s0 = inlined_call_operand.vmem [shape: bf16[4,1440], index: 0, kind: input, shape index: {}]   ;;  %s2560_s2 = inlined_call_operand.vmem [shape: f32[1,256], index: 2, kind: input, shape index: {}]   ;;  %s2561_s3 = inlined_call_operand.vmem [shape: bf16[4,256], index: 3, kind: output, shape index: {}]  }
   0x1   :  { %v1663_v0 = vld [vmem:[%s2558_s1 + $0x4] ss:$8 sps:$4 sm:$0xff]   ;;  %v1667_v2 = vld [vmem:[%s2558_s1] ss:$8 sps:$4 sm:$0xff]   ;;  %v1669_v4 = vld [vmem:[%s2558_s1 + $0x14] ss:$8 sps:$4 sm:$0xff]   ;;  %v215_v38 = vunpack.c.l.s4 %v1944_v37 }
   0x2   :  { %v1665_v1 = vld [vmem:[%s2558_s1 + $0x304] ss:$8 sps:$4 sm:$0xff]   ;;  %1179 = vmatprep.subr.bf16.mxu1 %v1663_v0  ;;  %v1668_v3 = vld [vmem:[%s2558_s1 + $0x300] ss:$8 sps:$4 sm:$0xff]   ;;  %v1671_v5 = vld [vmem:[%s2558_s1 + $0x314] ss:$8 sps:$4 sm:$0xff]  }
   0x3   :  { %1302 = vmatprep.subr.bf16.mxu0 %v1665_v1  ;;  %1180 = vmatpush1.bf16.msra.mxu1 %v1667_v2  ;;  %v1673_v6 = vld [vmem:[%s2558_s1 + $0x10] ss:$8 sps:$4 sm:$0xff]   ;;  %v1675_v8 = vld [vmem:[%s2558_s1 + $0x24] ss:$8 sps:$4 sm:$0xff]   ;;  %v1679_v10 = vld [vmem:[%s2558_s1 + $0x20] ss:$8 sps:$4 sm:$0xff]   ;;  %v216_v43 = vunpack.c.0.s8 %v215_v38 }
   0x4   :  { %1303 = vmatpush1.bf16.msra.mxu0 %v1668_v3  ;;  %1181 = vmatprep.subr.bf16.mxu1 %v1669_v4  ;;  %v1674_v7 = vld [vmem:[%s2558_s1 + $0x310] ss:$8 sps:$4 sm:$0xff]   ;;  %v1677_v9 = vld [vmem:[%s2558_s1 + $0x324] ss:$8 sps:$4 sm:$0xff]   ;;  %v1680_v11 = vld [vmem:[%s2558_s1 + $0x320] ss:$8 sps:$4 sm:$0xff]  }
   0x5   :  { %1304 = vmatprep.subr.bf16.mxu0 %v1671_v5  ;;  %v1681_v12 = vld [vmem:[%s2558_s1 + $0x34] ss:$8 sps:$4 sm:$0xff]   ;;  %v1685_v14 = vld [vmem:[%s2558_s1 + $0x30] ss:$8 sps:$4 sm:$0xff]   ;;  %v1687_v16 = vld [vmem:[%s2558_s1 + $0x44] ss:$8 sps:$4 sm:$0xff]  }
   0x6   :  { %v1683_v13 = vld [vmem:[%s2558_s1 + $0x334] ss:$8 sps:$4 sm:$0xff]   ;;  %v1686_v15 = vld [vmem:[%s2558_s1 + $0x330] ss:$8 sps:$4 sm:$0xff]   ;;  %v1689_v17 = vld [vmem:[%s2558_s1 + $0x344] ss:$8 sps:$4 sm:$0xff]  }
   0x7   :  { %1182 = vmatpush1.bf16.msra.mxu1 %v1673_v6  ;;  %v1691_v18 = vld [vmem:[%s2558_s1 + $0x40] ss:$8 sps:$4 sm:$0xff]   ;;  %v1693_v20 = vld [vmem:[%s2558_s1 + $0x54] ss:$8 sps:$4 sm:$0xff]   ;;  %v1697_v22 = vld [vmem:[%s2558_s1 + $0x50] ss:$8 sps:$4 sm:$0xff]  }
   0x8   :  { %1305 = vmatpush1.bf16.msra.mxu0 %v1674_v7  ;;  %1183 = vmatprep.subr.bf16.mxu1 %v1675_v8  ;;  %v1692_v19 = vld [vmem:[%s2558_s1 + $0x340] ss:$8 sps:$4 sm:$0xff]   ;;  %v1695_v21 = vld [vmem:[%s2558_s1 + $0x354] ss:$8 sps:$4 sm:$0xff]   ;;  %v1698_v23 = vld [vmem:[%s2558_s1 + $0x350] ss:$8 sps:$4 sm:$0xff]  }
   0x9   :  { %1306 = vmatprep.subr.bf16.mxu0 %v1677_v9  ;;  %v1699_v24 = vld [vmem:[%s2558_s1 + $0x64] ss:$8 sps:$4 sm:$0xff]   ;;  %v1703_v26 = vld [vmem:[%s2558_s1 + $0x60] ss:$8 sps:$4 sm:$0xff]   ;;  %v1705_v28 = vld [vmem:[%s2558_s1 + $0x74] ss:$8 sps:$4 sm:$0xff]  }
   0xa   :  { %v1701_v25 = vld [vmem:[%s2558_s1 + $0x364] ss:$8 sps:$4 sm:$0xff]   ;;  %v1704_v27 = vld [vmem:[%s2558_s1 + $0x360] ss:$8 sps:$4 sm:$0xff]   ;;  %v1707_v29 = vld [vmem:[%s2558_s1 + $0x374] ss:$8 sps:$4 sm:$0xff]  }
   0xb   :  { %1184 = vmatpush1.bf16.msra.mxu1 %v1679_v10  ;;  %v1709_v30 = vld [vmem:[%s2558_s1 + $0x70] ss:$8 sps:$4 sm:$0xff]   ;;  %v1711_v32 = vld [vmem:[%s2558_s1 + $0x84] ss:$8 sps:$4 sm:$0xff]   ;;  %v1715_v34 = vld [vmem:[%s2558_s1 + $0x80] ss:$8 sps:$4 sm:$0xff]  }
   0xc   :  { %1307 = vmatpush1.bf16.msra.mxu0 %v1680_v11  ;;  %1185 = vmatprep.subr.bf16.mxu1 %v1681_v12  ;;  %v1710_v31 = vld [vmem:[%s2558_s1 + $0x370] ss:$8 sps:$4 sm:$0xff]   ;;  %v1713_v33 = vld [vmem:[%s2558_s1 + $0x384] ss:$8 sps:$4 sm:$0xff]   ;;  %v1716_v35 = vld [vmem:[%s2558_s1 + $0x380] ss:$8 sps:$4 sm:$0xff]  }
   0xd   :  { %1308 = vmatprep.subr.bf16.mxu0 %v1683_v13  ;;  %v1717_v39 = vld [vmem:[%s2558_s1 + $0x94] ss:$8 sps:$4 sm:$0xff]   ;;  %v1721_v41 = vld [vmem:[%s2558_s1 + $0x90] ss:$8 sps:$4 sm:$0xff]   ;;  %v2082_v42 = vshrl.u32 %v200_v36, 7  ;;  %v15_v52 = vld [vmem:[%s2559_s0] sm:$0xff] }
   0xe   :  { %v1719_v40 = vld [vmem:[%s2558_s1 + $0x394] ss:$8 sps:$4 sm:$0xff]   ;;  %v1722_v44 = vld [vmem:[%s2558_s1 + $0x390] ss:$8 sps:$4 sm:$0xff]   ;;  %v1723_v45 = vld [vmem:[%s2558_s1 + $0xa4] ss:$8 sps:$4 sm:$0xff]   ;;  %v213_v11 = vcombine.high %v15_v52, %v15_v52 }
   0xf   :  { %1186 = vmatpush1.bf16.msra.mxu1 %v1685_v14  ;;  %v1725_v46 = vld [vmem:[%s2558_s1 + $0x3a4] ss:$8 sps:$4 sm:$0xff]   ;;  %v1727_v47 = vld [vmem:[%s2558_s1 + $0xa0] ss:$8 sps:$4 sm:$0xff]   ;;  %v2100_v49 = vsub.s32 %v216_v43, %v2082_v42  ;;  %v1729_v50 = vld [vmem:[%s2558_s1 + $0xb4] ss:$8 sps:$4 sm:$0xff]  }
  0x10   :  { %1309 = vmatpush1.bf16.msra.mxu0 %v1686_v15  ;;  %1187 = vmatprep.subr.bf16.mxu1 %v1687_v16  ;;  %v1728_v48 = vld [vmem:[%s2558_s1 + $0x3a0] ss:$8 sps:$4 sm:$0xff]   ;;  %v1731_v51 = vld [vmem:[%s2558_s1 + $0x3b4] ss:$8 sps:$4 sm:$0xff]   ;;  %v1733_v53 = vld [vmem:[%s2558_s1 + $0xb0] ss:$8 sps:$4 sm:$0xff]  }
  0x11   :  { %1310 = vmatprep.subr.bf16.mxu0 %v1689_v17  ;;  %v220_v54 = vrot.slane %v15_v52, %v2100_v49  ;;  %v1734_v55 = vld [vmem:[%s2558_s1 + $0x3b0] ss:$8 sps:$4 sm:$0xff]   ;;  %v16_v56 = vld [vmem:[%s2559_s0 + $0x8] sm:$0xff]  ;;  %v1741_v0 = vld [vmem:[%s2558_s1 + $0xd4] ss:$8 sps:$4 sm:$0xff]   ;;  %v2177_v16 = vrot.slane %v213_v11, %v2100_v49 }
  0x12   :  { %v1735_v57 = vld [vmem:[%s2558_s1 + $0xc4] ss:$8 sps:$4 sm:$0xff]   ;;  %v230_v60 = vcombine.high %v16_v56, %v16_v56  ;;  %v1739_v62 = vld [vmem:[%s2558_s1 + $0xc0] ss:$8 sps:$4 sm:$0xff]   ;;  %v1743_v1 = vld [vmem:[%s2558_s1 + $0x3d4] ss:$8 sps:$4 sm:$0xff]   ;;  %v2180_v17 = vrot.slane %v16_v56, %v2100_v49 }
  0x13   :  { %1188 = vmatpush1.bf16.msra.mxu1 %v1691_v18  ;;  %v1737_v58 = vld [vmem:[%s2558_s1 + $0x3c4] ss:$8 sps:$4 sm:$0xff]   ;;  %v228_v59 = vcombine.high %v220_v54, %v220_v54  ;;  %v1740_v63 = vld [vmem:[%s2558_s1 + $0x3c0] ss:$8 sps:$4 sm:$0xff]   ;;  %v1745_v3 = vld [vmem:[%s2558_s1 + $0xd0] ss:$8 sps:$4 sm:$0xff]  }
  0x14   :  { %1311 = vmatpush1.bf16.msra.mxu0 %v1692_v19  ;;  %1189 = vmatprep.subr.bf16.mxu1 %v1693_v20  ;;  %v244_v61 = vrot.slane %v230_v60, %v2100_v49  ;;  %v1746_v4 = vld [vmem:[%s2558_s1 + $0x3d0] ss:$8 sps:$4 sm:$0xff]   ;;  %v1747_v5 = vld [vmem:[%s2558_s1 + $0xe4] ss:$8 sps:$4 sm:$0xff]   ;;  %v1751_v7 = vld [vmem:[%s2558_s1 + $0xe0] ss:$8 sps:$4 sm:$0xff]  }
  0x15   :  { %1312 = vmatprep.subr.bf16.mxu0 %v1695_v21  ;;  %1211 = vmatprep.mubr.bf16.mxu1 %v228_v59  ;;  %v1749_v6 = vld [vmem:[%s2558_s1 + $0x3e4] ss:$8 sps:$4 sm:$0xff]   ;;  %v1752_v8 = vld [vmem:[%s2558_s1 + $0x3e0] ss:$8 sps:$4 sm:$0xff]   ;;  %v1753_v9 = vld [vmem:[%s2558_s1 + $0xf4] ss:$8 sps:$4 sm:$0xff]  }
  0x16   :  { %v246_v2 = vcombine.high %v244_v61, %v244_v61  ;;  %v1755_v10 = vld [vmem:[%s2558_s1 + $0x3f4] ss:$8 sps:$4 sm:$0xff]   ;;  %v1757_v12 = vld [vmem:[%s2558_s1 + $0xf0] ss:$8 sps:$4 sm:$0xff]   ;;  %v1762_v14 = vld [vmem:[%s2558_s1 + $0x104] ss:$8 sps:$4 sm:$0xff]  }
  0x17   :  { %1190 = vmatpush1.bf16.msra.mxu1 %v1697_v22  ;;  %v1758_v13 = vld [vmem:[%s2558_s1 + $0x3f0] ss:$8 sps:$4 sm:$0xff]   ;;  %v1766_v15 = vld [vmem:[%s2558_s1 + $0x404] ss:$8 sps:$4 sm:$0xff]   ;;  %v1760_v18 = vld [vmem:[%s2558_s1 + $0x100] ss:$8 sps:$4 sm:$0xff]   ;;  %v229_v22 = vcombine.high %v2177_v16, %v2177_v16 }
  0x18   :  { %1313 = vmatpush1.bf16.msra.mxu0 %v1698_v23  ;;  %1191 = vmatprep.subr.bf16.mxu1 %v1699_v24  ;;  %v1764_v19 = vld [vmem:[%s2558_s1 + $0x400] ss:$8 sps:$4 sm:$0xff]   ;;  %v1769_v20 = vld [vmem:[%s2558_s1 + $0x114] ss:$8 sps:$4 sm:$0xff]   ;;  %v1767_v23 = vld [vmem:[%s2558_s1 + $0x110] ss:$8 sps:$4 sm:$0xff]  }
  0x19   :  { %1314 = vmatprep.subr.bf16.mxu0 %v1701_v25  ;;  %1334 = vmatprep.mubr.bf16.mxu0 %v246_v2  ;;  %v1772_v21 = vld [vmem:[%s2558_s1 + $0x414] ss:$8 sps:$4 sm:$0xff]   ;;  %v1770_v24 = vld [vmem:[%s2558_s1 + $0x410] ss:$8 sps:$4 sm:$0xff]   ;;  %v1775_v25 = vld [vmem:[%s2558_s1 + $0x124] ss:$8 sps:$4 sm:$0xff]  }
  0x1a   :  { %v1788_v36 = vld [vmem:[%s2558_s1 + $0x440] ss:$8 sps:$4 sm:$0xff]   ;;  %v1793_v37 = vld [vmem:[%s2558_s1 + $0x154] ss:$8 sps:$4 sm:$0xff]   ;;  %v1802_v43 = vld [vmem:[%s2558_s1 + $0x464] ss:$8 sps:$4 sm:$0xff]  }
  0x1b   :  { %1192 = vmatpush1.bf16.msra.mxu1 %v1703_v26  ;;  %v1778_v26 = vld [vmem:[%s2558_s1 + $0x424] ss:$8 sps:$4 sm:$0xff]   ;;  %v1796_v38 = vld [vmem:[%s2558_s1 + $0x454] ss:$8 sps:$4 sm:$0xff]   ;;  %v1803_v52 = vld [vmem:[%s2558_s1 + $0x170] ss:$8 sps:$4 sm:$0xff]  }
  0x1c   :  { %1315 = vmatpush1.bf16.msra.mxu0 %v1704_v27  ;;  %1193 = vmatprep.subr.bf16.mxu1 %v1705_v28  ;;  %v1773_v27 = vld [vmem:[%s2558_s1 + $0x120] ss:$8 sps:$4 sm:$0xff]   ;;  %v1820_v59 = vld [vmem:[%s2558_s1 + $0x494] ss:$8 sps:$4 sm:$0xff]   ;;  %v1815_v60 = vld [vmem:[%s2558_s1 + $0x190] ss:$8 sps:$4 sm:$0xff]  }
  0x1d   :  { %1316 = vmatprep.subr.bf16.mxu0 %v1707_v29  ;;  %v1776_v28 = vld [vmem:[%s2558_s1 + $0x420] ss:$8 sps:$4 sm:$0xff]   ;;  %v1781_v29 = vld [vmem:[%s2558_s1 + $0x134] ss:$8 sps:$4 sm:$0xff]  }
  0x1e   :  { %v1809_v56 = vld [vmem:[%s2558_s1 + $0x180] ss:$8 sps:$4 sm:$0xff]   ;;  %v1829_v2 = vld [vmem:[%s2558_s1 + $0x1b4] ss:$8 sps:$4 sm:$0xff]  }
  0x1f   :  { %1194 = vmatpush1.bf16.msra.mxu1 %v1709_v30  ;;  %v1784_v30 = vld [vmem:[%s2558_s1 + $0x434] ss:$8 sps:$4 sm:$0xff]  }
  0x20   :  { %1317 = vmatpush1.bf16.msra.mxu0 %v1710_v31  ;;  %1195 = vmatprep.subr.bf16.mxu1 %v1711_v32  ;;  %v1779_v31 = vld [vmem:[%s2558_s1 + $0x130] ss:$8 sps:$4 sm:$0xff]   ;;  %v1844_v11 = vld [vmem:[%s2558_s1 + $0x4d4] ss:$8 sps:$4 sm:$0xff]  }
  0x21   :  { %1318 = vmatprep.subr.bf16.mxu0 %v1713_v33  ;;  %v1782_v32 = vld [vmem:[%s2558_s1 + $0x430] ss:$8 sps:$4 sm:$0xff]   ;;  %v1787_v33 = vld [vmem:[%s2558_s1 + $0x144] ss:$8 sps:$4 sm:$0xff]  }
  0x23   :  { %1196 = vmatpush1.bf16.msra.mxu1 %v1715_v34  ;;  %v1790_v34 = vld [vmem:[%s2558_s1 + $0x444] ss:$8 sps:$4 sm:$0xff]  }
  0x24   :  { %1319 = vmatpush1.bf16.msra.mxu0 %v1716_v35  ;;  %1197 = vmatprep.subr.bf16.mxu1 %v1717_v39  ;;  %v1785_v35 = vld [vmem:[%s2558_s1 + $0x140] ss:$8 sps:$4 sm:$0xff]   ;;  %v1791_v39 = vld [vmem:[%s2558_s1 + $0x150] ss:$8 sps:$4 sm:$0xff]  }
  0x25   :  { %1320 = vmatprep.subr.bf16.mxu0 %v1719_v40  ;;  %v1794_v40 = vld [vmem:[%s2558_s1 + $0x450] ss:$8 sps:$4 sm:$0xff]  }
  0x27   :  { %1198 = vmatpush1.bf16.msra.mxu1 %v1721_v41  ;;  %v1799_v41 = vld [vmem:[%s2558_s1 + $0x164] ss:$8 sps:$4 sm:$0xff]  }
  0x28   :  { %1321 = vmatpush1.bf16.msra.mxu0 %v1722_v44  ;;  %1199 = vmatprep.subr.bf16.mxu1 %v1723_v45  ;;  %v1797_v44 = vld [vmem:[%s2558_s1 + $0x160] ss:$8 sps:$4 sm:$0xff]   ;;  %v2262_v45 = vld [vmem:[%s2559_s0 + $0x10] sm:$0xff] }
  0x29   :  { %1322 = vmatprep.subr.bf16.mxu0 %v1725_v46  ;;  %v1800_v46 = vld [vmem:[%s2558_s1 + $0x460] ss:$8 sps:$4 sm:$0xff]  }
  0x2b   :  { %1200 = vmatpush1.bf16.msra.mxu1 %v1727_v47  ;;  %v1805_v47 = vld [vmem:[%s2558_s1 + $0x174] ss:$8 sps:$4 sm:$0xff]  }
  0x2c   :  { %1323 = vmatpush1.bf16.msra.mxu0 %v1728_v48  ;;  %1201 = vmatprep.subr.bf16.mxu1 %v1729_v50  ;;  %v2272_v48 = vrot.slane %v2262_v45, %v2100_v49  ;;  %v1808_v50 = vld [vmem:[%s2558_s1 + $0x474] ss:$8 sps:$4 sm:$0xff]  }
  0x2d   :  { %1324 = vmatprep.subr.bf16.mxu0 %v1731_v51 }
  0x2e   :  { %v262_v51 = vcombine.high %v2272_v48, %v2272_v48 }
  0x2f   :  { %1202 = vmatpush1.bf16.msra.mxu1 %v1733_v53  ;;  %v1806_v53 = vld [vmem:[%s2558_s1 + $0x470] ss:$8 sps:$4 sm:$0xff]  }
  0x30   :  { %1325 = vmatpush1.bf16.msra.mxu0 %v1734_v55  ;;  %1203 = vmatprep.subr.bf16.mxu1 %v1735_v57  ;;  %v1814_v55 = vld [vmem:[%s2558_s1 + $0x484] ss:$8 sps:$4 sm:$0xff]   ;;  %v1812_v57 = vld [vmem:[%s2558_s1 + $0x480] ss:$8 sps:$4 sm:$0xff]  }
  0x31   :  { %1326 = vmatprep.subr.bf16.mxu0 %v1737_v58  ;;  %v1817_v58 = vld [vmem:[%s2558_s1 + $0x194] ss:$8 sps:$4 sm:$0xff]  }
  0x33   :  { %1204 = vmatpush1.bf16.msra.mxu1 %v1739_v62  ;;  %v1823_v62 = vld [vmem:[%s2558_s1 + $0x1a4] ss:$8 sps:$4 sm:$0xff]  }
  0x34   :  { %1327 = vmatpush1.bf16.msra.mxu0 %v1740_v63  ;;  %1205 = vmatprep.subr.bf16.mxu1 %v1741_v0  ;;  %v1826_v63 = vld [vmem:[%s2558_s1 + $0x4a4] ss:$8 sps:$4 sm:$0xff]   ;;  %v1821_v0 = vld [vmem:[%s2558_s1 + $0x1a0] ss:$8 sps:$4 sm:$0xff]  }
  0x35   :  { %1328 = vmatprep.subr.bf16.mxu0 %v1743_v1  ;;  %v1824_v1 = vld [vmem:[%s2558_s1 + $0x4a0] ss:$8 sps:$4 sm:$0xff]  }
  0x37   :  { %1206 = vmatpush1.bf16.msra.mxu1 %v1745_v3  ;;  %v1832_v3 = vld [vmem:[%s2558_s1 + $0x4b4] ss:$8 sps:$4 sm:$0xff]  }
  0x38   :  { %1329 = vmatpush1.bf16.msra.mxu0 %v1746_v4  ;;  %1207 = vmatprep.subr.bf16.mxu1 %v1747_v5  ;;  %v1827_v4 = vld [vmem:[%s2558_s1 + $0x1b0] ss:$8 sps:$4 sm:$0xff]  }
  0x39   :  { %1330 = vmatprep.subr.bf16.mxu0 %v1749_v6  ;;  %v1830_v5 = vld [vmem:[%s2558_s1 + $0x4b0] ss:$8 sps:$4 sm:$0xff]   ;;  %v1835_v6 = vld [vmem:[%s2558_s1 + $0x1c4] ss:$8 sps:$4 sm:$0xff]  }
  0x3b   :  { %1208 = vmatpush1.bf16.msra.mxu1 %v1751_v7  ;;  %v1838_v7 = vld [vmem:[%s2558_s1 + $0x4c4] ss:$8 sps:$4 sm:$0xff]  }
  0x3c   :  { %1331 = vmatpush1.bf16.msra.mxu0 %v1752_v8  ;;  %1209 = vmatprep.subr.bf16.mxu1 %v1753_v9  ;;  %v1833_v8 = vld [vmem:[%s2558_s1 + $0x1c0] ss:$8 sps:$4 sm:$0xff]  }
  0x3d   :  { %1332 = vmatprep.subr.bf16.mxu0 %v1755_v10  ;;  %v1836_v9 = vld [vmem:[%s2558_s1 + $0x4c0] ss:$8 sps:$4 sm:$0xff]   ;;  %v1841_v10 = vld [vmem:[%s2558_s1 + $0x1d4] ss:$8 sps:$4 sm:$0xff]  }
  0x3f   :  { %1210 = vmatpush1.bf16.msra.mxu1 %v1757_v12  ;;  %v1839_v12 = vld [vmem:[%s2558_s1 + $0x1d0] ss:$8 sps:$4 sm:$0xff]  }
  0x40   :  { %1333 = vmatpush1.bf16.msra.mxu0 %v1758_v13  ;;  %1220 = vmatprep.subr.bf16.mxu1 %v1762_v14  ;;  %v1842_v13 = vld [vmem:[%s2558_s1 + $0x4d0] ss:$8 sps:$4 sm:$0xff]   ;;  %v1847_v14 = vld [vmem:[%s2558_s1 + $0x1e4] ss:$8 sps:$4 sm:$0xff]  }
  0x41   :  { %1343 = vmatprep.subr.bf16.mxu0 %v1766_v15  ;;  %v1850_v15 = vld [vmem:[%s2558_s1 + $0x4e4] ss:$8 sps:$4 sm:$0xff]  }
  0x42   :  { %1212 = vmatmul.mubr.bf16.vlgmr.msra.gmra.mrb[0].mxu1 %v220_v54  ;;  %v1811_v54 = vld [vmem:[%s2558_s1 + $0x184] ss:$8 sps:$4 sm:$0xff]  }
  0x43   :  { %1335 = vmatmul.mubr.bf16.vlgmr.msra.gmra.mrb[0].mxu0 %v244_v61  ;;  %1221 = vmatpush1.bf16.msra.mxu1 %v1760_v18  ;;  %v1818_v61 = vld [vmem:[%s2558_s1 + $0x490] ss:$8 sps:$4 sm:$0xff]   ;;  %v1845_v18 = vld [vmem:[%s2558_s1 + $0x1e0] ss:$8 sps:$4 sm:$0xff]  }
  0x44   :  { %1344 = vmatpush1.bf16.msra.mxu0 %v1764_v19  ;;  %1222 = vmatprep.subr.bf16.mxu1 %v1769_v20  ;;  %v1848_v19 = vld [vmem:[%s2558_s1 + $0x4e0] ss:$8 sps:$4 sm:$0xff]   ;;  %v1853_v20 = vld [vmem:[%s2558_s1 + $0x1f4] ss:$8 sps:$4 sm:$0xff]  }
  0x45   :  { %1345 = vmatprep.subr.bf16.mxu0 %v1772_v21  ;;  %1252 = vmatprep.mubr.bf16.mxu1 %v229_v22  ;;  %v1856_v21 = vld [vmem:[%s2558_s1 + $0x4f4] ss:$8 sps:$4 sm:$0xff]   ;;  %v247_v22 = vcombine.high %v2262_v45, %v2262_v45  ;;  %v1882_v45 = vld [vmem:[%s2558_s1 + $0x240] ss:$8 sps:$4 sm:$0xff]  }
  0x46   :  { %1375 = vmatprep.mubr.bf16.mxu0 %v262_v51  ;;  %v1891_v51 = vld [vmem:[%s2558_s1 + $0x550] ss:$8 sps:$4 sm:$0xff]  }
  0x47   :  { %1223 = vmatpush1.bf16.msra.mxu1 %v1767_v23  ;;  %v1851_v23 = vld [vmem:[%s2558_s1 + $0x1f0] ss:$8 sps:$4 sm:$0xff]  }
  0x48   :  { %1346 = vmatpush1.bf16.msra.mxu0 %v1770_v24  ;;  %1224 = vmatprep.subr.bf16.mxu1 %v1775_v25  ;;  %v1854_v24 = vld [vmem:[%s2558_s1 + $0x4f0] ss:$8 sps:$4 sm:$0xff]   ;;  %v1859_v25 = vld [vmem:[%s2558_s1 + $0x204] ss:$8 sps:$4 sm:$0xff]  }
  0x49   :  { %1347 = vmatprep.subr.bf16.mxu0 %v1778_v26  ;;  %v1863_v26 = vld [vmem:[%s2558_s1 + $0x504] ss:$8 sps:$4 sm:$0xff]  }
  0x4b   :  { %1225 = vmatpush1.bf16.msra.mxu1 %v1773_v27  ;;  %v2390_v27 = vrot.slane %v247_v22, %v2100_v49  ;;  %v1869_v49 = vld [vmem:[%s2558_s1 + $0x514] ss:$8 sps:$4 sm:$0xff]   ;;  %v202_v22 = vsub.s32 0, %v2082_v42 }
  0x4c   :  { %1348 = vmatpush1.bf16.msra.mxu0 %v1776_v28  ;;  %1226 = vmatprep.subr.bf16.mxu1 %v1781_v29  ;;  %v1857_v28 = vld [vmem:[%s2558_s1 + $0x200] ss:$8 sps:$4 sm:$0xff]  }
  0x4d   :  { %1349 = vmatprep.subr.bf16.mxu0 %v1784_v30  ;;  %v1861_v29 = vld [vmem:[%s2558_s1 + $0x500] ss:$8 sps:$4 sm:$0xff]   ;;  %v1866_v30 = vld [vmem:[%s2558_s1 + $0x214] ss:$8 sps:$4 sm:$0xff]  }
  0x4f   :  { %1227 = vmatpush1.bf16.msra.mxu1 %v1779_v31  ;;  %v263_v31 = vcombine.high %v2390_v27, %v2390_v27 }
  0x50   :  { %1350 = vmatpush1.bf16.msra.mxu0 %v1782_v32  ;;  %1228 = vmatprep.subr.bf16.mxu1 %v1787_v33  ;;  %v245_v32 = vcombine.high %v2180_v17, %v2180_v17  ;;  %v1864_v33 = vld [vmem:[%s2558_s1 + $0x210] ss:$8 sps:$4 sm:$0xff]  }
  0x51   :  { %1351 = vmatprep.subr.bf16.mxu0 %v1790_v34  ;;  %v1867_v34 = vld [vmem:[%s2558_s1 + $0x510] ss:$8 sps:$4 sm:$0xff]  }
  0x53   :  { %1229 = vmatpush1.bf16.msra.mxu1 %v1785_v35  ;;  %v1872_v35 = vld [vmem:[%s2558_s1 + $0x224] ss:$8 sps:$4 sm:$0xff]  }
  0x54   :  { %1352 = vmatpush1.bf16.msra.mxu0 %v1788_v36  ;;  %1230 = vmatprep.subr.bf16.mxu1 %v1793_v37  ;;  %v1870_v36 = vld [vmem:[%s2558_s1 + $0x220] ss:$8 sps:$4 sm:$0xff]  }
  0x55   :  { %1353 = vmatprep.subr.bf16.mxu0 %v1796_v38  ;;  %v1873_v37 = vld [vmem:[%s2558_s1 + $0x520] ss:$8 sps:$4 sm:$0xff]   ;;  %v1878_v38 = vld [vmem:[%s2558_s1 + $0x234] ss:$8 sps:$4 sm:$0xff]  }
  0x57   :  { %1231 = vmatpush1.bf16.msra.mxu1 %v1791_v39  ;;  %v1881_v39 = vld [vmem:[%s2558_s1 + $0x534] ss:$8 sps:$4 sm:$0xff]  }
  0x58   :  { %1354 = vmatpush1.bf16.msra.mxu0 %v1794_v40  ;;  %1232 = vmatprep.subr.bf16.mxu1 %v1799_v41  ;;  %v1876_v40 = vld [vmem:[%s2558_s1 + $0x230] ss:$8 sps:$4 sm:$0xff]  }
  0x59   :  { %1355 = vmatprep.subr.bf16.mxu0 %v1802_v43  ;;  %v1879_v41 = vld [vmem:[%s2558_s1 + $0x530] ss:$8 sps:$4 sm:$0xff]   ;;  %v1884_v43 = vld [vmem:[%s2558_s1 + $0x244] ss:$8 sps:$4 sm:$0xff]  }
  0x5b   :  { %1233 = vmatpush1.bf16.msra.mxu1 %v1797_v44  ;;  %v1887_v44 = vld [vmem:[%s2558_s1 + $0x544] ss:$8 sps:$4 sm:$0xff]  }
  0x5c   :  { %1356 = vmatpush1.bf16.msra.mxu0 %v1800_v46  ;;  %1234 = vmatprep.subr.bf16.mxu1 %v1805_v47  ;;  %v1885_v46 = vld [vmem:[%s2558_s1 + $0x540] ss:$8 sps:$4 sm:$0xff]   ;;  %v1890_v47 = vld [vmem:[%s2558_s1 + $0x254] ss:$8 sps:$4 sm:$0xff]  }
  0x5d   :  { %1357 = vmatprep.subr.bf16.mxu0 %v1808_v50  ;;  %v1888_v50 = vld [vmem:[%s2558_s1 + $0x250] ss:$8 sps:$4 sm:$0xff]  }
  0x5f   :  { %1235 = vmatpush1.bf16.msra.mxu1 %v1803_v52  ;;  %v1896_v52 = vld [vmem:[%s2558_s1 + $0x264] ss:$8 sps:$4 sm:$0xff]  }
  0x60   :  { %1358 = vmatpush1.bf16.msra.mxu0 %v1806_v53  ;;  %1236 = vmatprep.subr.bf16.mxu1 %v1811_v54  ;;  %v1899_v53 = vld [vmem:[%s2558_s1 + $0x564] ss:$8 sps:$4 sm:$0xff]   ;;  %v1894_v54 = vld [vmem:[%s2558_s1 + $0x260] ss:$8 sps:$4 sm:$0xff]  }
  0x61   :  { %1359 = vmatprep.subr.bf16.mxu0 %v1814_v55  ;;  %v1897_v55 = vld [vmem:[%s2558_s1 + $0x560] ss:$8 sps:$4 sm:$0xff]  }
  0x63   :  { %1237 = vmatpush1.bf16.msra.mxu1 %v1809_v56  ;;  %v1902_v56 = vld [vmem:[%s2558_s1 + $0x274] ss:$8 sps:$4 sm:$0xff]  }
  0x64   :  { %1360 = vmatpush1.bf16.msra.mxu0 %v1812_v57  ;;  %1238 = vmatprep.subr.bf16.mxu1 %v1817_v58  ;;  %v1905_v57 = vld [vmem:[%s2558_s1 + $0x574] ss:$8 sps:$4 sm:$0xff]   ;;  %v1900_v58 = vld [vmem:[%s2558_s1 + $0x270] ss:$8 sps:$4 sm:$0xff]  }
  0x65   :  { %1361 = vmatprep.subr.bf16.mxu0 %v1820_v59  ;;  %v1903_v59 = vld [vmem:[%s2558_s1 + $0x570] ss:$8 sps:$4 sm:$0xff]  }
  0x67   :  { %1239 = vmatpush1.bf16.msra.mxu1 %v1815_v60  ;;  %v1908_v60 = vld [vmem:[%s2558_s1 + $0x284] ss:$8 sps:$4 sm:$0xff]  }
  0x68   :  { %1362 = vmatpush1.bf16.msra.mxu0 %v1818_v61  ;;  %1240 = vmatprep.subr.bf16.mxu1 %v1823_v62  ;;  %v1911_v61 = vld [vmem:[%s2558_s1 + $0x584] ss:$8 sps:$4 sm:$0xff]   ;;  %v1906_v62 = vld [vmem:[%s2558_s1 + $0x280] ss:$8 sps:$4 sm:$0xff]  }
  0x69   :  { %1363 = vmatprep.subr.bf16.mxu0 %v1826_v63  ;;  %v1909_v63 = vld [vmem:[%s2558_s1 + $0x580] ss:$8 sps:$4 sm:$0xff]  }
  0x6b   :  { %1241 = vmatpush1.bf16.msra.mxu1 %v1821_v0  ;;  %v1914_v0 = vld [vmem:[%s2558_s1 + $0x294] ss:$8 sps:$4 sm:$0xff]  }
  0x6c   :  { %1364 = vmatpush1.bf16.msra.mxu0 %v1824_v1  ;;  %1242 = vmatprep.subr.bf16.mxu1 %v1829_v2  ;;  %v1917_v1 = vld [vmem:[%s2558_s1 + $0x594] ss:$8 sps:$4 sm:$0xff]   ;;  %v1912_v2 = vld [vmem:[%s2558_s1 + $0x290] ss:$8 sps:$4 sm:$0xff]  }
  0x6d   :  { %1365 = vmatprep.subr.bf16.mxu0 %v1832_v3  ;;  %v1915_v3 = vld [vmem:[%s2558_s1 + $0x590] ss:$8 sps:$4 sm:$0xff]  }
  0x6f   :  { %1243 = vmatpush1.bf16.msra.mxu1 %v1827_v4  ;;  %v1920_v4 = vld [vmem:[%s2558_s1 + $0x2a4] ss:$8 sps:$4 sm:$0xff]  }
  0x70   :  { %1366 = vmatpush1.bf16.msra.mxu0 %v1830_v5  ;;  %1244 = vmatprep.subr.bf16.mxu1 %v1835_v6  ;;  %v1918_v5 = vld [vmem:[%s2558_s1 + $0x2a0] ss:$8 sps:$4 sm:$0xff]   ;;  %v1923_v6 = vld [vmem:[%s2558_s1 + $0x2b4] ss:$8 sps:$4 sm:$0xff]  }
  0x71   :  { %1367 = vmatprep.subr.bf16.mxu0 %v1838_v7  ;;  %v1921_v7 = vld [vmem:[%s2558_s1 + $0x2b0] ss:$8 sps:$4 sm:$0xff]  }
  0x73   :  { %1245 = vmatpush1.bf16.msra.mxu1 %v1833_v8  ;;  %v1926_v8 = vld [vmem:[%s2558_s1 + $0x2c4] ss:$8 sps:$4 sm:$0xff]  }
  0x74   :  { %1368 = vmatpush1.bf16.msra.mxu0 %v1836_v9  ;;  %1246 = vmatprep.subr.bf16.mxu1 %v1841_v10  ;;  %v1924_v9 = vld [vmem:[%s2558_s1 + $0x2c0] ss:$8 sps:$4 sm:$0xff]   ;;  %v1929_v10 = vld [vmem:[%s2558_s1 + $0x2d4] ss:$8 sps:$4 sm:$0xff]  }
  0x75   :  { %1369 = vmatprep.subr.bf16.mxu0 %v1844_v11  ;;  %v1927_v11 = vld [vmem:[%s2558_s1 + $0x2d0] ss:$8 sps:$4 sm:$0xff]  }
  0x77   :  { %1247 = vmatpush1.bf16.msra.mxu1 %v1839_v12  ;;  %v1932_v12 = vld [vmem:[%s2558_s1 + $0x2e4] ss:$8 sps:$4 sm:$0xff]  }
  0x78   :  { %1370 = vmatpush1.bf16.msra.mxu0 %v1842_v13  ;;  %1248 = vmatprep.subr.bf16.mxu1 %v1847_v14  ;;  %v1930_v13 = vld [vmem:[%s2558_s1 + $0x2e0] ss:$8 sps:$4 sm:$0xff]   ;;  %v1935_v14 = vld [vmem:[%s2558_s1 + $0x2f4] ss:$8 sps:$4 sm:$0xff]  }
  0x79   :  { %1371 = vmatprep.subr.bf16.mxu0 %v1850_v15  ;;  %v1933_v15 = vld [vmem:[%s2558_s1 + $0x2f0] ss:$8 sps:$4 sm:$0xff]  }
  0x7b   :  { %1249 = vmatpush1.bf16.msra.mxu1 %v1845_v18 }
  0x7c   :  { %1372 = vmatpush1.bf16.msra.mxu0 %v1848_v19  ;;  %1250 = vmatprep.subr.bf16.mxu1 %v1853_v20 }
  0x7d   :  { %1373 = vmatprep.subr.bf16.mxu0 %v1856_v21 }
  0x7f   :  { %1251 = vmatpush1.bf16.msra.mxu1 %v1851_v23  ;;  %v198_v23 = vld [vmem:[%s2560_s2] sm:$0x3] }
  0x80   :  { %1374 = vmatpush1.bf16.msra.mxu0 %v1854_v24  ;;  %1261 = vmatprep.subr.bf16.mxu1 %v1859_v25  ;;  %v206_v24 = vsub.s32 1, %v2082_v42  ;;  %v203_v25 = vrot.slane %v198_v23, %v202_v22 }
  0x81   :  { %1384 = vmatprep.subr.bf16.mxu0 %v1863_v26 }
  0x82   :  { %1253 = vmatmul.mubr.bf16.vlgmr.msra.gmra.mrb[0].mxu1 %v2177_v16  ;;  %v1875_v16 = vld [vmem:[%s2558_s1 + $0x524] ss:$8 sps:$4 sm:$0xff]   ;;  %v207_v26 = vrot.slane %v198_v23, %v206_v24 }
  0x83   :  { %1376 = vmatmul.mubr.bf16.vlgmr.msra.gmra.mrb[0].mxu0 %v2272_v48  ;;  %1262 = vmatpush1.bf16.msra.mxu1 %v1857_v28  ;;  %v1893_v48 = vld [vmem:[%s2558_s1 + $0x554] ss:$8 sps:$4 sm:$0xff]  }
  0x84   :  { %1385 = vmatpush1.bf16.msra.mxu0 %v1861_v29  ;;  %1263 = vmatprep.subr.bf16.mxu1 %v1866_v30 }
  0x85   :  { %1386 = vmatprep.subr.bf16.mxu0 %v1869_v49  ;;  %1637 = vmatprep.mubr.msk.bf16.mxu0 %vm1175_vm0, %v263_v31 }
  0x86   :  { %1293 = vmatprep.mubr.bf16.mxu1 %v245_v32 }
  0x87   :  { %1264 = vmatpush1.bf16.msra.mxu1 %v1864_v33 }
  0x88   :  { %1387 = vmatpush1.bf16.msra.mxu0 %v1867_v34  ;;  %1265 = vmatprep.subr.bf16.mxu1 %v1872_v35 }
  0x89   :  { %1388 = vmatprep.subr.bf16.mxu0 %v1875_v16 }
  0x8b   :  { %1266 = vmatpush1.bf16.msra.mxu1 %v1870_v36 }
  0x8c   :  { %1389 = vmatpush1.bf16.msra.mxu0 %v1873_v37  ;;  %1267 = vmatprep.subr.bf16.mxu1 %v1878_v38 }
  0x8d   :  { %1390 = vmatprep.subr.bf16.mxu0 %v1881_v39 }
  0x8f   :  { %1268 = vmatpush1.bf16.msra.mxu1 %v1876_v40 }
  0x90   :  { %1391 = vmatpush1.bf16.msra.mxu0 %v1879_v41  ;;  %1269 = vmatprep.subr.bf16.mxu1 %v1884_v43 }
  0x91   :  { %1392 = vmatprep.subr.bf16.mxu0 %v1887_v44 }
  0x93   :  { %1270 = vmatpush1.bf16.msra.mxu1 %v1882_v45 }
  0x94   :  { %1393 = vmatpush1.bf16.msra.mxu0 %v1885_v46  ;;  %1271 = vmatprep.subr.bf16.mxu1 %v1890_v47 }
  0x95   :  { %1394 = vmatprep.subr.bf16.mxu0 %v1893_v48 }
  0x97   :  { %1272 = vmatpush1.bf16.msra.mxu1 %v1888_v50 }
  0x98   :  { %1395 = vmatpush1.bf16.msra.mxu0 %v1891_v51  ;;  %1273 = vmatprep.subr.bf16.mxu1 %v1896_v52 }
  0x99   :  { %1396 = vmatprep.subr.bf16.mxu0 %v1899_v53 }
  0x9b   :  { %1274 = vmatpush1.bf16.msra.mxu1 %v1894_v54 }
  0x9c   :  { %1397 = vmatpush1.bf16.msra.mxu0 %v1897_v55  ;;  %1275 = vmatprep.subr.bf16.mxu1 %v1902_v56 }
  0x9d   :  { %1398 = vmatprep.subr.bf16.mxu0 %v1905_v57 }
  0x9f   :  { %1276 = vmatpush1.bf16.msra.mxu1 %v1900_v58 }
  0xa0   :  { %1399 = vmatpush1.bf16.msra.mxu0 %v1903_v59  ;;  %1277 = vmatprep.subr.bf16.mxu1 %v1908_v60 }
  0xa1   :  { %1400 = vmatprep.subr.bf16.mxu0 %v1911_v61 }
  0xa3   :  { %1278 = vmatpush1.bf16.msra.mxu1 %v1906_v62 }
  0xa4   :  { %1401 = vmatpush1.bf16.msra.mxu0 %v1909_v63  ;;  %1279 = vmatprep.subr.bf16.mxu1 %v1914_v0 }
  0xa5   :  { %1402 = vmatprep.subr.bf16.mxu0 %v1917_v1 }
  0xa7   :  { %1280 = vmatpush1.bf16.msra.mxu1 %v1912_v2 }
  0xa8   :  { %1403 = vmatpush1.bf16.msra.mxu0 %v1915_v3  ;;  %1281 = vmatprep.subr.bf16.mxu1 %v1920_v4 }
  0xab   :  { %1417 = vmatmul.mubr.bf16.vlgmr.msra.gmra.mrb[0].mxu0 %v2390_v27  ;;  %1282 = vmatpush1.bf16.msra.mxu1 %v1918_v5 }
  0xac   :  { %1283 = vmatprep.subr.bf16.mxu1 %v1923_v6 }
  0xaf   :  { %1284 = vmatpush1.bf16.msra.mxu1 %v1921_v7 }
  0xb0   :  { %1285 = vmatprep.subr.bf16.mxu1 %v1926_v8 }
  0xb3   :  { %1286 = vmatpush1.bf16.msra.mxu1 %v1924_v9 }
  0xb4   :  { %1287 = vmatprep.subr.bf16.mxu1 %v1929_v10 }
  0xb7   :  { %1288 = vmatpush1.bf16.msra.mxu1 %v1927_v11 }
  0xb8   :  { %1289 = vmatprep.subr.bf16.mxu1 %v1932_v12 }
  0xbb   :  { %1290 = vmatpush1.bf16.msra.mxu1 %v1930_v13 }
  0xbc   :  { %1291 = vmatprep.subr.bf16.mxu1 %v1935_v14 }
  0xbf   :  { %1292 = vmatpush1.bf16.msra.mxu1 %v1933_v15 }
  0xc2   :  { %1294 = vmatmul.mubr.bf16.vlgmr.msra.gmra.mrb[0].mxu1 %v2180_v17 }
 0x17e   :  { %v1418_v18 = vpop.f32.mrb[0].mxu0 }
 0x17f   :  { %v1420_v19 = vpop.f32.mrb[1].mxu0 }
 0x180   :  { %v1422_v20 = vpop.f32.mrb[2].mxu0 }
 0x181   :  { %v1423_v21 = vpop.f32.mrb[3].mxu0 }
 0x195   :  { %v1295_v27 = vpop.f32.mrb[0].mxu1 }
 0x196   :  { %v1642_v28 = vadd.f32 %v1295_v27, %v203_v25  ;;  %v1297_v29 = vpop.f32.mrb[1].mxu1 }
 0x197   :  { %v1644_v30 = vadd.f32 %v1297_v29, %v207_v26  ;;  %v1299_v49 = vpop.f32.mrb[2].mxu1 }
 0x198   :  { %v1643_v17 = vadd.f32 %v1642_v28, %v1418_v18  ;;  %v1300_v31 = vpop.f32.mrb[3].mxu1 }
 0x199   :  { %v1645_v32 = vadd.f32 %v1644_v30, %v1420_v19 }
 0x19a   :  { %v1638_v33 = vmul.f32 -1.442695, %v1643_v17 }
 0x19b   :  { %v1639_v34 = vmul.f32 -1.442695, %v1645_v32 }
 0x19c   :  { %1936 = vpow2.f32 %v1638_v33 }
 0x19d   :  { %1938 = vpow2.f32 %v1639_v34 }
 0x1a6   :  { %v1937_v35 = vpop.eup %1936 }
 0x1a7   :  { %v1939_v16 = vpop.eup %1938  ;;  %v1431_v36 = vadd.f32 1.0, %v1937_v35 }
 0x1a8   :  { %v1432_v37 = vadd.f32 1.0, %v1939_v16 }
 0x1a9   :  { %1940 = vrcp.f32 %v1431_v36 }
 0x1aa   :  { %1942 = vrcp.f32 %v1432_v37 }
 0x1b3   :  { %v1941_v42 = vpop.eup %1940 }
 0x1b4   :  { %v1943_v38 = vpop.eup %1942  ;;  %v1437_v39 = vmul.f32 %v1941_v42, %v1643_v17 }
 0x1b5   :  { %v1438_v40 = vmul.f32 %v1943_v38, %v1645_v32 }
 0x1b7   :  { %v1640_v41 = vpack.c.bf16 %v1438_v40, %v1437_v39 }
 0x1b9   :  { %1641 = vst.sshfl [vmem:[%s2561_s3] sm:$0x33 pattern:$0x76325410] %v1640_v41 }

// kernel: seg_no_ffm_forward.31
= control target key start
LH: loop header
LB: loop body
LE: loop exit
PB: predicated region body
PF: predicated region fallthrough
CT: control target
= control target key end

     0   :  { %vm1193_vm0 = vmmov 0   ;;  %s1463_s1 = inlined_call_operand.vmem [shape: bf16[1152,128], index: 1, kind: input, shape index: {}]   ;;  %s1464_s0 = inlined_call_operand.vmem [shape: bf16[16,1152], index: 0, kind: input, shape index: {}]   ;;  %s1465_s2 = inlined_call_operand.vmem [shape: f32[1,128], index: 2, kind: input, shape index: {}]   ;;  %s1466_s3 = inlined_call_operand.vmem [shape: bf16[16,128], index: 3, kind: output, shape index: {}]  }
   0x1   :  { %v1099_v0 = vld [vmem:[%s1463_s1 + $0x40] sm:$0xff]   ;;  %v1103_v4 = vld [vmem:[%s1463_s1 + $0x48] sm:$0xff]   ;;  %v1107_v8 = vld [vmem:[%s1463_s1 + $0x50] sm:$0xff]  }
   0x2   :  { %v1100_v1 = vld [vmem:[%s1463_s1] sm:$0xff]   ;;  %980 = vmatprep.subr.bf16.mxu0 %v1099_v0  ;;  %v1104_v5 = vld [vmem:[%s1463_s1 + $0x8] sm:$0xff]   ;;  %v1108_v9 = vld [vmem:[%s1463_s1 + $0x10] sm:$0xff]  }
   0x3   :  { %v1101_v2 = vld [vmem:[%s1463_s1 + $0xc0] sm:$0xff]   ;;  %981 = vmatpush3.bf16.msra.mxu0 %v1100_v1  ;;  %v1105_v6 = vld [vmem:[%s1463_s1 + $0xc8] sm:$0xff]   ;;  %v1109_v10 = vld [vmem:[%s1463_s1 + $0xd0] sm:$0xff]  }
   0x4   :  { %v1102_v3 = vld [vmem:[%s1463_s1 + $0x80] sm:$0xff]   ;;  %1002 = vmatprep.subr.bf16.mxu1 %v1101_v2  ;;  %982 = vmatprep.subr.bf16.mxu0 %v1103_v4  ;;  %v1106_v7 = vld [vmem:[%s1463_s1 + $0x88] sm:$0xff]   ;;  %v1110_v11 = vld [vmem:[%s1463_s1 + $0x90] sm:$0xff]  }
   0x5   :  { %1003 = vmatpush3.bf16.msra.mxu1 %v1102_v3  ;;  %v1111_v12 = vld [vmem:[%s1463_s1 + $0x58] sm:$0xff]   ;;  %v1115_v16 = vld [vmem:[%s1463_s1 + $0x60] sm:$0xff]   ;;  %v1119_v20 = vld [vmem:[%s1463_s1 + $0x68] sm:$0xff]  }
   0x6   :  { %1004 = vmatprep.subr.bf16.mxu1 %v1105_v6  ;;  %v1112_v13 = vld [vmem:[%s1463_s1 + $0x18] sm:$0xff]   ;;  %v1116_v17 = vld [vmem:[%s1463_s1 + $0x20] sm:$0xff]   ;;  %v1120_v21 = vld [vmem:[%s1463_s1 + $0x28] sm:$0xff]   ;;  %v1192_v6 = vmov 0.0  }
   0x7   :  { %983 = vmatpush3.bf16.msra.mxu0 %v1104_v5  ;;  %v1113_v14 = vld [vmem:[%s1463_s1 + $0xd8] sm:$0xff]   ;;  %v1117_v18 = vld [vmem:[%s1463_s1 + $0xe0] sm:$0xff]   ;;  %v1121_v22 = vld [vmem:[%s1463_s1 + $0xe8] sm:$0xff]  }
   0x8   :  { %984 = vmatprep.subr.bf16.mxu0 %v1107_v8  ;;  %v1114_v15 = vld [vmem:[%s1463_s1 + $0x98] sm:$0xff]   ;;  %v1118_v19 = vld [vmem:[%s1463_s1 + $0xa0] sm:$0xff]   ;;  %v1122_v23 = vld [vmem:[%s1463_s1 + $0xa8] sm:$0xff]  }
   0x9   :  { %1005 = vmatpush3.bf16.msra.mxu1 %v1106_v7  ;;  %v1123_v24 = vld [vmem:[%s1463_s1 + $0x70] sm:$0xff]   ;;  %v1127_v28 = vld [vmem:[%s1463_s1 + $0x78] sm:$0xff]   ;;  %v1130_v31 = vld [vmem:[%s1464_s0] ss:$36 sps:$4 sm:$0xff]  }
   0xa   :  { %1006 = vmatprep.subr.bf16.mxu1 %v1109_v10  ;;  %v1124_v25 = vld [vmem:[%s1463_s1 + $0x30] sm:$0xff]   ;;  %v1128_v29 = vld [vmem:[%s1463_s1 + $0x38] sm:$0xff]   ;;  %v1132_v32 = vld [vmem:[%s1464_s0 + $0x4] ss:$36 sps:$4 sm:$0xff]  }
   0xb   :  { %985 = vmatpush3.bf16.msra.mxu0 %v1108_v9  ;;  %v1125_v26 = vld [vmem:[%s1463_s1 + $0xf0] sm:$0xff]   ;;  %v1129_v30 = vld [vmem:[%s1463_s1 + $0xf8] sm:$0xff]   ;;  %686 = vmatprep.mubr.bf16.mxu0 %v1132_v32  ;;  %v1134_v34 = vld [vmem:[%s1463_s1 + $0x140] sm:$0xff]  }
   0xc   :  { %986 = vmatprep.subr.bf16.mxu0 %v1111_v12  ;;  %v1126_v27 = vld [vmem:[%s1463_s1 + $0xb0] sm:$0xff]   ;;  %v1133_v33 = vld [vmem:[%s1463_s1 + $0xb8] sm:$0xff]   ;;  %v1135_v35 = vld [vmem:[%s1464_s0 + $0x8] ss:$36 sps:$4 sm:$0xff]  }
   0xd   :  { %1007 = vmatpush3.bf16.msra.mxu1 %v1110_v11  ;;  %v1137_v36 = vld [vmem:[%s1464_s0 + $0xc] ss:$36 sps:$4 sm:$0xff]   ;;  %v1138_v37 = vld [vmem:[%s1463_s1 + $0x100] sm:$0xff]   ;;  %v1149_v48 = vld [vmem:[%s1463_s1 + $0x158] sm:$0xff]  }
   0xe   :  { %1008 = vmatprep.subr.bf16.mxu1 %v1113_v14  ;;  %727 = vmatprep.mubr.bf16.mxu1 %v1137_v36  ;;  %v1139_v38 = vld [vmem:[%s1463_s1 + $0x1c0] sm:$0xff]   ;;  %v1141_v40 = vld [vmem:[%s1463_s1 + $0x148] sm:$0xff]   ;;  %v1145_v44 = vld [vmem:[%s1463_s1 + $0x150] sm:$0xff]  }
   0xf   :  { %987 = vmatpush3.bf16.msra.mxu0 %v1112_v13  ;;  %v1140_v39 = vld [vmem:[%s1463_s1 + $0x180] sm:$0xff]   ;;  %v1142_v41 = vld [vmem:[%s1463_s1 + $0x108] sm:$0xff]   ;;  %v1146_v45 = vld [vmem:[%s1463_s1 + $0x110] sm:$0xff]  }
  0x10   :  { %988 = vmatprep.subr.bf16.mxu0 %v1115_v16  ;;  %v1143_v42 = vld [vmem:[%s1463_s1 + $0x1c8] sm:$0xff]   ;;  %v1147_v46 = vld [vmem:[%s1463_s1 + $0x1d0] sm:$0xff]   ;;  %v1150_v49 = vld [vmem:[%s1463_s1 + $0x118] sm:$0xff]  }
  0x11   :  { %1009 = vmatpush3.bf16.msra.mxu1 %v1114_v15  ;;  %v1144_v43 = vld [vmem:[%s1463_s1 + $0x188] sm:$0xff]   ;;  %v1148_v47 = vld [vmem:[%s1463_s1 + $0x190] sm:$0xff]   ;;  %v1151_v50 = vld [vmem:[%s1463_s1 + $0x1d8] sm:$0xff]  }
  0x12   :  { %1010 = vmatprep.subr.bf16.mxu1 %v1117_v18  ;;  %v1152_v51 = vld [vmem:[%s1463_s1 + $0x198] sm:$0xff]   ;;  %v1153_v52 = vld [vmem:[%s1463_s1 + $0x160] sm:$0xff]   ;;  %v1157_v56 = vld [vmem:[%s1463_s1 + $0x168] sm:$0xff]  }
  0x13   :  { %989 = vmatpush3.bf16.msra.mxu0 %v1116_v17  ;;  %v1154_v53 = vld [vmem:[%s1463_s1 + $0x120] sm:$0xff]   ;;  %v1158_v57 = vld [vmem:[%s1463_s1 + $0x128] sm:$0xff]   ;;  %v1161_v60 = vld [vmem:[%s1463_s1 + $0x170] sm:$0xff]  }
  0x14   :  { %990 = vmatprep.subr.bf16.mxu0 %v1119_v20  ;;  %v1155_v54 = vld [vmem:[%s1463_s1 + $0x1e0] sm:$0xff]   ;;  %v1159_v58 = vld [vmem:[%s1463_s1 + $0x1e8] sm:$0xff]   ;;  %v1162_v61 = vld [vmem:[%s1463_s1 + $0x130] sm:$0xff]  }
  0x15   :  { %1011 = vmatpush3.bf16.msra.mxu1 %v1118_v19  ;;  %v1156_v55 = vld [vmem:[%s1463_s1 + $0x1a0] sm:$0xff]   ;;  %v1160_v59 = vld [vmem:[%s1463_s1 + $0x1a8] sm:$0xff]   ;;  %v1163_v62 = vld [vmem:[%s1463_s1 + $0x1f0] sm:$0xff]  }
  0x16   :  { %1012 = vmatprep.subr.bf16.mxu1 %v1121_v22  ;;  %v1164_v63 = vld [vmem:[%s1463_s1 + $0x1b0] sm:$0xff]   ;;  %v1165_v0 = vld [vmem:[%s1463_s1 + $0x178] sm:$0xff]   ;;  %v1175_v9 = vld [vmem:[%s1463_s1 + $0x200] sm:$0xff]  }
  0x17   :  { %991 = vmatpush3.bf16.msra.mxu0 %v1120_v21  ;;  %v1166_v1 = vld [vmem:[%s1463_s1 + $0x138] sm:$0xff]   ;;  %v1168_v3 = vld [vmem:[%s1464_s0 + $0x10] ss:$36 sps:$4 sm:$0xff]   ;;  %v1176_v10 = vld [vmem:[%s1463_s1 + $0x208] sm:$0xff]  }
  0x18   :  { %992 = vmatprep.subr.bf16.mxu0 %v1123_v24  ;;  %v1167_v2 = vld [vmem:[%s1463_s1 + $0x1f8] sm:$0xff]   ;;  %v1177_v11 = vld [vmem:[%s1463_s1 + $0x210] sm:$0xff]   ;;  %v1179_v13 = vld [vmem:[%s1463_s1 + $0x220] sm:$0xff]  }
  0x19   :  { %1013 = vmatpush3.bf16.msra.mxu1 %v1122_v23  ;;  %v1170_v4 = vld [vmem:[%s1464_s0 + $0x14] ss:$36 sps:$4 sm:$0xff]   ;;  %v1174_v8 = vld [vmem:[%s1464_s0 + $0x1c] ss:$36 sps:$4 sm:$0xff]   ;;  %v1180_v14 = vld [vmem:[%s1463_s1 + $0x228] sm:$0xff]  }
  0x1a   :  { %1014 = vmatprep.subr.bf16.mxu1 %v1125_v26  ;;  %v1171_v5 = vld [vmem:[%s1463_s1 + $0x1b8] sm:$0xff]   ;;  %v1181_v15 = vld [vmem:[%s1463_s1 + $0x230] sm:$0xff]   ;;  %v1183_v17 = vld [vmem:[%s1464_s0 + $0x20] ss:$36 sps:$4 sm:$0xff]  }
  0x1b   :  { %993 = vmatpush3.bf16.msra.mxu0 %v1124_v25  ;;  %v1172_v7 = vld [vmem:[%s1464_s0 + $0x18] ss:$36 sps:$4 sm:$0xff]   ;;  %v887_v19 = vld [vmem:[%s1465_s2] ss:$0 sm:$0xff] }
  0x1c   :  { %994 = vmatprep.subr.bf16.mxu0 %v1127_v28  ;;  %v1178_v12 = vld [vmem:[%s1463_s1 + $0x218] sm:$0xff]  }
  0x1d   :  { %1015 = vmatpush3.bf16.msra.mxu1 %v1126_v27  ;;  %v1182_v16 = vld [vmem:[%s1463_s1 + $0x238] sm:$0xff]  }
  0x1e   :  { %1016 = vmatprep.subr.bf16.mxu1 %v1129_v30 }
  0x1f   :  { %995 = vmatpush3.bf16.msra.mxu0 %v1128_v29 }
  0x20   :  { %1024 = vmatprep.subr.bf16.mxu0 %v1134_v34 }
  0x21   :  { %1017 = vmatpush3.bf16.msra.mxu1 %v1133_v33 }
  0x22   :  { %687 = vmatmul.mubr.bf16.vlgmr.msra.gmra.mrb[0].mxu0 %v1130_v31  ;;  %1046 = vmatprep.subr.bf16.mxu1 %v1139_v38 }
  0x23   :  { %1025 = vmatpush3.bf16.msra.mxu0 %v1138_v37  ;;  %768 = vmatprep.mubr.bf16.mxu0 %v1170_v4 }
  0x24   :  { %728 = vmatmul.mubr.bf16.vlgmr.msra.gmra.mrb[0].mxu1 %v1135_v35  ;;  %1026 = vmatprep.subr.bf16.mxu0 %v1141_v40 }
  0x25   :  { %1047 = vmatpush3.bf16.msra.mxu1 %v1140_v39  ;;  %809 = vmatprep.mubr.bf16.mxu1 %v1174_v8 }
  0x26   :  { %1048 = vmatprep.subr.bf16.mxu1 %v1143_v42 }
  0x27   :  { %1027 = vmatpush3.bf16.msra.mxu0 %v1142_v41 }
  0x28   :  { %1028 = vmatprep.subr.bf16.mxu0 %v1145_v44 }
  0x29   :  { %1049 = vmatpush3.bf16.msra.mxu1 %v1144_v43 }
  0x2a   :  { %1050 = vmatprep.subr.bf16.mxu1 %v1147_v46 }
  0x2b   :  { %1029 = vmatpush3.bf16.msra.mxu0 %v1146_v45 }
  0x2c   :  { %1030 = vmatprep.subr.bf16.mxu0 %v1149_v48 }
  0x2d   :  { %1051 = vmatpush3.bf16.msra.mxu1 %v1148_v47 }
  0x2e   :  { %1052 = vmatprep.subr.bf16.mxu1 %v1151_v50 }
  0x2f   :  { %1031 = vmatpush3.bf16.msra.mxu0 %v1150_v49 }
  0x30   :  { %1032 = vmatprep.subr.bf16.mxu0 %v1153_v52 }
  0x31   :  { %1053 = vmatpush3.bf16.msra.mxu1 %v1152_v51 }
  0x32   :  { %1054 = vmatprep.subr.bf16.mxu1 %v1155_v54 }
  0x33   :  { %1033 = vmatpush3.bf16.msra.mxu0 %v1154_v53 }
  0x34   :  { %1034 = vmatprep.subr.bf16.mxu0 %v1157_v56 }
  0x35   :  { %1055 = vmatpush3.bf16.msra.mxu1 %v1156_v55 }
  0x36   :  { %1056 = vmatprep.subr.bf16.mxu1 %v1159_v58 }
  0x37   :  { %1035 = vmatpush3.bf16.msra.mxu0 %v1158_v57 }
  0x38   :  { %1036 = vmatprep.subr.bf16.mxu0 %v1161_v60 }
  0x39   :  { %1057 = vmatpush3.bf16.msra.mxu1 %v1160_v59 }
  0x3a   :  { %1058 = vmatprep.subr.bf16.mxu1 %v1163_v62 }
  0x3b   :  { %1037 = vmatpush3.bf16.msra.mxu0 %v1162_v61 }
  0x3c   :  { %1038 = vmatprep.subr.bf16.mxu0 %v1165_v0 }
  0x3d   :  { %1059 = vmatpush3.bf16.msra.mxu1 %v1164_v63 }
  0x3e   :  { %1060 = vmatprep.subr.bf16.mxu1 %v1167_v2 }
  0x3f   :  { %1039 = vmatpush3.bf16.msra.mxu0 %v1166_v1 }
  0x40   :  { %1077 = vmatprep.subr.bf16.mxu0 %v1192_v6 }
  0x41   :  { %1061 = vmatpush3.bf16.msra.mxu1 %v1171_v5 }
  0x42   :  { %769 = vmatmul.mubr.bf16.vlgmr.msra.gmra.mrb[4].mxu0 %v1168_v3 }
  0x43   :  { %1093 = vmatprep.mubr.msk.bf16.mxu0 %vm1193_vm0, %v1192_v6  ;;  %1078 = vmatpush3.bf16.msra.mxu0 %v1175_v9 }
  0x44   :  { %810 = vmatmul.mubr.bf16.vlgmr.msra.gmra.mrb[4].mxu1 %v1172_v7  ;;  %1079 = vmatprep.subr.bf16.mxu0 %v1192_v6 }
  0x47   :  { %1080 = vmatpush3.bf16.msra.mxu0 %v1176_v10 }
  0x48   :  { %1081 = vmatprep.subr.bf16.mxu0 %v1192_v6 }
  0x4b   :  { %1082 = vmatpush3.bf16.msra.mxu0 %v1177_v11 }
  0x4c   :  { %1083 = vmatprep.subr.bf16.mxu0 %v1192_v6 }
  0x4f   :  { %1084 = vmatpush3.bf16.msra.mxu0 %v1178_v12 }
  0x50   :  { %1085 = vmatprep.subr.bf16.mxu0 %v1192_v6 }
  0x53   :  { %1086 = vmatpush3.bf16.msra.mxu0 %v1179_v13 }
  0x54   :  { %1087 = vmatprep.subr.bf16.mxu0 %v1192_v6 }
  0x57   :  { %1088 = vmatpush3.bf16.msra.mxu0 %v1180_v14 }
  0x58   :  { %1089 = vmatprep.subr.bf16.mxu0 %v1192_v6 }
  0x5b   :  { %1090 = vmatpush3.bf16.msra.mxu0 %v1181_v15 }
  0x5c   :  { %1091 = vmatprep.subr.bf16.mxu0 %v1192_v6 }
  0x5f   :  { %1092 = vmatpush3.bf16.msra.mxu0 %v1182_v16 }
  0x62   :  { %1094 = vmatmul.mubr.bf16.vlgmr.msra.gmra.mrb[8].mxu0 %v1183_v17 }
  0xf5   :  { %v996_v18 = vpop.f32.mrb[0].mxu0 }
  0xf6   :  { %v997_v20 = vpop.f32.mrb[1].mxu0 }
  0xf7   :  { %v998_v21 = vadd.f32 %v997_v20, %v996_v18  ;;  %v999_v22 = vpop.f32.mrb[2].mxu0  ;;  %v1018_v23 = vpop.f32.mrb[0].mxu1 }
  0xf8   :  { %v1000_v24 = vpop.f32.mrb[3].mxu0  ;;  %v1019_v27 = vpop.f32.mrb[1].mxu1 }
  0xf9   :  { %v689_v25 = vadd.f32 %v998_v21, %v887_v19  ;;  %v1001_v26 = vadd.f32 %v1000_v24, %v999_v22  ;;  %v1020_v28 = vadd.f32 %v1019_v27, %v1018_v23  ;;  %v1021_v29 = vpop.f32.mrb[2].mxu1 }
  0xfa   :  { %v1022_v31 = vpop.f32.mrb[3].mxu1 }
  0xfb   :  { %v692_v30 = vadd.f32 %v1001_v26, %v887_v19  ;;  %v730_v32 = vadd.f32 %v1020_v28, %v689_v25  ;;  %v1023_v33 = vadd.f32 %v1022_v31, %v1021_v29 }
  0xfd   :  { %v733_v34 = vadd.f32 %v1023_v33, %v692_v30 }
 0x115   :  { %v1040_v35 = vpop.f32.mrb[4].mxu0 }
 0x116   :  { %v1041_v36 = vpop.f32.mrb[5].mxu0 }
 0x117   :  { %v1042_v37 = vadd.f32 %v1041_v36, %v1040_v35  ;;  %v1043_v38 = vpop.f32.mrb[6].mxu0  ;;  %v1062_v39 = vpop.f32.mrb[4].mxu1 }
 0x118   :  { %v1044_v40 = vpop.f32.mrb[7].mxu0  ;;  %v1063_v43 = vpop.f32.mrb[5].mxu1 }
 0x119   :  { %v771_v41 = vadd.f32 %v1042_v37, %v730_v32  ;;  %v1045_v42 = vadd.f32 %v1044_v40, %v1043_v38  ;;  %v1064_v44 = vadd.f32 %v1063_v43, %v1062_v39  ;;  %v1065_v45 = vpop.f32.mrb[6].mxu1 }
 0x11a   :  { %v1066_v47 = vpop.f32.mrb[7].mxu1 }
 0x11b   :  { %v774_v46 = vadd.f32 %v1045_v42, %v733_v34  ;;  %v1067_v48 = vadd.f32 %v1066_v47, %v1065_v45  ;;  %v812_v49 = vadd.f32 %v1064_v44, %v771_v41 }
 0x11d   :  { %v815_v50 = vadd.f32 %v1067_v48, %v774_v46 }
 0x135   :  { %v852_v51 = vpop.f32.mrb[8].mxu0 }
 0x136   :  { %v853_v52 = vadd.f32 %v852_v51, %v812_v49  ;;  %v1095_v53 = vpop.f32.mrb[9].mxu0 }
 0x137   :  { %v855_v54 = vpop.f32.mrb[10].mxu0 }
 0x138   :  { %v969_v55 = vmul.f32 -1.442695, %v853_v52  ;;  %v856_v56 = vadd.f32 %v855_v54, %v815_v50  ;;  %v1096_v57 = vpop.f32.mrb[11].mxu0 }
 0x13a   :  { %1184 = vpow2.f32 %v969_v55  ;;  %v970_v58 = vmul.f32 -1.442695, %v856_v56 }
 0x13c   :  { %1186 = vpow2.f32 %v970_v58 }
 0x144   :  { %v1185_v59 = vpop.eup %1184 }
 0x145   :  { %v865_v60 = vadd.f32 1.0, %v1185_v59 }
 0x146   :  { %v1187_v61 = vpop.eup %1186 }
 0x147   :  { %1188 = vrcp.f32 %v865_v60  ;;  %v866_v62 = vadd.f32 1.0, %v1187_v61 }
 0x149   :  { %1190 = vrcp.f32 %v866_v62 }
 0x151   :  { %v1189_v63 = vpop.eup %1188 }
 0x152   :  { %v871_v1 = vmul.f32 %v1189_v63, %v853_v52 }
 0x153   :  { %v1191_v0 = vpop.eup %1190 }
 0x154   :  { %v872_v2 = vmul.f32 %v1191_v0, %v856_v56 }
 0x156   :  { %v978_v3 = vpack.c.bf16 %v872_v2, %v871_v1 }
 0x158   :  { %979 = vst [vmem:[%s1466_s3] sm:$0xff] %v978_v3  }

// kernel: seg_no_ffm_forward.33
= control target key start
LH: loop header
LB: loop body
LE: loop exit
PB: predicated region body
PF: predicated region fallthrough
CT: control target
= control target key end

     0   :  { %v633_v1 = vmov 0   ;;  %v417_v56 = vlaneseq  ;;  %s826_s2 = inlined_call_operand.vmem [shape: bf16[256,256], index: 2, kind: input, shape index: {}]   ;;  %s827_s3 = inlined_call_operand.vmem [shape: bf16[128,256], index: 3, kind: input, shape index: {}]   ;;  %s828_s1 = inlined_call_operand.vmem [shape: bf16[16,128], index: 1, kind: input, shape index: {}]   ;;  %s829_s0 = inlined_call_operand.vmem [shape: bf16[16,256], index: 0, kind: input, shape index: {}]   ;;  %s830_s4 = inlined_call_operand.vmem [shape: f32[1,256], index: 4, kind: input, shape index: {}]   ;;  %s831_s5 = inlined_call_operand.vmem [shape: bf16[16,256], index: 5, kind: output, shape index: {}]  }
   0x1   :  { %v541_v0 = vld [vmem:[%s826_s2 + $0x4] ss:$8 sps:$4 sm:$0xff]   ;;  %191 = vmatprep.mubr.bf16.mxu1 %v633_v1  ;;  %v543_v2 = vld [vmem:[%s826_s2] ss:$8 sps:$4 sm:$0xff]   ;;  %v544_v3 = vld [vmem:[%s826_s2 + $0x14] ss:$8 sps:$4 sm:$0xff]  }
   0x2   :  { %372 = vmatprep.subr.bf16.mxu0 %v541_v0  ;;  %v546_v4 = vld [vmem:[%s826_s2 + $0x10] ss:$8 sps:$4 sm:$0xff]   ;;  %v547_v5 = vld [vmem:[%s826_s2 + $0x24] ss:$8 sps:$4 sm:$0xff]   ;;  %v549_v6 = vld [vmem:[%s826_s2 + $0x20] ss:$8 sps:$4 sm:$0xff]  }
   0x3   :  { %373 = vmatpush1.bf16.msra.mxu0 %v543_v2  ;;  %v550_v7 = vld [vmem:[%s826_s2 + $0x34] ss:$8 sps:$4 sm:$0xff]   ;;  %v552_v8 = vld [vmem:[%s826_s2 + $0x30] ss:$8 sps:$4 sm:$0xff]   ;;  %v564_v9 = vld [vmem:[%s827_s3 + $0x4] ss:$8 sps:$4 sm:$0xff]  }
   0x4   :  { %374 = vmatprep.subr.bf16.mxu0 %v544_v3  ;;  %v567_v10 = vld [vmem:[%s827_s3] ss:$8 sps:$4 sm:$0xff]   ;;  %v553_v11 = vld [vmem:[%s826_s2 + $0x44] ss:$8 sps:$4 sm:$0xff]   ;;  %159 = vmatprep.subr.bf16.mxu1 %v564_v9  ;;  %v570_v12 = vld [vmem:[%s827_s3 + $0x14] ss:$8 sps:$4 sm:$0xff]  }
   0x5   :  { %160 = vmatpush1.bf16.msra.mxu1 %v567_v10  ;;  %v573_v13 = vld [vmem:[%s827_s3 + $0x10] ss:$8 sps:$4 sm:$0xff]   ;;  %v555_v14 = vld [vmem:[%s826_s2 + $0x40] ss:$8 sps:$4 sm:$0xff]   ;;  %v556_v15 = vld [vmem:[%s826_s2 + $0x54] ss:$8 sps:$4 sm:$0xff]  }
   0x6   :  { %161 = vmatprep.subr.bf16.mxu1 %v570_v12  ;;  %v576_v16 = vld [vmem:[%s827_s3 + $0x24] ss:$8 sps:$4 sm:$0xff]   ;;  %v579_v17 = vld [vmem:[%s827_s3 + $0x20] ss:$8 sps:$4 sm:$0xff]   ;;  %v558_v18 = vld [vmem:[%s826_s2 + $0x50] ss:$8 sps:$4 sm:$0xff]  }
   0x7   :  { %375 = vmatpush1.bf16.msra.mxu0 %v546_v4  ;;  %v582_v19 = vld [vmem:[%s827_s3 + $0x34] ss:$8 sps:$4 sm:$0xff]   ;;  %v559_v20 = vld [vmem:[%s826_s2 + $0x64] ss:$8 sps:$4 sm:$0xff]   ;;  %v561_v21 = vld [vmem:[%s826_s2 + $0x60] ss:$8 sps:$4 sm:$0xff]  }
   0x8   :  { %376 = vmatprep.subr.bf16.mxu0 %v547_v5  ;;  %v585_v22 = vld [vmem:[%s827_s3 + $0x30] ss:$8 sps:$4 sm:$0xff]   ;;  %v588_v23 = vld [vmem:[%s827_s3 + $0x44] ss:$8 sps:$4 sm:$0xff]   ;;  %v562_v24 = vld [vmem:[%s826_s2 + $0x74] ss:$8 sps:$4 sm:$0xff]  }
   0x9   :  { %162 = vmatpush1.bf16.msra.mxu1 %v573_v13  ;;  %v591_v25 = vld [vmem:[%s827_s3 + $0x40] ss:$8 sps:$4 sm:$0xff]   ;;  %v566_v26 = vld [vmem:[%s826_s2 + $0x70] ss:$8 sps:$4 sm:$0xff]   ;;  %v594_v27 = vld [vmem:[%s827_s3 + $0x54] ss:$8 sps:$4 sm:$0xff]  }
   0xa   :  { %163 = vmatprep.subr.bf16.mxu1 %v576_v16  ;;  %v568_v28 = vld [vmem:[%s826_s2 + $0x84] ss:$8 sps:$4 sm:$0xff]   ;;  %v572_v29 = vld [vmem:[%s826_s2 + $0x80] ss:$8 sps:$4 sm:$0xff]   ;;  %v597_v30 = vld [vmem:[%s827_s3 + $0x50] ss:$8 sps:$4 sm:$0xff]  }
   0xb   :  { %377 = vmatpush1.bf16.msra.mxu0 %v549_v6  ;;  %v600_v31 = vld [vmem:[%s827_s3 + $0x64] ss:$8 sps:$4 sm:$0xff]   ;;  %v574_v32 = vld [vmem:[%s826_s2 + $0x94] ss:$8 sps:$4 sm:$0xff]   ;;  %v603_v33 = vld [vmem:[%s827_s3 + $0x60] ss:$8 sps:$4 sm:$0xff]  }
   0xc   :  { %378 = vmatprep.subr.bf16.mxu0 %v550_v7  ;;  %v616_v34 = vld [vmem:[%s829_s0 + $0x4] ss:$8 sps:$4 sm:$0xff]   ;;  %v578_v35 = vld [vmem:[%s826_s2 + $0x90] ss:$8 sps:$4 sm:$0xff]   ;;  %v606_v36 = vld [vmem:[%s827_s3 + $0x74] ss:$8 sps:$4 sm:$0xff]  }
   0xd   :  { %164 = vmatpush1.bf16.msra.mxu1 %v579_v17  ;;  %v580_v37 = vld [vmem:[%s826_s2 + $0xa4] ss:$8 sps:$4 sm:$0xff]   ;;  %404 = vmatprep.mubr.bf16.mxu0 %v616_v34  ;;  %v609_v38 = vld [vmem:[%s827_s3 + $0x70] ss:$8 sps:$4 sm:$0xff]   ;;  %v584_v39 = vld [vmem:[%s826_s2 + $0xa0] ss:$8 sps:$4 sm:$0xff]  }
   0xe   :  { %165 = vmatprep.subr.bf16.mxu1 %v582_v19  ;;  %v586_v40 = vld [vmem:[%s826_s2 + $0xb4] ss:$8 sps:$4 sm:$0xff]   ;;  %v612_v41 = vld [vmem:[%s828_s1] sm:$0xff]   ;;  %v590_v42 = vld [vmem:[%s826_s2 + $0xb0] ss:$8 sps:$4 sm:$0xff]   ;;  %v418_v57 = vshrl.u32 %v417_v56, 7 }
   0xf   :  { %379 = vmatpush1.bf16.msra.mxu0 %v552_v8  ;;  %v592_v43 = vld [vmem:[%s826_s2 + $0xc4] ss:$8 sps:$4 sm:$0xff]   ;;  %v596_v44 = vld [vmem:[%s826_s2 + $0xc0] ss:$8 sps:$4 sm:$0xff]   ;;  %v598_v45 = vld [vmem:[%s826_s2 + $0xd4] ss:$8 sps:$4 sm:$0xff]  }
  0x10   :  { %380 = vmatprep.subr.bf16.mxu0 %v553_v11  ;;  %v602_v46 = vld [vmem:[%s826_s2 + $0xd0] ss:$8 sps:$4 sm:$0xff]   ;;  %v604_v47 = vld [vmem:[%s826_s2 + $0xe4] ss:$8 sps:$4 sm:$0xff]   ;;  %v608_v48 = vld [vmem:[%s826_s2 + $0xe0] ss:$8 sps:$4 sm:$0xff]  }
  0x11   :  { %166 = vmatpush1.bf16.msra.mxu1 %v585_v22  ;;  %v610_v49 = vld [vmem:[%s826_s2 + $0xf4] ss:$8 sps:$4 sm:$0xff]   ;;  %v613_v50 = vld [vmem:[%s826_s2 + $0xf0] ss:$8 sps:$4 sm:$0xff]   ;;  %v614_v51 = vld [vmem:[%s829_s0] ss:$8 sps:$4 sm:$0xff]  }
  0x12   :  { %167 = vmatprep.subr.bf16.mxu1 %v588_v23  ;;  %v419_v58 = vsub.s32 0, %v418_v57  ;;  %v415_v59 = vld [vmem:[%s830_s4] sm:$0x3]  ;;  %v423_v60 = vsub.s32 1, %v418_v57 }
  0x13   :  { %381 = vmatpush1.bf16.msra.mxu0 %v555_v14 }
  0x14   :  { %382 = vmatprep.subr.bf16.mxu0 %v556_v15  ;;  %v420_v61 = vrot.slane %v415_v59, %v419_v58  ;;  %v424_v63 = vrot.slane %v415_v59, %v423_v60 }
  0x15   :  { %168 = vmatpush1.bf16.msra.mxu1 %v591_v25 }
  0x16   :  { %169 = vmatprep.subr.bf16.mxu1 %v594_v27 }
  0x17   :  { %383 = vmatpush1.bf16.msra.mxu0 %v558_v18 }
  0x18   :  { %384 = vmatprep.subr.bf16.mxu0 %v559_v20 }
  0x19   :  { %170 = vmatpush1.bf16.msra.mxu1 %v597_v30 }
  0x1a   :  { %171 = vmatprep.subr.bf16.mxu1 %v600_v31 }
  0x1b   :  { %385 = vmatpush1.bf16.msra.mxu0 %v561_v21 }
  0x1c   :  { %386 = vmatprep.subr.bf16.mxu0 %v562_v24 }
  0x1d   :  { %172 = vmatpush1.bf16.msra.mxu1 %v603_v33 }
  0x1e   :  { %173 = vmatprep.subr.bf16.mxu1 %v606_v36 }
  0x1f   :  { %387 = vmatpush1.bf16.msra.mxu0 %v566_v26 }
  0x20   :  { %388 = vmatprep.subr.bf16.mxu0 %v568_v28 }
  0x21   :  { %174 = vmatpush1.bf16.msra.mxu1 %v609_v38 }
  0x23   :  { %389 = vmatpush1.bf16.msra.mxu0 %v572_v29 }
  0x24   :  { %390 = vmatprep.subr.bf16.mxu0 %v574_v32  ;;  %192 = vmatmul.mubr.bf16.vlgmr.msra.gmra.mrb[0].mxu1 %v612_v41 }
  0x27   :  { %391 = vmatpush1.bf16.msra.mxu0 %v578_v35 }
  0x28   :  { %392 = vmatprep.subr.bf16.mxu0 %v580_v37 }
  0x2b   :  { %393 = vmatpush1.bf16.msra.mxu0 %v584_v39 }
  0x2c   :  { %394 = vmatprep.subr.bf16.mxu0 %v586_v40 }
  0x2f   :  { %395 = vmatpush1.bf16.msra.mxu0 %v590_v42 }
  0x30   :  { %396 = vmatprep.subr.bf16.mxu0 %v592_v43 }
  0x33   :  { %397 = vmatpush1.bf16.msra.mxu0 %v596_v44 }
  0x34   :  { %398 = vmatprep.subr.bf16.mxu0 %v598_v45 }
  0x37   :  { %399 = vmatpush1.bf16.msra.mxu0 %v602_v46 }
  0x38   :  { %400 = vmatprep.subr.bf16.mxu0 %v604_v47 }
  0x3b   :  { %401 = vmatpush1.bf16.msra.mxu0 %v608_v48 }
  0x3c   :  { %402 = vmatprep.subr.bf16.mxu0 %v610_v49 }
  0x3f   :  { %403 = vmatpush1.bf16.msra.mxu0 %v613_v50 }
  0x42   :  { %405 = vmatmul.mubr.bf16.vlgmr.msra.gmra.mrb[0].mxu0 %v614_v51 }
  0xf7   :  { %v193_v52 = vpop.f32.mrb[0].mxu1 }
  0xf8   :  { %v195_v53 = vpop.f32.mrb[1].mxu1 }
  0xf9   :  { %v197_v54 = vpop.f32.mrb[2].mxu1 }
  0xfa   :  { %v199_v55 = vpop.f32.mrb[3].mxu1 }
 0x115   :  { %v406_v62 = vpop.f32.mrb[0].mxu0 }
 0x116   :  { %v407_v0 = vadd.f32 %v406_v62, %v193_v52  ;;  %v408_v1 = vpop.f32.mrb[1].mxu0 }
 0x117   :  { %v409_v2 = vadd.f32 %v408_v1, %v195_v53  ;;  %v410_v3 = vpop.f32.mrb[2].mxu0 }
 0x118   :  { %v427_v4 = vadd.f32 %v420_v61, %v407_v0  ;;  %v411_v5 = vadd.f32 %v410_v3, %v197_v54  ;;  %v412_v6 = vpop.f32.mrb[3].mxu0 }
 0x119   :  { %v428_v7 = vadd.f32 %v424_v63, %v409_v2  ;;  %v413_v8 = vadd.f32 %v412_v6, %v199_v55 }
 0x11a   :  { %v528_v9 = vmul.f32 -1.442695, %v427_v4  ;;  %v429_v10 = vadd.f32 %v420_v61, %v411_v5 }
 0x11b   :  { %v529_v11 = vmul.f32 -1.442695, %v428_v7  ;;  %v430_v12 = vadd.f32 %v424_v63, %v413_v8 }
 0x11c   :  { %617 = vpow2.f32 %v528_v9  ;;  %v530_v13 = vmul.f32 -1.442695, %v429_v10 }
 0x11d   :  { %619 = vpow2.f32 %v529_v11  ;;  %v531_v14 = vmul.f32 -1.442695, %v430_v12 }
 0x11e   :  { %621 = vpow2.f32 %v530_v13 }
 0x11f   :  { %623 = vpow2.f32 %v531_v14 }
 0x126   :  { %v618_v15 = vpop.eup %617 }
 0x127   :  { %v620_v16 = vpop.eup %619  ;;  %v443_v17 = vadd.f32 1.0, %v618_v15 }
 0x128   :  { %v622_v18 = vpop.eup %621  ;;  %v444_v19 = vadd.f32 1.0, %v620_v16 }
 0x129   :  { %v624_v20 = vpop.eup %623  ;;  %625 = vrcp.f32 %v443_v17  ;;  %v445_v21 = vadd.f32 1.0, %v622_v18 }
 0x12a   :  { %627 = vrcp.f32 %v444_v19  ;;  %v446_v22 = vadd.f32 1.0, %v624_v20 }
 0x12b   :  { %629 = vrcp.f32 %v445_v21 }
 0x12c   :  { %631 = vrcp.f32 %v446_v22 }
 0x133   :  { %v626_v23 = vpop.eup %625 }
 0x134   :  { %v628_v24 = vpop.eup %627  ;;  %v455_v25 = vmul.f32 %v626_v23, %v427_v4 }
 0x135   :  { %v630_v26 = vpop.eup %629  ;;  %v456_v27 = vmul.f32 %v628_v24, %v428_v7 }
 0x136   :  { %v632_v28 = vpop.eup %631  ;;  %v457_v29 = vmul.f32 %v630_v26, %v429_v10 }
 0x137   :  { %v534_v30 = vpack.c.bf16 %v456_v27, %v455_v25  ;;  %v458_v31 = vmul.f32 %v632_v28, %v430_v12 }
 0x139   :  { %471 = vst [vmem:[%s831_s5] sm:$0xff] %v534_v30  ;;  %v535_v32 = vpack.c.bf16 %v458_v31, %v457_v29 }
 0x13b   :  { %472 = vst [vmem:[%s831_s5 + $0x8] sm:$0xff] %v535_v32 }

// kernel: seg_no_ffm_forward.34
= control target key start
LH: loop header
LB: loop body
LE: loop exit
PB: predicated region body
PF: predicated region fallthrough
CT: control target
= control target key end

     0   :  { %vm330_vm0 = vcmask 654336   ;;  %s910_s3 = inlined_call_operand.vmem [shape: bf16[256,128], index: 3, kind: input, shape index: {}]   ;;  %s911_s2 = inlined_call_operand.vmem [shape: bf16[80,128], index: 2, kind: input, shape index: {}]   ;;  %s912_s1 = inlined_call_operand.vmem [shape: bf16[64,256], index: 1, kind: input, shape index: {}]   ;;  %s913_s0 = inlined_call_operand.vmem [shape: bf16[64,80], index: 0, kind: input, shape index: {}]   ;;  %s914_s4 = inlined_call_operand.vmem [shape: f32[1,128], index: 4, kind: input, shape index: {}]   ;;  %s915_s5 = inlined_call_operand.vmem [shape: bf16[64,128], index: 5, kind: output, shape index: {}]  }
   0x1   :  { %v675_v0 = vld [vmem:[%s910_s3 + $0x40] sm:$0xff]   ;;  %v677_v2 = vld [vmem:[%s910_s3 + $0x48] sm:$0xff]   ;;  %v679_v4 = vld [vmem:[%s910_s3 + $0x50] sm:$0xff]  }
   0x2   :  { %v676_v1 = vld [vmem:[%s910_s3] sm:$0xff]   ;;  %608 = vmatprep.subr.bf16.mxu0 %v675_v0  ;;  %v678_v3 = vld [vmem:[%s910_s3 + $0x8] sm:$0xff]   ;;  %v680_v5 = vld [vmem:[%s910_s3 + $0x10] sm:$0xff]  }
   0x3   :  { %609 = vmatpush3.bf16.msra.mxu0 %v676_v1  ;;  %v681_v6 = vld [vmem:[%s910_s3 + $0x58] sm:$0xff]   ;;  %v683_v7 = vld [vmem:[%s911_s2] sm:$0xff]   ;;  %v686_v9 = vld [vmem:[%s911_s2 + $0x8] sm:$0xff]  }
   0x4   :  { %610 = vmatprep.subr.bf16.mxu0 %v677_v2  ;;  %v682_v8 = vld [vmem:[%s910_s3 + $0x18] sm:$0xff]   ;;  %657 = vmatprep.subr.bf16.mxu1 %v683_v7  ;;  %v684_v10 = vld [vmem:[%s910_s3 + $0x60] sm:$0xff]   ;;  %v689_v11 = vld [vmem:[%s911_s2 + $0x10] sm:$0xff]  }
   0x5   :  { %658 = vmatpush3.bf16.msra.mxu1 %v683_v7  ;;  %v685_v12 = vld [vmem:[%s910_s3 + $0x20] sm:$0xff]   ;;  %v687_v13 = vld [vmem:[%s910_s3 + $0x68] sm:$0xff]   ;;  %v692_v14 = vld [vmem:[%s911_s2 + $0x18] sm:$0xff]  }
   0x6   :  { %659 = vmatprep.subr.bf16.mxu1 %v686_v9  ;;  %v688_v15 = vld [vmem:[%s910_s3 + $0x28] sm:$0xff]   ;;  %v690_v16 = vld [vmem:[%s910_s3 + $0x70] sm:$0xff]   ;;  %v695_v17 = vld [vmem:[%s911_s2 + $0x20] sm:$0xff]  }
   0x7   :  { %611 = vmatpush3.bf16.msra.mxu0 %v678_v3  ;;  %v691_v18 = vld [vmem:[%s910_s3 + $0x30] sm:$0xff]   ;;  %v698_v19 = vld [vmem:[%s912_s1 + $0x4] ss:$8 sps:$4 sm:$0xff]   ;;  %v693_v21 = vld [vmem:[%s910_s3 + $0x78] sm:$0xff]  }
   0x8   :  { %612 = vmatprep.subr.bf16.mxu0 %v679_v4  ;;  %v699_v20 = vld [vmem:[%s913_s0] sm:$0xff]   ;;  %247 = vmatprep.mubr.bf16.mxu0 %v698_v19  ;;  %v694_v22 = vld [vmem:[%s910_s3 + $0x38] sm:$0xff]   ;;  %v700_v23 = vld [vmem:[%s913_s0 + $0x8] sm:$0xff]  }
   0x9   :  { %660 = vmatpush3.bf16.msra.mxu1 %v686_v9  ;;  %667 = vmatprep.mubr.msk.bf16.mxu1 %vm330_vm0, %v699_v20  ;;  %v707_v24 = vld [vmem:[%s913_s0 + $0x10] sm:$0xff]   ;;  %v696_v25 = vld [vmem:[%s912_s1] ss:$8 sps:$4 sm:$0xff]   ;;  %v708_v27 = vld [vmem:[%s913_s0 + $0x18] sm:$0xff]  }
   0xa   :  { %661 = vmatprep.subr.bf16.mxu1 %v689_v11  ;;  %v701_v26 = vld [vmem:[%s912_s1 + $0x14] ss:$8 sps:$4 sm:$0xff]   ;;  %v703_v28 = vld [vmem:[%s912_s1 + $0x10] ss:$8 sps:$4 sm:$0xff]   ;;  %v704_v29 = vld [vmem:[%s912_s1 + $0x24] ss:$8 sps:$4 sm:$0xff]  }
   0xb   :  { %613 = vmatpush3.bf16.msra.mxu0 %v680_v5  ;;  %v706_v30 = vld [vmem:[%s912_s1 + $0x20] ss:$8 sps:$4 sm:$0xff]   ;;  %v709_v31 = vld [vmem:[%s912_s1 + $0x34] ss:$8 sps:$4 sm:$0xff]   ;;  %v711_v32 = vld [vmem:[%s912_s1 + $0x30] ss:$8 sps:$4 sm:$0xff]  }
   0xc   :  { %614 = vmatprep.subr.bf16.mxu0 %v681_v6  ;;  %v880_v42 = vld [vmem:[%s914_s4] ss:$0 sm:$0xff] }
   0xd   :  { %662 = vmatpush3.bf16.msra.mxu1 %v689_v11 }
   0xe   :  { %663 = vmatprep.subr.bf16.mxu1 %v692_v14 }
   0xf   :  { %615 = vmatpush3.bf16.msra.mxu0 %v682_v8 }
  0x10   :  { %616 = vmatprep.subr.bf16.mxu0 %v684_v10 }
  0x11   :  { %664 = vmatpush3.bf16.msra.mxu1 %v692_v14 }
  0x12   :  { %665 = vmatprep.subr.bf16.mxu1 %v695_v17 }
  0x13   :  { %617 = vmatpush3.bf16.msra.mxu0 %v685_v12 }
  0x14   :  { %618 = vmatprep.subr.bf16.mxu0 %v687_v13 }
  0x15   :  { %666 = vmatpush3.bf16.msra.mxu1 %v695_v17 }
  0x17   :  { %619 = vmatpush3.bf16.msra.mxu0 %v688_v15 }
  0x18   :  { %620 = vmatprep.subr.bf16.mxu0 %v690_v16  ;;  %668 = vmatmul.mubr.msk.bf16.vlgmr.msra.gmra.mrb[0].mxu1 %vm330_vm0, %v700_v23 }
  0x19   :  { %671 = vmatprep.mubr.msk.bf16.mxu1 %vm330_vm0, %v707_v24 }
  0x1b   :  { %621 = vmatpush3.bf16.msra.mxu0 %v691_v18 }
  0x1c   :  { %622 = vmatprep.subr.bf16.mxu0 %v693_v21 }
  0x1f   :  { %623 = vmatpush3.bf16.msra.mxu0 %v694_v22 }
  0x20   :  { %672 = vmatmul.mubr.msk.bf16.gmra.mrb[4].mxu1 %vm330_vm0, %v708_v27 }
  0x22   :  { %248 = vmatmul.mubr.bf16.vlgmr.msra.gmra.mrb[0].mxu0 %v696_v25 }
  0x23   :  { %255 = vmatprep.mubr.bf16.mxu0 %v701_v26 }
  0x2a   :  { %256 = vmatmul.mubr.bf16.gmra.mrb[4].mxu0 %v703_v28 }
  0x2b   :  { %263 = vmatprep.mubr.bf16.mxu0 %v704_v29 }
  0x32   :  { %264 = vmatmul.mubr.bf16.gmra.mrb[8].mxu0 %v706_v30 }
  0x33   :  { %271 = vmatprep.mubr.bf16.mxu0 %v709_v31 }
  0x3a   :  { %272 = vmatmul.mubr.bf16.gmra.mrb[12].mxu0 %v711_v32 }
  0xeb   :  { %v669_v33 = vpop.f32.mrb[0].mxu1 }
  0xec   :  { %v377_v34 = vpop.f32.mrb[1].mxu1 }
  0xed   :  { %v670_v35 = vpop.f32.mrb[2].mxu1 }
  0xee   :  { %v380_v36 = vpop.f32.mrb[3].mxu1 }
  0xf3   :  { %v673_v45 = vpop.f32.mrb[4].mxu1 }
  0xf4   :  { %v393_v46 = vpop.f32.mrb[5].mxu1 }
  0xf5   :  { %v624_v37 = vpop.f32.mrb[0].mxu0  ;;  %v674_v49 = vpop.f32.mrb[6].mxu1 }
  0xf6   :  { %v625_v38 = vpop.f32.mrb[1].mxu0  ;;  %v396_v50 = vpop.f32.mrb[7].mxu1 }
  0xf7   :  { %v626_v39 = vadd.f32 %v625_v38, %v624_v37  ;;  %v627_v40 = vpop.f32.mrb[2].mxu0 }
  0xf8   :  { %v628_v41 = vpop.f32.mrb[3].mxu0 }
  0xf9   :  { %v629_v43 = vadd.f32 %v628_v41, %v627_v40  ;;  %v378_v44 = vadd.f32 %v626_v39, %v377_v34 }
  0xfb   :  { %v883_v47 = vadd.f32 %v880_v42, %v378_v44  ;;  %v381_v48 = vadd.f32 %v629_v43, %v380_v36 }
  0xfd   :  { %v561_v51 = vmul.f32 -1.442695, %v883_v47  ;;  %v416_v52 = vadd.f32 %v880_v42, %v381_v48  ;;  %v630_v53 = vpop.f32.mrb[4].mxu0 }
  0xfe   :  { %v631_v54 = vpop.f32.mrb[5].mxu0 }
  0xff   :  { %712 = vpow2.f32 %v561_v51  ;;  %v562_v55 = vmul.f32 -1.442695, %v416_v52  ;;  %v632_v56 = vadd.f32 %v631_v54, %v630_v53  ;;  %v633_v57 = vpop.f32.mrb[6].mxu0 }
 0x100   :  { %v634_v58 = vpop.f32.mrb[7].mxu0 }
 0x101   :  { %714 = vpow2.f32 %v562_v55  ;;  %v386_v59 = vadd.f32 %v669_v33, %v632_v56  ;;  %v635_v60 = vadd.f32 %v634_v58, %v633_v57 }
 0x103   :  { %v888_v61 = vadd.f32 %v880_v42, %v386_v59  ;;  %v389_v62 = vadd.f32 %v670_v35, %v635_v60 }
 0x105   :  { %v563_v63 = vmul.f32 -1.442695, %v888_v61  ;;  %v418_v0 = vadd.f32 %v880_v42, %v389_v62  ;;  %v636_v1 = vpop.f32.mrb[8].mxu0 }
 0x106   :  { %v637_v2 = vpop.f32.mrb[9].mxu0 }
 0x107   :  { %716 = vpow2.f32 %v563_v63  ;;  %v564_v3 = vmul.f32 -1.442695, %v418_v0  ;;  %v638_v4 = vadd.f32 %v637_v2, %v636_v1  ;;  %v639_v5 = vpop.f32.mrb[10].mxu0 }
 0x108   :  { %v640_v6 = vpop.f32.mrb[11].mxu0 }
 0x109   :  { %v713_v7 = vpop.eup %712  ;;  %718 = vpow2.f32 %v564_v3  ;;  %v641_v8 = vadd.f32 %v640_v6, %v639_v5  ;;  %v394_v9 = vadd.f32 %v638_v4, %v393_v46 }
 0x10a   :  { %v447_v10 = vadd.f32 1.0, %v713_v7 }
 0x10b   :  { %v715_v11 = vpop.eup %714  ;;  %v419_v12 = vadd.f32 %v880_v42, %v394_v9  ;;  %v397_v13 = vadd.f32 %v641_v8, %v396_v50 }
 0x10c   :  { %720 = vrcp.f32 %v447_v10  ;;  %v448_v14 = vadd.f32 1.0, %v715_v11 }
 0x10d   :  { %v565_v15 = vmul.f32 -1.442695, %v419_v12  ;;  %v420_v16 = vadd.f32 %v880_v42, %v397_v13  ;;  %v642_v17 = vpop.f32.mrb[12].mxu0 }
 0x10e   :  { %722 = vrcp.f32 %v448_v14  ;;  %v643_v18 = vpop.f32.mrb[13].mxu0 }
 0x10f   :  { %724 = vpow2.f32 %v565_v15  ;;  %v566_v19 = vmul.f32 -1.442695, %v420_v16  ;;  %v644_v20 = vadd.f32 %v643_v18, %v642_v17  ;;  %v645_v21 = vpop.f32.mrb[14].mxu0 }
 0x110   :  { %v646_v22 = vpop.f32.mrb[15].mxu0 }
 0x111   :  { %v717_v23 = vpop.eup %716  ;;  %726 = vpow2.f32 %v566_v19  ;;  %v402_v24 = vadd.f32 %v673_v45, %v644_v20  ;;  %v647_v25 = vadd.f32 %v646_v22, %v645_v21 }
 0x112   :  { %v449_v26 = vadd.f32 1.0, %v717_v23 }
 0x113   :  { %v719_v27 = vpop.eup %718  ;;  %v421_v28 = vadd.f32 %v880_v42, %v402_v24  ;;  %v405_v29 = vadd.f32 %v674_v49, %v647_v25 }
 0x114   :  { %728 = vrcp.f32 %v449_v26  ;;  %v450_v30 = vadd.f32 1.0, %v719_v27 }
 0x115   :  { %v567_v31 = vmul.f32 -1.442695, %v421_v28  ;;  %v422_v32 = vadd.f32 %v880_v42, %v405_v29 }
 0x116   :  { %v721_v33 = vpop.eup %720  ;;  %730 = vrcp.f32 %v450_v30 }
 0x117   :  { %732 = vpow2.f32 %v567_v31  ;;  %v568_v34 = vmul.f32 -1.442695, %v422_v32  ;;  %v471_v37 = vmul.f32 %v721_v33, %v883_v47 }
 0x118   :  { %v723_v35 = vpop.eup %722 }
 0x119   :  { %v725_v36 = vpop.eup %724  ;;  %v472_v38 = vmul.f32 %v723_v35, %v416_v52  ;;  %734 = vpow2.f32 %v568_v34 }
 0x11a   :  { %v451_v39 = vadd.f32 1.0, %v725_v36 }
 0x11b   :  { %v727_v40 = vpop.eup %726  ;;  %v588_v41 = vpack.c.bf16 %v472_v38, %v471_v37 }
 0x11c   :  { %736 = vrcp.f32 %v451_v39  ;;  %v452_v43 = vadd.f32 1.0, %v727_v40 }
 0x11d   :  { %589 = vst [vmem:[%s915_s5] sm:$0xff] %v588_v41  }
 0x11e   :  { %v729_v42 = vpop.eup %728  ;;  %738 = vrcp.f32 %v452_v43 }
 0x11f   :  { %v473_v46 = vmul.f32 %v729_v42, %v888_v61 }
 0x120   :  { %v731_v44 = vpop.eup %730 }
 0x121   :  { %v733_v45 = vpop.eup %732  ;;  %v474_v48 = vmul.f32 %v731_v44, %v418_v0 }
 0x122   :  { %v453_v49 = vadd.f32 1.0, %v733_v45 }
 0x123   :  { %v735_v47 = vpop.eup %734  ;;  %v593_v50 = vpack.c.bf16 %v474_v48, %v473_v46 }
 0x124   :  { %740 = vrcp.f32 %v453_v49  ;;  %v454_v51 = vadd.f32 1.0, %v735_v47 }
 0x125   :  { %605 = vst [vmem:[%s915_s5 + $0x8] sm:$0xff] %v593_v50  }
 0x126   :  { %v737_v52 = vpop.eup %736  ;;  %742 = vrcp.f32 %v454_v51 }
 0x127   :  { %v475_v54 = vmul.f32 %v737_v52, %v419_v12 }
 0x128   :  { %v739_v53 = vpop.eup %738 }
 0x129   :  { %v476_v55 = vmul.f32 %v739_v53, %v420_v16 }
 0x12b   :  { %v598_v56 = vpack.c.bf16 %v476_v55, %v475_v54 }
 0x12d   :  { %606 = vst [vmem:[%s915_s5 + $0x10] sm:$0xff] %v598_v56  }
 0x12e   :  { %v741_v57 = vpop.eup %740 }
 0x12f   :  { %v477_v59 = vmul.f32 %v741_v57, %v421_v28 }
 0x130   :  { %v743_v58 = vpop.eup %742 }
 0x131   :  { %v478_v60 = vmul.f32 %v743_v58, %v422_v32 }
 0x133   :  { %v603_v61 = vpack.c.bf16 %v478_v60, %v477_v59 }
 0x135   :  { %607 = vst [vmem:[%s915_s5 + $0x18] sm:$0xff] %v603_v61  }

// kernel: seg_no_ffm_forward.35
= control target key start
LH: loop header
LB: loop body
LE: loop exit
PB: predicated region body
PF: predicated region fallthrough
CT: control target
= control target key end

     0   :  { %vm434_vm0 = vcmask 523264   ;;  %vm730_vm1 = vcmask 519168   ;;  %s1266_s1 = inlined_call_operand.vmem [shape: bf16[576,64], index: 1, kind: input, shape index: {}]   ;;  %s1267_s0 = inlined_call_operand.vmem [shape: bf16[64,576], index: 0, kind: input, shape index: {}]   ;;  %s1268_s2 = inlined_call_operand.vmem [shape: f32[1,64], index: 2, kind: input, shape index: {}]   ;;  %s1269_s3 = inlined_call_operand.vmem [shape: bf16[64,64], index: 3, kind: output, shape index: {}]  }
   0x1   :  { %v940_v0 = vld [vmem:[%s1266_s1 + $0x40] sm:$0xff]   ;;  %v944_v4 = vld [vmem:[%s1266_s1 + $0x48] sm:$0xff]   ;;  %v948_v8 = vld [vmem:[%s1266_s1 + $0x50] sm:$0xff]  }
   0x2   :  { %v941_v1 = vld [vmem:[%s1266_s1 + $0xc0] sm:$0xff]   ;;  %828 = vmatprep.subr.bf16.mxu0 %v940_v0  ;;  %v945_v5 = vld [vmem:[%s1266_s1 + $0xc8] sm:$0xff]   ;;  %v949_v9 = vld [vmem:[%s1266_s1 + $0xd0] sm:$0xff]  }
   0x3   :  { %v942_v2 = vld [vmem:[%s1266_s1] sm:$0xff]   ;;  %868 = vmatprep.subr.bf16.mxu1 %v941_v1  ;;  %v946_v6 = vld [vmem:[%s1266_s1 + $0x8] sm:$0xff]   ;;  %v950_v10 = vld [vmem:[%s1266_s1 + $0x10] sm:$0xff]  }
   0x4   :  { %v943_v3 = vld [vmem:[%s1266_s1 + $0x80] sm:$0xff]   ;;  %829 = vmatpush3.bf16.msra.mxu0 %v942_v2  ;;  %v947_v7 = vld [vmem:[%s1266_s1 + $0x88] sm:$0xff]   ;;  %v951_v11 = vld [vmem:[%s1266_s1 + $0x90] sm:$0xff]  }
   0x5   :  { %869 = vmatpush3.bf16.msra.mxu1 %v943_v3  ;;  %830 = vmatprep.subr.bf16.mxu0 %v944_v4  ;;  %v952_v12 = vld [vmem:[%s1266_s1 + $0x58] sm:$0xff]   ;;  %v956_v16 = vld [vmem:[%s1266_s1 + $0x60] sm:$0xff]   ;;  %v960_v20 = vld [vmem:[%s1266_s1 + $0x68] sm:$0xff]  }
   0x6   :  { %870 = vmatprep.subr.bf16.mxu1 %v945_v5  ;;  %v953_v13 = vld [vmem:[%s1266_s1 + $0xd8] sm:$0xff]   ;;  %v957_v17 = vld [vmem:[%s1266_s1 + $0xe0] sm:$0xff]   ;;  %v961_v21 = vld [vmem:[%s1266_s1 + $0xe8] sm:$0xff]  }
   0x7   :  { %v954_v14 = vld [vmem:[%s1266_s1 + $0x18] sm:$0xff]   ;;  %v958_v18 = vld [vmem:[%s1266_s1 + $0x20] sm:$0xff]   ;;  %v962_v22 = vld [vmem:[%s1266_s1 + $0x28] sm:$0xff]  }
   0x8   :  { %831 = vmatpush3.bf16.msra.mxu0 %v946_v6  ;;  %v955_v15 = vld [vmem:[%s1266_s1 + $0x98] sm:$0xff]   ;;  %v959_v19 = vld [vmem:[%s1266_s1 + $0xa0] sm:$0xff]   ;;  %v963_v23 = vld [vmem:[%s1266_s1 + $0xa8] sm:$0xff]  }
   0x9   :  { %871 = vmatpush3.bf16.msra.mxu1 %v947_v7  ;;  %832 = vmatprep.subr.bf16.mxu0 %v948_v8  ;;  %v964_v24 = vld [vmem:[%s1266_s1 + $0x70] sm:$0xff]   ;;  %v968_v28 = vld [vmem:[%s1266_s1 + $0x78] sm:$0xff]   ;;  %v977_v35 = vld [vmem:[%s1267_s0 + $0xc] ss:$20 sps:$4 sm:$0xff]  }
   0xa   :  { %872 = vmatprep.subr.bf16.mxu1 %v949_v9  ;;  %v965_v25 = vld [vmem:[%s1266_s1 + $0xf0] sm:$0xff]   ;;  %v969_v29 = vld [vmem:[%s1266_s1 + $0xf8] sm:$0xff]   ;;  %v978_v36 = vld [vmem:[%s1266_s1 + $0x100] sm:$0xff]   ;;  %544 = vmatprep.mubr.bf16.mxu1 %v977_v35 }
   0xb   :  { %v966_v26 = vld [vmem:[%s1266_s1 + $0x30] sm:$0xff]   ;;  %v970_v30 = vld [vmem:[%s1266_s1 + $0x38] sm:$0xff]   ;;  %v979_v37 = vld [vmem:[%s1267_s0 + $0x2c] ss:$20 sps:$4 sm:$0xff]  }
   0xc   :  { %833 = vmatpush3.bf16.msra.mxu0 %v950_v10  ;;  %v967_v27 = vld [vmem:[%s1266_s1 + $0xb0] sm:$0xff]   ;;  %v971_v31 = vld [vmem:[%s1266_s1 + $0xb8] sm:$0xff]   ;;  %v985_v39 = vld [vmem:[%s1266_s1 + $0x108] sm:$0xff]  }
   0xd   :  { %873 = vmatpush3.bf16.msra.mxu1 %v951_v11  ;;  %834 = vmatprep.subr.bf16.mxu0 %v952_v12  ;;  %v972_v32 = vld [vmem:[%s1267_s0] ss:$20 sps:$4 sm:$0xff]   ;;  %v974_v33 = vld [vmem:[%s1267_s0 + $0x4] ss:$20 sps:$4 sm:$0xff]   ;;  %v975_v34 = vld [vmem:[%s1267_s0 + $0x8] ss:$20 sps:$4 sm:$0xff]  }
   0xe   :  { %874 = vmatprep.subr.bf16.mxu1 %v953_v13  ;;  %479 = vmatprep.mubr.bf16.mxu0 %v974_v33  ;;  %v981_v38 = vld [vmem:[%s1267_s0 + $0x34] ss:$20 sps:$4 sm:$0xff]   ;;  %v984_v41 = vld [vmem:[%s1267_s0 + $0x30] ss:$20 sps:$4 sm:$0xff]   ;;  %v999_v45 = vld [vmem:[%s1266_s1 + $0x118] sm:$0xff]  }
   0xf   :  { %v983_v40 = vld [vmem:[%s1267_s0 + $0x28] ss:$20 sps:$4 sm:$0xff]   ;;  %v992_v44 = vld [vmem:[%s1266_s1 + $0x110] sm:$0xff]   ;;  %v991_v47 = vld [vmem:[%s1267_s0 + $0x58] ss:$20 sps:$4 sm:$0xff]  }
  0x10   :  { %835 = vmatpush3.bf16.msra.mxu0 %v954_v14  ;;  %v986_v42 = vld [vmem:[%s1267_s0 + $0x54] ss:$20 sps:$4 sm:$0xff]   ;;  %v988_v43 = vld [vmem:[%s1267_s0 + $0x5c] ss:$20 sps:$4 sm:$0xff]   ;;  %v995_v49 = vld [vmem:[%s1267_s0 + $0x84] ss:$20 sps:$4 sm:$0xff]  }
  0x11   :  { %875 = vmatpush3.bf16.msra.mxu1 %v955_v15  ;;  %836 = vmatprep.subr.bf16.mxu0 %v956_v16  ;;  %v990_v46 = vld [vmem:[%s1267_s0 + $0x50] ss:$20 sps:$4 sm:$0xff]   ;;  %v997_v50 = vld [vmem:[%s1267_s0 + $0x78] ss:$20 sps:$4 sm:$0xff]   ;;  %v998_v51 = vld [vmem:[%s1267_s0 + $0x80] ss:$20 sps:$4 sm:$0xff]  }
  0x12   :  { %876 = vmatprep.subr.bf16.mxu1 %v957_v17  ;;  %v993_v48 = vld [vmem:[%s1267_s0 + $0x7c] ss:$20 sps:$4 sm:$0xff]   ;;  %v1001_v53 = vld [vmem:[%s1267_s0 + $0x60] ss:$20 sps:$4 sm:$0xff]   ;;  %v1002_v54 = vld [vmem:[%s1267_s0 + $0x38] ss:$20 sps:$4 sm:$0xff]  }
  0x13   :  { %v1000_v52 = vld [vmem:[%s1267_s0 + $0x10] ss:$20 sps:$4 sm:$0xff]   ;;  %v1003_v55 = vld [vmem:[%s1267_s0 + $0x88] ss:$20 sps:$4 sm:$0xff]   ;;  %v743_v58 = vld [vmem:[%s1268_s2] ss:$0 sm:$0xff] }
  0x14   :  { %837 = vmatpush3.bf16.msra.mxu0 %v958_v18 }
  0x15   :  { %877 = vmatpush3.bf16.msra.mxu1 %v959_v19  ;;  %838 = vmatprep.subr.bf16.mxu0 %v960_v20 }
  0x16   :  { %878 = vmatprep.subr.bf16.mxu1 %v961_v21 }
  0x18   :  { %839 = vmatpush3.bf16.msra.mxu0 %v962_v22 }
  0x19   :  { %879 = vmatpush3.bf16.msra.mxu1 %v963_v23  ;;  %840 = vmatprep.subr.bf16.mxu0 %v964_v24 }
  0x1a   :  { %880 = vmatprep.subr.bf16.mxu1 %v965_v25 }
  0x1c   :  { %841 = vmatpush3.bf16.msra.mxu0 %v966_v26 }
  0x1d   :  { %881 = vmatpush3.bf16.msra.mxu1 %v967_v27  ;;  %842 = vmatprep.subr.bf16.mxu0 %v968_v28 }
  0x1e   :  { %882 = vmatprep.subr.bf16.mxu1 %v969_v29 }
  0x20   :  { %843 = vmatpush3.bf16.msra.mxu0 %v970_v30 }
  0x21   :  { %883 = vmatpush3.bf16.msra.mxu1 %v971_v31  ;;  %916 = vmatprep.subr.bf16.mxu0 %v978_v36 }
  0x22   :  { %932 = vmatprep.subr.bf16.mxu1 %v978_v36 }
  0x23   :  { %480 = vmatmul.mubr.bf16.vlgmr.msra.gmra.mrb[0].mxu0 %v972_v32 }
  0x24   :  { %545 = vmatmul.mubr.bf16.vlgmr.msra.gmra.mrb[0].mxu1 %v975_v34  ;;  %917 = vmatpush3.bf16.msra.mxu0 %v978_v36 }
  0x25   :  { %936 = vmatpush3.bf16.msra.mxu1 %v978_v36  ;;  %487 = vmatprep.mubr.bf16.mxu0 %v979_v37 }
  0x26   :  { %552 = vmatprep.mubr.bf16.mxu1 %v981_v38  ;;  %918 = vmatprep.subr.bf16.mxu0 %v985_v39 }
  0x27   :  { %933 = vmatprep.subr.bf16.mxu1 %v985_v39 }
  0x28   :  { %919 = vmatpush3.bf16.msra.mxu0 %v985_v39 }
  0x29   :  { %937 = vmatpush3.bf16.msra.mxu1 %v985_v39  ;;  %920 = vmatprep.subr.bf16.mxu0 %v992_v44 }
  0x2a   :  { %934 = vmatprep.subr.bf16.mxu1 %v992_v44 }
  0x2b   :  { %488 = vmatmul.mubr.bf16.gmra.mrb[4].mxu0 %v983_v40 }
  0x2c   :  { %553 = vmatmul.mubr.bf16.gmra.mrb[4].mxu1 %v984_v41  ;;  %495 = vmatprep.mubr.bf16.mxu0 %v986_v42 }
  0x2d   :  { %560 = vmatprep.mubr.bf16.mxu1 %v988_v43  ;;  %921 = vmatpush3.bf16.msra.mxu0 %v992_v44 }
  0x2e   :  { %938 = vmatpush3.bf16.msra.mxu1 %v992_v44  ;;  %922 = vmatprep.subr.bf16.mxu0 %v999_v45 }
  0x2f   :  { %935 = vmatprep.subr.bf16.mxu1 %v999_v45 }
  0x31   :  { %923 = vmatpush3.bf16.msra.mxu0 %v999_v45 }
  0x32   :  { %939 = vmatpush3.bf16.msra.mxu1 %v999_v45 }
  0x33   :  { %496 = vmatmul.mubr.bf16.gmra.mrb[8].mxu0 %v990_v46 }
  0x34   :  { %561 = vmatmul.mubr.bf16.gmra.mrb[8].mxu1 %v991_v47  ;;  %503 = vmatprep.mubr.bf16.mxu0 %v993_v48 }
  0x35   :  { %568 = vmatprep.mubr.bf16.mxu1 %v995_v49 }
  0x3b   :  { %504 = vmatmul.mubr.bf16.gmra.mrb[12].mxu0 %v997_v50 }
  0x3c   :  { %569 = vmatmul.mubr.bf16.gmra.mrb[12].mxu1 %v998_v51  ;;  %924 = vmatprep.mubr.msk.bf16.mxu0 %vm434_vm0, %v1000_v52 }
  0x3d   :  { %928 = vmatprep.mubr.msk.bf16.mxu1 %vm434_vm0, %v1001_v53 }
  0x43   :  { %925 = vmatmul.mubr.msk.bf16.vlgmr.msra.gmra.mrb[16].mxu0 %vm434_vm0, %v1002_v54 }
  0x44   :  { %929 = vmatmul.mubr.msk.bf16.vlgmr.msra.gmra.mrb[16].mxu1 %vm434_vm0, %v1003_v55 }
  0xf6   :  { %v844_v56 = vpop.f32.mrb[0].mxu0 }
  0xf7   :  { %v884_v57 = vpop.f32.mrb[0].mxu1  ;;  %v845_v59 = vpop.f32.mrb[1].mxu0 }
  0xf8   :  { %v846_v60 = vadd.f32 %v845_v59, %v844_v56  ;;  %v885_v61 = vpop.f32.mrb[1].mxu1  ;;  %v847_v62 = vpop.f32.mrb[2].mxu0 }
  0xf9   :  { %v886_v63 = vadd.f32 %v885_v61, %v884_v57  ;;  %v887_v0 = vpop.f32.mrb[2].mxu1  ;;  %v848_v1 = vpop.f32.mrb[3].mxu0 }
  0xfa   :  { %v482_v2 = vadd.f32 %v846_v60, %v743_v58  ;;  %v849_v3 = vadd.f32 %v848_v1, %v847_v62  ;;  %v888_v4 = vpop.f32.mrb[3].mxu1 }
  0xfb   :  { %v889_v5 = vadd.f32 %v888_v4, %v887_v0 }
  0xfc   :  { %v485_v6 = vadd.f32 %v849_v3, %v743_v58  ;;  %v547_v7 = vadd.f32 %v886_v63, %v482_v2 }
  0xfe   :  { %v850_v8 = vpop.f32.mrb[4].mxu0  ;;  %v1227_v9 = vadd.f32 %v889_v5, %v485_v6 }
  0xff   :  { %v890_v10 = vpop.f32.mrb[4].mxu1  ;;  %v851_v11 = vpop.f32.mrb[5].mxu0 }
 0x100   :  { %v852_v12 = vadd.f32 %v851_v11, %v850_v8  ;;  %v891_v13 = vpop.f32.mrb[5].mxu1  ;;  %v853_v14 = vpop.f32.mrb[6].mxu0 }
 0x101   :  { %v892_v15 = vadd.f32 %v891_v13, %v890_v10  ;;  %v893_v16 = vpop.f32.mrb[6].mxu1  ;;  %v854_v17 = vpop.f32.mrb[7].mxu0 }
 0x102   :  { %v490_v18 = vadd.f32 %v852_v12, %v743_v58  ;;  %v855_v19 = vadd.f32 %v854_v17, %v853_v14  ;;  %v894_v20 = vpop.f32.mrb[7].mxu1 }
 0x103   :  { %v895_v21 = vadd.f32 %v894_v20, %v893_v16 }
 0x104   :  { %v493_v22 = vadd.f32 %v855_v19, %v743_v58  ;;  %v555_v23 = vadd.f32 %v892_v15, %v490_v18 }
 0x106   :  { %v856_v24 = vpop.f32.mrb[8].mxu0  ;;  %v558_v25 = vadd.f32 %v895_v21, %v493_v22 }
 0x107   :  { %v896_v26 = vpop.f32.mrb[8].mxu1  ;;  %v857_v27 = vpop.f32.mrb[9].mxu0 }
 0x108   :  { %v858_v28 = vadd.f32 %v857_v27, %v856_v24  ;;  %v897_v29 = vpop.f32.mrb[9].mxu1  ;;  %v859_v30 = vpop.f32.mrb[10].mxu0 }
 0x109   :  { %v898_v31 = vadd.f32 %v897_v29, %v896_v26  ;;  %v899_v32 = vpop.f32.mrb[10].mxu1  ;;  %v860_v33 = vpop.f32.mrb[11].mxu0 }
 0x10a   :  { %v498_v34 = vadd.f32 %v858_v28, %v743_v58  ;;  %v861_v35 = vadd.f32 %v860_v33, %v859_v30  ;;  %v900_v36 = vpop.f32.mrb[11].mxu1 }
 0x10b   :  { %v901_v37 = vadd.f32 %v900_v36, %v899_v32 }
 0x10c   :  { %v501_v38 = vadd.f32 %v861_v35, %v743_v58  ;;  %v563_v39 = vadd.f32 %v898_v31, %v498_v34 }
 0x10e   :  { %v862_v40 = vpop.f32.mrb[12].mxu0  ;;  %v566_v41 = vadd.f32 %v901_v37, %v501_v38 }
 0x10f   :  { %v902_v42 = vpop.f32.mrb[12].mxu1  ;;  %v863_v43 = vpop.f32.mrb[13].mxu0 }
 0x110   :  { %v864_v44 = vadd.f32 %v863_v43, %v862_v40  ;;  %v903_v45 = vpop.f32.mrb[13].mxu1  ;;  %v865_v46 = vpop.f32.mrb[14].mxu0 }
 0x111   :  { %v904_v47 = vadd.f32 %v903_v45, %v902_v42  ;;  %v905_v48 = vpop.f32.mrb[14].mxu1  ;;  %v866_v49 = vpop.f32.mrb[15].mxu0 }
 0x112   :  { %v506_v50 = vadd.f32 %v864_v44, %v743_v58  ;;  %v867_v51 = vadd.f32 %v866_v49, %v865_v46  ;;  %v906_v52 = vpop.f32.mrb[15].mxu1 }
 0x113   :  { %v907_v53 = vadd.f32 %v906_v52, %v905_v48 }
 0x114   :  { %v509_v54 = vadd.f32 %v867_v51, %v743_v58  ;;  %v571_v55 = vadd.f32 %v904_v47, %v506_v50 }
 0x116   :  { %v926_v56 = vpop.f32.mrb[16].mxu0  ;;  %v574_v57 = vadd.f32 %v907_v53, %v509_v54 }
 0x117   :  { %v620_v59 = vadd.f32 %v926_v56, %v555_v23  ;;  %v930_v60 = vpop.f32.mrb[16].mxu1  ;;  %v611_v61 = vpop.f32.mrb[17].mxu0 }
 0x118   :  { %v636_v62 = vadd.f32 %v930_v60, %v571_v55  ;;  %v612_v63 = vadd.f32 %v611_v61, %v547_v7  ;;  %v627_v0 = vpop.f32.mrb[17].mxu1  ;;  %v927_v1 = vpop.f32.mrb[18].mxu0 }
 0x119   :  { %v806_v2 = vmul.f32 -1.442695, %v620_v59  ;;  %v628_v3 = vadd.f32 %v627_v0, %v563_v39  ;;  %v623_v4 = vadd.f32 %v927_v1, %v558_v25  ;;  %v931_v5 = vpop.f32.mrb[18].mxu1  ;;  %v614_v6 = vpop.f32.mrb[19].mxu0 }
 0x11a   :  { %v810_v8 = vmul.f32 -1.442695, %v636_v62  ;;  %v804_v10 = vmul.f32 -1.442695, %v612_v63  ;;  %v639_v11 = vadd.f32 %v931_v5, %v574_v57  ;;  %v1230_v58 = vadd.f32 %v614_v6, %v1227_v9  ;;  %v630_v12 = vpop.f32.mrb[19].mxu1 }
 0x11b   :  { %1004 = vpow2.f32 %v806_v2  ;;  %v808_v13 = vmul.f32 -1.442695, %v628_v3  ;;  %v807_v14 = vmul.f32 -1.442695, %v623_v4  ;;  %v631_v15 = vadd.f32 %v630_v12, %v566_v41 }
 0x11c   :  { %1006 = vpow2.f32 %v810_v8  ;;  %v811_v7 = vmul.f32 -1.442695, %v639_v11  ;;  %v805_v16 = vmul.f32 -1.442695, %v1230_v58 }
 0x11d   :  { %1008 = vpow2.f32 %v804_v10  ;;  %v809_v17 = vmul.f32 -1.442695, %v631_v15 }
 0x11e   :  { %1010 = vpow2.f32 %v808_v13 }
 0x11f   :  { %1012 = vpow2.f32 %v807_v14 }
 0x120   :  { %1014 = vpow2.f32 %v811_v7 }
 0x121   :  { %1016 = vpow2.f32 %v805_v16 }
 0x122   :  { %1018 = vpow2.f32 %v809_v17 }
 0x125   :  { %v1005_v18 = vpop.eup %1004 }
 0x126   :  { %v1007_v19 = vpop.eup %1006  ;;  %v668_v9 = vadd.f32 1.0, %v1005_v18 }
 0x127   :  { %v1009_v20 = vpop.eup %1008  ;;  %v672_v21 = vadd.f32 1.0, %v1007_v19 }
 0x128   :  { %v1011_v22 = vpop.eup %1010  ;;  %1020 = vrcp.f32 %v668_v9  ;;  %v666_v23 = vadd.f32 1.0, %v1009_v20 }
 0x129   :  { %v1013_v24 = vpop.eup %1012  ;;  %1022 = vrcp.f32 %v672_v21  ;;  %v670_v25 = vadd.f32 1.0, %v1011_v22 }
 0x12a   :  { %v1015_v26 = vpop.eup %1014  ;;  %1024 = vrcp.f32 %v666_v23  ;;  %v669_v27 = vadd.f32 1.0, %v1013_v24 }
 0x12b   :  { %v1017_v28 = vpop.eup %1016  ;;  %1026 = vrcp.f32 %v670_v25  ;;  %v673_v29 = vadd.f32 1.0, %v1015_v26 }
 0x12c   :  { %v1019_v30 = vpop.eup %1018  ;;  %1028 = vrcp.f32 %v669_v27  ;;  %v667_v31 = vadd.f32 1.0, %v1017_v28 }
 0x12d   :  { %1030 = vrcp.f32 %v673_v29  ;;  %v671_v32 = vadd.f32 1.0, %v1019_v30 }
 0x12e   :  { %1032 = vrcp.f32 %v667_v31 }
 0x12f   :  { %1034 = vrcp.f32 %v671_v32 }
 0x132   :  { %v1021_v33 = vpop.eup %1020 }
 0x133   :  { %v1023_v34 = vpop.eup %1022  ;;  %v692_v35 = vmul.f32 %v1021_v33, %v620_v59 }
 0x134   :  { %v1025_v36 = vpop.eup %1024  ;;  %v696_v37 = vmul.f32 %v1023_v34, %v636_v62 }
 0x135   :  { %v1027_v38 = vpop.eup %1026  ;;  %v822_v39 = vpack.c.bf16 %v692_v35, %v692_v35  ;;  %v690_v40 = vmul.f32 %v1025_v36, %v612_v63 }
 0x136   :  { %v1029_v41 = vpop.eup %1028  ;;  %v826_v42 = vpack.c.bf16 %v696_v37, %v696_v37  ;;  %v694_v43 = vmul.f32 %v1027_v38, %v628_v3 }
 0x137   :  { %v1031_v44 = vpop.eup %1030  ;;  %733 = vst.msk [vmem:[%s1269_s3 + $0x8] sm:$0xf] %vm730_vm1, %v822_v39  ;;  %v820_v45 = vpack.c.bf16 %v690_v40, %v690_v40  ;;  %v693_v46 = vmul.f32 %v1029_v41, %v623_v4 }
 0x138   :  { %v1033_v47 = vpop.eup %1032  ;;  %737 = vst.msk [vmem:[%s1269_s3 + $0x18] sm:$0xf] %vm730_vm1, %v826_v42  ;;  %v824_v48 = vpack.c.bf16 %v694_v43, %v694_v43  ;;  %v697_v49 = vmul.f32 %v1031_v44, %v639_v11 }
 0x139   :  { %v1035_v50 = vpop.eup %1034  ;;  %731 = vst.msk [vmem:[%s1269_s3] sm:$0xf] %vm730_vm1, %v820_v45  ;;  %v823_v51 = vpack.c.bf16 %v693_v46, %v693_v46  ;;  %v691_v52 = vmul.f32 %v1033_v47, %v1230_v58 }
 0x13a   :  { %735 = vst.msk [vmem:[%s1269_s3 + $0x10] sm:$0xf] %vm730_vm1, %v824_v48  ;;  %v827_v53 = vpack.c.bf16 %v697_v49, %v697_v49  ;;  %v695_v54 = vmul.f32 %v1035_v50, %v631_v15 }
 0x13b   :  { %734 = vst.msk [vmem:[%s1269_s3 + $0xc] sm:$0xf] %vm730_vm1, %v823_v51  ;;  %v821_v55 = vpack.c.bf16 %v691_v52, %v691_v52 }
 0x13c   :  { %738 = vst.msk [vmem:[%s1269_s3 + $0x1c] sm:$0xf] %vm730_vm1, %v827_v53  ;;  %v825_v56 = vpack.c.bf16 %v695_v54, %v695_v54 }
 0x13d   :  { %732 = vst.msk [vmem:[%s1269_s3 + $0x4] sm:$0xf] %vm730_vm1, %v821_v55 }
 0x13e   :  { %736 = vst.msk [vmem:[%s1269_s3 + $0x14] sm:$0xf] %vm730_vm1, %v825_v56 }

// kernel: seg_no_ffm_forward.37
= control target key start
LH: loop header
LB: loop body
LE: loop exit
PB: predicated region body
PF: predicated region fallthrough
CT: control target
= control target key end

     0   :  { %vm105_vm0 = vcmask 523264   ;;  %s740_s2 = inlined_call_operand.vmem [shape: bf16[128,128], index: 2, kind: input, shape index: {}]   ;;  %s741_s3 = inlined_call_operand.vmem [shape: bf16[64,128], index: 3, kind: input, shape index: {}]   ;;  %s742_s1 = inlined_call_operand.vmem [shape: bf16[64,64], index: 1, kind: input, shape index: {}]   ;;  %s743_s0 = inlined_call_operand.vmem [shape: bf16[64,128], index: 0, kind: input, shape index: {}]   ;;  %s744_s4 = inlined_call_operand.vmem [shape: f32[1,128], index: 4, kind: input, shape index: {}]   ;;  %s745_s5 = inlined_call_operand.vmem [shape: bf16[64,128], index: 5, kind: output, shape index: {}]  }
   0x1   :  { %v575_v0 = vld [vmem:[%s740_s2] sm:$0xff]   ;;  %v576_v1 = vld [vmem:[%s740_s2 + $0x8] sm:$0xff]   ;;  %v577_v2 = vld [vmem:[%s740_s2 + $0x10] sm:$0xff]  }
   0x2   :  { %543 = vmatprep.subr.bf16.mxu0 %v575_v0  ;;  %v579_v3 = vld [vmem:[%s741_s3] sm:$0xff]   ;;  %v581_v4 = vld [vmem:[%s741_s3 + $0x8] sm:$0xff]   ;;  %v578_v5 = vld [vmem:[%s740_s2 + $0x18] sm:$0xff]  }
   0x3   :  { %544 = vmatpush3.bf16.msra.mxu0 %v575_v0  ;;  %527 = vmatprep.subr.bf16.mxu1 %v579_v3  ;;  %v583_v6 = vld [vmem:[%s741_s3 + $0x10] sm:$0xff]   ;;  %v580_v7 = vld [vmem:[%s740_s2 + $0x20] sm:$0xff]   ;;  %v585_v9 = vld [vmem:[%s741_s3 + $0x18] sm:$0xff]  }
   0x4   :  { %545 = vmatprep.subr.bf16.mxu0 %v576_v1  ;;  %528 = vmatpush3.bf16.msra.mxu1 %v579_v3  ;;  %v586_v8 = vld [vmem:[%s742_s1] sm:$0xff]   ;;  %v582_v11 = vld [vmem:[%s740_s2 + $0x28] sm:$0xff]   ;;  %v591_v13 = vld [vmem:[%s742_s1 + $0x10] sm:$0xff]  }
   0x5   :  { %529 = vmatprep.subr.bf16.mxu1 %v581_v4  ;;  %535 = vmatprep.mubr.msk.bf16.mxu1 %vm105_vm0, %v586_v8  ;;  %v589_v10 = vld [vmem:[%s743_s0] sm:$0xff]   ;;  %v588_v12 = vld [vmem:[%s742_s1 + $0x8] sm:$0xff]   ;;  %v584_v14 = vld [vmem:[%s740_s2 + $0x30] sm:$0xff]  }
   0x6   :  { %559 = vmatprep.mubr.bf16.mxu0 %v589_v10  ;;  %v587_v15 = vld [vmem:[%s740_s2 + $0x38] sm:$0xff]   ;;  %v590_v17 = vld [vmem:[%s743_s0 + $0x8] sm:$0xff]   ;;  %v593_v18 = vld [vmem:[%s743_s0 + $0x10] sm:$0xff]  }
   0x7   :  { %546 = vmatpush3.bf16.msra.mxu0 %v576_v1  ;;  %v592_v16 = vld [vmem:[%s742_s1 + $0x18] sm:$0xff]   ;;  %v459_v29 = vld [vmem:[%s744_s4] ss:$0 sm:$0xff] }
   0x8   :  { %547 = vmatprep.subr.bf16.mxu0 %v577_v2  ;;  %530 = vmatpush3.bf16.msra.mxu1 %v581_v4  ;;  %v594_v19 = vld [vmem:[%s743_s0 + $0x18] sm:$0xff]  }
   0x9   :  { %531 = vmatprep.subr.bf16.mxu1 %v583_v6 }
   0xb   :  { %548 = vmatpush3.bf16.msra.mxu0 %v577_v2 }
   0xc   :  { %549 = vmatprep.subr.bf16.mxu0 %v578_v5  ;;  %532 = vmatpush3.bf16.msra.mxu1 %v583_v6 }
   0xd   :  { %533 = vmatprep.subr.bf16.mxu1 %v585_v9 }
   0xf   :  { %550 = vmatpush3.bf16.msra.mxu0 %v578_v5 }
  0x10   :  { %551 = vmatprep.subr.bf16.mxu0 %v580_v7  ;;  %534 = vmatpush3.bf16.msra.mxu1 %v585_v9 }
  0x13   :  { %552 = vmatpush3.bf16.msra.mxu0 %v580_v7  ;;  %536 = vmatmul.mubr.msk.bf16.vlgmr.msra.gmra.mrb[0].mxu1 %vm105_vm0, %v588_v12 }
  0x14   :  { %553 = vmatprep.subr.bf16.mxu0 %v582_v11  ;;  %539 = vmatprep.mubr.msk.bf16.mxu1 %vm105_vm0, %v591_v13 }
  0x17   :  { %554 = vmatpush3.bf16.msra.mxu0 %v582_v11 }
  0x18   :  { %555 = vmatprep.subr.bf16.mxu0 %v584_v14 }
  0x1b   :  { %556 = vmatpush3.bf16.msra.mxu0 %v584_v14  ;;  %540 = vmatmul.mubr.msk.bf16.gmra.mrb[4].mxu1 %vm105_vm0, %v592_v16 }
  0x1c   :  { %557 = vmatprep.subr.bf16.mxu0 %v587_v15 }
  0x1f   :  { %558 = vmatpush3.bf16.msra.mxu0 %v587_v15 }
  0x22   :  { %560 = vmatmul.mubr.bf16.vlgmr.msra.gmra.mrb[0].mxu0 %v590_v17 }
  0x23   :  { %563 = vmatprep.mubr.bf16.mxu0 %v593_v18 }
  0x2a   :  { %564 = vmatmul.mubr.bf16.gmra.mrb[4].mxu0 %v594_v19 }
  0xe6   :  { %v537_v20 = vpop.f32.mrb[0].mxu1 }
  0xe7   :  { %v152_v21 = vpop.f32.mrb[1].mxu1 }
  0xe8   :  { %v538_v22 = vpop.f32.mrb[2].mxu1 }
  0xe9   :  { %v155_v23 = vpop.f32.mrb[3].mxu1 }
  0xee   :  { %v541_v24 = vpop.f32.mrb[4].mxu1 }
  0xef   :  { %v168_v25 = vpop.f32.mrb[5].mxu1 }
  0xf0   :  { %v542_v26 = vpop.f32.mrb[6].mxu1 }
  0xf1   :  { %v171_v27 = vpop.f32.mrb[7].mxu1 }
  0xf5   :  { %v561_v28 = vpop.f32.mrb[0].mxu0 }
  0xf6   :  { %v298_v30 = vadd.f32 %v561_v28, %v537_v20  ;;  %v289_v31 = vpop.f32.mrb[1].mxu0 }
  0xf7   :  { %v290_v32 = vadd.f32 %v289_v31, %v152_v21  ;;  %v562_v33 = vpop.f32.mrb[2].mxu0 }
  0xf8   :  { %v724_v34 = vadd.f32 %v459_v29, %v298_v30  ;;  %v301_v35 = vadd.f32 %v562_v33, %v538_v22  ;;  %v292_v36 = vpop.f32.mrb[3].mxu0 }
  0xf9   :  { %v327_v37 = vadd.f32 %v459_v29, %v290_v32  ;;  %v293_v38 = vadd.f32 %v292_v36, %v155_v23 }
  0xfa   :  { %v462_v39 = vmul.f32 -1.442695, %v724_v34  ;;  %v330_v40 = vadd.f32 %v459_v29, %v301_v35 }
  0xfb   :  { %v460_v41 = vmul.f32 -1.442695, %v327_v37  ;;  %v328_v42 = vadd.f32 %v459_v29, %v293_v38 }
  0xfc   :  { %595 = vpow2.f32 %v462_v39  ;;  %v463_v43 = vmul.f32 -1.442695, %v330_v40 }
  0xfd   :  { %597 = vpow2.f32 %v460_v41  ;;  %v461_v44 = vmul.f32 -1.442695, %v328_v42  ;;  %v565_v45 = vpop.f32.mrb[4].mxu0 }
  0xfe   :  { %599 = vpow2.f32 %v463_v43  ;;  %v314_v46 = vadd.f32 %v565_v45, %v541_v24  ;;  %v305_v47 = vpop.f32.mrb[5].mxu0 }
  0xff   :  { %601 = vpow2.f32 %v461_v44  ;;  %v306_v48 = vadd.f32 %v305_v47, %v168_v25  ;;  %v566_v49 = vpop.f32.mrb[6].mxu0 }
 0x100   :  { %v333_v50 = vadd.f32 %v459_v29, %v314_v46  ;;  %v317_v51 = vadd.f32 %v566_v49, %v542_v26  ;;  %v308_v52 = vpop.f32.mrb[7].mxu0 }
 0x101   :  { %v331_v53 = vadd.f32 %v459_v29, %v306_v48  ;;  %v309_v54 = vadd.f32 %v308_v52, %v171_v27 }
 0x102   :  { %v466_v55 = vmul.f32 -1.442695, %v333_v50  ;;  %v334_v56 = vadd.f32 %v459_v29, %v317_v51 }
 0x103   :  { %v464_v57 = vmul.f32 -1.442695, %v331_v53  ;;  %v332_v58 = vadd.f32 %v459_v29, %v309_v54 }
 0x104   :  { %603 = vpow2.f32 %v466_v55  ;;  %v467_v59 = vmul.f32 -1.442695, %v334_v56 }
 0x105   :  { %605 = vpow2.f32 %v464_v57  ;;  %v465_v60 = vmul.f32 -1.442695, %v332_v58 }
 0x106   :  { %v596_v61 = vpop.eup %595  ;;  %607 = vpow2.f32 %v467_v59 }
 0x107   :  { %v598_v62 = vpop.eup %597  ;;  %v361_v63 = vadd.f32 1.0, %v596_v61  ;;  %609 = vpow2.f32 %v465_v60 }
 0x108   :  { %v600_v0 = vpop.eup %599  ;;  %v359_v1 = vadd.f32 1.0, %v598_v62 }
 0x109   :  { %v602_v2 = vpop.eup %601  ;;  %611 = vrcp.f32 %v361_v63  ;;  %v362_v3 = vadd.f32 1.0, %v600_v0 }
 0x10a   :  { %613 = vrcp.f32 %v359_v1  ;;  %v360_v4 = vadd.f32 1.0, %v602_v2 }
 0x10b   :  { %615 = vrcp.f32 %v362_v3 }
 0x10c   :  { %617 = vrcp.f32 %v360_v4 }
 0x10e   :  { %v604_v5 = vpop.eup %603 }
 0x10f   :  { %v606_v6 = vpop.eup %605  ;;  %v365_v7 = vadd.f32 1.0, %v604_v5 }
 0x110   :  { %v608_v8 = vpop.eup %607  ;;  %v363_v9 = vadd.f32 1.0, %v606_v6 }
 0x111   :  { %v610_v10 = vpop.eup %609  ;;  %619 = vrcp.f32 %v365_v7  ;;  %v366_v11 = vadd.f32 1.0, %v608_v8 }
 0x112   :  { %621 = vrcp.f32 %v363_v9  ;;  %v364_v12 = vadd.f32 1.0, %v610_v10 }
 0x113   :  { %v612_v13 = vpop.eup %611  ;;  %623 = vrcp.f32 %v366_v11 }
 0x114   :  { %v614_v14 = vpop.eup %613  ;;  %625 = vrcp.f32 %v364_v12  ;;  %v385_v17 = vmul.f32 %v612_v13, %v724_v34 }
 0x115   :  { %v616_v15 = vpop.eup %615  ;;  %v383_v19 = vmul.f32 %v614_v14, %v327_v37 }
 0x116   :  { %v618_v16 = vpop.eup %617  ;;  %v386_v18 = vmul.f32 %v616_v15, %v330_v40 }
 0x117   :  { %v384_v20 = vmul.f32 %v618_v16, %v328_v42 }
 0x118   :  { %v492_v21 = vpack.c.bf16 %v386_v18, %v385_v17 }
 0x119   :  { %v487_v22 = vpack.c.bf16 %v384_v20, %v383_v19 }
 0x11a   :  { %504 = vst [vmem:[%s745_s5 + $0x8] sm:$0xff] %v492_v21  }
 0x11b   :  { %v620_v23 = vpop.eup %619  ;;  %488 = vst [vmem:[%s745_s5] sm:$0xff] %v487_v22  }
 0x11c   :  { %v622_v24 = vpop.eup %621  ;;  %v389_v27 = vmul.f32 %v620_v23, %v333_v50 }
 0x11d   :  { %v624_v25 = vpop.eup %623  ;;  %v387_v29 = vmul.f32 %v622_v24, %v331_v53 }
 0x11e   :  { %v626_v26 = vpop.eup %625  ;;  %v390_v28 = vmul.f32 %v624_v25, %v334_v56 }
 0x11f   :  { %v388_v30 = vmul.f32 %v626_v26, %v332_v58 }
 0x120   :  { %v502_v31 = vpack.c.bf16 %v390_v28, %v389_v27 }
 0x121   :  { %v497_v32 = vpack.c.bf16 %v388_v30, %v387_v29 }
 0x122   :  { %506 = vst [vmem:[%s745_s5 + $0x18] sm:$0xff] %v502_v31  }
 0x123   :  { %505 = vst [vmem:[%s745_s5 + $0x10] sm:$0xff] %v497_v32  }

// kernel: seg_no_ffm_forward.39
= control target key start
LH: loop header
LB: loop body
LE: loop exit
PB: predicated region body
PF: predicated region fallthrough
CT: control target
= control target key end

     0   :  { %v633_v1 = vmov 0   ;;  %v417_v56 = vlaneseq  ;;  %s826_s3 = inlined_call_operand.vmem [shape: bf16[256,256], index: 3, kind: input, shape index: {}]   ;;  %s827_s2 = inlined_call_operand.vmem [shape: bf16[128,256], index: 2, kind: input, shape index: {}]   ;;  %s828_s0 = inlined_call_operand.vmem [shape: bf16[16,128], index: 0, kind: input, shape index: {}]   ;;  %s829_s1 = inlined_call_operand.vmem [shape: bf16[16,256], index: 1, kind: input, shape index: {}]   ;;  %s830_s4 = inlined_call_operand.vmem [shape: f32[1,256], index: 4, kind: input, shape index: {}]   ;;  %s831_s5 = inlined_call_operand.vmem [shape: bf16[16,256], index: 5, kind: output, shape index: {}]  }
   0x1   :  { %v541_v0 = vld [vmem:[%s826_s3 + $0x4] ss:$8 sps:$4 sm:$0xff]   ;;  %404 = vmatprep.mubr.bf16.mxu0 %v633_v1  ;;  %v543_v2 = vld [vmem:[%s826_s3] ss:$8 sps:$4 sm:$0xff]   ;;  %v544_v3 = vld [vmem:[%s826_s3 + $0x14] ss:$8 sps:$4 sm:$0xff]  }
   0x2   :  { %243 = vmatprep.subr.bf16.mxu1 %v541_v0  ;;  %v546_v4 = vld [vmem:[%s826_s3 + $0x10] ss:$8 sps:$4 sm:$0xff]   ;;  %v547_v5 = vld [vmem:[%s826_s3 + $0x24] ss:$8 sps:$4 sm:$0xff]   ;;  %v549_v6 = vld [vmem:[%s826_s3 + $0x20] ss:$8 sps:$4 sm:$0xff]  }
   0x3   :  { %244 = vmatpush1.bf16.msra.mxu1 %v543_v2  ;;  %v550_v7 = vld [vmem:[%s826_s3 + $0x34] ss:$8 sps:$4 sm:$0xff]   ;;  %v552_v8 = vld [vmem:[%s826_s3 + $0x30] ss:$8 sps:$4 sm:$0xff]   ;;  %v565_v9 = vld [vmem:[%s827_s2 + $0x4] ss:$8 sps:$4 sm:$0xff]  }
   0x4   :  { %245 = vmatprep.subr.bf16.mxu1 %v544_v3  ;;  %v567_v10 = vld [vmem:[%s827_s2] ss:$8 sps:$4 sm:$0xff]   ;;  %v553_v11 = vld [vmem:[%s826_s3 + $0x44] ss:$8 sps:$4 sm:$0xff]   ;;  %372 = vmatprep.subr.bf16.mxu0 %v565_v9  ;;  %v571_v12 = vld [vmem:[%s827_s2 + $0x14] ss:$8 sps:$4 sm:$0xff]  }
   0x5   :  { %373 = vmatpush1.bf16.msra.mxu0 %v567_v10  ;;  %v573_v13 = vld [vmem:[%s827_s2 + $0x10] ss:$8 sps:$4 sm:$0xff]   ;;  %v555_v14 = vld [vmem:[%s826_s3 + $0x40] ss:$8 sps:$4 sm:$0xff]   ;;  %v556_v15 = vld [vmem:[%s826_s3 + $0x54] ss:$8 sps:$4 sm:$0xff]  }
   0x6   :  { %374 = vmatprep.subr.bf16.mxu0 %v571_v12  ;;  %v577_v16 = vld [vmem:[%s827_s2 + $0x24] ss:$8 sps:$4 sm:$0xff]   ;;  %v579_v17 = vld [vmem:[%s827_s2 + $0x20] ss:$8 sps:$4 sm:$0xff]   ;;  %v558_v18 = vld [vmem:[%s826_s3 + $0x50] ss:$8 sps:$4 sm:$0xff]  }
   0x7   :  { %246 = vmatpush1.bf16.msra.mxu1 %v546_v4  ;;  %v583_v19 = vld [vmem:[%s827_s2 + $0x34] ss:$8 sps:$4 sm:$0xff]   ;;  %v559_v20 = vld [vmem:[%s826_s3 + $0x64] ss:$8 sps:$4 sm:$0xff]   ;;  %v585_v21 = vld [vmem:[%s827_s2 + $0x30] ss:$8 sps:$4 sm:$0xff]  }
   0x8   :  { %247 = vmatprep.subr.bf16.mxu1 %v547_v5  ;;  %v561_v22 = vld [vmem:[%s826_s3 + $0x60] ss:$8 sps:$4 sm:$0xff]   ;;  %v589_v23 = vld [vmem:[%s827_s2 + $0x44] ss:$8 sps:$4 sm:$0xff]   ;;  %v562_v24 = vld [vmem:[%s826_s3 + $0x74] ss:$8 sps:$4 sm:$0xff]  }
   0x9   :  { %375 = vmatpush1.bf16.msra.mxu0 %v573_v13  ;;  %v591_v25 = vld [vmem:[%s827_s2 + $0x40] ss:$8 sps:$4 sm:$0xff]   ;;  %v564_v26 = vld [vmem:[%s826_s3 + $0x70] ss:$8 sps:$4 sm:$0xff]   ;;  %v595_v27 = vld [vmem:[%s827_s2 + $0x54] ss:$8 sps:$4 sm:$0xff]  }
   0xa   :  { %376 = vmatprep.subr.bf16.mxu0 %v577_v16  ;;  %v568_v28 = vld [vmem:[%s826_s3 + $0x84] ss:$8 sps:$4 sm:$0xff]   ;;  %v597_v29 = vld [vmem:[%s827_s2 + $0x50] ss:$8 sps:$4 sm:$0xff]   ;;  %v570_v30 = vld [vmem:[%s826_s3 + $0x80] ss:$8 sps:$4 sm:$0xff]  }
   0xb   :  { %248 = vmatpush1.bf16.msra.mxu1 %v549_v6  ;;  %v601_v31 = vld [vmem:[%s827_s2 + $0x64] ss:$8 sps:$4 sm:$0xff]   ;;  %v574_v32 = vld [vmem:[%s826_s3 + $0x94] ss:$8 sps:$4 sm:$0xff]   ;;  %v603_v33 = vld [vmem:[%s827_s2 + $0x60] ss:$8 sps:$4 sm:$0xff]  }
   0xc   :  { %249 = vmatprep.subr.bf16.mxu1 %v550_v7  ;;  %v616_v34 = vld [vmem:[%s829_s1 + $0x4] ss:$8 sps:$4 sm:$0xff]   ;;  %v576_v35 = vld [vmem:[%s826_s3 + $0x90] ss:$8 sps:$4 sm:$0xff]   ;;  %v607_v36 = vld [vmem:[%s827_s2 + $0x74] ss:$8 sps:$4 sm:$0xff]  }
   0xd   :  { %377 = vmatpush1.bf16.msra.mxu0 %v579_v17  ;;  %v580_v37 = vld [vmem:[%s826_s3 + $0xa4] ss:$8 sps:$4 sm:$0xff]   ;;  %275 = vmatprep.mubr.bf16.mxu1 %v616_v34  ;;  %v609_v38 = vld [vmem:[%s827_s2 + $0x70] ss:$8 sps:$4 sm:$0xff]   ;;  %v582_v39 = vld [vmem:[%s826_s3 + $0xa0] ss:$8 sps:$4 sm:$0xff]  }
   0xe   :  { %378 = vmatprep.subr.bf16.mxu0 %v583_v19  ;;  %v586_v40 = vld [vmem:[%s826_s3 + $0xb4] ss:$8 sps:$4 sm:$0xff]   ;;  %v613_v41 = vld [vmem:[%s828_s0] sm:$0xff]   ;;  %v588_v42 = vld [vmem:[%s826_s3 + $0xb0] ss:$8 sps:$4 sm:$0xff]   ;;  %v418_v57 = vshrl.u32 %v417_v56, 7 }
   0xf   :  { %250 = vmatpush1.bf16.msra.mxu1 %v552_v8  ;;  %v592_v43 = vld [vmem:[%s826_s3 + $0xc4] ss:$8 sps:$4 sm:$0xff]   ;;  %v594_v44 = vld [vmem:[%s826_s3 + $0xc0] ss:$8 sps:$4 sm:$0xff]   ;;  %v598_v45 = vld [vmem:[%s826_s3 + $0xd4] ss:$8 sps:$4 sm:$0xff]  }
  0x10   :  { %251 = vmatprep.subr.bf16.mxu1 %v553_v11  ;;  %v600_v46 = vld [vmem:[%s826_s3 + $0xd0] ss:$8 sps:$4 sm:$0xff]   ;;  %v604_v47 = vld [vmem:[%s826_s3 + $0xe4] ss:$8 sps:$4 sm:$0xff]   ;;  %v606_v48 = vld [vmem:[%s826_s3 + $0xe0] ss:$8 sps:$4 sm:$0xff]  }
  0x11   :  { %379 = vmatpush1.bf16.msra.mxu0 %v585_v21  ;;  %v610_v49 = vld [vmem:[%s826_s3 + $0xf4] ss:$8 sps:$4 sm:$0xff]   ;;  %v612_v50 = vld [vmem:[%s826_s3 + $0xf0] ss:$8 sps:$4 sm:$0xff]   ;;  %v614_v51 = vld [vmem:[%s829_s1] ss:$8 sps:$4 sm:$0xff]  }
  0x12   :  { %380 = vmatprep.subr.bf16.mxu0 %v589_v23  ;;  %v419_v58 = vsub.s32 0, %v418_v57  ;;  %v415_v59 = vld [vmem:[%s830_s4] sm:$0x3]  ;;  %v423_v60 = vsub.s32 1, %v418_v57 }
  0x13   :  { %252 = vmatpush1.bf16.msra.mxu1 %v555_v14 }
  0x14   :  { %253 = vmatprep.subr.bf16.mxu1 %v556_v15  ;;  %v420_v61 = vrot.slane %v415_v59, %v419_v58  ;;  %v424_v63 = vrot.slane %v415_v59, %v423_v60 }
  0x15   :  { %381 = vmatpush1.bf16.msra.mxu0 %v591_v25 }
  0x16   :  { %382 = vmatprep.subr.bf16.mxu0 %v595_v27 }
  0x17   :  { %254 = vmatpush1.bf16.msra.mxu1 %v558_v18 }
  0x18   :  { %255 = vmatprep.subr.bf16.mxu1 %v559_v20 }
  0x19   :  { %383 = vmatpush1.bf16.msra.mxu0 %v597_v29 }
  0x1a   :  { %384 = vmatprep.subr.bf16.mxu0 %v601_v31 }
  0x1b   :  { %256 = vmatpush1.bf16.msra.mxu1 %v561_v22 }
  0x1c   :  { %257 = vmatprep.subr.bf16.mxu1 %v562_v24 }
  0x1d   :  { %385 = vmatpush1.bf16.msra.mxu0 %v603_v33 }
  0x1e   :  { %386 = vmatprep.subr.bf16.mxu0 %v607_v36 }
  0x1f   :  { %258 = vmatpush1.bf16.msra.mxu1 %v564_v26 }
  0x20   :  { %259 = vmatprep.subr.bf16.mxu1 %v568_v28 }
  0x21   :  { %387 = vmatpush1.bf16.msra.mxu0 %v609_v38 }
  0x23   :  { %260 = vmatpush1.bf16.msra.mxu1 %v570_v30 }
  0x24   :  { %261 = vmatprep.subr.bf16.mxu1 %v574_v32  ;;  %405 = vmatmul.mubr.bf16.vlgmr.msra.gmra.mrb[0].mxu0 %v613_v41 }
  0x27   :  { %262 = vmatpush1.bf16.msra.mxu1 %v576_v35 }
  0x28   :  { %263 = vmatprep.subr.bf16.mxu1 %v580_v37 }
  0x2b   :  { %264 = vmatpush1.bf16.msra.mxu1 %v582_v39 }
  0x2c   :  { %265 = vmatprep.subr.bf16.mxu1 %v586_v40 }
  0x2f   :  { %266 = vmatpush1.bf16.msra.mxu1 %v588_v42 }
  0x30   :  { %267 = vmatprep.subr.bf16.mxu1 %v592_v43 }
  0x33   :  { %268 = vmatpush1.bf16.msra.mxu1 %v594_v44 }
  0x34   :  { %269 = vmatprep.subr.bf16.mxu1 %v598_v45 }
  0x37   :  { %270 = vmatpush1.bf16.msra.mxu1 %v600_v46 }
  0x38   :  { %271 = vmatprep.subr.bf16.mxu1 %v604_v47 }
  0x3b   :  { %272 = vmatpush1.bf16.msra.mxu1 %v606_v48 }
  0x3c   :  { %273 = vmatprep.subr.bf16.mxu1 %v610_v49 }
  0x3f   :  { %274 = vmatpush1.bf16.msra.mxu1 %v612_v50 }
  0x42   :  { %276 = vmatmul.mubr.bf16.vlgmr.msra.gmra.mrb[0].mxu1 %v614_v51 }
  0xf7   :  { %v406_v52 = vpop.f32.mrb[0].mxu0 }
  0xf8   :  { %v408_v53 = vpop.f32.mrb[1].mxu0 }
  0xf9   :  { %v410_v54 = vpop.f32.mrb[2].mxu0 }
  0xfa   :  { %v412_v55 = vpop.f32.mrb[3].mxu0 }
 0x115   :  { %v277_v62 = vpop.f32.mrb[0].mxu1 }
 0x116   :  { %v407_v0 = vadd.f32 %v406_v52, %v277_v62  ;;  %v279_v1 = vpop.f32.mrb[1].mxu1 }
 0x117   :  { %v409_v2 = vadd.f32 %v408_v53, %v279_v1  ;;  %v281_v3 = vpop.f32.mrb[2].mxu1 }
 0x118   :  { %v427_v4 = vadd.f32 %v420_v61, %v407_v0  ;;  %v411_v5 = vadd.f32 %v410_v54, %v281_v3  ;;  %v283_v6 = vpop.f32.mrb[3].mxu1 }
 0x119   :  { %v428_v7 = vadd.f32 %v424_v63, %v409_v2  ;;  %v413_v8 = vadd.f32 %v412_v55, %v283_v6 }
 0x11a   :  { %v528_v9 = vmul.f32 -1.442695, %v427_v4  ;;  %v429_v10 = vadd.f32 %v420_v61, %v411_v5 }
 0x11b   :  { %v529_v11 = vmul.f32 -1.442695, %v428_v7  ;;  %v430_v12 = vadd.f32 %v424_v63, %v413_v8 }
 0x11c   :  { %617 = vpow2.f32 %v528_v9  ;;  %v530_v13 = vmul.f32 -1.442695, %v429_v10 }
 0x11d   :  { %619 = vpow2.f32 %v529_v11  ;;  %v531_v14 = vmul.f32 -1.442695, %v430_v12 }
 0x11e   :  { %621 = vpow2.f32 %v530_v13 }
 0x11f   :  { %623 = vpow2.f32 %v531_v14 }
 0x126   :  { %v618_v15 = vpop.eup %617 }
 0x127   :  { %v620_v16 = vpop.eup %619  ;;  %v443_v17 = vadd.f32 1.0, %v618_v15 }
 0x128   :  { %v622_v18 = vpop.eup %621  ;;  %v444_v19 = vadd.f32 1.0, %v620_v16 }
 0x129   :  { %v624_v20 = vpop.eup %623  ;;  %625 = vrcp.f32 %v443_v17  ;;  %v445_v21 = vadd.f32 1.0, %v622_v18 }
 0x12a   :  { %627 = vrcp.f32 %v444_v19  ;;  %v446_v22 = vadd.f32 1.0, %v624_v20 }
 0x12b   :  { %629 = vrcp.f32 %v445_v21 }
 0x12c   :  { %631 = vrcp.f32 %v446_v22 }
 0x133   :  { %v626_v23 = vpop.eup %625 }
 0x134   :  { %v628_v24 = vpop.eup %627  ;;  %v455_v25 = vmul.f32 %v626_v23, %v427_v4 }
 0x135   :  { %v630_v26 = vpop.eup %629  ;;  %v456_v27 = vmul.f32 %v628_v24, %v428_v7 }
 0x136   :  { %v632_v28 = vpop.eup %631  ;;  %v457_v29 = vmul.f32 %v630_v26, %v429_v10 }
 0x137   :  { %v534_v30 = vpack.c.bf16 %v456_v27, %v455_v25  ;;  %v458_v31 = vmul.f32 %v632_v28, %v430_v12 }
 0x139   :  { %471 = vst [vmem:[%s831_s5] sm:$0xff] %v534_v30  ;;  %v535_v32 = vpack.c.bf16 %v458_v31, %v457_v29 }
 0x13b   :  { %472 = vst [vmem:[%s831_s5 + $0x8] sm:$0xff] %v535_v32 }

// kernel: seg_no_ffm_forward.44
= control target key start
LH: loop header
LB: loop body
LE: loop exit
PB: predicated region body
PF: predicated region fallthrough
CT: control target
= control target key end

     0   :  { %s1629_s18 = smov 0   ;;  %s1631_s19 = smov 0   ;;  %s1934_s0 = inlined_call_operand.vmem [shape: bf16[4,256], index: 0, kind: input, shape index: {}]   ;;  %s1935_s1 = inlined_call_operand.vmem [shape: bf16[4,256], index: 1, kind: input, shape index: {}]   ;;  %s1936_s2 = inlined_call_operand.vmem [shape: bf16[256,512], index: 2, kind: input, shape index: {}]   ;;  %s1937_s3 = inlined_call_operand.vmem [shape: bf16[256,512], index: 3, kind: input, shape index: {}]   ;;  %s1938_s4 = inlined_call_operand.vmem [shape: f32[1,512], index: 4, kind: input, shape index: {}]   ;;  %s1939_s5 = inlined_call_operand.vmem [shape: bf16[4,512], index: 5, kind: output, shape index: {}]  }
   0x1   :  { %s1633_s20 = smov 0   ;;  %s1635_s21 = smov 0  }
   0x2   :  { %s1637_s22 = smov 0  }
   0x3 LB: > { %s24_s23 = sadd.s32 1, %s1593_s21  ;;  %p93_p1 = scmp.ne.s32.totalorder %s1585_s19, %s1581_s18  ;;  %s1597_s22 = sphi %s1637_s22, %s15_s22   ;;  %s1593_s21 = sphi %s1635_s21, %s1944_s21   ;;  %s1589_s20 = sphi %s1633_s20, %s1943_s20   ;;  %s1585_s19 = sphi %s1631_s19, %s1942_s19   ;;  %s1581_s18 = sphi %s1629_s18, %s1941_s18  }
   0x4   : > { %p25_p0 = scmp.ge.s32.totalorder %s24_s23, 2  ;;  %p94_p2 = scmp.eq.s32.totalorder %s1597_s22, 0 }
   0x5   : > { %s86_s26 = sadd.s32 1, %s1585_s19  ;;  %p1328_p5 = scmp.ge.s32.totalorder %s1597_s22, 2 }
   0x6   : > { %s1946_s23 = smov (%p25_p0, %s24_s23), 0  ;;  %p1660_p3 = por %p94_p2, %p93_p1 }
   0x7   : > { %s83_s25 = ssub.s32 %s1593_s21, %s1946_s23  ;;  %215 = sbr.rel (%p1328_p5) target bundleno = 54 (0x36), region = 24 }
   0x8   : > { %p84_p4 = scmp.eq.s32.totalorder %s83_s25, 0 }
   0xa   : > { %s1668_s27 = scalar_select %p84_p4, %s1585_s19, %s86_s26  }
   0xe   : > { %218 = sbr.rel (!%p1660_p3) target bundleno = 34 (0x22), region = 28  ;;  %s220_s28 = sand.u32 (%p1660_p3), 1, %s1585_s19  }
   0xf   : > { %s1413_s29 = sshll.u32 (%p1660_p3), %s1593_s21, 3  ;;  %s1329_s30 = sshll.u32 (%p1660_p3), %s220_s28, 8 }
  0x10   : > { %s1678_s8 = scalar_lea.vmem (%p1660_p3), %s1936_s2, %s1413_s29  ;;  %s1683_s9 = scalar_lea.vmem (%p1660_p3), [#allocation2], %s1329_s30 }
  0x11   : > { %v315_v0 = vld [vmem:[%s1678_s8] sm:$0xff] (%p1660_p3)  ;;  %v317_v1 = vld [vmem:[%s1678_s8 + $0x10] sm:$0xff] (%p1660_p3) }
  0x12   : > { %v319_v2 = vld [vmem:[%s1678_s8 + $0x20] sm:$0xff] (%p1660_p3)  ;;  %316 = vst [vmem:[%s1683_s9] sm:$0xff] (%p1660_p3), %v315_v0  ;;  %318 = vst [vmem:[%s1683_s9 + $0x8] sm:$0xff] (%p1660_p3), %v317_v1  ;;  %v321_v3 = vld [vmem:[%s1678_s8 + $0x30] sm:$0xff] (%p1660_p3) }
  0x13   : > { %320 = vst [vmem:[%s1683_s9 + $0x10] sm:$0xff] (%p1660_p3), %v319_v2  ;;  %v323_v4 = vld [vmem:[%s1678_s8 + $0x40] sm:$0xff] (%p1660_p3)  ;;  %v325_v5 = vld [vmem:[%s1678_s8 + $0x50] sm:$0xff] (%p1660_p3)  ;;  %322 = vst [vmem:[%s1683_s9 + $0x18] sm:$0xff] (%p1660_p3), %v321_v3 }
  0x14   : > { %324 = vst [vmem:[%s1683_s9 + $0x20] sm:$0xff] (%p1660_p3), %v323_v4  ;;  %326 = vst [vmem:[%s1683_s9 + $0x28] sm:$0xff] (%p1660_p3), %v325_v5  ;;  %v327_v6 = vld [vmem:[%s1678_s8 + $0x60] sm:$0xff] (%p1660_p3)  ;;  %v329_v7 = vld [vmem:[%s1678_s8 + $0x70] sm:$0xff] (%p1660_p3) }
  0x15   : > { %v331_v8 = vld [vmem:[%s1678_s8 + $0x80] sm:$0xff]  ;;  %328 = vst [vmem:[%s1683_s9 + $0x30] sm:$0xff] %v327_v6  ;;  %330 = vst [vmem:[%s1683_s9 + $0x38] sm:$0xff] %v329_v7  ;;  %v333_v9 = vld [vmem:[%s1678_s8 + $0x90] sm:$0xff] }
  0x16   : > { %332 = vst [vmem:[%s1683_s9 + $0x40] sm:$0xff] %v331_v8  ;;  %v335_v10 = vld [vmem:[%s1678_s8 + $0xa0] sm:$0xff]  ;;  %v337_v11 = vld [vmem:[%s1678_s8 + $0xb0] sm:$0xff]  ;;  %334 = vst [vmem:[%s1683_s9 + $0x48] sm:$0xff] %v333_v9 }
  0x17   : > { %336 = vst [vmem:[%s1683_s9 + $0x50] sm:$0xff] %v335_v10  ;;  %338 = vst [vmem:[%s1683_s9 + $0x58] sm:$0xff] %v337_v11  ;;  %v339_v12 = vld [vmem:[%s1678_s8 + $0xc0] sm:$0xff]  ;;  %v341_v13 = vld [vmem:[%s1678_s8 + $0xd0] sm:$0xff] }
  0x18   : > { %v343_v14 = vld [vmem:[%s1678_s8 + $0xe0] sm:$0xff]  ;;  %340 = vst [vmem:[%s1683_s9 + $0x60] sm:$0xff] %v339_v12  ;;  %342 = vst [vmem:[%s1683_s9 + $0x68] sm:$0xff] %v341_v13  ;;  %v345_v15 = vld [vmem:[%s1678_s8 + $0xf0] sm:$0xff] }
  0x19   : > { %344 = vst [vmem:[%s1683_s9 + $0x70] sm:$0xff] %v343_v14  ;;  %v347_v16 = vld [vmem:[%s1678_s8 + $0x100] sm:$0xff]  ;;  %v349_v17 = vld [vmem:[%s1678_s8 + $0x110] sm:$0xff]  ;;  %346 = vst [vmem:[%s1683_s9 + $0x78] sm:$0xff] %v345_v15 }
  0x1a   : > { %348 = vst [vmem:[%s1683_s9 + $0x80] sm:$0xff] %v347_v16  ;;  %350 = vst [vmem:[%s1683_s9 + $0x88] sm:$0xff] %v349_v17  ;;  %v351_v18 = vld [vmem:[%s1678_s8 + $0x120] sm:$0xff]  ;;  %v353_v19 = vld [vmem:[%s1678_s8 + $0x130] sm:$0xff] }
  0x1b   : > { %v355_v20 = vld [vmem:[%s1678_s8 + $0x140] sm:$0xff]  ;;  %352 = vst [vmem:[%s1683_s9 + $0x90] sm:$0xff] %v351_v18  ;;  %354 = vst [vmem:[%s1683_s9 + $0x98] sm:$0xff] %v353_v19  ;;  %v357_v21 = vld [vmem:[%s1678_s8 + $0x150] sm:$0xff] }
  0x1c   : > { %356 = vst [vmem:[%s1683_s9 + $0xa0] sm:$0xff] %v355_v20  ;;  %v359_v22 = vld [vmem:[%s1678_s8 + $0x160] sm:$0xff]  ;;  %v361_v23 = vld [vmem:[%s1678_s8 + $0x170] sm:$0xff]  ;;  %358 = vst [vmem:[%s1683_s9 + $0xa8] sm:$0xff] %v357_v21 }
  0x1d   : > { %360 = vst [vmem:[%s1683_s9 + $0xb0] sm:$0xff] %v359_v22  ;;  %362 = vst [vmem:[%s1683_s9 + $0xb8] sm:$0xff] %v361_v23  ;;  %v363_v24 = vld [vmem:[%s1678_s8 + $0x180] sm:$0xff]  ;;  %v365_v25 = vld [vmem:[%s1678_s8 + $0x190] sm:$0xff] }
  0x1e   : > { %v367_v26 = vld [vmem:[%s1678_s8 + $0x1a0] sm:$0xff]  ;;  %364 = vst [vmem:[%s1683_s9 + $0xc0] sm:$0xff] %v363_v24  ;;  %366 = vst [vmem:[%s1683_s9 + $0xc8] sm:$0xff] %v365_v25  ;;  %v369_v27 = vld [vmem:[%s1678_s8 + $0x1b0] sm:$0xff] }
  0x1f   : > { %368 = vst [vmem:[%s1683_s9 + $0xd0] sm:$0xff] %v367_v26  ;;  %v371_v28 = vld [vmem:[%s1678_s8 + $0x1c0] sm:$0xff]  ;;  %v373_v29 = vld [vmem:[%s1678_s8 + $0x1d0] sm:$0xff]  ;;  %370 = vst [vmem:[%s1683_s9 + $0xd8] sm:$0xff] %v369_v27 }
  0x20   : > { %372 = vst [vmem:[%s1683_s9 + $0xe0] sm:$0xff] %v371_v28  ;;  %374 = vst [vmem:[%s1683_s9 + $0xe8] sm:$0xff] %v373_v29  ;;  %v375_v30 = vld [vmem:[%s1678_s8 + $0x1e0] sm:$0xff]  ;;  %v377_v31 = vld [vmem:[%s1678_s8 + $0x1f0] sm:$0xff] }
  0x21   : > { %376 = vst [vmem:[%s1683_s9 + $0xf0] sm:$0xff] %v375_v30  ;;  %378 = vst [vmem:[%s1683_s9 + $0xf8] sm:$0xff] %v377_v31 }
  0x22 PF: > { %384 = sbr.rel (!%p1660_p3) target bundleno = 54 (0x36), region = 66  ;;  %s386_s10 = sand.u32 (%p1660_p3), 1, %s1585_s19  }
  0x23   : > { %s1414_s11 = sshll.u32 (%p1660_p3), %s1593_s21, 3  ;;  %s1332_s12 = sshll.u32 (%p1660_p3), %s386_s10, 8 }
  0x24   : > { %s1753_s15 = scalar_lea.vmem (%p1660_p3), %s1937_s3, %s1414_s11  ;;  %s1758_s16 = scalar_lea.vmem (%p1660_p3), [#allocation3], %s1332_s12 }
  0x25   : > { %v481_v32 = vld [vmem:[%s1753_s15] sm:$0xff] (%p1660_p3)  ;;  %v483_v33 = vld [vmem:[%s1753_s15 + $0x10] sm:$0xff] (%p1660_p3) }
  0x26   : > { %v485_v34 = vld [vmem:[%s1753_s15 + $0x20] sm:$0xff] (%p1660_p3)  ;;  %482 = vst [vmem:[%s1758_s16] sm:$0xff] (%p1660_p3), %v481_v32  ;;  %484 = vst [vmem:[%s1758_s16 + $0x8] sm:$0xff] (%p1660_p3), %v483_v33  ;;  %v487_v35 = vld [vmem:[%s1753_s15 + $0x30] sm:$0xff] (%p1660_p3) }
  0x27   : > { %486 = vst [vmem:[%s1758_s16 + $0x10] sm:$0xff] (%p1660_p3), %v485_v34  ;;  %v489_v36 = vld [vmem:[%s1753_s15 + $0x40] sm:$0xff] (%p1660_p3)  ;;  %v491_v37 = vld [vmem:[%s1753_s15 + $0x50] sm:$0xff] (%p1660_p3)  ;;  %488 = vst [vmem:[%s1758_s16 + $0x18] sm:$0xff] (%p1660_p3), %v487_v35 }
  0x28   : > { %490 = vst [vmem:[%s1758_s16 + $0x20] sm:$0xff] (%p1660_p3), %v489_v36  ;;  %492 = vst [vmem:[%s1758_s16 + $0x28] sm:$0xff] (%p1660_p3), %v491_v37  ;;  %v493_v38 = vld [vmem:[%s1753_s15 + $0x60] sm:$0xff] (%p1660_p3)  ;;  %v495_v39 = vld [vmem:[%s1753_s15 + $0x70] sm:$0xff] (%p1660_p3) }
  0x29   : > { %v497_v40 = vld [vmem:[%s1753_s15 + $0x80] sm:$0xff]  ;;  %494 = vst [vmem:[%s1758_s16 + $0x30] sm:$0xff] %v493_v38  ;;  %496 = vst [vmem:[%s1758_s16 + $0x38] sm:$0xff] %v495_v39  ;;  %v499_v41 = vld [vmem:[%s1753_s15 + $0x90] sm:$0xff] }
  0x2a   : > { %498 = vst [vmem:[%s1758_s16 + $0x40] sm:$0xff] %v497_v40  ;;  %v501_v42 = vld [vmem:[%s1753_s15 + $0xa0] sm:$0xff]  ;;  %v503_v43 = vld [vmem:[%s1753_s15 + $0xb0] sm:$0xff]  ;;  %500 = vst [vmem:[%s1758_s16 + $0x48] sm:$0xff] %v499_v41 }
  0x2b   : > { %502 = vst [vmem:[%s1758_s16 + $0x50] sm:$0xff] %v501_v42  ;;  %504 = vst [vmem:[%s1758_s16 + $0x58] sm:$0xff] %v503_v43  ;;  %v505_v44 = vld [vmem:[%s1753_s15 + $0xc0] sm:$0xff]  ;;  %v507_v45 = vld [vmem:[%s1753_s15 + $0xd0] sm:$0xff] }
  0x2c   : > { %v509_v46 = vld [vmem:[%s1753_s15 + $0xe0] sm:$0xff]  ;;  %506 = vst [vmem:[%s1758_s16 + $0x60] sm:$0xff] %v505_v44  ;;  %508 = vst [vmem:[%s1758_s16 + $0x68] sm:$0xff] %v507_v45  ;;  %v511_v47 = vld [vmem:[%s1753_s15 + $0xf0] sm:$0xff] }
  0x2d   : > { %510 = vst [vmem:[%s1758_s16 + $0x70] sm:$0xff] %v509_v46  ;;  %v513_v48 = vld [vmem:[%s1753_s15 + $0x100] sm:$0xff]  ;;  %v515_v49 = vld [vmem:[%s1753_s15 + $0x110] sm:$0xff]  ;;  %512 = vst [vmem:[%s1758_s16 + $0x78] sm:$0xff] %v511_v47 }
  0x2e   : > { %514 = vst [vmem:[%s1758_s16 + $0x80] sm:$0xff] %v513_v48  ;;  %516 = vst [vmem:[%s1758_s16 + $0x88] sm:$0xff] %v515_v49  ;;  %v517_v50 = vld [vmem:[%s1753_s15 + $0x120] sm:$0xff]  ;;  %v519_v51 = vld [vmem:[%s1753_s15 + $0x130] sm:$0xff] }
  0x2f   : > { %v521_v52 = vld [vmem:[%s1753_s15 + $0x140] sm:$0xff]  ;;  %518 = vst [vmem:[%s1758_s16 + $0x90] sm:$0xff] %v517_v50  ;;  %520 = vst [vmem:[%s1758_s16 + $0x98] sm:$0xff] %v519_v51  ;;  %v523_v53 = vld [vmem:[%s1753_s15 + $0x150] sm:$0xff] }
  0x30   : > { %522 = vst [vmem:[%s1758_s16 + $0xa0] sm:$0xff] %v521_v52  ;;  %v525_v54 = vld [vmem:[%s1753_s15 + $0x160] sm:$0xff]  ;;  %v527_v55 = vld [vmem:[%s1753_s15 + $0x170] sm:$0xff]  ;;  %524 = vst [vmem:[%s1758_s16 + $0xa8] sm:$0xff] %v523_v53 }
  0x31   : > { %526 = vst [vmem:[%s1758_s16 + $0xb0] sm:$0xff] %v525_v54  ;;  %528 = vst [vmem:[%s1758_s16 + $0xb8] sm:$0xff] %v527_v55  ;;  %v529_v56 = vld [vmem:[%s1753_s15 + $0x180] sm:$0xff]  ;;  %v531_v57 = vld [vmem:[%s1753_s15 + $0x190] sm:$0xff] }
  0x32   : > { %v533_v58 = vld [vmem:[%s1753_s15 + $0x1a0] sm:$0xff]  ;;  %530 = vst [vmem:[%s1758_s16 + $0xc0] sm:$0xff] %v529_v56  ;;  %532 = vst [vmem:[%s1758_s16 + $0xc8] sm:$0xff] %v531_v57  ;;  %v535_v59 = vld [vmem:[%s1753_s15 + $0x1b0] sm:$0xff] }
  0x33   : > { %534 = vst [vmem:[%s1758_s16 + $0xd0] sm:$0xff] %v533_v58  ;;  %v537_v60 = vld [vmem:[%s1753_s15 + $0x1c0] sm:$0xff]  ;;  %v539_v61 = vld [vmem:[%s1753_s15 + $0x1d0] sm:$0xff]  ;;  %536 = vst [vmem:[%s1758_s16 + $0xd8] sm:$0xff] %v535_v59 }
  0x34   : > { %538 = vst [vmem:[%s1758_s16 + $0xe0] sm:$0xff] %v537_v60  ;;  %540 = vst [vmem:[%s1758_s16 + $0xe8] sm:$0xff] %v539_v61  ;;  %v541_v62 = vld [vmem:[%s1753_s15 + $0x1e0] sm:$0xff]  ;;  %v543_v63 = vld [vmem:[%s1753_s15 + $0x1f0] sm:$0xff] }
  0x35   : > { %542 = vst [vmem:[%s1758_s16 + $0xf0] sm:$0xff] %v541_v62  ;;  %544 = vst [vmem:[%s1758_s16 + $0xf8] sm:$0xff] %v543_v63 }
  0x36 PF: > { %p1335_p6 = scmp.ge.s32.totalorder %s1597_s22, 1  ;;  %p557_p7 = scmp.lt.s32.totalorder %s1597_s22, 3 }
  0x38   : > { %p558_p8 = pnand %p1335_p6, %p557_p7 }
  0x39   : > { %s564_s17 = sand.u32 (!%p558_p8), 1, %s1581_s18   ;;  %v1827_v0 = vld.sshfl [vmem:[%s1935_s1] sm:$0x33 pattern:$0x76325410] (!%p558_p8)  ;;  %s1338_s6 = sshll.u32 (!%p558_p8), %s1589_s20, 1 }
  0x3a   : > { %561 = sbr.rel (%p558_p8) target bundleno = 374 (0x176), region = 108  ;;  %s1336_s26 = sshll.u32 (!%p558_p8), %s564_s17, 8  ;;  %v721_v1 = vcombine.high (!%p558_p8), %v1827_v0, %v1827_v0  ;;  %v1834_v2 = vld.sshfl [vmem:[%s1934_s0] sm:$0x33 pattern:$0x76325410] (!%p558_p8) }
  0x3b   : > { %v933_v3 = vcombine.high (!%p558_p8), %v1834_v2, %v1834_v2  ;;  %s1838_s30 = scalar_lea.vmem (!%p558_p8), [#allocation3], %s1336_s26  ;;  %s1841_s18 = scalar_lea.vmem (!%p558_p8), [#allocation2], %s1336_s26 }
  0x3c   : > { %v1455_v4 = vld [vmem:[%s1838_s30 + $0x4] ss:$8 sps:$4 sm:$0xff] (!%p558_p8)   ;;  %916 = vmatprep.mubr.bf16.mxu0 (!%p558_p8), %v721_v1  ;;  %v1459_v6 = vld [vmem:[%s1838_s30] ss:$8 sps:$4 sm:$0xff] (!%p558_p8)   ;;  %v1461_v8 = vld [vmem:[%s1838_s30 + $0x14] ss:$8 sps:$4 sm:$0xff] (!%p558_p8)  }
  0x3d   : > { %v1457_v5 = vld [vmem:[%s1841_s18 + $0x4] ss:$8 sps:$4 sm:$0xff] (!%p558_p8)   ;;  %1128 = vmatprep.mubr.bf16.mxu1 (!%p558_p8), %v933_v3  ;;  %884 = vmatprep.subr.bf16.mxu0 (!%p558_p8), %v1455_v4  ;;  %v1460_v7 = vld [vmem:[%s1841_s18] ss:$8 sps:$4 sm:$0xff] (!%p558_p8)   ;;  %v1463_v9 = vld [vmem:[%s1841_s18 + $0x14] ss:$8 sps:$4 sm:$0xff] (!%p558_p8)  }
  0x3e   : > { %1096 = vmatprep.subr.bf16.mxu1 (!%p558_p8), %v1457_v5  ;;  %885 = vmatpush1.bf16.msra.mxu0 (!%p558_p8), %v1459_v6  ;;  %v1465_v10 = vld [vmem:[%s1838_s30 + $0x10] ss:$8 sps:$4 sm:$0xff] (!%p558_p8)   ;;  %v1467_v12 = vld [vmem:[%s1838_s30 + $0x24] ss:$8 sps:$4 sm:$0xff] (!%p558_p8)   ;;  %v1471_v14 = vld [vmem:[%s1838_s30 + $0x20] ss:$8 sps:$4 sm:$0xff] (!%p558_p8)   ;;  %v1139_v6 = vlaneseq (!%p558_p8) }
  0x3f   : > { %1097 = vmatpush1.bf16.msra.mxu1 (!%p558_p8), %v1460_v7  ;;  %886 = vmatprep.subr.bf16.mxu0 (!%p558_p8), %v1461_v8  ;;  %v1466_v11 = vld [vmem:[%s1841_s18 + $0x10] ss:$8 sps:$4 sm:$0xff] (!%p558_p8)   ;;  %v1469_v13 = vld [vmem:[%s1841_s18 + $0x24] ss:$8 sps:$4 sm:$0xff] (!%p558_p8)   ;;  %v1472_v15 = vld [vmem:[%s1841_s18 + $0x20] ss:$8 sps:$4 sm:$0xff] (!%p558_p8)  }
  0x40   : > { %1098 = vmatprep.subr.bf16.mxu1 (!%p558_p8), %v1463_v9  ;;  %v1473_v16 = vld [vmem:[%s1838_s30 + $0x34] ss:$8 sps:$4 sm:$0xff] (!%p558_p8)   ;;  %v1477_v18 = vld [vmem:[%s1838_s30 + $0x30] ss:$8 sps:$4 sm:$0xff] (!%p558_p8)   ;;  %v1479_v20 = vld [vmem:[%s1838_s30 + $0x44] ss:$8 sps:$4 sm:$0xff] (!%p558_p8)  }
  0x41   : > { %v1475_v17 = vld [vmem:[%s1841_s18 + $0x34] ss:$8 sps:$4 sm:$0xff]   ;;  %v1478_v19 = vld [vmem:[%s1841_s18 + $0x30] ss:$8 sps:$4 sm:$0xff]   ;;  %v1481_v21 = vld [vmem:[%s1841_s18 + $0x44] ss:$8 sps:$4 sm:$0xff]  }
  0x42   : > { %887 = vmatpush1.bf16.msra.mxu0 %v1465_v10  ;;  %v1483_v22 = vld [vmem:[%s1838_s30 + $0x40] ss:$8 sps:$4 sm:$0xff]   ;;  %v1485_v24 = vld [vmem:[%s1838_s30 + $0x54] ss:$8 sps:$4 sm:$0xff]   ;;  %v1489_v26 = vld [vmem:[%s1838_s30 + $0x50] ss:$8 sps:$4 sm:$0xff]  }
  0x43   : > { %1099 = vmatpush1.bf16.msra.mxu1 %v1466_v11  ;;  %888 = vmatprep.subr.bf16.mxu0 %v1467_v12  ;;  %v1484_v23 = vld [vmem:[%s1841_s18 + $0x40] ss:$8 sps:$4 sm:$0xff]   ;;  %v1487_v25 = vld [vmem:[%s1841_s18 + $0x54] ss:$8 sps:$4 sm:$0xff]   ;;  %v1490_v27 = vld [vmem:[%s1841_s18 + $0x50] ss:$8 sps:$4 sm:$0xff]  }
  0x44   : > { %1100 = vmatprep.subr.bf16.mxu1 %v1469_v13  ;;  %v1491_v28 = vld [vmem:[%s1838_s30 + $0x64] ss:$8 sps:$4 sm:$0xff]   ;;  %v1495_v30 = vld [vmem:[%s1838_s30 + $0x60] ss:$8 sps:$4 sm:$0xff]   ;;  %v1497_v32 = vld [vmem:[%s1838_s30 + $0x74] ss:$8 sps:$4 sm:$0xff]  }
  0x45   : > { %v1493_v29 = vld [vmem:[%s1841_s18 + $0x64] ss:$8 sps:$4 sm:$0xff]   ;;  %v1496_v31 = vld [vmem:[%s1841_s18 + $0x60] ss:$8 sps:$4 sm:$0xff]   ;;  %v1499_v33 = vld [vmem:[%s1841_s18 + $0x74] ss:$8 sps:$4 sm:$0xff]  }
  0x46   : > { %889 = vmatpush1.bf16.msra.mxu0 %v1471_v14  ;;  %v1501_v34 = vld [vmem:[%s1838_s30 + $0x70] ss:$8 sps:$4 sm:$0xff]   ;;  %v1503_v36 = vld [vmem:[%s1838_s30 + $0x84] ss:$8 sps:$4 sm:$0xff]   ;;  %v1507_v38 = vld [vmem:[%s1838_s30 + $0x80] ss:$8 sps:$4 sm:$0xff]  }
  0x47   : > { %1101 = vmatpush1.bf16.msra.mxu1 %v1472_v15  ;;  %890 = vmatprep.subr.bf16.mxu0 %v1473_v16  ;;  %v1502_v35 = vld [vmem:[%s1841_s18 + $0x70] ss:$8 sps:$4 sm:$0xff]   ;;  %v1505_v37 = vld [vmem:[%s1841_s18 + $0x84] ss:$8 sps:$4 sm:$0xff]   ;;  %v1508_v39 = vld [vmem:[%s1841_s18 + $0x80] ss:$8 sps:$4 sm:$0xff]  }
  0x48   : > { %1102 = vmatprep.subr.bf16.mxu1 %v1475_v17  ;;  %v1509_v40 = vld [vmem:[%s1838_s30 + $0x94] ss:$8 sps:$4 sm:$0xff]   ;;  %v1513_v42 = vld [vmem:[%s1838_s30 + $0x90] ss:$8 sps:$4 sm:$0xff]   ;;  %v1515_v44 = vld [vmem:[%s1838_s30 + $0xa4] ss:$8 sps:$4 sm:$0xff]  }
  0x49   : > { %v1511_v41 = vld [vmem:[%s1841_s18 + $0x94] ss:$8 sps:$4 sm:$0xff]   ;;  %v1514_v43 = vld [vmem:[%s1841_s18 + $0x90] ss:$8 sps:$4 sm:$0xff]   ;;  %v1517_v45 = vld [vmem:[%s1841_s18 + $0xa4] ss:$8 sps:$4 sm:$0xff]  }
  0x4a   : > { %891 = vmatpush1.bf16.msra.mxu0 %v1477_v18  ;;  %v1519_v46 = vld [vmem:[%s1838_s30 + $0xa0] ss:$8 sps:$4 sm:$0xff]   ;;  %v1521_v48 = vld [vmem:[%s1838_s30 + $0xb4] ss:$8 sps:$4 sm:$0xff]   ;;  %v1525_v50 = vld [vmem:[%s1838_s30 + $0xb0] ss:$8 sps:$4 sm:$0xff]  }
  0x4b   : > { %1103 = vmatpush1.bf16.msra.mxu1 %v1478_v19  ;;  %892 = vmatprep.subr.bf16.mxu0 %v1479_v20  ;;  %v1520_v47 = vld [vmem:[%s1841_s18 + $0xa0] ss:$8 sps:$4 sm:$0xff]   ;;  %v1523_v49 = vld [vmem:[%s1841_s18 + $0xb4] ss:$8 sps:$4 sm:$0xff]   ;;  %v1526_v51 = vld [vmem:[%s1841_s18 + $0xb0] ss:$8 sps:$4 sm:$0xff]  }
  0x4c   : > { %1104 = vmatprep.subr.bf16.mxu1 %v1481_v21  ;;  %v1527_v52 = vld [vmem:[%s1838_s30 + $0xc4] ss:$8 sps:$4 sm:$0xff]   ;;  %v1531_v54 = vld [vmem:[%s1838_s30 + $0xc0] ss:$8 sps:$4 sm:$0xff]   ;;  %v1533_v56 = vld [vmem:[%s1838_s30 + $0xd4] ss:$8 sps:$4 sm:$0xff]  }
  0x4d   : > { %v1529_v53 = vld [vmem:[%s1841_s18 + $0xc4] ss:$8 sps:$4 sm:$0xff]   ;;  %v1532_v55 = vld [vmem:[%s1841_s18 + $0xc0] ss:$8 sps:$4 sm:$0xff]   ;;  %v1535_v57 = vld [vmem:[%s1841_s18 + $0xd4] ss:$8 sps:$4 sm:$0xff]  }
  0x4e   : > { %893 = vmatpush1.bf16.msra.mxu0 %v1483_v22  ;;  %v1537_v58 = vld [vmem:[%s1838_s30 + $0xd0] ss:$8 sps:$4 sm:$0xff]   ;;  %v1539_v60 = vld [vmem:[%s1838_s30 + $0xe4] ss:$8 sps:$4 sm:$0xff]   ;;  %v1543_v62 = vld [vmem:[%s1838_s30 + $0xe0] ss:$8 sps:$4 sm:$0xff]  }
  0x4f   : > { %1105 = vmatpush1.bf16.msra.mxu1 %v1484_v23  ;;  %894 = vmatprep.subr.bf16.mxu0 %v1485_v24  ;;  %v1538_v59 = vld [vmem:[%s1841_s18 + $0xd0] ss:$8 sps:$4 sm:$0xff]   ;;  %v1541_v61 = vld [vmem:[%s1841_s18 + $0xe4] ss:$8 sps:$4 sm:$0xff]   ;;  %v1544_v63 = vld [vmem:[%s1841_s18 + $0xe0] ss:$8 sps:$4 sm:$0xff]  }
  0x50   : > { %1106 = vmatprep.subr.bf16.mxu1 %v1487_v25  ;;  %v1545_v1 = vld [vmem:[%s1838_s30 + $0xf4] ss:$8 sps:$4 sm:$0xff]   ;;  %v1549_v4 = vld [vmem:[%s1838_s30 + $0xf0] ss:$8 sps:$4 sm:$0xff]   ;;  %p633_p9 = scmp.lt.s32.totalorder %s1338_s6, 3  ;;  %v1140_v7 = vshrl.u32 %v1139_v6, 7 }
  0x51   : > { %v1547_v3 = vld [vmem:[%s1841_s18 + $0xf4] ss:$8 sps:$4 sm:$0xff]   ;;  %v1550_v5 = vld [vmem:[%s1841_s18 + $0xf0] ss:$8 sps:$4 sm:$0xff]  }
  0x52   : > { %895 = vmatpush1.bf16.msra.mxu0 %v1489_v26  ;;  %s1948_s6 = smov (!%p633_p9, %s1338_s6), 3  ;;  %v1141_v8 = vsub.s32 0, %v1140_v7  ;;  %v1145_v10 = vsub.s32 1, %v1140_v7 }
  0x53   : > { %1107 = vmatpush1.bf16.msra.mxu1 %v1490_v27  ;;  %896 = vmatprep.subr.bf16.mxu0 %v1491_v28  ;;  %s635_s9 = scalar_lea.vmem %s1938_s4, %s1948_s6  ;;  %s1340_s20 = sshll.u32 %s1948_s6, 1 }
  0x54   : > { %1108 = vmatprep.subr.bf16.mxu1 %v1493_v29  ;;  %v1137_v9 = vld [vmem:[%s635_s9] sm:$0x3]  ;;  %s645_s12 = scalar_lea.vmem %s1939_s5, %s1340_s20 }
  0x55   : > { %v1142_v11 = vrot.slane %v1137_v9, %v1141_v8 }
  0x56   : > { %897 = vmatpush1.bf16.msra.mxu0 %v1495_v30 }
  0x57   : > { %1109 = vmatpush1.bf16.msra.mxu1 %v1496_v31  ;;  %898 = vmatprep.subr.bf16.mxu0 %v1497_v32 }
  0x58   : > { %1110 = vmatprep.subr.bf16.mxu1 %v1499_v33 }
  0x5a   : > { %899 = vmatpush1.bf16.msra.mxu0 %v1501_v34 }
  0x5b   : > { %1111 = vmatpush1.bf16.msra.mxu1 %v1502_v35  ;;  %900 = vmatprep.subr.bf16.mxu0 %v1503_v36 }
  0x5c   : > { %1112 = vmatprep.subr.bf16.mxu1 %v1505_v37 }
  0x5e   : > { %901 = vmatpush1.bf16.msra.mxu0 %v1507_v38 }
  0x5f   : > { %1113 = vmatpush1.bf16.msra.mxu1 %v1508_v39  ;;  %902 = vmatprep.subr.bf16.mxu0 %v1509_v40 }
  0x60   : > { %1114 = vmatprep.subr.bf16.mxu1 %v1511_v41 }
  0x62   : > { %903 = vmatpush1.bf16.msra.mxu0 %v1513_v42 }
  0x63   : > { %1115 = vmatpush1.bf16.msra.mxu1 %v1514_v43  ;;  %904 = vmatprep.subr.bf16.mxu0 %v1515_v44 }
  0x64   : > { %1116 = vmatprep.subr.bf16.mxu1 %v1517_v45 }
  0x66   : > { %905 = vmatpush1.bf16.msra.mxu0 %v1519_v46 }
  0x67   : > { %1117 = vmatpush1.bf16.msra.mxu1 %v1520_v47  ;;  %906 = vmatprep.subr.bf16.mxu0 %v1521_v48 }
  0x68   : > { %1118 = vmatprep.subr.bf16.mxu1 %v1523_v49 }
  0x6a   : > { %907 = vmatpush1.bf16.msra.mxu0 %v1525_v50 }
  0x6b   : > { %1119 = vmatpush1.bf16.msra.mxu1 %v1526_v51  ;;  %908 = vmatprep.subr.bf16.mxu0 %v1527_v52 }
  0x6c   : > { %1120 = vmatprep.subr.bf16.mxu1 %v1529_v53 }
  0x6e   : > { %909 = vmatpush1.bf16.msra.mxu0 %v1531_v54 }
  0x6f   : > { %1121 = vmatpush1.bf16.msra.mxu1 %v1532_v55  ;;  %910 = vmatprep.subr.bf16.mxu0 %v1533_v56 }
  0x70   : > { %1122 = vmatprep.subr.bf16.mxu1 %v1535_v57 }
  0x72   : > { %911 = vmatpush1.bf16.msra.mxu0 %v1537_v58 }
  0x73   : > { %1123 = vmatpush1.bf16.msra.mxu1 %v1538_v59  ;;  %912 = vmatprep.subr.bf16.mxu0 %v1539_v60 }
  0x74   : > { %1124 = vmatprep.subr.bf16.mxu1 %v1541_v61 }
  0x76   : > { %913 = vmatpush1.bf16.msra.mxu0 %v1543_v62 }
  0x77   : > { %1125 = vmatpush1.bf16.msra.mxu1 %v1544_v63  ;;  %914 = vmatprep.subr.bf16.mxu0 %v1545_v1 }
  0x78   : > { %1126 = vmatprep.subr.bf16.mxu1 %v1547_v3 }
  0x7a   : > { %915 = vmatpush1.bf16.msra.mxu0 %v1549_v4 }
  0x7b   : > { %1127 = vmatpush1.bf16.msra.mxu1 %v1550_v5 }
  0x7d   : > { %917 = vmatmul.mubr.bf16.vlgmr.msra.gmra.mrb[0].mxu0 %v1827_v0  ;;  %v1146_v0 = vrot.slane %v1137_v9, %v1145_v10 }
  0x7e   : > { %1129 = vmatmul.mubr.bf16.vlgmr.msra.gmra.mrb[0].mxu1 %v1834_v2 }
 0x150   : > { %v918_v12 = vpop.f32.mrb[0].mxu0 }
 0x151   : > { %v1130_v13 = vpop.f32.mrb[0].mxu1  ;;  %v920_v2 = vpop.f32.mrb[1].mxu0 }
 0x152   : > { %v1131_v14 = vadd.f32 %v1130_v13, %v918_v12  ;;  %v1132_v15 = vpop.f32.mrb[1].mxu1  ;;  %v922_v17 = vpop.f32.mrb[2].mxu0 }
 0x153   : > { %v1133_v16 = vadd.f32 %v1132_v15, %v920_v2  ;;  %v1134_v18 = vpop.f32.mrb[2].mxu1  ;;  %v923_v20 = vpop.f32.mrb[3].mxu0 }
 0x154   : > { %v1149_v19 = vadd.f32 %v1142_v11, %v1131_v14  ;;  %v1135_v21 = vpop.f32.mrb[3].mxu1 }
 0x155   : > { %v1150_v22 = vadd.f32 %v1146_v0, %v1133_v16 }
 0x156   : > { %v1407_v23 = vmul.f32 -1.442695, %v1149_v19 }
 0x157   : > { %v1408_v24 = vmul.f32 -1.442695, %v1150_v22 }
 0x158   : > { %1551 = vpow2.f32 %v1407_v23 }
 0x159   : > { %1553 = vpow2.f32 %v1408_v24 }
 0x162   : > { %v1552_v25 = vpop.eup %1551 }
 0x163   : > { %v1554_v26 = vpop.eup %1553  ;;  %v1157_v27 = vadd.f32 1.0, %v1552_v25 }
 0x164   : > { %v1158_v28 = vadd.f32 1.0, %v1554_v26 }
 0x165   : > { %1555 = vrcp.f32 %v1157_v27 }
 0x166   : > { %1557 = vrcp.f32 %v1158_v28 }
 0x16f   : > { %v1556_v29 = vpop.eup %1555 }
 0x170   : > { %v1558_v30 = vpop.eup %1557  ;;  %v1163_v31 = vmul.f32 %v1556_v29, %v1149_v19 }
 0x171   : > { %v1164_v32 = vmul.f32 %v1558_v30, %v1150_v22 }
 0x173   : > { %v1409_v33 = vpack.c.bf16 %v1164_v32, %v1163_v31 }
 0x175   : > { %1410 = vst.sshfl [vmem:[%s645_s12] sm:$0x33 pattern:$0x76325410] %v1409_v33 }
 0x176 PF: > { %s15_s22 = sadd.s32 1, %s1597_s22   ;;  %s1941_s18 = smov %s1585_s19 }
 0x177   : > { %p12_p10 = scmp.ge.s32.totalorder %s15_s22, 4   ;;  %s1942_s19 = smov %s1668_s27 }
 0x178   : > { %s1943_s20 = smov %s1593_s21  ;;  %s1944_s21 = smov %s1946_s23 }
 0x179   :  { %14 = sbr.rel (!%p12_p10) target bundleno = 3 (0x3), region = 168 }

// kernel: seg_no_ffm_forward.43
= control target key start
LH: loop header
LB: loop body
LE: loop exit
PB: predicated region body
PF: predicated region fallthrough
CT: control target
= control target key end

     0   :  { %v309_v36 = vlaneseq  ;;  %v3029_v37 = vmov 1983009808   ;;  %s3995_s1 = inlined_call_operand.vmem [shape: bf16[2304,256], index: 1, kind: input, shape index: {}]   ;;  %s3996_s0 = inlined_call_operand.vmem [shape: bf16[4,2304], index: 0, kind: input, shape index: {}]   ;;  %s3997_s2 = inlined_call_operand.vmem [shape: f32[1,256], index: 2, kind: input, shape index: {}]   ;;  %s3998_s3 = inlined_call_operand.vmem [shape: bf16[4,256], index: 3, kind: output, shape index: {}]  }
   0x1   :  { %v2585_v0 = vld [vmem:[%s3995_s1 + $0x4] ss:$8 sps:$4 sm:$0xff]   ;;  %v2589_v2 = vld [vmem:[%s3995_s1] ss:$8 sps:$4 sm:$0xff]   ;;  %v2591_v4 = vld [vmem:[%s3995_s1 + $0x14] ss:$8 sps:$4 sm:$0xff]   ;;  %v326_v38 = vunpack.c.l.s4 %v3029_v37 }
   0x2   :  { %v2587_v1 = vld [vmem:[%s3995_s1 + $0x404] ss:$8 sps:$4 sm:$0xff]   ;;  %1858 = vmatprep.subr.bf16.mxu1 %v2585_v0  ;;  %v2590_v3 = vld [vmem:[%s3995_s1 + $0x400] ss:$8 sps:$4 sm:$0xff]   ;;  %v2593_v5 = vld [vmem:[%s3995_s1 + $0x414] ss:$8 sps:$4 sm:$0xff]  }
   0x3   :  { %2022 = vmatprep.subr.bf16.mxu0 %v2587_v1  ;;  %1859 = vmatpush1.bf16.msra.mxu1 %v2589_v2  ;;  %v2595_v6 = vld [vmem:[%s3995_s1 + $0x10] ss:$8 sps:$4 sm:$0xff]   ;;  %v2597_v8 = vld [vmem:[%s3995_s1 + $0x24] ss:$8 sps:$4 sm:$0xff]   ;;  %v2601_v10 = vld [vmem:[%s3995_s1 + $0x20] ss:$8 sps:$4 sm:$0xff]   ;;  %v327_v43 = vunpack.c.0.s8 %v326_v38 }
   0x4   :  { %2023 = vmatpush1.bf16.msra.mxu0 %v2590_v3  ;;  %1860 = vmatprep.subr.bf16.mxu1 %v2591_v4  ;;  %v2596_v7 = vld [vmem:[%s3995_s1 + $0x410] ss:$8 sps:$4 sm:$0xff]   ;;  %v2599_v9 = vld [vmem:[%s3995_s1 + $0x424] ss:$8 sps:$4 sm:$0xff]   ;;  %v2602_v11 = vld [vmem:[%s3995_s1 + $0x420] ss:$8 sps:$4 sm:$0xff]  }
   0x5   :  { %2024 = vmatprep.subr.bf16.mxu0 %v2593_v5  ;;  %v2603_v12 = vld [vmem:[%s3995_s1 + $0x34] ss:$8 sps:$4 sm:$0xff]   ;;  %v2607_v14 = vld [vmem:[%s3995_s1 + $0x30] ss:$8 sps:$4 sm:$0xff]   ;;  %v2609_v16 = vld [vmem:[%s3995_s1 + $0x44] ss:$8 sps:$4 sm:$0xff]  }
   0x6   :  { %v2605_v13 = vld [vmem:[%s3995_s1 + $0x434] ss:$8 sps:$4 sm:$0xff]   ;;  %v2608_v15 = vld [vmem:[%s3995_s1 + $0x430] ss:$8 sps:$4 sm:$0xff]   ;;  %v2611_v17 = vld [vmem:[%s3995_s1 + $0x444] ss:$8 sps:$4 sm:$0xff]  }
   0x7   :  { %1861 = vmatpush1.bf16.msra.mxu1 %v2595_v6  ;;  %v2613_v18 = vld [vmem:[%s3995_s1 + $0x40] ss:$8 sps:$4 sm:$0xff]   ;;  %v2615_v20 = vld [vmem:[%s3995_s1 + $0x54] ss:$8 sps:$4 sm:$0xff]   ;;  %v2619_v22 = vld [vmem:[%s3995_s1 + $0x50] ss:$8 sps:$4 sm:$0xff]  }
   0x8   :  { %2025 = vmatpush1.bf16.msra.mxu0 %v2596_v7  ;;  %1862 = vmatprep.subr.bf16.mxu1 %v2597_v8  ;;  %v2614_v19 = vld [vmem:[%s3995_s1 + $0x440] ss:$8 sps:$4 sm:$0xff]   ;;  %v2617_v21 = vld [vmem:[%s3995_s1 + $0x454] ss:$8 sps:$4 sm:$0xff]   ;;  %v2620_v23 = vld [vmem:[%s3995_s1 + $0x450] ss:$8 sps:$4 sm:$0xff]  }
   0x9   :  { %2026 = vmatprep.subr.bf16.mxu0 %v2599_v9  ;;  %v2621_v24 = vld [vmem:[%s3995_s1 + $0x64] ss:$8 sps:$4 sm:$0xff]   ;;  %v2625_v26 = vld [vmem:[%s3995_s1 + $0x60] ss:$8 sps:$4 sm:$0xff]   ;;  %v2627_v28 = vld [vmem:[%s3995_s1 + $0x74] ss:$8 sps:$4 sm:$0xff]  }
   0xa   :  { %v2623_v25 = vld [vmem:[%s3995_s1 + $0x464] ss:$8 sps:$4 sm:$0xff]   ;;  %v2626_v27 = vld [vmem:[%s3995_s1 + $0x460] ss:$8 sps:$4 sm:$0xff]   ;;  %v2629_v29 = vld [vmem:[%s3995_s1 + $0x474] ss:$8 sps:$4 sm:$0xff]  }
   0xb   :  { %1863 = vmatpush1.bf16.msra.mxu1 %v2601_v10  ;;  %v2631_v30 = vld [vmem:[%s3995_s1 + $0x70] ss:$8 sps:$4 sm:$0xff]   ;;  %v2633_v32 = vld [vmem:[%s3995_s1 + $0x84] ss:$8 sps:$4 sm:$0xff]   ;;  %v2637_v34 = vld [vmem:[%s3995_s1 + $0x80] ss:$8 sps:$4 sm:$0xff]  }
   0xc   :  { %2027 = vmatpush1.bf16.msra.mxu0 %v2602_v11  ;;  %1864 = vmatprep.subr.bf16.mxu1 %v2603_v12  ;;  %v2632_v31 = vld [vmem:[%s3995_s1 + $0x470] ss:$8 sps:$4 sm:$0xff]   ;;  %v2635_v33 = vld [vmem:[%s3995_s1 + $0x484] ss:$8 sps:$4 sm:$0xff]   ;;  %v2638_v35 = vld [vmem:[%s3995_s1 + $0x480] ss:$8 sps:$4 sm:$0xff]  }
   0xd   :  { %2028 = vmatprep.subr.bf16.mxu0 %v2605_v13  ;;  %v2639_v39 = vld [vmem:[%s3995_s1 + $0x94] ss:$8 sps:$4 sm:$0xff]   ;;  %v2643_v41 = vld [vmem:[%s3995_s1 + $0x90] ss:$8 sps:$4 sm:$0xff]   ;;  %v3167_v42 = vshrl.u32 %v309_v36, 7  ;;  %v14_v52 = vld [vmem:[%s3996_s0] sm:$0xff] }
   0xe   :  { %v2641_v40 = vld [vmem:[%s3995_s1 + $0x494] ss:$8 sps:$4 sm:$0xff]   ;;  %v2644_v44 = vld [vmem:[%s3995_s1 + $0x490] ss:$8 sps:$4 sm:$0xff]   ;;  %v2645_v45 = vld [vmem:[%s3995_s1 + $0xa4] ss:$8 sps:$4 sm:$0xff]   ;;  %v324_v10 = vcombine.high %v14_v52, %v14_v52 }
   0xf   :  { %1865 = vmatpush1.bf16.msra.mxu1 %v2607_v14  ;;  %v2647_v46 = vld [vmem:[%s3995_s1 + $0x4a4] ss:$8 sps:$4 sm:$0xff]   ;;  %v2649_v47 = vld [vmem:[%s3995_s1 + $0xa0] ss:$8 sps:$4 sm:$0xff]   ;;  %v3185_v49 = vsub.s32 %v327_v43, %v3167_v42  ;;  %v2651_v50 = vld [vmem:[%s3995_s1 + $0xb4] ss:$8 sps:$4 sm:$0xff]  }
  0x10   :  { %2029 = vmatpush1.bf16.msra.mxu0 %v2608_v15  ;;  %1866 = vmatprep.subr.bf16.mxu1 %v2609_v16  ;;  %v2650_v48 = vld [vmem:[%s3995_s1 + $0x4a0] ss:$8 sps:$4 sm:$0xff]   ;;  %v2653_v51 = vld [vmem:[%s3995_s1 + $0x4b4] ss:$8 sps:$4 sm:$0xff]   ;;  %v2655_v53 = vld [vmem:[%s3995_s1 + $0xb0] ss:$8 sps:$4 sm:$0xff]  }
  0x11   :  { %2030 = vmatprep.subr.bf16.mxu0 %v2611_v17  ;;  %v331_v54 = vrot.slane %v14_v52, %v3185_v49  ;;  %v2656_v55 = vld [vmem:[%s3995_s1 + $0x4b0] ss:$8 sps:$4 sm:$0xff]   ;;  %v2657_v57 = vld [vmem:[%s3995_s1 + $0xc4] ss:$8 sps:$4 sm:$0xff]   ;;  %v2661_v62 = vld [vmem:[%s3995_s1 + $0xc0] ss:$8 sps:$4 sm:$0xff]   ;;  %v3262_v16 = vrot.slane %v324_v10, %v3185_v49 }
  0x12   :  { %v16_v56 = vld [vmem:[%s3996_s0 + $0x10] sm:$0xff]  ;;  %v2659_v58 = vld [vmem:[%s3995_s1 + $0x4c4] ss:$8 sps:$4 sm:$0xff]   ;;  %v2662_v63 = vld [vmem:[%s3995_s1 + $0x4c0] ss:$8 sps:$4 sm:$0xff]  }
  0x13   :  { %1867 = vmatpush1.bf16.msra.mxu1 %v2613_v18  ;;  %v339_v59 = vcombine.high %v331_v54, %v331_v54  ;;  %v365_v60 = vrot.slane %v16_v56, %v3185_v49  ;;  %v2663_v0 = vld [vmem:[%s3995_s1 + $0xd4] ss:$8 sps:$4 sm:$0xff]   ;;  %v2667_v2 = vld [vmem:[%s3995_s1 + $0xd0] ss:$8 sps:$4 sm:$0xff]   ;;  %v2669_v4 = vld [vmem:[%s3995_s1 + $0xe4] ss:$8 sps:$4 sm:$0xff]   ;;  %v358_v11 = vcombine.high %v16_v56, %v16_v56 }
  0x14   :  { %2031 = vmatpush1.bf16.msra.mxu0 %v2614_v19  ;;  %1868 = vmatprep.subr.bf16.mxu1 %v2615_v20  ;;  %v2665_v1 = vld [vmem:[%s3995_s1 + $0x4d4] ss:$8 sps:$4 sm:$0xff]   ;;  %v2668_v3 = vld [vmem:[%s3995_s1 + $0x4d0] ss:$8 sps:$4 sm:$0xff]   ;;  %v2671_v5 = vld [vmem:[%s3995_s1 + $0x4e4] ss:$8 sps:$4 sm:$0xff]  }
  0x15   :  { %2032 = vmatprep.subr.bf16.mxu0 %v2617_v21  ;;  %1890 = vmatprep.mubr.bf16.mxu1 %v339_v59  ;;  %v373_v61 = vcombine.high %v365_v60, %v365_v60  ;;  %v2673_v6 = vld [vmem:[%s3995_s1 + $0xe0] ss:$8 sps:$4 sm:$0xff]   ;;  %v2675_v8 = vld [vmem:[%s3995_s1 + $0xf4] ss:$8 sps:$4 sm:$0xff]   ;;  %v2679_v12 = vld [vmem:[%s3995_s1 + $0xf0] ss:$8 sps:$4 sm:$0xff]   ;;  %v3265_v17 = vrot.slane %v358_v11, %v3185_v49 }
  0x16   :  { %v2674_v7 = vld [vmem:[%s3995_s1 + $0x4e0] ss:$8 sps:$4 sm:$0xff]   ;;  %v2677_v9 = vld [vmem:[%s3995_s1 + $0x4f4] ss:$8 sps:$4 sm:$0xff]   ;;  %v2680_v13 = vld [vmem:[%s3995_s1 + $0x4f0] ss:$8 sps:$4 sm:$0xff]  }
  0x17   :  { %1869 = vmatpush1.bf16.msra.mxu1 %v2619_v22  ;;  %2054 = vmatprep.mubr.bf16.mxu0 %v373_v61  ;;  %v2684_v14 = vld [vmem:[%s3995_s1 + $0x104] ss:$8 sps:$4 sm:$0xff]   ;;  %v2682_v18 = vld [vmem:[%s3995_s1 + $0x100] ss:$8 sps:$4 sm:$0xff]   ;;  %v2691_v20 = vld [vmem:[%s3995_s1 + $0x114] ss:$8 sps:$4 sm:$0xff]   ;;  %v340_v22 = vcombine.high %v3262_v16, %v3262_v16 }
  0x18   :  { %2033 = vmatpush1.bf16.msra.mxu0 %v2620_v23  ;;  %1870 = vmatprep.subr.bf16.mxu1 %v2621_v24  ;;  %v2688_v15 = vld [vmem:[%s3995_s1 + $0x504] ss:$8 sps:$4 sm:$0xff]   ;;  %v2686_v19 = vld [vmem:[%s3995_s1 + $0x500] ss:$8 sps:$4 sm:$0xff]   ;;  %v2694_v21 = vld [vmem:[%s3995_s1 + $0x514] ss:$8 sps:$4 sm:$0xff]   ;;  %v374_v23 = vcombine.high %v3265_v17, %v3265_v17 }
  0x19   :  { %2034 = vmatprep.subr.bf16.mxu0 %v2623_v25  ;;  %v2689_v24 = vld [vmem:[%s3995_s1 + $0x110] ss:$8 sps:$4 sm:$0xff]   ;;  %v2707_v36 = vld [vmem:[%s3995_s1 + $0x140] ss:$8 sps:$4 sm:$0xff]   ;;  %v2715_v38 = vld [vmem:[%s3995_s1 + $0x154] ss:$8 sps:$4 sm:$0xff]  }
  0x1a   :  { %v2692_v25 = vld [vmem:[%s3995_s1 + $0x510] ss:$8 sps:$4 sm:$0xff]   ;;  %v2710_v37 = vld [vmem:[%s3995_s1 + $0x540] ss:$8 sps:$4 sm:$0xff]   ;;  %v2721_v43 = vld [vmem:[%s3995_s1 + $0x164] ss:$8 sps:$4 sm:$0xff]  }
  0x1b   :  { %1871 = vmatpush1.bf16.msra.mxu1 %v2625_v26  ;;  %v2697_v26 = vld [vmem:[%s3995_s1 + $0x124] ss:$8 sps:$4 sm:$0xff]   ;;  %v2739_v56 = vld [vmem:[%s3995_s1 + $0x194] ss:$8 sps:$4 sm:$0xff]   ;;  %v2740_v59 = vld [vmem:[%s3995_s1 + $0x590] ss:$8 sps:$4 sm:$0xff]  }
  0x1c   :  { %2035 = vmatpush1.bf16.msra.mxu0 %v2626_v27  ;;  %1872 = vmatprep.subr.bf16.mxu1 %v2627_v28  ;;  %v2700_v27 = vld [vmem:[%s3995_s1 + $0x524] ss:$8 sps:$4 sm:$0xff]   ;;  %v2695_v28 = vld [vmem:[%s3995_s1 + $0x120] ss:$8 sps:$4 sm:$0xff]   ;;  %v2761_v10 = vld [vmem:[%s3995_s1 + $0x1d0] ss:$8 sps:$4 sm:$0xff]  }
  0x1d   :  { %2036 = vmatprep.subr.bf16.mxu0 %v2629_v29  ;;  %v2698_v29 = vld [vmem:[%s3995_s1 + $0x520] ss:$8 sps:$4 sm:$0xff]   ;;  %v2733_v52 = vld [vmem:[%s3995_s1 + $0x184] ss:$8 sps:$4 sm:$0xff]   ;;  %v2764_v11 = vld [vmem:[%s3995_s1 + $0x5d0] ss:$8 sps:$4 sm:$0xff]  }
  0x1e   :  { %v2748_v61 = vld [vmem:[%s3995_s1 + $0x5a4] ss:$8 sps:$4 sm:$0xff]  }
  0x1f   :  { %1873 = vmatpush1.bf16.msra.mxu1 %v2631_v30  ;;  %v2703_v30 = vld [vmem:[%s3995_s1 + $0x134] ss:$8 sps:$4 sm:$0xff]  }
  0x20   :  { %2037 = vmatpush1.bf16.msra.mxu0 %v2632_v31  ;;  %1874 = vmatprep.subr.bf16.mxu1 %v2633_v32  ;;  %v2706_v31 = vld [vmem:[%s3995_s1 + $0x534] ss:$8 sps:$4 sm:$0xff]   ;;  %v2701_v32 = vld [vmem:[%s3995_s1 + $0x130] ss:$8 sps:$4 sm:$0xff]  }
  0x21   :  { %2038 = vmatprep.subr.bf16.mxu0 %v2635_v33  ;;  %v2704_v33 = vld [vmem:[%s3995_s1 + $0x530] ss:$8 sps:$4 sm:$0xff]  }
  0x23   :  { %1875 = vmatpush1.bf16.msra.mxu1 %v2637_v34  ;;  %v2709_v34 = vld [vmem:[%s3995_s1 + $0x144] ss:$8 sps:$4 sm:$0xff]  }
  0x24   :  { %2039 = vmatpush1.bf16.msra.mxu0 %v2638_v35  ;;  %1876 = vmatprep.subr.bf16.mxu1 %v2639_v39  ;;  %v2712_v35 = vld [vmem:[%s3995_s1 + $0x544] ss:$8 sps:$4 sm:$0xff]   ;;  %v2718_v39 = vld [vmem:[%s3995_s1 + $0x554] ss:$8 sps:$4 sm:$0xff]  }
  0x25   :  { %2040 = vmatprep.subr.bf16.mxu0 %v2641_v40  ;;  %v2713_v40 = vld [vmem:[%s3995_s1 + $0x150] ss:$8 sps:$4 sm:$0xff]  }
  0x27   :  { %1877 = vmatpush1.bf16.msra.mxu1 %v2643_v41  ;;  %v2716_v41 = vld [vmem:[%s3995_s1 + $0x550] ss:$8 sps:$4 sm:$0xff]  }
  0x28   :  { %2041 = vmatpush1.bf16.msra.mxu0 %v2644_v44  ;;  %1878 = vmatprep.subr.bf16.mxu1 %v2645_v45  ;;  %v2724_v44 = vld [vmem:[%s3995_s1 + $0x564] ss:$8 sps:$4 sm:$0xff]   ;;  %v2719_v45 = vld [vmem:[%s3995_s1 + $0x160] ss:$8 sps:$4 sm:$0xff]  }
  0x29   :  { %2042 = vmatprep.subr.bf16.mxu0 %v2647_v46  ;;  %v2722_v46 = vld [vmem:[%s3995_s1 + $0x560] ss:$8 sps:$4 sm:$0xff]  }
  0x2b   :  { %1879 = vmatpush1.bf16.msra.mxu1 %v2649_v47  ;;  %v2727_v47 = vld [vmem:[%s3995_s1 + $0x174] ss:$8 sps:$4 sm:$0xff]  }
  0x2c   :  { %2043 = vmatpush1.bf16.msra.mxu0 %v2650_v48  ;;  %1880 = vmatprep.subr.bf16.mxu1 %v2651_v50  ;;  %v2730_v48 = vld [vmem:[%s3995_s1 + $0x574] ss:$8 sps:$4 sm:$0xff]   ;;  %v2725_v50 = vld [vmem:[%s3995_s1 + $0x170] ss:$8 sps:$4 sm:$0xff]  }
  0x2d   :  { %2044 = vmatprep.subr.bf16.mxu0 %v2653_v51  ;;  %v2728_v51 = vld [vmem:[%s3995_s1 + $0x570] ss:$8 sps:$4 sm:$0xff]  }
  0x2f   :  { %1881 = vmatpush1.bf16.msra.mxu1 %v2655_v53  ;;  %v2736_v53 = vld [vmem:[%s3995_s1 + $0x584] ss:$8 sps:$4 sm:$0xff]  }
  0x30   :  { %2045 = vmatpush1.bf16.msra.mxu0 %v2656_v55  ;;  %1882 = vmatprep.subr.bf16.mxu1 %v2657_v57  ;;  %v2734_v55 = vld [vmem:[%s3995_s1 + $0x580] ss:$8 sps:$4 sm:$0xff]   ;;  %v2742_v57 = vld [vmem:[%s3995_s1 + $0x594] ss:$8 sps:$4 sm:$0xff]  }
  0x31   :  { %2046 = vmatprep.subr.bf16.mxu0 %v2659_v58  ;;  %v2737_v58 = vld [vmem:[%s3995_s1 + $0x190] ss:$8 sps:$4 sm:$0xff]  }
  0x33   :  { %1883 = vmatpush1.bf16.msra.mxu1 %v2661_v62  ;;  %v2743_v62 = vld [vmem:[%s3995_s1 + $0x1a0] ss:$8 sps:$4 sm:$0xff]  }
  0x34   :  { %2047 = vmatpush1.bf16.msra.mxu0 %v2662_v63  ;;  %1884 = vmatprep.subr.bf16.mxu1 %v2663_v0  ;;  %v2746_v63 = vld [vmem:[%s3995_s1 + $0x5a0] ss:$8 sps:$4 sm:$0xff]   ;;  %v2751_v0 = vld [vmem:[%s3995_s1 + $0x1b4] ss:$8 sps:$4 sm:$0xff]  }
  0x35   :  { %2048 = vmatprep.subr.bf16.mxu0 %v2665_v1  ;;  %v2754_v1 = vld [vmem:[%s3995_s1 + $0x5b4] ss:$8 sps:$4 sm:$0xff]  }
  0x37   :  { %1885 = vmatpush1.bf16.msra.mxu1 %v2667_v2  ;;  %v2749_v2 = vld [vmem:[%s3995_s1 + $0x1b0] ss:$8 sps:$4 sm:$0xff]  }
  0x38   :  { %2049 = vmatpush1.bf16.msra.mxu0 %v2668_v3  ;;  %1886 = vmatprep.subr.bf16.mxu1 %v2669_v4  ;;  %v2752_v3 = vld [vmem:[%s3995_s1 + $0x5b0] ss:$8 sps:$4 sm:$0xff]   ;;  %v2757_v4 = vld [vmem:[%s3995_s1 + $0x1c4] ss:$8 sps:$4 sm:$0xff]  }
  0x39   :  { %2050 = vmatprep.subr.bf16.mxu0 %v2671_v5  ;;  %v2760_v5 = vld [vmem:[%s3995_s1 + $0x5c4] ss:$8 sps:$4 sm:$0xff]  }
  0x3b   :  { %1887 = vmatpush1.bf16.msra.mxu1 %v2673_v6  ;;  %v2755_v6 = vld [vmem:[%s3995_s1 + $0x1c0] ss:$8 sps:$4 sm:$0xff]  }
  0x3c   :  { %2051 = vmatpush1.bf16.msra.mxu0 %v2674_v7  ;;  %1888 = vmatprep.subr.bf16.mxu1 %v2675_v8  ;;  %v2758_v7 = vld [vmem:[%s3995_s1 + $0x5c0] ss:$8 sps:$4 sm:$0xff]   ;;  %v2763_v8 = vld [vmem:[%s3995_s1 + $0x1d4] ss:$8 sps:$4 sm:$0xff]  }
  0x3d   :  { %2052 = vmatprep.subr.bf16.mxu0 %v2677_v9  ;;  %v2766_v9 = vld [vmem:[%s3995_s1 + $0x5d4] ss:$8 sps:$4 sm:$0xff]  }
  0x3f   :  { %1889 = vmatpush1.bf16.msra.mxu1 %v2679_v12  ;;  %v2769_v12 = vld [vmem:[%s3995_s1 + $0x1e4] ss:$8 sps:$4 sm:$0xff]  }
  0x40   :  { %2053 = vmatpush1.bf16.msra.mxu0 %v2680_v13  ;;  %1899 = vmatprep.subr.bf16.mxu1 %v2684_v14  ;;  %v2772_v13 = vld [vmem:[%s3995_s1 + $0x5e4] ss:$8 sps:$4 sm:$0xff]   ;;  %v2767_v14 = vld [vmem:[%s3995_s1 + $0x1e0] ss:$8 sps:$4 sm:$0xff]  }
  0x41   :  { %2063 = vmatprep.subr.bf16.mxu0 %v2688_v15  ;;  %v2770_v15 = vld [vmem:[%s3995_s1 + $0x5e0] ss:$8 sps:$4 sm:$0xff]  }
  0x42   :  { %1891 = vmatmul.mubr.bf16.vlgmr.msra.gmra.mrb[0].mxu1 %v331_v54  ;;  %v2731_v54 = vld [vmem:[%s3995_s1 + $0x180] ss:$8 sps:$4 sm:$0xff]  }
  0x43   :  { %2055 = vmatmul.mubr.bf16.vlgmr.msra.gmra.mrb[0].mxu0 %v365_v60  ;;  %1900 = vmatpush1.bf16.msra.mxu1 %v2682_v18  ;;  %v2745_v60 = vld [vmem:[%s3995_s1 + $0x1a4] ss:$8 sps:$4 sm:$0xff]   ;;  %v2775_v18 = vld [vmem:[%s3995_s1 + $0x1f4] ss:$8 sps:$4 sm:$0xff]  }
  0x44   :  { %2064 = vmatpush1.bf16.msra.mxu0 %v2686_v19  ;;  %1901 = vmatprep.subr.bf16.mxu1 %v2691_v20  ;;  %v2778_v19 = vld [vmem:[%s3995_s1 + $0x5f4] ss:$8 sps:$4 sm:$0xff]   ;;  %v2773_v20 = vld [vmem:[%s3995_s1 + $0x1f0] ss:$8 sps:$4 sm:$0xff]  }
  0x45   :  { %2065 = vmatprep.subr.bf16.mxu0 %v2694_v21  ;;  %1931 = vmatprep.mubr.bf16.mxu1 %v340_v22  ;;  %v2776_v21 = vld [vmem:[%s3995_s1 + $0x5f0] ss:$8 sps:$4 sm:$0xff]   ;;  %v2781_v22 = vld [vmem:[%s3995_s1 + $0x204] ss:$8 sps:$4 sm:$0xff]  }
  0x46   :  { %2095 = vmatprep.mubr.bf16.mxu0 %v374_v23  ;;  %v2784_v23 = vld [vmem:[%s3995_s1 + $0x604] ss:$8 sps:$4 sm:$0xff]  }
  0x47   :  { %1902 = vmatpush1.bf16.msra.mxu1 %v2689_v24  ;;  %v2779_v24 = vld [vmem:[%s3995_s1 + $0x200] ss:$8 sps:$4 sm:$0xff]  }
  0x48   :  { %2066 = vmatpush1.bf16.msra.mxu0 %v2692_v25  ;;  %1903 = vmatprep.subr.bf16.mxu1 %v2697_v26  ;;  %v2782_v25 = vld [vmem:[%s3995_s1 + $0x600] ss:$8 sps:$4 sm:$0xff]   ;;  %v2787_v26 = vld [vmem:[%s3995_s1 + $0x214] ss:$8 sps:$4 sm:$0xff]  }
  0x49   :  { %2067 = vmatprep.subr.bf16.mxu0 %v2700_v27  ;;  %v3475_v27 = vld [vmem:[%s3996_s0 + $0x8] sm:$0xff] }
  0x4b   :  { %1904 = vmatpush1.bf16.msra.mxu1 %v2695_v28  ;;  %v2790_v28 = vld [vmem:[%s3995_s1 + $0x614] ss:$8 sps:$4 sm:$0xff]  }
  0x4c   :  { %2068 = vmatpush1.bf16.msra.mxu0 %v2698_v29  ;;  %1905 = vmatprep.subr.bf16.mxu1 %v2703_v30  ;;  %v3482_v29 = vrot.slane %v3475_v27, %v3185_v49  ;;  %v3487_v30 = vld [vmem:[%s3996_s0 + $0x18] sm:$0xff] }
  0x4d   :  { %2069 = vmatprep.subr.bf16.mxu0 %v2706_v31  ;;  %v2785_v31 = vld [vmem:[%s3995_s1 + $0x210] ss:$8 sps:$4 sm:$0xff]  }
  0x4f   :  { %1906 = vmatpush1.bf16.msra.mxu1 %v2701_v32  ;;  %v2788_v32 = vld [vmem:[%s3995_s1 + $0x610] ss:$8 sps:$4 sm:$0xff]  }
  0x50   :  { %2070 = vmatpush1.bf16.msra.mxu0 %v2704_v33  ;;  %1907 = vmatprep.subr.bf16.mxu1 %v2709_v34  ;;  %v356_v33 = vcombine.high %v3482_v29, %v3482_v29  ;;  %v3501_v34 = vrot.slane %v3487_v30, %v3185_v49 }
  0x51   :  { %2071 = vmatprep.subr.bf16.mxu0 %v2712_v35 }
  0x52   :  { %v390_v35 = vcombine.high %v3501_v34, %v3501_v34 }
  0x53   :  { %1908 = vmatpush1.bf16.msra.mxu1 %v2707_v36  ;;  %v2791_v36 = vld [vmem:[%s3995_s1 + $0x220] ss:$8 sps:$4 sm:$0xff]  }
  0x54   :  { %2072 = vmatpush1.bf16.msra.mxu0 %v2710_v37  ;;  %1909 = vmatprep.subr.bf16.mxu1 %v2715_v38  ;;  %v2794_v37 = vld [vmem:[%s3995_s1 + $0x620] ss:$8 sps:$4 sm:$0xff]   ;;  %v2799_v38 = vld [vmem:[%s3995_s1 + $0x234] ss:$8 sps:$4 sm:$0xff]  }
  0x55   :  { %2073 = vmatprep.subr.bf16.mxu0 %v2718_v39  ;;  %v2802_v39 = vld [vmem:[%s3995_s1 + $0x634] ss:$8 sps:$4 sm:$0xff]  }
  0x57   :  { %1910 = vmatpush1.bf16.msra.mxu1 %v2713_v40  ;;  %v2797_v40 = vld [vmem:[%s3995_s1 + $0x230] ss:$8 sps:$4 sm:$0xff]  }
  0x58   :  { %2074 = vmatpush1.bf16.msra.mxu0 %v2716_v41  ;;  %1911 = vmatprep.subr.bf16.mxu1 %v2721_v43  ;;  %v2800_v41 = vld [vmem:[%s3995_s1 + $0x630] ss:$8 sps:$4 sm:$0xff]   ;;  %v2805_v43 = vld [vmem:[%s3995_s1 + $0x244] ss:$8 sps:$4 sm:$0xff]  }
  0x59   :  { %2075 = vmatprep.subr.bf16.mxu0 %v2724_v44  ;;  %v2808_v44 = vld [vmem:[%s3995_s1 + $0x644] ss:$8 sps:$4 sm:$0xff]  }
  0x5b   :  { %1912 = vmatpush1.bf16.msra.mxu1 %v2719_v45  ;;  %v2803_v45 = vld [vmem:[%s3995_s1 + $0x240] ss:$8 sps:$4 sm:$0xff]  }
  0x5c   :  { %2076 = vmatpush1.bf16.msra.mxu0 %v2722_v46  ;;  %1913 = vmatprep.subr.bf16.mxu1 %v2727_v47  ;;  %v2806_v46 = vld [vmem:[%s3995_s1 + $0x640] ss:$8 sps:$4 sm:$0xff]   ;;  %v2811_v47 = vld [vmem:[%s3995_s1 + $0x254] ss:$8 sps:$4 sm:$0xff]  }
  0x5d   :  { %2077 = vmatprep.subr.bf16.mxu0 %v2730_v48  ;;  %v2814_v48 = vld [vmem:[%s3995_s1 + $0x654] ss:$8 sps:$4 sm:$0xff]  }
  0x5f   :  { %1914 = vmatpush1.bf16.msra.mxu1 %v2725_v50  ;;  %v2809_v50 = vld [vmem:[%s3995_s1 + $0x250] ss:$8 sps:$4 sm:$0xff]  }
  0x60   :  { %2078 = vmatpush1.bf16.msra.mxu0 %v2728_v51  ;;  %1915 = vmatprep.subr.bf16.mxu1 %v2733_v52  ;;  %v2812_v51 = vld [vmem:[%s3995_s1 + $0x650] ss:$8 sps:$4 sm:$0xff]   ;;  %v2817_v52 = vld [vmem:[%s3995_s1 + $0x264] ss:$8 sps:$4 sm:$0xff]  }
  0x61   :  { %2079 = vmatprep.subr.bf16.mxu0 %v2736_v53  ;;  %v2820_v53 = vld [vmem:[%s3995_s1 + $0x664] ss:$8 sps:$4 sm:$0xff]  }
  0x63   :  { %1916 = vmatpush1.bf16.msra.mxu1 %v2731_v54  ;;  %v2815_v54 = vld [vmem:[%s3995_s1 + $0x260] ss:$8 sps:$4 sm:$0xff]  }
  0x64   :  { %2080 = vmatpush1.bf16.msra.mxu0 %v2734_v55  ;;  %1917 = vmatprep.subr.bf16.mxu1 %v2739_v56  ;;  %v2818_v55 = vld [vmem:[%s3995_s1 + $0x660] ss:$8 sps:$4 sm:$0xff]   ;;  %v2823_v56 = vld [vmem:[%s3995_s1 + $0x274] ss:$8 sps:$4 sm:$0xff]  }
  0x65   :  { %2081 = vmatprep.subr.bf16.mxu0 %v2742_v57  ;;  %v2826_v57 = vld [vmem:[%s3995_s1 + $0x674] ss:$8 sps:$4 sm:$0xff]  }
  0x67   :  { %1918 = vmatpush1.bf16.msra.mxu1 %v2737_v58  ;;  %v2821_v58 = vld [vmem:[%s3995_s1 + $0x270] ss:$8 sps:$4 sm:$0xff]  }
  0x68   :  { %2082 = vmatpush1.bf16.msra.mxu0 %v2740_v59  ;;  %1919 = vmatprep.subr.bf16.mxu1 %v2745_v60  ;;  %v2824_v59 = vld [vmem:[%s3995_s1 + $0x670] ss:$8 sps:$4 sm:$0xff]   ;;  %v2829_v60 = vld [vmem:[%s3995_s1 + $0x284] ss:$8 sps:$4 sm:$0xff]  }
  0x69   :  { %2083 = vmatprep.subr.bf16.mxu0 %v2748_v61  ;;  %v2832_v61 = vld [vmem:[%s3995_s1 + $0x684] ss:$8 sps:$4 sm:$0xff]  }
  0x6b   :  { %1920 = vmatpush1.bf16.msra.mxu1 %v2743_v62  ;;  %v2827_v62 = vld [vmem:[%s3995_s1 + $0x280] ss:$8 sps:$4 sm:$0xff]  }
  0x6c   :  { %2084 = vmatpush1.bf16.msra.mxu0 %v2746_v63  ;;  %1921 = vmatprep.subr.bf16.mxu1 %v2751_v0  ;;  %v2830_v63 = vld [vmem:[%s3995_s1 + $0x680] ss:$8 sps:$4 sm:$0xff]   ;;  %v2835_v0 = vld [vmem:[%s3995_s1 + $0x294] ss:$8 sps:$4 sm:$0xff]  }
  0x6d   :  { %2085 = vmatprep.subr.bf16.mxu0 %v2754_v1  ;;  %v2838_v1 = vld [vmem:[%s3995_s1 + $0x694] ss:$8 sps:$4 sm:$0xff]  }
  0x6f   :  { %1922 = vmatpush1.bf16.msra.mxu1 %v2749_v2  ;;  %v2833_v2 = vld [vmem:[%s3995_s1 + $0x290] ss:$8 sps:$4 sm:$0xff]  }
  0x70   :  { %2086 = vmatpush1.bf16.msra.mxu0 %v2752_v3  ;;  %1923 = vmatprep.subr.bf16.mxu1 %v2757_v4  ;;  %v2836_v3 = vld [vmem:[%s3995_s1 + $0x690] ss:$8 sps:$4 sm:$0xff]   ;;  %v2841_v4 = vld [vmem:[%s3995_s1 + $0x2a4] ss:$8 sps:$4 sm:$0xff]  }
  0x71   :  { %2087 = vmatprep.subr.bf16.mxu0 %v2760_v5  ;;  %v2844_v5 = vld [vmem:[%s3995_s1 + $0x6a4] ss:$8 sps:$4 sm:$0xff]  }
  0x73   :  { %1924 = vmatpush1.bf16.msra.mxu1 %v2755_v6  ;;  %v2839_v6 = vld [vmem:[%s3995_s1 + $0x2a0] ss:$8 sps:$4 sm:$0xff]  }
  0x74   :  { %2088 = vmatpush1.bf16.msra.mxu0 %v2758_v7  ;;  %1925 = vmatprep.subr.bf16.mxu1 %v2763_v8  ;;  %v2842_v7 = vld [vmem:[%s3995_s1 + $0x6a0] ss:$8 sps:$4 sm:$0xff]   ;;  %v2847_v8 = vld [vmem:[%s3995_s1 + $0x2b4] ss:$8 sps:$4 sm:$0xff]  }
  0x75   :  { %2089 = vmatprep.subr.bf16.mxu0 %v2766_v9  ;;  %v2850_v9 = vld [vmem:[%s3995_s1 + $0x6b4] ss:$8 sps:$4 sm:$0xff]  }
  0x77   :  { %1926 = vmatpush1.bf16.msra.mxu1 %v2761_v10  ;;  %v2845_v10 = vld [vmem:[%s3995_s1 + $0x2b0] ss:$8 sps:$4 sm:$0xff]  }
  0x78   :  { %2090 = vmatpush1.bf16.msra.mxu0 %v2764_v11  ;;  %1927 = vmatprep.subr.bf16.mxu1 %v2769_v12  ;;  %v2848_v11 = vld [vmem:[%s3995_s1 + $0x6b0] ss:$8 sps:$4 sm:$0xff]   ;;  %v2853_v12 = vld [vmem:[%s3995_s1 + $0x2c4] ss:$8 sps:$4 sm:$0xff]  }
  0x79   :  { %2091 = vmatprep.subr.bf16.mxu0 %v2772_v13  ;;  %v2856_v13 = vld [vmem:[%s3995_s1 + $0x6c4] ss:$8 sps:$4 sm:$0xff]  }
  0x7b   :  { %1928 = vmatpush1.bf16.msra.mxu1 %v2767_v14  ;;  %v2851_v14 = vld [vmem:[%s3995_s1 + $0x2c0] ss:$8 sps:$4 sm:$0xff]  }
  0x7c   :  { %2092 = vmatpush1.bf16.msra.mxu0 %v2770_v15  ;;  %1929 = vmatprep.subr.bf16.mxu1 %v2775_v18  ;;  %v2854_v15 = vld [vmem:[%s3995_s1 + $0x6c0] ss:$8 sps:$4 sm:$0xff]   ;;  %v2859_v18 = vld [vmem:[%s3995_s1 + $0x2d4] ss:$8 sps:$4 sm:$0xff]  }
  0x7d   :  { %2093 = vmatprep.subr.bf16.mxu0 %v2778_v19  ;;  %v2862_v19 = vld [vmem:[%s3995_s1 + $0x6d4] ss:$8 sps:$4 sm:$0xff]  }
  0x7f   :  { %1930 = vmatpush1.bf16.msra.mxu1 %v2773_v20  ;;  %v2857_v20 = vld [vmem:[%s3995_s1 + $0x2d0] ss:$8 sps:$4 sm:$0xff]  }
  0x80   :  { %2094 = vmatpush1.bf16.msra.mxu0 %v2776_v21  ;;  %1940 = vmatprep.subr.bf16.mxu1 %v2781_v22  ;;  %v2860_v21 = vld [vmem:[%s3995_s1 + $0x6d0] ss:$8 sps:$4 sm:$0xff]   ;;  %v2865_v22 = vld [vmem:[%s3995_s1 + $0x2e4] ss:$8 sps:$4 sm:$0xff]  }
  0x81   :  { %2104 = vmatprep.subr.bf16.mxu0 %v2784_v23  ;;  %v2868_v23 = vld [vmem:[%s3995_s1 + $0x6e4] ss:$8 sps:$4 sm:$0xff]  }
  0x82   :  { %1932 = vmatmul.mubr.bf16.vlgmr.msra.gmra.mrb[0].mxu1 %v3262_v16  ;;  %v2793_v16 = vld [vmem:[%s3995_s1 + $0x224] ss:$8 sps:$4 sm:$0xff]  }
  0x83   :  { %2096 = vmatmul.mubr.bf16.vlgmr.msra.gmra.mrb[0].mxu0 %v3265_v17  ;;  %1941 = vmatpush1.bf16.msra.mxu1 %v2779_v24  ;;  %v2796_v17 = vld [vmem:[%s3995_s1 + $0x624] ss:$8 sps:$4 sm:$0xff]   ;;  %v2863_v24 = vld [vmem:[%s3995_s1 + $0x2e0] ss:$8 sps:$4 sm:$0xff]  }
  0x84   :  { %2105 = vmatpush1.bf16.msra.mxu0 %v2782_v25  ;;  %1942 = vmatprep.subr.bf16.mxu1 %v2787_v26  ;;  %v2866_v25 = vld [vmem:[%s3995_s1 + $0x6e0] ss:$8 sps:$4 sm:$0xff]   ;;  %v2871_v26 = vld [vmem:[%s3995_s1 + $0x2f4] ss:$8 sps:$4 sm:$0xff]  }
  0x85   :  { %2106 = vmatprep.subr.bf16.mxu0 %v2790_v28  ;;  %1972 = vmatprep.mubr.bf16.mxu1 %v356_v33  ;;  %v2874_v28 = vld [vmem:[%s3995_s1 + $0x6f4] ss:$8 sps:$4 sm:$0xff]   ;;  %v2869_v33 = vld [vmem:[%s3995_s1 + $0x2f0] ss:$8 sps:$4 sm:$0xff]  }
  0x86   :  { %2136 = vmatprep.mubr.bf16.mxu0 %v390_v35 }
  0x87   :  { %1943 = vmatpush1.bf16.msra.mxu1 %v2785_v31  ;;  %v341_v31 = vcombine.high %v3475_v27, %v3475_v27  ;;  %v2880_v27 = vld [vmem:[%s3995_s1 + $0x704] ss:$8 sps:$4 sm:$0xff]  }
  0x88   :  { %2107 = vmatpush1.bf16.msra.mxu0 %v2788_v32  ;;  %1944 = vmatprep.subr.bf16.mxu1 %v2793_v16  ;;  %v375_v32 = vcombine.high %v3487_v30, %v3487_v30  ;;  %v2872_v16 = vld [vmem:[%s3995_s1 + $0x6f0] ss:$8 sps:$4 sm:$0xff]  }
  0x89   :  { %2108 = vmatprep.subr.bf16.mxu0 %v2796_v17  ;;  %v2877_v17 = vld [vmem:[%s3995_s1 + $0x304] ss:$8 sps:$4 sm:$0xff]   ;;  %v3684_v30 = vrot.slane %v341_v31, %v3185_v49  ;;  %v2956_v31 = vld [vmem:[%s3995_s1 + $0x7d0] ss:$8 sps:$4 sm:$0xff]  }
  0x8a   :  { %v3687_v35 = vrot.slane %v375_v32, %v3185_v49  ;;  %v2886_v49 = vld [vmem:[%s3995_s1 + $0x714] ss:$8 sps:$4 sm:$0xff]   ;;  %v2961_v32 = vld [vmem:[%s3995_s1 + $0x3e4] ss:$8 sps:$4 sm:$0xff]  }
  0x8b   :  { %1945 = vmatpush1.bf16.msra.mxu1 %v2791_v36  ;;  %v2875_v36 = vld [vmem:[%s3995_s1 + $0x300] ss:$8 sps:$4 sm:$0xff]  }
  0x8c   :  { %2109 = vmatpush1.bf16.msra.mxu0 %v2794_v37  ;;  %1946 = vmatprep.subr.bf16.mxu1 %v2799_v38  ;;  %v2878_v37 = vld [vmem:[%s3995_s1 + $0x700] ss:$8 sps:$4 sm:$0xff]   ;;  %v2883_v38 = vld [vmem:[%s3995_s1 + $0x314] ss:$8 sps:$4 sm:$0xff]  }
  0x8d   :  { %2110 = vmatprep.subr.bf16.mxu0 %v2802_v39  ;;  %v357_v39 = vcombine.high %v3684_v30, %v3684_v30 }
  0x8f   :  { %1947 = vmatpush1.bf16.msra.mxu1 %v2797_v40  ;;  %v391_v40 = vcombine.high %v3687_v35, %v3687_v35 }
  0x90   :  { %2111 = vmatpush1.bf16.msra.mxu0 %v2800_v41  ;;  %1948 = vmatprep.subr.bf16.mxu1 %v2805_v43  ;;  %v2881_v41 = vld [vmem:[%s3995_s1 + $0x310] ss:$8 sps:$4 sm:$0xff]  }
  0x91   :  { %2112 = vmatprep.subr.bf16.mxu0 %v2808_v44  ;;  %v2884_v43 = vld [vmem:[%s3995_s1 + $0x710] ss:$8 sps:$4 sm:$0xff]   ;;  %v2889_v44 = vld [vmem:[%s3995_s1 + $0x324] ss:$8 sps:$4 sm:$0xff]  }
  0x93   :  { %1949 = vmatpush1.bf16.msra.mxu1 %v2803_v45  ;;  %v2890_v45 = vld [vmem:[%s3995_s1 + $0x720] ss:$8 sps:$4 sm:$0xff]  }
  0x94   :  { %2113 = vmatpush1.bf16.msra.mxu0 %v2806_v46  ;;  %1950 = vmatprep.subr.bf16.mxu1 %v2811_v47  ;;  %v2895_v46 = vld [vmem:[%s3995_s1 + $0x334] ss:$8 sps:$4 sm:$0xff]  }
  0x95   :  { %2114 = vmatprep.subr.bf16.mxu0 %v2814_v48  ;;  %v2898_v47 = vld [vmem:[%s3995_s1 + $0x734] ss:$8 sps:$4 sm:$0xff]   ;;  %v2893_v48 = vld [vmem:[%s3995_s1 + $0x330] ss:$8 sps:$4 sm:$0xff]  }
  0x97   :  { %1951 = vmatpush1.bf16.msra.mxu1 %v2809_v50  ;;  %v2896_v50 = vld [vmem:[%s3995_s1 + $0x730] ss:$8 sps:$4 sm:$0xff]  }
  0x98   :  { %2115 = vmatpush1.bf16.msra.mxu0 %v2812_v51  ;;  %1952 = vmatprep.subr.bf16.mxu1 %v2817_v52  ;;  %v2901_v51 = vld [vmem:[%s3995_s1 + $0x344] ss:$8 sps:$4 sm:$0xff]  }
  0x99   :  { %2116 = vmatprep.subr.bf16.mxu0 %v2820_v53  ;;  %v2904_v52 = vld [vmem:[%s3995_s1 + $0x744] ss:$8 sps:$4 sm:$0xff]   ;;  %v2899_v53 = vld [vmem:[%s3995_s1 + $0x340] ss:$8 sps:$4 sm:$0xff]  }
  0x9b   :  { %1953 = vmatpush1.bf16.msra.mxu1 %v2815_v54  ;;  %v2902_v54 = vld [vmem:[%s3995_s1 + $0x740] ss:$8 sps:$4 sm:$0xff]  }
  0x9c   :  { %2117 = vmatpush1.bf16.msra.mxu0 %v2818_v55  ;;  %1954 = vmatprep.subr.bf16.mxu1 %v2823_v56  ;;  %v2907_v55 = vld [vmem:[%s3995_s1 + $0x354] ss:$8 sps:$4 sm:$0xff]  }
  0x9d   :  { %2118 = vmatprep.subr.bf16.mxu0 %v2826_v57  ;;  %v2910_v56 = vld [vmem:[%s3995_s1 + $0x754] ss:$8 sps:$4 sm:$0xff]   ;;  %v2905_v57 = vld [vmem:[%s3995_s1 + $0x350] ss:$8 sps:$4 sm:$0xff]  }
  0x9f   :  { %1955 = vmatpush1.bf16.msra.mxu1 %v2821_v58  ;;  %v2908_v58 = vld [vmem:[%s3995_s1 + $0x750] ss:$8 sps:$4 sm:$0xff]  }
  0xa0   :  { %2119 = vmatpush1.bf16.msra.mxu0 %v2824_v59  ;;  %1956 = vmatprep.subr.bf16.mxu1 %v2829_v60  ;;  %v2913_v59 = vld [vmem:[%s3995_s1 + $0x364] ss:$8 sps:$4 sm:$0xff]  }
  0xa1   :  { %2120 = vmatprep.subr.bf16.mxu0 %v2832_v61  ;;  %v2916_v60 = vld [vmem:[%s3995_s1 + $0x764] ss:$8 sps:$4 sm:$0xff]   ;;  %v2911_v61 = vld [vmem:[%s3995_s1 + $0x360] ss:$8 sps:$4 sm:$0xff]  }
  0xa3   :  { %1957 = vmatpush1.bf16.msra.mxu1 %v2827_v62  ;;  %v2914_v62 = vld [vmem:[%s3995_s1 + $0x760] ss:$8 sps:$4 sm:$0xff]  }
  0xa4   :  { %2121 = vmatpush1.bf16.msra.mxu0 %v2830_v63  ;;  %1958 = vmatprep.subr.bf16.mxu1 %v2835_v0  ;;  %v2919_v63 = vld [vmem:[%s3995_s1 + $0x374] ss:$8 sps:$4 sm:$0xff]  }
  0xa5   :  { %2122 = vmatprep.subr.bf16.mxu0 %v2838_v1  ;;  %v2922_v0 = vld [vmem:[%s3995_s1 + $0x774] ss:$8 sps:$4 sm:$0xff]   ;;  %v2917_v1 = vld [vmem:[%s3995_s1 + $0x370] ss:$8 sps:$4 sm:$0xff]  }
  0xa7   :  { %1959 = vmatpush1.bf16.msra.mxu1 %v2833_v2  ;;  %v2920_v2 = vld [vmem:[%s3995_s1 + $0x770] ss:$8 sps:$4 sm:$0xff]  }
  0xa8   :  { %2123 = vmatpush1.bf16.msra.mxu0 %v2836_v3  ;;  %1960 = vmatprep.subr.bf16.mxu1 %v2841_v4  ;;  %v2925_v3 = vld [vmem:[%s3995_s1 + $0x384] ss:$8 sps:$4 sm:$0xff]  }
  0xa9   :  { %2124 = vmatprep.subr.bf16.mxu0 %v2844_v5  ;;  %v2928_v4 = vld [vmem:[%s3995_s1 + $0x784] ss:$8 sps:$4 sm:$0xff]   ;;  %v2923_v5 = vld [vmem:[%s3995_s1 + $0x380] ss:$8 sps:$4 sm:$0xff]  }
  0xab   :  { %1961 = vmatpush1.bf16.msra.mxu1 %v2839_v6  ;;  %v2926_v6 = vld [vmem:[%s3995_s1 + $0x780] ss:$8 sps:$4 sm:$0xff]  }
  0xac   :  { %2125 = vmatpush1.bf16.msra.mxu0 %v2842_v7  ;;  %1962 = vmatprep.subr.bf16.mxu1 %v2847_v8  ;;  %v2931_v7 = vld [vmem:[%s3995_s1 + $0x394] ss:$8 sps:$4 sm:$0xff]  }
  0xad   :  { %2126 = vmatprep.subr.bf16.mxu0 %v2850_v9  ;;  %v2934_v8 = vld [vmem:[%s3995_s1 + $0x794] ss:$8 sps:$4 sm:$0xff]   ;;  %v2929_v9 = vld [vmem:[%s3995_s1 + $0x390] ss:$8 sps:$4 sm:$0xff]  }
  0xaf   :  { %1963 = vmatpush1.bf16.msra.mxu1 %v2845_v10  ;;  %v2932_v10 = vld [vmem:[%s3995_s1 + $0x790] ss:$8 sps:$4 sm:$0xff]  }
  0xb0   :  { %2127 = vmatpush1.bf16.msra.mxu0 %v2848_v11  ;;  %1964 = vmatprep.subr.bf16.mxu1 %v2853_v12  ;;  %v2937_v11 = vld [vmem:[%s3995_s1 + $0x3a4] ss:$8 sps:$4 sm:$0xff]  }
  0xb1   :  { %2128 = vmatprep.subr.bf16.mxu0 %v2856_v13  ;;  %v2940_v12 = vld [vmem:[%s3995_s1 + $0x7a4] ss:$8 sps:$4 sm:$0xff]   ;;  %v2935_v13 = vld [vmem:[%s3995_s1 + $0x3a0] ss:$8 sps:$4 sm:$0xff]  }
  0xb3   :  { %1965 = vmatpush1.bf16.msra.mxu1 %v2851_v14  ;;  %v2938_v14 = vld [vmem:[%s3995_s1 + $0x7a0] ss:$8 sps:$4 sm:$0xff]  }
  0xb4   :  { %2129 = vmatpush1.bf16.msra.mxu0 %v2854_v15  ;;  %1966 = vmatprep.subr.bf16.mxu1 %v2859_v18  ;;  %v2943_v15 = vld [vmem:[%s3995_s1 + $0x3b4] ss:$8 sps:$4 sm:$0xff]  }
  0xb5   :  { %2130 = vmatprep.subr.bf16.mxu0 %v2862_v19  ;;  %v2946_v18 = vld [vmem:[%s3995_s1 + $0x7b4] ss:$8 sps:$4 sm:$0xff]   ;;  %v2941_v19 = vld [vmem:[%s3995_s1 + $0x3b0] ss:$8 sps:$4 sm:$0xff]  }
  0xb7   :  { %1967 = vmatpush1.bf16.msra.mxu1 %v2857_v20  ;;  %v2944_v20 = vld [vmem:[%s3995_s1 + $0x7b0] ss:$8 sps:$4 sm:$0xff]  }
  0xb8   :  { %2131 = vmatpush1.bf16.msra.mxu0 %v2860_v21  ;;  %1968 = vmatprep.subr.bf16.mxu1 %v2865_v22  ;;  %v2949_v21 = vld [vmem:[%s3995_s1 + $0x3c4] ss:$8 sps:$4 sm:$0xff]  }
  0xb9   :  { %2132 = vmatprep.subr.bf16.mxu0 %v2868_v23  ;;  %v2952_v22 = vld [vmem:[%s3995_s1 + $0x7c4] ss:$8 sps:$4 sm:$0xff]   ;;  %v2947_v23 = vld [vmem:[%s3995_s1 + $0x3c0] ss:$8 sps:$4 sm:$0xff]  }
  0xbb   :  { %1969 = vmatpush1.bf16.msra.mxu1 %v2863_v24  ;;  %v2950_v24 = vld [vmem:[%s3995_s1 + $0x7c0] ss:$8 sps:$4 sm:$0xff]  }
  0xbc   :  { %2133 = vmatpush1.bf16.msra.mxu0 %v2866_v25  ;;  %1970 = vmatprep.subr.bf16.mxu1 %v2871_v26  ;;  %v2955_v25 = vld [vmem:[%s3995_s1 + $0x3d4] ss:$8 sps:$4 sm:$0xff]  }
  0xbd   :  { %2134 = vmatprep.subr.bf16.mxu0 %v2874_v28  ;;  %v2958_v26 = vld [vmem:[%s3995_s1 + $0x7d4] ss:$8 sps:$4 sm:$0xff]   ;;  %v2953_v28 = vld [vmem:[%s3995_s1 + $0x3d0] ss:$8 sps:$4 sm:$0xff]  }
  0xbf   :  { %1971 = vmatpush1.bf16.msra.mxu1 %v2869_v33  ;;  %v2964_v33 = vld [vmem:[%s3995_s1 + $0x7e4] ss:$8 sps:$4 sm:$0xff]  }
  0xc0   :  { %2135 = vmatpush1.bf16.msra.mxu0 %v2872_v16  ;;  %1981 = vmatprep.subr.bf16.mxu1 %v2877_v17  ;;  %v2959_v16 = vld [vmem:[%s3995_s1 + $0x3e0] ss:$8 sps:$4 sm:$0xff]  }
  0xc1   :  { %2145 = vmatprep.subr.bf16.mxu0 %v2880_v27  ;;  %v2962_v17 = vld [vmem:[%s3995_s1 + $0x7e0] ss:$8 sps:$4 sm:$0xff]   ;;  %v2967_v27 = vld [vmem:[%s3995_s1 + $0x3f4] ss:$8 sps:$4 sm:$0xff]  }
  0xc2   :  { %1973 = vmatmul.mubr.bf16.vlgmr.msra.gmra.mrb[0].mxu1 %v3482_v29  ;;  %v2892_v29 = vld [vmem:[%s3995_s1 + $0x724] ss:$8 sps:$4 sm:$0xff]  }
  0xc3   :  { %2137 = vmatmul.mubr.bf16.vlgmr.msra.gmra.mrb[0].mxu0 %v3501_v34  ;;  %1982 = vmatpush1.bf16.msra.mxu1 %v2875_v36  ;;  %v2887_v34 = vld [vmem:[%s3995_s1 + $0x320] ss:$8 sps:$4 sm:$0xff]   ;;  %v2970_v36 = vld [vmem:[%s3995_s1 + $0x7f4] ss:$8 sps:$4 sm:$0xff]  }
  0xc4   :  { %2146 = vmatpush1.bf16.msra.mxu0 %v2878_v37  ;;  %1983 = vmatprep.subr.bf16.mxu1 %v2883_v38  ;;  %v2965_v37 = vld [vmem:[%s3995_s1 + $0x3f0] ss:$8 sps:$4 sm:$0xff]  }
  0xc5   :  { %2147 = vmatprep.subr.bf16.mxu0 %v2886_v49  ;;  %2013 = vmatprep.mubr.bf16.mxu1 %v357_v39  ;;  %v2968_v38 = vld [vmem:[%s3995_s1 + $0x7f0] ss:$8 sps:$4 sm:$0xff]   ;;  %v2975_v49 = vld [vmem:[%s3995_s1 + $0x804] ss:$8 sps:$4 sm:$0xff]  }
  0xc6   :  { %2177 = vmatprep.mubr.bf16.mxu0 %v391_v40  ;;  %v3887_v39 = vld.sshfl [vmem:[%s3996_s0 + $0x20] sm:$0x33 pattern:$0x76325410] }
  0xc7   :  { %1984 = vmatpush1.bf16.msra.mxu1 %v2881_v41  ;;  %v2973_v40 = vld [vmem:[%s3995_s1 + $0x800] ss:$8 sps:$4 sm:$0xff]   ;;  %v399_v41 = vcombine.high %v3887_v39, %v3887_v39 }
  0xc8   :  { %2148 = vmatpush1.bf16.msra.mxu0 %v2884_v43  ;;  %1985 = vmatprep.subr.bf16.mxu1 %v2889_v44  ;;  %v2978_v43 = vld [vmem:[%s3995_s1 + $0x814] ss:$8 sps:$4 sm:$0xff]   ;;  %v2976_v44 = vld [vmem:[%s3995_s1 + $0x810] ss:$8 sps:$4 sm:$0xff]  }
  0xc9   :  { %2149 = vmatprep.subr.bf16.mxu0 %v2892_v29  ;;  %v2981_v29 = vld [vmem:[%s3995_s1 + $0x824] ss:$8 sps:$4 sm:$0xff]  }
  0xcb   :  { %1986 = vmatpush1.bf16.msra.mxu1 %v2887_v34  ;;  %v2979_v34 = vld [vmem:[%s3995_s1 + $0x820] ss:$8 sps:$4 sm:$0xff]  }
  0xcc   :  { %2150 = vmatpush1.bf16.msra.mxu0 %v2890_v45  ;;  %1987 = vmatprep.subr.bf16.mxu1 %v2895_v46  ;;  %v2987_v45 = vld [vmem:[%s3995_s1 + $0x844] ss:$8 sps:$4 sm:$0xff]   ;;  %v2985_v46 = vld [vmem:[%s3995_s1 + $0x840] ss:$8 sps:$4 sm:$0xff]  }
  0xcd   :  { %2151 = vmatprep.subr.bf16.mxu0 %v2898_v47  ;;  %v2990_v47 = vld [vmem:[%s3995_s1 + $0x854] ss:$8 sps:$4 sm:$0xff]  }
  0xcf   :  { %1988 = vmatpush1.bf16.msra.mxu1 %v2893_v48  ;;  %v2988_v48 = vld [vmem:[%s3995_s1 + $0x850] ss:$8 sps:$4 sm:$0xff]  }
  0xd0   :  { %2152 = vmatpush1.bf16.msra.mxu0 %v2896_v50  ;;  %1989 = vmatprep.subr.bf16.mxu1 %v2901_v51  ;;  %v2993_v50 = vld [vmem:[%s3995_s1 + $0x864] ss:$8 sps:$4 sm:$0xff]   ;;  %v2991_v51 = vld [vmem:[%s3995_s1 + $0x860] ss:$8 sps:$4 sm:$0xff]  }
  0xd1   :  { %2153 = vmatprep.subr.bf16.mxu0 %v2904_v52  ;;  %v2996_v52 = vld [vmem:[%s3995_s1 + $0x874] ss:$8 sps:$4 sm:$0xff]  }
  0xd3   :  { %1990 = vmatpush1.bf16.msra.mxu1 %v2899_v53  ;;  %v2994_v53 = vld [vmem:[%s3995_s1 + $0x870] ss:$8 sps:$4 sm:$0xff]  }
  0xd4   :  { %2154 = vmatpush1.bf16.msra.mxu0 %v2902_v54  ;;  %1991 = vmatprep.subr.bf16.mxu1 %v2907_v55  ;;  %v2999_v54 = vld [vmem:[%s3995_s1 + $0x884] ss:$8 sps:$4 sm:$0xff]   ;;  %v2997_v55 = vld [vmem:[%s3995_s1 + $0x880] ss:$8 sps:$4 sm:$0xff]  }
  0xd5   :  { %2155 = vmatprep.subr.bf16.mxu0 %v2910_v56  ;;  %v3002_v56 = vld [vmem:[%s3995_s1 + $0x894] ss:$8 sps:$4 sm:$0xff]  }
  0xd7   :  { %1992 = vmatpush1.bf16.msra.mxu1 %v2905_v57  ;;  %v3000_v57 = vld [vmem:[%s3995_s1 + $0x890] ss:$8 sps:$4 sm:$0xff]  }
  0xd8   :  { %2156 = vmatpush1.bf16.msra.mxu0 %v2908_v58  ;;  %1993 = vmatprep.subr.bf16.mxu1 %v2913_v59  ;;  %v3005_v58 = vld [vmem:[%s3995_s1 + $0x8a4] ss:$8 sps:$4 sm:$0xff]   ;;  %v3003_v59 = vld [vmem:[%s3995_s1 + $0x8a0] ss:$8 sps:$4 sm:$0xff]  }
  0xd9   :  { %2157 = vmatprep.subr.bf16.mxu0 %v2916_v60  ;;  %v3008_v60 = vld [vmem:[%s3995_s1 + $0x8b4] ss:$8 sps:$4 sm:$0xff]  }
  0xdb   :  { %1994 = vmatpush1.bf16.msra.mxu1 %v2911_v61  ;;  %v3006_v61 = vld [vmem:[%s3995_s1 + $0x8b0] ss:$8 sps:$4 sm:$0xff]  }
  0xdc   :  { %2158 = vmatpush1.bf16.msra.mxu0 %v2914_v62  ;;  %1995 = vmatprep.subr.bf16.mxu1 %v2919_v63  ;;  %v3011_v62 = vld [vmem:[%s3995_s1 + $0x8c4] ss:$8 sps:$4 sm:$0xff]   ;;  %v3009_v63 = vld [vmem:[%s3995_s1 + $0x8c0] ss:$8 sps:$4 sm:$0xff]  }
  0xdd   :  { %2159 = vmatprep.subr.bf16.mxu0 %v2922_v0  ;;  %v3014_v0 = vld [vmem:[%s3995_s1 + $0x8d4] ss:$8 sps:$4 sm:$0xff]  }
  0xdf   :  { %1996 = vmatpush1.bf16.msra.mxu1 %v2917_v1  ;;  %v3012_v1 = vld [vmem:[%s3995_s1 + $0x8d0] ss:$8 sps:$4 sm:$0xff]  }
  0xe0   :  { %2160 = vmatpush1.bf16.msra.mxu0 %v2920_v2  ;;  %1997 = vmatprep.subr.bf16.mxu1 %v2925_v3  ;;  %v3017_v2 = vld [vmem:[%s3995_s1 + $0x8e4] ss:$8 sps:$4 sm:$0xff]   ;;  %v3015_v3 = vld [vmem:[%s3995_s1 + $0x8e0] ss:$8 sps:$4 sm:$0xff]  }
  0xe1   :  { %2161 = vmatprep.subr.bf16.mxu0 %v2928_v4  ;;  %v3020_v4 = vld [vmem:[%s3995_s1 + $0x8f4] ss:$8 sps:$4 sm:$0xff]  }
  0xe3   :  { %1998 = vmatpush1.bf16.msra.mxu1 %v2923_v5  ;;  %v3018_v5 = vld [vmem:[%s3995_s1 + $0x8f0] ss:$8 sps:$4 sm:$0xff]  }
  0xe4   :  { %2162 = vmatpush1.bf16.msra.mxu0 %v2926_v6  ;;  %1999 = vmatprep.subr.bf16.mxu1 %v2931_v7 }
  0xe5   :  { %2163 = vmatprep.subr.bf16.mxu0 %v2934_v8 }
  0xe7   :  { %2000 = vmatpush1.bf16.msra.mxu1 %v2929_v9 }
  0xe8   :  { %2164 = vmatpush1.bf16.msra.mxu0 %v2932_v10  ;;  %2001 = vmatprep.subr.bf16.mxu1 %v2937_v11  ;;  %v311_v10 = vsub.s32 0, %v3167_v42  ;;  %v307_v11 = vld [vmem:[%s3997_s2] sm:$0x3] }
  0xe9   :  { %2165 = vmatprep.subr.bf16.mxu0 %v2940_v12  ;;  %v315_v12 = vsub.s32 1, %v3167_v42 }
  0xeb   :  { %2002 = vmatpush1.bf16.msra.mxu1 %v2935_v13  ;;  %v312_v13 = vrot.slane %v307_v11, %v311_v10 }
  0xec   :  { %2166 = vmatpush1.bf16.msra.mxu0 %v2938_v14  ;;  %2003 = vmatprep.subr.bf16.mxu1 %v2943_v15  ;;  %v316_v14 = vrot.slane %v307_v11, %v315_v12 }
  0xed   :  { %2167 = vmatprep.subr.bf16.mxu0 %v2946_v18 }
  0xef   :  { %2004 = vmatpush1.bf16.msra.mxu1 %v2941_v19 }
  0xf0   :  { %2168 = vmatpush1.bf16.msra.mxu0 %v2944_v20  ;;  %2005 = vmatprep.subr.bf16.mxu1 %v2949_v21 }
  0xf1   :  { %2169 = vmatprep.subr.bf16.mxu0 %v2952_v22 }
  0xf3   :  { %2006 = vmatpush1.bf16.msra.mxu1 %v2947_v23 }
  0xf4   :  { %2170 = vmatpush1.bf16.msra.mxu0 %v2950_v24  ;;  %2007 = vmatprep.subr.bf16.mxu1 %v2955_v25 }
  0xf5   :  { %2171 = vmatprep.subr.bf16.mxu0 %v2958_v26 }
  0xf7   :  { %2008 = vmatpush1.bf16.msra.mxu1 %v2953_v28 }
  0xf8   :  { %2172 = vmatpush1.bf16.msra.mxu0 %v2956_v31  ;;  %2009 = vmatprep.subr.bf16.mxu1 %v2961_v32 }
  0xf9   :  { %2173 = vmatprep.subr.bf16.mxu0 %v2964_v33 }
  0xfb   :  { %2010 = vmatpush1.bf16.msra.mxu1 %v2959_v16 }
  0xfc   :  { %2174 = vmatpush1.bf16.msra.mxu0 %v2962_v17  ;;  %2011 = vmatprep.subr.bf16.mxu1 %v2967_v27 }
  0xfd   :  { %2175 = vmatprep.subr.bf16.mxu0 %v2970_v36 }
  0xff   :  { %2012 = vmatpush1.bf16.msra.mxu1 %v2965_v37 }
 0x100   :  { %2176 = vmatpush1.bf16.msra.mxu0 %v2968_v38 }
 0x101   :  { %2186 = vmatprep.subr.bf16.mxu0 %v2975_v49 }
 0x102   :  { %2014 = vmatmul.mubr.bf16.vlgmr.msra.gmra.mrb[0].mxu1 %v3684_v30  ;;  %v2984_v30 = vld [vmem:[%s3995_s1 + $0x834] ss:$8 sps:$4 sm:$0xff]  }
 0x103   :  { %2178 = vmatmul.mubr.bf16.vlgmr.msra.gmra.mrb[0].mxu0 %v3687_v35  ;;  %v2982_v35 = vld [vmem:[%s3995_s1 + $0x830] ss:$8 sps:$4 sm:$0xff]  }
 0x104   :  { %2187 = vmatpush1.bf16.msra.mxu0 %v2973_v40  ;;  %2218 = vmatprep.mubr.bf16.mxu0 %v399_v41 }
 0x105   :  { %2188 = vmatprep.subr.bf16.mxu0 %v2978_v43 }
 0x108   :  { %2189 = vmatpush1.bf16.msra.mxu0 %v2976_v44 }
 0x109   :  { %2190 = vmatprep.subr.bf16.mxu0 %v2981_v29 }
 0x10c   :  { %2191 = vmatpush1.bf16.msra.mxu0 %v2979_v34 }
 0x10d   :  { %2192 = vmatprep.subr.bf16.mxu0 %v2984_v30 }
 0x110   :  { %2193 = vmatpush1.bf16.msra.mxu0 %v2982_v35 }
 0x111   :  { %2194 = vmatprep.subr.bf16.mxu0 %v2987_v45 }
 0x114   :  { %2195 = vmatpush1.bf16.msra.mxu0 %v2985_v46 }
 0x115   :  { %2196 = vmatprep.subr.bf16.mxu0 %v2990_v47 }
 0x118   :  { %2197 = vmatpush1.bf16.msra.mxu0 %v2988_v48 }
 0x119   :  { %2198 = vmatprep.subr.bf16.mxu0 %v2993_v50 }
 0x11c   :  { %2199 = vmatpush1.bf16.msra.mxu0 %v2991_v51 }
 0x11d   :  { %2200 = vmatprep.subr.bf16.mxu0 %v2996_v52 }
 0x120   :  { %2201 = vmatpush1.bf16.msra.mxu0 %v2994_v53 }
 0x121   :  { %2202 = vmatprep.subr.bf16.mxu0 %v2999_v54 }
 0x124   :  { %2203 = vmatpush1.bf16.msra.mxu0 %v2997_v55 }
 0x125   :  { %2204 = vmatprep.subr.bf16.mxu0 %v3002_v56 }
 0x128   :  { %2205 = vmatpush1.bf16.msra.mxu0 %v3000_v57 }
 0x129   :  { %2206 = vmatprep.subr.bf16.mxu0 %v3005_v58 }
 0x12c   :  { %2207 = vmatpush1.bf16.msra.mxu0 %v3003_v59 }
 0x12d   :  { %2208 = vmatprep.subr.bf16.mxu0 %v3008_v60 }
 0x130   :  { %2209 = vmatpush1.bf16.msra.mxu0 %v3006_v61 }
 0x131   :  { %2210 = vmatprep.subr.bf16.mxu0 %v3011_v62 }
 0x134   :  { %2211 = vmatpush1.bf16.msra.mxu0 %v3009_v63 }
 0x135   :  { %2212 = vmatprep.subr.bf16.mxu0 %v3014_v0 }
 0x138   :  { %2213 = vmatpush1.bf16.msra.mxu0 %v3012_v1 }
 0x139   :  { %2214 = vmatprep.subr.bf16.mxu0 %v3017_v2 }
 0x13c   :  { %2215 = vmatpush1.bf16.msra.mxu0 %v3015_v3 }
 0x13d   :  { %2216 = vmatprep.subr.bf16.mxu0 %v3020_v4 }
 0x140   :  { %2217 = vmatpush1.bf16.msra.mxu0 %v3018_v5 }
 0x143   :  { %2219 = vmatmul.mubr.bf16.vlgmr.msra.gmra.mrb[0].mxu0 %v3887_v39 }
 0x1d5   :  { %v2015_v6 = vpop.f32.mrb[0].mxu1 }
 0x1d6   :  { %v2017_v7 = vpop.f32.mrb[1].mxu1  ;;  %v2552_v15 = vadd.f32 %v2015_v6, %v312_v13 }
 0x1d7   :  { %v2019_v8 = vpop.f32.mrb[2].mxu1  ;;  %v2554_v18 = vadd.f32 %v2017_v7, %v316_v14 }
 0x1d8   :  { %v2020_v9 = vpop.f32.mrb[3].mxu1 }
 0x216   :  { %v2220_v19 = vpop.f32.mrb[0].mxu0 }
 0x217   :  { %v2553_v20 = vadd.f32 %v2552_v15, %v2220_v19  ;;  %v2222_v21 = vpop.f32.mrb[1].mxu0 }
 0x218   :  { %v2555_v22 = vadd.f32 %v2554_v18, %v2222_v21  ;;  %v2224_v23 = vpop.f32.mrb[2].mxu0 }
 0x219   :  { %v2548_v24 = vmul.f32 -1.442695, %v2553_v20  ;;  %v2225_v25 = vpop.f32.mrb[3].mxu0 }
 0x21a   :  { %v2549_v26 = vmul.f32 -1.442695, %v2555_v22 }
 0x21b   :  { %3021 = vpow2.f32 %v2548_v24 }
 0x21c   :  { %3023 = vpow2.f32 %v2549_v26 }
 0x225   :  { %v3022_v28 = vpop.eup %3021 }
 0x226   :  { %v3024_v31 = vpop.eup %3023  ;;  %v2233_v32 = vadd.f32 1.0, %v3022_v28 }
 0x227   :  { %v2234_v33 = vadd.f32 1.0, %v3024_v31 }
 0x228   :  { %3025 = vrcp.f32 %v2233_v32 }
 0x229   :  { %3027 = vrcp.f32 %v2234_v33 }
 0x232   :  { %v3026_v42 = vpop.eup %3025 }
 0x233   :  { %v3028_v16 = vpop.eup %3027  ;;  %v2239_v17 = vmul.f32 %v3026_v42, %v2553_v20 }
 0x234   :  { %v2240_v27 = vmul.f32 %v3028_v16, %v2555_v22 }
 0x236   :  { %v2550_v36 = vpack.c.bf16 %v2240_v27, %v2239_v17 }
 0x238   :  { %2551 = vst.sshfl [vmem:[%s3998_s3] sm:$0x33 pattern:$0x76325410] %v2550_v36 }

// kernel: seg_no_ffm_forward.47
= control target key start
LH: loop header
LB: loop body
LE: loop exit
PB: predicated region body
PF: predicated region fallthrough
CT: control target
= control target key end

     0   :  { %s2083_s18 = smov 0   ;;  %s2085_s19 = smov 0   ;;  %s2503_s0 = inlined_call_operand.vmem [shape: bf16[4,512], index: 0, kind: input, shape index: {}]   ;;  %s2504_s1 = inlined_call_operand.vmem [shape: bf16[4,256], index: 1, kind: input, shape index: {}]   ;;  %s2505_s2 = inlined_call_operand.vmem [shape: bf16[512,512], index: 2, kind: input, shape index: {}]   ;;  %s2506_s3 = inlined_call_operand.vmem [shape: bf16[256,512], index: 3, kind: input, shape index: {}]   ;;  %s2507_s4 = inlined_call_operand.vmem [shape: f32[1,512], index: 4, kind: input, shape index: {}]   ;;  %s2508_s5 = inlined_call_operand.vmem [shape: bf16[4,512], index: 5, kind: output, shape index: {}]  }
   0x1   :  { %s2087_s20 = smov 0   ;;  %s2089_s21 = smov 0  }
   0x2   :  { %s2091_s22 = smov 0  }
   0x3 LB: > { %s24_s23 = sadd.s32 1, %s2046_s21  ;;  %p93_p1 = scmp.ne.s32.totalorder %s2038_s19, %s2034_s18  ;;  %s2050_s22 = sphi %s2091_s22, %s15_s22   ;;  %s2046_s21 = sphi %s2089_s21, %s2513_s21   ;;  %s2042_s20 = sphi %s2087_s20, %s2512_s20   ;;  %s2038_s19 = sphi %s2085_s19, %s2511_s19   ;;  %s2034_s18 = sphi %s2083_s18, %s2510_s18  }
   0x4   : > { %p25_p0 = scmp.ge.s32.totalorder %s24_s23, 2  ;;  %p94_p2 = scmp.eq.s32.totalorder %s2050_s22, 0 }
   0x5   : > { %s86_s26 = sadd.s32 1, %s2038_s19  ;;  %p1700_p5 = scmp.ge.s32.totalorder %s2050_s22, 2 }
   0x6   : > { %s2515_s23 = smov (%p25_p0, %s24_s23), 0  ;;  %p2114_p3 = por %p94_p2, %p93_p1 }
   0x7   : > { %s83_s25 = ssub.s32 %s2046_s21, %s2515_s23  ;;  %215 = sbr.rel (%p1700_p5) target bundleno = 70 (0x46), region = 24 }
   0x8   : > { %p84_p4 = scmp.eq.s32.totalorder %s83_s25, 0 }
   0xa   : > { %s2122_s27 = scalar_select %p84_p4, %s2038_s19, %s86_s26  }
   0xe   : > { %218 = sbr.rel (!%p2114_p3) target bundleno = 50 (0x32), region = 28  ;;  %s220_s28 = sand.u32 (%p2114_p3), 1, %s2038_s19  }
   0xf   : > { %s1816_s29 = sshll.u32 (%p2114_p3), %s2046_s21, 3  ;;  %s1701_s30 = sshll.u32 (%p2114_p3), %s220_s28, 9 }
  0x10   : > { %s2132_s8 = scalar_lea.vmem (%p2114_p3), %s2505_s2, %s1816_s29  ;;  %s2137_s9 = scalar_lea.vmem (%p2114_p3), [#allocation2], %s1701_s30 }
  0x11   : > { %v379_v0 = vld [vmem:[%s2132_s8] sm:$0xff] (%p2114_p3)  ;;  %v381_v1 = vld [vmem:[%s2132_s8 + $0x10] sm:$0xff] (%p2114_p3) }
  0x12   : > { %v383_v2 = vld [vmem:[%s2132_s8 + $0x20] sm:$0xff] (%p2114_p3)  ;;  %380 = vst [vmem:[%s2137_s9] sm:$0xff] (%p2114_p3), %v379_v0  ;;  %382 = vst [vmem:[%s2137_s9 + $0x8] sm:$0xff] (%p2114_p3), %v381_v1  ;;  %v385_v3 = vld [vmem:[%s2132_s8 + $0x30] sm:$0xff] (%p2114_p3) }
  0x13   : > { %384 = vst [vmem:[%s2137_s9 + $0x10] sm:$0xff] (%p2114_p3), %v383_v2  ;;  %v387_v4 = vld [vmem:[%s2132_s8 + $0x40] sm:$0xff] (%p2114_p3)  ;;  %v389_v5 = vld [vmem:[%s2132_s8 + $0x50] sm:$0xff] (%p2114_p3)  ;;  %386 = vst [vmem:[%s2137_s9 + $0x18] sm:$0xff] (%p2114_p3), %v385_v3 }
  0x14   : > { %388 = vst [vmem:[%s2137_s9 + $0x20] sm:$0xff] (%p2114_p3), %v387_v4  ;;  %390 = vst [vmem:[%s2137_s9 + $0x28] sm:$0xff] (%p2114_p3), %v389_v5  ;;  %v391_v6 = vld [vmem:[%s2132_s8 + $0x60] sm:$0xff] (%p2114_p3)  ;;  %v393_v7 = vld [vmem:[%s2132_s8 + $0x70] sm:$0xff] (%p2114_p3) }
  0x15   : > { %v395_v8 = vld [vmem:[%s2132_s8 + $0x80] sm:$0xff]  ;;  %392 = vst [vmem:[%s2137_s9 + $0x30] sm:$0xff] %v391_v6  ;;  %394 = vst [vmem:[%s2137_s9 + $0x38] sm:$0xff] %v393_v7  ;;  %v397_v9 = vld [vmem:[%s2132_s8 + $0x90] sm:$0xff] }
  0x16   : > { %396 = vst [vmem:[%s2137_s9 + $0x40] sm:$0xff] %v395_v8  ;;  %v399_v10 = vld [vmem:[%s2132_s8 + $0xa0] sm:$0xff]  ;;  %v401_v11 = vld [vmem:[%s2132_s8 + $0xb0] sm:$0xff]  ;;  %398 = vst [vmem:[%s2137_s9 + $0x48] sm:$0xff] %v397_v9 }
  0x17   : > { %400 = vst [vmem:[%s2137_s9 + $0x50] sm:$0xff] %v399_v10  ;;  %402 = vst [vmem:[%s2137_s9 + $0x58] sm:$0xff] %v401_v11  ;;  %v403_v12 = vld [vmem:[%s2132_s8 + $0xc0] sm:$0xff]  ;;  %v405_v13 = vld [vmem:[%s2132_s8 + $0xd0] sm:$0xff] }
  0x18   : > { %v407_v14 = vld [vmem:[%s2132_s8 + $0xe0] sm:$0xff]  ;;  %404 = vst [vmem:[%s2137_s9 + $0x60] sm:$0xff] %v403_v12  ;;  %406 = vst [vmem:[%s2137_s9 + $0x68] sm:$0xff] %v405_v13  ;;  %v409_v15 = vld [vmem:[%s2132_s8 + $0xf0] sm:$0xff] }
  0x19   : > { %408 = vst [vmem:[%s2137_s9 + $0x70] sm:$0xff] %v407_v14  ;;  %v411_v16 = vld [vmem:[%s2132_s8 + $0x100] sm:$0xff]  ;;  %v413_v17 = vld [vmem:[%s2132_s8 + $0x110] sm:$0xff]  ;;  %410 = vst [vmem:[%s2137_s9 + $0x78] sm:$0xff] %v409_v15 }
  0x1a   : > { %412 = vst [vmem:[%s2137_s9 + $0x80] sm:$0xff] %v411_v16  ;;  %414 = vst [vmem:[%s2137_s9 + $0x88] sm:$0xff] %v413_v17  ;;  %v415_v18 = vld [vmem:[%s2132_s8 + $0x120] sm:$0xff]  ;;  %v417_v19 = vld [vmem:[%s2132_s8 + $0x130] sm:$0xff] }
  0x1b   : > { %v419_v20 = vld [vmem:[%s2132_s8 + $0x140] sm:$0xff]  ;;  %416 = vst [vmem:[%s2137_s9 + $0x90] sm:$0xff] %v415_v18  ;;  %418 = vst [vmem:[%s2137_s9 + $0x98] sm:$0xff] %v417_v19  ;;  %v421_v21 = vld [vmem:[%s2132_s8 + $0x150] sm:$0xff] }
  0x1c   : > { %420 = vst [vmem:[%s2137_s9 + $0xa0] sm:$0xff] %v419_v20  ;;  %v423_v22 = vld [vmem:[%s2132_s8 + $0x160] sm:$0xff]  ;;  %v425_v23 = vld [vmem:[%s2132_s8 + $0x170] sm:$0xff]  ;;  %422 = vst [vmem:[%s2137_s9 + $0xa8] sm:$0xff] %v421_v21 }
  0x1d   : > { %424 = vst [vmem:[%s2137_s9 + $0xb0] sm:$0xff] %v423_v22  ;;  %426 = vst [vmem:[%s2137_s9 + $0xb8] sm:$0xff] %v425_v23  ;;  %v427_v24 = vld [vmem:[%s2132_s8 + $0x180] sm:$0xff]  ;;  %v429_v25 = vld [vmem:[%s2132_s8 + $0x190] sm:$0xff] }
  0x1e   : > { %v431_v26 = vld [vmem:[%s2132_s8 + $0x1a0] sm:$0xff]  ;;  %428 = vst [vmem:[%s2137_s9 + $0xc0] sm:$0xff] %v427_v24  ;;  %430 = vst [vmem:[%s2137_s9 + $0xc8] sm:$0xff] %v429_v25  ;;  %v433_v27 = vld [vmem:[%s2132_s8 + $0x1b0] sm:$0xff] }
  0x1f   : > { %432 = vst [vmem:[%s2137_s9 + $0xd0] sm:$0xff] %v431_v26  ;;  %v435_v28 = vld [vmem:[%s2132_s8 + $0x1c0] sm:$0xff]  ;;  %v437_v29 = vld [vmem:[%s2132_s8 + $0x1d0] sm:$0xff]  ;;  %434 = vst [vmem:[%s2137_s9 + $0xd8] sm:$0xff] %v433_v27 }
  0x20   : > { %436 = vst [vmem:[%s2137_s9 + $0xe0] sm:$0xff] %v435_v28  ;;  %438 = vst [vmem:[%s2137_s9 + $0xe8] sm:$0xff] %v437_v29  ;;  %v439_v30 = vld [vmem:[%s2132_s8 + $0x1e0] sm:$0xff]  ;;  %v441_v31 = vld [vmem:[%s2132_s8 + $0x1f0] sm:$0xff] }
  0x21   : > { %v443_v32 = vld [vmem:[%s2132_s8 + $0x200] sm:$0xff]  ;;  %440 = vst [vmem:[%s2137_s9 + $0xf0] sm:$0xff] %v439_v30  ;;  %442 = vst [vmem:[%s2137_s9 + $0xf8] sm:$0xff] %v441_v31  ;;  %v445_v33 = vld [vmem:[%s2132_s8 + $0x210] sm:$0xff] }
  0x22   : > { %444 = vst [vmem:[%s2137_s9 + $0x100] sm:$0xff] %v443_v32  ;;  %v447_v34 = vld [vmem:[%s2132_s8 + $0x220] sm:$0xff]  ;;  %v449_v35 = vld [vmem:[%s2132_s8 + $0x230] sm:$0xff]  ;;  %446 = vst [vmem:[%s2137_s9 + $0x108] sm:$0xff] %v445_v33 }
  0x23   : > { %448 = vst [vmem:[%s2137_s9 + $0x110] sm:$0xff] %v447_v34  ;;  %450 = vst [vmem:[%s2137_s9 + $0x118] sm:$0xff] %v449_v35  ;;  %v451_v36 = vld [vmem:[%s2132_s8 + $0x240] sm:$0xff]  ;;  %v453_v37 = vld [vmem:[%s2132_s8 + $0x250] sm:$0xff] }
  0x24   : > { %v455_v38 = vld [vmem:[%s2132_s8 + $0x260] sm:$0xff]  ;;  %452 = vst [vmem:[%s2137_s9 + $0x120] sm:$0xff] %v451_v36  ;;  %454 = vst [vmem:[%s2137_s9 + $0x128] sm:$0xff] %v453_v37  ;;  %v457_v39 = vld [vmem:[%s2132_s8 + $0x270] sm:$0xff] }
  0x25   : > { %456 = vst [vmem:[%s2137_s9 + $0x130] sm:$0xff] %v455_v38  ;;  %v459_v40 = vld [vmem:[%s2132_s8 + $0x280] sm:$0xff]  ;;  %v461_v41 = vld [vmem:[%s2132_s8 + $0x290] sm:$0xff]  ;;  %458 = vst [vmem:[%s2137_s9 + $0x138] sm:$0xff] %v457_v39 }
  0x26   : > { %460 = vst [vmem:[%s2137_s9 + $0x140] sm:$0xff] %v459_v40  ;;  %462 = vst [vmem:[%s2137_s9 + $0x148] sm:$0xff] %v461_v41  ;;  %v463_v42 = vld [vmem:[%s2132_s8 + $0x2a0] sm:$0xff]  ;;  %v465_v43 = vld [vmem:[%s2132_s8 + $0x2b0] sm:$0xff] }
  0x27   : > { %v467_v44 = vld [vmem:[%s2132_s8 + $0x2c0] sm:$0xff]  ;;  %464 = vst [vmem:[%s2137_s9 + $0x150] sm:$0xff] %v463_v42  ;;  %466 = vst [vmem:[%s2137_s9 + $0x158] sm:$0xff] %v465_v43  ;;  %v469_v45 = vld [vmem:[%s2132_s8 + $0x2d0] sm:$0xff] }
  0x28   : > { %468 = vst [vmem:[%s2137_s9 + $0x160] sm:$0xff] %v467_v44  ;;  %v471_v46 = vld [vmem:[%s2132_s8 + $0x2e0] sm:$0xff]  ;;  %v473_v47 = vld [vmem:[%s2132_s8 + $0x2f0] sm:$0xff]  ;;  %470 = vst [vmem:[%s2137_s9 + $0x168] sm:$0xff] %v469_v45 }
  0x29   : > { %472 = vst [vmem:[%s2137_s9 + $0x170] sm:$0xff] %v471_v46  ;;  %474 = vst [vmem:[%s2137_s9 + $0x178] sm:$0xff] %v473_v47  ;;  %v475_v48 = vld [vmem:[%s2132_s8 + $0x300] sm:$0xff]  ;;  %v477_v49 = vld [vmem:[%s2132_s8 + $0x310] sm:$0xff] }
  0x2a   : > { %v479_v50 = vld [vmem:[%s2132_s8 + $0x320] sm:$0xff]  ;;  %476 = vst [vmem:[%s2137_s9 + $0x180] sm:$0xff] %v475_v48  ;;  %478 = vst [vmem:[%s2137_s9 + $0x188] sm:$0xff] %v477_v49  ;;  %v481_v51 = vld [vmem:[%s2132_s8 + $0x330] sm:$0xff] }
  0x2b   : > { %480 = vst [vmem:[%s2137_s9 + $0x190] sm:$0xff] %v479_v50  ;;  %v483_v52 = vld [vmem:[%s2132_s8 + $0x340] sm:$0xff]  ;;  %v485_v53 = vld [vmem:[%s2132_s8 + $0x350] sm:$0xff]  ;;  %482 = vst [vmem:[%s2137_s9 + $0x198] sm:$0xff] %v481_v51 }
  0x2c   : > { %484 = vst [vmem:[%s2137_s9 + $0x1a0] sm:$0xff] %v483_v52  ;;  %486 = vst [vmem:[%s2137_s9 + $0x1a8] sm:$0xff] %v485_v53  ;;  %v487_v54 = vld [vmem:[%s2132_s8 + $0x360] sm:$0xff]  ;;  %v489_v55 = vld [vmem:[%s2132_s8 + $0x370] sm:$0xff] }
  0x2d   : > { %v491_v56 = vld [vmem:[%s2132_s8 + $0x380] sm:$0xff]  ;;  %488 = vst [vmem:[%s2137_s9 + $0x1b0] sm:$0xff] %v487_v54  ;;  %490 = vst [vmem:[%s2137_s9 + $0x1b8] sm:$0xff] %v489_v55  ;;  %v493_v57 = vld [vmem:[%s2132_s8 + $0x390] sm:$0xff] }
  0x2e   : > { %492 = vst [vmem:[%s2137_s9 + $0x1c0] sm:$0xff] %v491_v56  ;;  %v495_v58 = vld [vmem:[%s2132_s8 + $0x3a0] sm:$0xff]  ;;  %v497_v59 = vld [vmem:[%s2132_s8 + $0x3b0] sm:$0xff]  ;;  %494 = vst [vmem:[%s2137_s9 + $0x1c8] sm:$0xff] %v493_v57 }
  0x2f   : > { %496 = vst [vmem:[%s2137_s9 + $0x1d0] sm:$0xff] %v495_v58  ;;  %498 = vst [vmem:[%s2137_s9 + $0x1d8] sm:$0xff] %v497_v59  ;;  %v499_v60 = vld [vmem:[%s2132_s8 + $0x3c0] sm:$0xff]  ;;  %v501_v61 = vld [vmem:[%s2132_s8 + $0x3d0] sm:$0xff] }
  0x30   : > { %v503_v62 = vld [vmem:[%s2132_s8 + $0x3e0] sm:$0xff]  ;;  %500 = vst [vmem:[%s2137_s9 + $0x1e0] sm:$0xff] %v499_v60  ;;  %502 = vst [vmem:[%s2137_s9 + $0x1e8] sm:$0xff] %v501_v61  ;;  %v505_v63 = vld [vmem:[%s2132_s8 + $0x3f0] sm:$0xff] }
  0x31   : > { %504 = vst [vmem:[%s2137_s9 + $0x1f0] sm:$0xff] %v503_v62  ;;  %506 = vst [vmem:[%s2137_s9 + $0x1f8] sm:$0xff] %v505_v63 }
  0x32 PF: > { %512 = sbr.rel (!%p2114_p3) target bundleno = 70 (0x46), region = 66  ;;  %s514_s10 = sand.u32 (%p2114_p3), 1, %s2038_s19  }
  0x33   : > { %s1817_s11 = sshll.u32 (%p2114_p3), %s2046_s21, 3  ;;  %s1704_s12 = sshll.u32 (%p2114_p3), %s514_s10, 8 }
  0x34   : > { %s2271_s15 = scalar_lea.vmem (%p2114_p3), %s2506_s3, %s1817_s11  ;;  %s2276_s16 = scalar_lea.vmem (%p2114_p3), [#allocation3], %s1704_s12 }
  0x35   : > { %v609_v0 = vld [vmem:[%s2271_s15] sm:$0xff] (%p2114_p3)  ;;  %v611_v1 = vld [vmem:[%s2271_s15 + $0x10] sm:$0xff] (%p2114_p3) }
  0x36   : > { %v613_v2 = vld [vmem:[%s2271_s15 + $0x20] sm:$0xff] (%p2114_p3)  ;;  %610 = vst [vmem:[%s2276_s16] sm:$0xff] (%p2114_p3), %v609_v0  ;;  %612 = vst [vmem:[%s2276_s16 + $0x8] sm:$0xff] (%p2114_p3), %v611_v1  ;;  %v615_v3 = vld [vmem:[%s2271_s15 + $0x30] sm:$0xff] (%p2114_p3) }
  0x37   : > { %614 = vst [vmem:[%s2276_s16 + $0x10] sm:$0xff] (%p2114_p3), %v613_v2  ;;  %v617_v4 = vld [vmem:[%s2271_s15 + $0x40] sm:$0xff] (%p2114_p3)  ;;  %v619_v5 = vld [vmem:[%s2271_s15 + $0x50] sm:$0xff] (%p2114_p3)  ;;  %616 = vst [vmem:[%s2276_s16 + $0x18] sm:$0xff] (%p2114_p3), %v615_v3 }
  0x38   : > { %618 = vst [vmem:[%s2276_s16 + $0x20] sm:$0xff] (%p2114_p3), %v617_v4  ;;  %620 = vst [vmem:[%s2276_s16 + $0x28] sm:$0xff] (%p2114_p3), %v619_v5  ;;  %v621_v6 = vld [vmem:[%s2271_s15 + $0x60] sm:$0xff] (%p2114_p3)  ;;  %v623_v7 = vld [vmem:[%s2271_s15 + $0x70] sm:$0xff] (%p2114_p3) }
  0x39   : > { %v625_v8 = vld [vmem:[%s2271_s15 + $0x80] sm:$0xff]  ;;  %622 = vst [vmem:[%s2276_s16 + $0x30] sm:$0xff] %v621_v6  ;;  %624 = vst [vmem:[%s2276_s16 + $0x38] sm:$0xff] %v623_v7  ;;  %v627_v9 = vld [vmem:[%s2271_s15 + $0x90] sm:$0xff] }
  0x3a   : > { %626 = vst [vmem:[%s2276_s16 + $0x40] sm:$0xff] %v625_v8  ;;  %v629_v10 = vld [vmem:[%s2271_s15 + $0xa0] sm:$0xff]  ;;  %v631_v11 = vld [vmem:[%s2271_s15 + $0xb0] sm:$0xff]  ;;  %628 = vst [vmem:[%s2276_s16 + $0x48] sm:$0xff] %v627_v9 }
  0x3b   : > { %630 = vst [vmem:[%s2276_s16 + $0x50] sm:$0xff] %v629_v10  ;;  %632 = vst [vmem:[%s2276_s16 + $0x58] sm:$0xff] %v631_v11  ;;  %v633_v12 = vld [vmem:[%s2271_s15 + $0xc0] sm:$0xff]  ;;  %v635_v13 = vld [vmem:[%s2271_s15 + $0xd0] sm:$0xff] }
  0x3c   : > { %v637_v14 = vld [vmem:[%s2271_s15 + $0xe0] sm:$0xff]  ;;  %634 = vst [vmem:[%s2276_s16 + $0x60] sm:$0xff] %v633_v12  ;;  %636 = vst [vmem:[%s2276_s16 + $0x68] sm:$0xff] %v635_v13  ;;  %v639_v15 = vld [vmem:[%s2271_s15 + $0xf0] sm:$0xff] }
  0x3d   : > { %638 = vst [vmem:[%s2276_s16 + $0x70] sm:$0xff] %v637_v14  ;;  %v641_v16 = vld [vmem:[%s2271_s15 + $0x100] sm:$0xff]  ;;  %v643_v17 = vld [vmem:[%s2271_s15 + $0x110] sm:$0xff]  ;;  %640 = vst [vmem:[%s2276_s16 + $0x78] sm:$0xff] %v639_v15 }
  0x3e   : > { %642 = vst [vmem:[%s2276_s16 + $0x80] sm:$0xff] %v641_v16  ;;  %644 = vst [vmem:[%s2276_s16 + $0x88] sm:$0xff] %v643_v17  ;;  %v645_v18 = vld [vmem:[%s2271_s15 + $0x120] sm:$0xff]  ;;  %v647_v19 = vld [vmem:[%s2271_s15 + $0x130] sm:$0xff] }
  0x3f   : > { %v649_v20 = vld [vmem:[%s2271_s15 + $0x140] sm:$0xff]  ;;  %646 = vst [vmem:[%s2276_s16 + $0x90] sm:$0xff] %v645_v18  ;;  %648 = vst [vmem:[%s2276_s16 + $0x98] sm:$0xff] %v647_v19  ;;  %v651_v21 = vld [vmem:[%s2271_s15 + $0x150] sm:$0xff] }
  0x40   : > { %650 = vst [vmem:[%s2276_s16 + $0xa0] sm:$0xff] %v649_v20  ;;  %v653_v22 = vld [vmem:[%s2271_s15 + $0x160] sm:$0xff]  ;;  %v655_v23 = vld [vmem:[%s2271_s15 + $0x170] sm:$0xff]  ;;  %652 = vst [vmem:[%s2276_s16 + $0xa8] sm:$0xff] %v651_v21 }
  0x41   : > { %654 = vst [vmem:[%s2276_s16 + $0xb0] sm:$0xff] %v653_v22  ;;  %656 = vst [vmem:[%s2276_s16 + $0xb8] sm:$0xff] %v655_v23  ;;  %v657_v24 = vld [vmem:[%s2271_s15 + $0x180] sm:$0xff]  ;;  %v659_v25 = vld [vmem:[%s2271_s15 + $0x190] sm:$0xff] }
  0x42   : > { %v661_v26 = vld [vmem:[%s2271_s15 + $0x1a0] sm:$0xff]  ;;  %658 = vst [vmem:[%s2276_s16 + $0xc0] sm:$0xff] %v657_v24  ;;  %660 = vst [vmem:[%s2276_s16 + $0xc8] sm:$0xff] %v659_v25  ;;  %v663_v27 = vld [vmem:[%s2271_s15 + $0x1b0] sm:$0xff] }
  0x43   : > { %662 = vst [vmem:[%s2276_s16 + $0xd0] sm:$0xff] %v661_v26  ;;  %v665_v28 = vld [vmem:[%s2271_s15 + $0x1c0] sm:$0xff]  ;;  %v667_v29 = vld [vmem:[%s2271_s15 + $0x1d0] sm:$0xff]  ;;  %664 = vst [vmem:[%s2276_s16 + $0xd8] sm:$0xff] %v663_v27 }
  0x44   : > { %666 = vst [vmem:[%s2276_s16 + $0xe0] sm:$0xff] %v665_v28  ;;  %668 = vst [vmem:[%s2276_s16 + $0xe8] sm:$0xff] %v667_v29  ;;  %v669_v30 = vld [vmem:[%s2271_s15 + $0x1e0] sm:$0xff]  ;;  %v671_v31 = vld [vmem:[%s2271_s15 + $0x1f0] sm:$0xff] }
  0x45   : > { %670 = vst [vmem:[%s2276_s16 + $0xf0] sm:$0xff] %v669_v30  ;;  %672 = vst [vmem:[%s2276_s16 + $0xf8] sm:$0xff] %v671_v31 }
  0x46 PF: > { %p1707_p6 = scmp.ge.s32.totalorder %s2050_s22, 1  ;;  %p685_p7 = scmp.lt.s32.totalorder %s2050_s22, 3 }
  0x48   : > { %p686_p8 = pnand %p1707_p6, %p685_p7 }
  0x49   : > { %s692_s17 = sand.u32 (!%p686_p8), 1, %s2034_s18   ;;  %v2345_v32 = vld.sshfl [vmem:[%s2504_s1] sm:$0x33 pattern:$0x76325410] (!%p686_p8)  ;;  %v1090_v33 = vlaneseq (!%p686_p8)  ;;  %s1710_s7 = sshll.u32 (!%p686_p8), %s2042_s20, 1 }
  0x4a   : > { %689 = sbr.rel (%p686_p8) target bundleno = 454 (0x1c6), region = 108  ;;  %s1708_s26 = sshll.u32 (!%p686_p8), %s692_s17, 9  ;;  %v881_v34 = vcombine.high (!%p686_p8), %v2345_v32, %v2345_v32  ;;  %v2052_v35 = vmov (!%p686_p8), 1983009808   ;;  %v2357_v39 = vld [vmem:[%s2503_s0] sm:$0xff] (!%p686_p8) }
  0x4b   : > { %s1709_s28 = sshll.u32 (!%p686_p8), %s692_s17, 8  ;;  %v1088_v36 = vunpack.c.l.s4 (!%p686_p8), %v2052_v35  ;;  %v2349_v37 = vshrl.u32 (!%p686_p8), %v1090_v33, 7  ;;  %s2359_s6 = scalar_lea.vmem (!%p686_p8), [#allocation2], %s1708_s26 }
  0x4c   : > { %s2351_s29 = scalar_lea.vmem (!%p686_p8), [#allocation3], %s1709_s28  ;;  %1076 = vmatprep.mubr.bf16.mxu0 (!%p686_p8), %v881_v34  ;;  %v1861_v40 = vld [vmem:[%s2359_s6 + $0x4] ss:$8 sps:$4 sm:$0xff] (!%p686_p8)   ;;  %v1864_v43 = vld [vmem:[%s2359_s6] ss:$8 sps:$4 sm:$0xff] (!%p686_p8)   ;;  %p761_p9 = scmp.lt.s32.totalorder (!%p686_p8), %s1710_s7, 3 }
  0x4d   : > { %v1859_v38 = vld [vmem:[%s2351_s29 + $0x4] ss:$8 sps:$4 sm:$0xff] (!%p686_p8)   ;;  %v1089_v41 = vunpack.c.0.s8 (!%p686_p8), %v1088_v36  ;;  %v1863_v42 = vld [vmem:[%s2351_s29] ss:$8 sps:$4 sm:$0xff] (!%p686_p8)   ;;  %1427 = vmatprep.subr.bf16.mxu1 (!%p686_p8), %v1861_v40  ;;  %v1865_v44 = vld [vmem:[%s2351_s29 + $0x14] ss:$8 sps:$4 sm:$0xff] (!%p686_p8)  }
  0x4e   : > { %1044 = vmatprep.subr.bf16.mxu0 (!%p686_p8), %v1859_v38  ;;  %1428 = vmatpush1.bf16.msra.mxu1 (!%p686_p8), %v1864_v43  ;;  %v1867_v46 = vld [vmem:[%s2359_s6 + $0x14] ss:$8 sps:$4 sm:$0xff] (!%p686_p8)   ;;  %v1869_v47 = vld [vmem:[%s2351_s29 + $0x10] ss:$8 sps:$4 sm:$0xff] (!%p686_p8)   ;;  %v1871_v50 = vld [vmem:[%s2351_s29 + $0x24] ss:$8 sps:$4 sm:$0xff] (!%p686_p8)   ;;  %v1086_v43 = vcombine.high (!%p686_p8), %v2357_v39, %v2357_v39 }
  0x4f   : > { %v2366_v45 = vsub.s32 (!%p686_p8), %v1089_v41, %v2349_v37  ;;  %1045 = vmatpush1.bf16.msra.mxu0 (!%p686_p8), %v1863_v42  ;;  %v1870_v48 = vld [vmem:[%s2359_s6 + $0x10] ss:$8 sps:$4 sm:$0xff] (!%p686_p8)   ;;  %1429 = vmatprep.subr.bf16.mxu1 (!%p686_p8), %v1867_v46  ;;  %v1873_v51 = vld [vmem:[%s2359_s6 + $0x24] ss:$8 sps:$4 sm:$0xff] (!%p686_p8)   ;;  %v1875_v52 = vld [vmem:[%s2351_s29 + $0x20] ss:$8 sps:$4 sm:$0xff] (!%p686_p8)  }
  0x50   : > { %1046 = vmatprep.subr.bf16.mxu0 (!%p686_p8), %v1865_v44  ;;  %v1876_v53 = vld [vmem:[%s2359_s6 + $0x20] ss:$8 sps:$4 sm:$0xff] (!%p686_p8)   ;;  %v1877_v55 = vld [vmem:[%s2351_s29 + $0x34] ss:$8 sps:$4 sm:$0xff] (!%p686_p8)   ;;  %v1881_v57 = vld [vmem:[%s2351_s29 + $0x30] ss:$8 sps:$4 sm:$0xff] (!%p686_p8)  }
  0x51   : > { %v2373_v49 = vrot.slane %v2357_v39, %v2366_v45  ;;  %v1879_v56 = vld [vmem:[%s2359_s6 + $0x34] ss:$8 sps:$4 sm:$0xff]   ;;  %v1882_v58 = vld [vmem:[%s2359_s6 + $0x30] ss:$8 sps:$4 sm:$0xff]   ;;  %v1883_v59 = vld [vmem:[%s2351_s29 + $0x44] ss:$8 sps:$4 sm:$0xff]  }
  0x52   : > { %1430 = vmatpush1.bf16.msra.mxu1 %v1870_v48  ;;  %v1885_v60 = vld [vmem:[%s2359_s6 + $0x44] ss:$8 sps:$4 sm:$0xff]   ;;  %v1887_v61 = vld [vmem:[%s2351_s29 + $0x40] ss:$8 sps:$4 sm:$0xff]   ;;  %v1889_v63 = vld [vmem:[%s2351_s29 + $0x54] ss:$8 sps:$4 sm:$0xff]   ;;  %v2436_v48 = vrot.slane %v1086_v43, %v2366_v45 }
  0x53   : > { %v1101_v54 = vcombine.high %v2373_v49, %v2373_v49  ;;  %1047 = vmatpush1.bf16.msra.mxu0 %v1869_v47  ;;  %1431 = vmatprep.subr.bf16.mxu1 %v1873_v51  ;;  %v1888_v62 = vld [vmem:[%s2359_s6 + $0x40] ss:$8 sps:$4 sm:$0xff]   ;;  %v1891_v0 = vld [vmem:[%s2359_s6 + $0x54] ss:$8 sps:$4 sm:$0xff]   ;;  %v1893_v1 = vld [vmem:[%s2351_s29 + $0x50] ss:$8 sps:$4 sm:$0xff]  }
  0x54   : > { %1048 = vmatprep.subr.bf16.mxu0 %v1871_v50  ;;  %v1894_v2 = vld [vmem:[%s2359_s6 + $0x50] ss:$8 sps:$4 sm:$0xff]   ;;  %v1895_v3 = vld [vmem:[%s2351_s29 + $0x64] ss:$8 sps:$4 sm:$0xff]   ;;  %v1899_v5 = vld [vmem:[%s2351_s29 + $0x60] ss:$8 sps:$4 sm:$0xff]   ;;  %v1102_v51 = vcombine.high %v2436_v48, %v2436_v48 }
  0x55   : > { %1459 = vmatprep.mubr.bf16.mxu1 %v1101_v54  ;;  %v1897_v4 = vld [vmem:[%s2359_s6 + $0x64] ss:$8 sps:$4 sm:$0xff]   ;;  %v1900_v6 = vld [vmem:[%s2359_s6 + $0x60] ss:$8 sps:$4 sm:$0xff]   ;;  %v1901_v7 = vld [vmem:[%s2351_s29 + $0x74] ss:$8 sps:$4 sm:$0xff]  }
  0x56   : > { %1432 = vmatpush1.bf16.msra.mxu1 %v1876_v53  ;;  %v1903_v8 = vld [vmem:[%s2359_s6 + $0x74] ss:$8 sps:$4 sm:$0xff]   ;;  %v1905_v9 = vld [vmem:[%s2351_s29 + $0x70] ss:$8 sps:$4 sm:$0xff]   ;;  %v1907_v11 = vld [vmem:[%s2351_s29 + $0x84] ss:$8 sps:$4 sm:$0xff]  }
  0x57   : > { %1049 = vmatpush1.bf16.msra.mxu0 %v1875_v52  ;;  %1433 = vmatprep.subr.bf16.mxu1 %v1879_v56  ;;  %v1906_v10 = vld [vmem:[%s2359_s6 + $0x70] ss:$8 sps:$4 sm:$0xff]   ;;  %v1909_v12 = vld [vmem:[%s2359_s6 + $0x84] ss:$8 sps:$4 sm:$0xff]   ;;  %v1911_v13 = vld [vmem:[%s2351_s29 + $0x80] ss:$8 sps:$4 sm:$0xff]  }
  0x58   : > { %1050 = vmatprep.subr.bf16.mxu0 %v1877_v55  ;;  %v1912_v14 = vld [vmem:[%s2359_s6 + $0x80] ss:$8 sps:$4 sm:$0xff]   ;;  %v1913_v15 = vld [vmem:[%s2351_s29 + $0x94] ss:$8 sps:$4 sm:$0xff]   ;;  %v1917_v17 = vld [vmem:[%s2351_s29 + $0x90] ss:$8 sps:$4 sm:$0xff]  }
  0x59   : > { %v1915_v16 = vld [vmem:[%s2359_s6 + $0x94] ss:$8 sps:$4 sm:$0xff]   ;;  %v1918_v18 = vld [vmem:[%s2359_s6 + $0x90] ss:$8 sps:$4 sm:$0xff]   ;;  %v1919_v19 = vld [vmem:[%s2351_s29 + $0xa4] ss:$8 sps:$4 sm:$0xff]  }
  0x5a   : > { %1434 = vmatpush1.bf16.msra.mxu1 %v1882_v58  ;;  %v1921_v20 = vld [vmem:[%s2359_s6 + $0xa4] ss:$8 sps:$4 sm:$0xff]   ;;  %v1923_v21 = vld [vmem:[%s2351_s29 + $0xa0] ss:$8 sps:$4 sm:$0xff]   ;;  %v1925_v23 = vld [vmem:[%s2351_s29 + $0xb4] ss:$8 sps:$4 sm:$0xff]  }
  0x5b   : > { %1051 = vmatpush1.bf16.msra.mxu0 %v1881_v57  ;;  %1435 = vmatprep.subr.bf16.mxu1 %v1885_v60  ;;  %v1924_v22 = vld [vmem:[%s2359_s6 + $0xa0] ss:$8 sps:$4 sm:$0xff]   ;;  %v1927_v24 = vld [vmem:[%s2359_s6 + $0xb4] ss:$8 sps:$4 sm:$0xff]   ;;  %v1929_v25 = vld [vmem:[%s2351_s29 + $0xb0] ss:$8 sps:$4 sm:$0xff]  }
  0x5c   : > { %1052 = vmatprep.subr.bf16.mxu0 %v1883_v59  ;;  %v1930_v26 = vld [vmem:[%s2359_s6 + $0xb0] ss:$8 sps:$4 sm:$0xff]   ;;  %v1931_v27 = vld [vmem:[%s2351_s29 + $0xc4] ss:$8 sps:$4 sm:$0xff]   ;;  %v1935_v29 = vld [vmem:[%s2351_s29 + $0xc0] ss:$8 sps:$4 sm:$0xff]  }
  0x5d   : > { %v1933_v28 = vld [vmem:[%s2359_s6 + $0xc4] ss:$8 sps:$4 sm:$0xff]   ;;  %v1936_v30 = vld [vmem:[%s2359_s6 + $0xc0] ss:$8 sps:$4 sm:$0xff]   ;;  %v1937_v31 = vld [vmem:[%s2351_s29 + $0xd4] ss:$8 sps:$4 sm:$0xff]  }
  0x5e   : > { %1436 = vmatpush1.bf16.msra.mxu1 %v1888_v62  ;;  %v1939_v33 = vld [vmem:[%s2359_s6 + $0xd4] ss:$8 sps:$4 sm:$0xff]   ;;  %v1941_v34 = vld [vmem:[%s2351_s29 + $0xd0] ss:$8 sps:$4 sm:$0xff]   ;;  %v1943_v36 = vld [vmem:[%s2351_s29 + $0xe4] ss:$8 sps:$4 sm:$0xff]  }
  0x5f   : > { %1053 = vmatpush1.bf16.msra.mxu0 %v1887_v61  ;;  %1437 = vmatprep.subr.bf16.mxu1 %v1891_v0  ;;  %v1942_v35 = vld [vmem:[%s2359_s6 + $0xd0] ss:$8 sps:$4 sm:$0xff]   ;;  %v1945_v38 = vld [vmem:[%s2359_s6 + $0xe4] ss:$8 sps:$4 sm:$0xff]   ;;  %v1947_v40 = vld [vmem:[%s2351_s29 + $0xe0] ss:$8 sps:$4 sm:$0xff]  }
  0x60   : > { %1054 = vmatprep.subr.bf16.mxu0 %v1889_v63  ;;  %v1948_v41 = vld [vmem:[%s2359_s6 + $0xe0] ss:$8 sps:$4 sm:$0xff]   ;;  %v1949_v42 = vld [vmem:[%s2351_s29 + $0xf4] ss:$8 sps:$4 sm:$0xff]   ;;  %v1953_v46 = vld [vmem:[%s2351_s29 + $0xf0] ss:$8 sps:$4 sm:$0xff]  }
  0x61   : > { %v1951_v44 = vld [vmem:[%s2359_s6 + $0xf4] ss:$8 sps:$4 sm:$0xff]   ;;  %v1954_v47 = vld [vmem:[%s2359_s6 + $0xf0] ss:$8 sps:$4 sm:$0xff]   ;;  %v1958_v50 = vld [vmem:[%s2359_s6 + $0x104] ss:$8 sps:$4 sm:$0xff]  }
  0x62   : > { %1438 = vmatpush1.bf16.msra.mxu1 %v1894_v2  ;;  %v1956_v39 = vld [vmem:[%s2359_s6 + $0x100] ss:$8 sps:$4 sm:$0xff]   ;;  %v1961_v52 = vld [vmem:[%s2359_s6 + $0x114] ss:$8 sps:$4 sm:$0xff]   ;;  %v1959_v45 = vld [vmem:[%s2359_s6 + $0x110] ss:$8 sps:$4 sm:$0xff]  }
  0x63   : > { %1055 = vmatpush1.bf16.msra.mxu0 %v1893_v1  ;;  %1439 = vmatprep.subr.bf16.mxu1 %v1897_v4  ;;  %v1964_v53 = vld [vmem:[%s2359_s6 + $0x124] ss:$8 sps:$4 sm:$0xff]   ;;  %v1962_v54 = vld [vmem:[%s2359_s6 + $0x120] ss:$8 sps:$4 sm:$0xff]   ;;  %v1967_v55 = vld [vmem:[%s2359_s6 + $0x134] ss:$8 sps:$4 sm:$0xff]  }
  0x64   : > { %1056 = vmatprep.subr.bf16.mxu0 %v1895_v3  ;;  %v1965_v56 = vld [vmem:[%s2359_s6 + $0x130] ss:$8 sps:$4 sm:$0xff]   ;;  %v1973_v57 = vld [vmem:[%s2359_s6 + $0x154] ss:$8 sps:$4 sm:$0xff]   ;;  %v1976_v59 = vld [vmem:[%s2359_s6 + $0x164] ss:$8 sps:$4 sm:$0xff]  }
  0x65   : > { %v1971_v58 = vld [vmem:[%s2359_s6 + $0x150] ss:$8 sps:$4 sm:$0xff]   ;;  %v1974_v60 = vld [vmem:[%s2359_s6 + $0x160] ss:$8 sps:$4 sm:$0xff]   ;;  %v1979_v61 = vld [vmem:[%s2359_s6 + $0x174] ss:$8 sps:$4 sm:$0xff]  }
  0x66   : > { %1440 = vmatpush1.bf16.msra.mxu1 %v1900_v6  ;;  %v1977_v62 = vld [vmem:[%s2359_s6 + $0x170] ss:$8 sps:$4 sm:$0xff]   ;;  %v1982_v63 = vld [vmem:[%s2359_s6 + $0x184] ss:$8 sps:$4 sm:$0xff]   ;;  %v1980_v0 = vld [vmem:[%s2359_s6 + $0x180] ss:$8 sps:$4 sm:$0xff]  }
  0x67   : > { %1057 = vmatpush1.bf16.msra.mxu0 %v1899_v5  ;;  %1441 = vmatprep.subr.bf16.mxu1 %v1903_v8  ;;  %v1985_v1 = vld [vmem:[%s2359_s6 + $0x194] ss:$8 sps:$4 sm:$0xff]   ;;  %v1983_v2 = vld [vmem:[%s2359_s6 + $0x190] ss:$8 sps:$4 sm:$0xff]   ;;  %v1988_v3 = vld [vmem:[%s2359_s6 + $0x1a4] ss:$8 sps:$4 sm:$0xff]  }
  0x68   : > { %1058 = vmatprep.subr.bf16.mxu0 %v1901_v7  ;;  %v1986_v4 = vld [vmem:[%s2359_s6 + $0x1a0] ss:$8 sps:$4 sm:$0xff]   ;;  %v1991_v5 = vld [vmem:[%s2359_s6 + $0x1b4] ss:$8 sps:$4 sm:$0xff]   ;;  %v1989_v6 = vld [vmem:[%s2359_s6 + $0x1b0] ss:$8 sps:$4 sm:$0xff]  }
  0x69   : > { %v1994_v7 = vld [vmem:[%s2359_s6 + $0x1c4] ss:$8 sps:$4 sm:$0xff]   ;;  %v1992_v8 = vld [vmem:[%s2359_s6 + $0x1c0] ss:$8 sps:$4 sm:$0xff]   ;;  %s2517_s7 = smov (!%p761_p9, %s1710_s7), 3 }
  0x6a   : > { %1442 = vmatpush1.bf16.msra.mxu1 %v1906_v10  ;;  %v1995_v10 = vld [vmem:[%s2359_s6 + $0x1d0] ss:$8 sps:$4 sm:$0xff]   ;;  %s763_s10 = scalar_lea.vmem %s2507_s4, %s2517_s7  ;;  %s1712_s20 = sshll.u32 %s2517_s7, 1 }
  0x6b   : > { %1059 = vmatpush1.bf16.msra.mxu0 %v1905_v9  ;;  %1443 = vmatprep.subr.bf16.mxu1 %v1909_v12  ;;  %v1997_v9 = vld [vmem:[%s2359_s6 + $0x1d4] ss:$8 sps:$4 sm:$0xff]   ;;  %v1998_v12 = vld [vmem:[%s2359_s6 + $0x1e0] ss:$8 sps:$4 sm:$0xff]   ;;  %s773_s13 = scalar_lea.vmem %s2508_s5, %s1712_s20 }
  0x6c   : > { %1060 = vmatprep.subr.bf16.mxu0 %v1907_v11  ;;  %v2000_v11 = vld [vmem:[%s2359_s6 + $0x1e4] ss:$8 sps:$4 sm:$0xff]  }
  0x6e   : > { %1444 = vmatpush1.bf16.msra.mxu1 %v1912_v14  ;;  %v2001_v14 = vld [vmem:[%s2359_s6 + $0x1f0] ss:$8 sps:$4 sm:$0xff]  }
  0x6f   : > { %1061 = vmatpush1.bf16.msra.mxu0 %v1911_v13  ;;  %1445 = vmatprep.subr.bf16.mxu1 %v1915_v16  ;;  %v2003_v13 = vld [vmem:[%s2359_s6 + $0x1f4] ss:$8 sps:$4 sm:$0xff]  }
  0x70   : > { %1062 = vmatprep.subr.bf16.mxu0 %v1913_v15 }
  0x72   : > { %1446 = vmatpush1.bf16.msra.mxu1 %v1918_v18 }
  0x73   : > { %1063 = vmatpush1.bf16.msra.mxu0 %v1917_v17  ;;  %1447 = vmatprep.subr.bf16.mxu1 %v1921_v20 }
  0x74   : > { %1064 = vmatprep.subr.bf16.mxu0 %v1919_v19 }
  0x76   : > { %1448 = vmatpush1.bf16.msra.mxu1 %v1924_v22 }
  0x77   : > { %1065 = vmatpush1.bf16.msra.mxu0 %v1923_v21  ;;  %1449 = vmatprep.subr.bf16.mxu1 %v1927_v24 }
  0x78   : > { %1066 = vmatprep.subr.bf16.mxu0 %v1925_v23 }
  0x7a   : > { %1450 = vmatpush1.bf16.msra.mxu1 %v1930_v26  ;;  %v1509_v26 = vld [vmem:[%s763_s10] sm:$0x3] }
  0x7b   : > { %1067 = vmatpush1.bf16.msra.mxu0 %v1929_v25  ;;  %1451 = vmatprep.subr.bf16.mxu1 %v1933_v28  ;;  %v1513_v25 = vsub.s32 0, %v2349_v37 }
  0x7c   : > { %1068 = vmatprep.subr.bf16.mxu0 %v1931_v27  ;;  %v1517_v27 = vsub.s32 1, %v2349_v37 }
  0x7d   : > { %v1514_v28 = vrot.slane %v1509_v26, %v1513_v25 }
  0x7e   : > { %1452 = vmatpush1.bf16.msra.mxu1 %v1936_v30  ;;  %v1518_v30 = vrot.slane %v1509_v26, %v1517_v27 }
  0x7f   : > { %1069 = vmatpush1.bf16.msra.mxu0 %v1935_v29  ;;  %1453 = vmatprep.subr.bf16.mxu1 %v1939_v33 }
  0x80   : > { %1070 = vmatprep.subr.bf16.mxu0 %v1937_v31 }
  0x82   : > { %1454 = vmatpush1.bf16.msra.mxu1 %v1942_v35 }
  0x83   : > { %1071 = vmatpush1.bf16.msra.mxu0 %v1941_v34  ;;  %1455 = vmatprep.subr.bf16.mxu1 %v1945_v38 }
  0x84   : > { %1072 = vmatprep.subr.bf16.mxu0 %v1943_v36 }
  0x86   : > { %1456 = vmatpush1.bf16.msra.mxu1 %v1948_v41 }
  0x87   : > { %1073 = vmatpush1.bf16.msra.mxu0 %v1947_v40  ;;  %1457 = vmatprep.subr.bf16.mxu1 %v1951_v44 }
  0x88   : > { %1074 = vmatprep.subr.bf16.mxu0 %v1949_v42 }
  0x8a   : > { %1458 = vmatpush1.bf16.msra.mxu1 %v1954_v47 }
  0x8b   : > { %1075 = vmatpush1.bf16.msra.mxu0 %v1953_v46 }
  0x8c   : > { %1468 = vmatprep.subr.bf16.mxu0 %v1958_v50 }
  0x8d   : > { %1460 = vmatmul.mubr.bf16.vlgmr.msra.gmra.mrb[0].mxu1 %v2373_v49  ;;  %v1968_v49 = vld [vmem:[%s2359_s6 + $0x140] ss:$8 sps:$4 sm:$0xff]  }
  0x8e   : > { %1077 = vmatmul.mubr.bf16.vlgmr.msra.gmra.mrb[0].mxu0 %v2345_v32  ;;  %v1970_v32 = vld [vmem:[%s2359_s6 + $0x144] ss:$8 sps:$4 sm:$0xff]  }
  0x8f   : > { %1469 = vmatpush1.bf16.msra.mxu0 %v1956_v39  ;;  %1500 = vmatprep.mubr.bf16.mxu0 %v1102_v51 }
  0x90   : > { %1470 = vmatprep.subr.bf16.mxu0 %v1961_v52 }
  0x93   : > { %1471 = vmatpush1.bf16.msra.mxu0 %v1959_v45 }
  0x94   : > { %1472 = vmatprep.subr.bf16.mxu0 %v1964_v53 }
  0x97   : > { %1473 = vmatpush1.bf16.msra.mxu0 %v1962_v54 }
  0x98   : > { %1474 = vmatprep.subr.bf16.mxu0 %v1967_v55 }
  0x9b   : > { %1475 = vmatpush1.bf16.msra.mxu0 %v1965_v56 }
  0x9c   : > { %1476 = vmatprep.subr.bf16.mxu0 %v1970_v32 }
  0x9f   : > { %1477 = vmatpush1.bf16.msra.mxu0 %v1968_v49 }
  0xa0   : > { %1478 = vmatprep.subr.bf16.mxu0 %v1973_v57 }
  0xa3   : > { %1479 = vmatpush1.bf16.msra.mxu0 %v1971_v58 }
  0xa4   : > { %1480 = vmatprep.subr.bf16.mxu0 %v1976_v59 }
  0xa7   : > { %1481 = vmatpush1.bf16.msra.mxu0 %v1974_v60 }
  0xa8   : > { %1482 = vmatprep.subr.bf16.mxu0 %v1979_v61 }
  0xab   : > { %1483 = vmatpush1.bf16.msra.mxu0 %v1977_v62 }
  0xac   : > { %1484 = vmatprep.subr.bf16.mxu0 %v1982_v63 }
  0xaf   : > { %1485 = vmatpush1.bf16.msra.mxu0 %v1980_v0 }
  0xb0   : > { %1486 = vmatprep.subr.bf16.mxu0 %v1985_v1 }
  0xb3   : > { %1487 = vmatpush1.bf16.msra.mxu0 %v1983_v2 }
  0xb4   : > { %1488 = vmatprep.subr.bf16.mxu0 %v1988_v3 }
  0xb7   : > { %1489 = vmatpush1.bf16.msra.mxu0 %v1986_v4 }
  0xb8   : > { %1490 = vmatprep.subr.bf16.mxu0 %v1991_v5 }
  0xbb   : > { %1491 = vmatpush1.bf16.msra.mxu0 %v1989_v6 }
  0xbc   : > { %1492 = vmatprep.subr.bf16.mxu0 %v1994_v7 }
  0xbf   : > { %1493 = vmatpush1.bf16.msra.mxu0 %v1992_v8 }
  0xc0   : > { %1494 = vmatprep.subr.bf16.mxu0 %v1997_v9 }
  0xc3   : > { %1495 = vmatpush1.bf16.msra.mxu0 %v1995_v10 }
  0xc4   : > { %1496 = vmatprep.subr.bf16.mxu0 %v2000_v11 }
  0xc7   : > { %1497 = vmatpush1.bf16.msra.mxu0 %v1998_v12 }
  0xc8   : > { %1498 = vmatprep.subr.bf16.mxu0 %v2003_v13 }
  0xcb   : > { %1499 = vmatpush1.bf16.msra.mxu0 %v2001_v14 }
  0xce   : > { %1501 = vmatmul.mubr.bf16.vlgmr.msra.gmra.mrb[4].mxu0 %v2436_v48 }
 0x160   : > { %v1461_v16 = vpop.f32.mrb[0].mxu1 }
 0x161   : > { %v1078_v15 = vpop.f32.mrb[0].mxu0  ;;  %v1463_v19 = vpop.f32.mrb[1].mxu1 }
 0x162   : > { %v1462_v17 = vadd.f32 %v1461_v16, %v1078_v15  ;;  %v1080_v18 = vpop.f32.mrb[1].mxu0  ;;  %v1465_v22 = vpop.f32.mrb[2].mxu1 }
 0x163   : > { %v1464_v20 = vadd.f32 %v1463_v19, %v1080_v18  ;;  %v1082_v21 = vpop.f32.mrb[2].mxu0  ;;  %v1466_v24 = vpop.f32.mrb[3].mxu1 }
 0x164   : > { %v1083_v23 = vpop.f32.mrb[3].mxu0 }
 0x1a1   : > { %v1502_v29 = vpop.f32.mrb[4].mxu0 }
 0x1a2   : > { %v1503_v31 = vadd.f32 %v1502_v29, %v1462_v17  ;;  %v1504_v33 = vpop.f32.mrb[5].mxu0 }
 0x1a3   : > { %v1505_v34 = vadd.f32 %v1504_v33, %v1464_v20  ;;  %v1506_v35 = vpop.f32.mrb[6].mxu0 }
 0x1a4   : > { %v1521_v36 = vadd.f32 %v1514_v28, %v1503_v31  ;;  %v1507_v38 = vpop.f32.mrb[7].mxu0 }
 0x1a5   : > { %v1522_v40 = vadd.f32 %v1518_v30, %v1505_v34 }
 0x1a6   : > { %v1810_v41 = vmul.f32 -1.442695, %v1521_v36 }
 0x1a7   : > { %v1811_v42 = vmul.f32 -1.442695, %v1522_v40 }
 0x1a8   : > { %2004 = vpow2.f32 %v1810_v41 }
 0x1a9   : > { %2006 = vpow2.f32 %v1811_v42 }
 0x1b2   : > { %v2005_v43 = vpop.eup %2004 }
 0x1b3   : > { %v2007_v44 = vpop.eup %2006  ;;  %v1529_v46 = vadd.f32 1.0, %v2005_v43 }
 0x1b4   : > { %v1530_v47 = vadd.f32 1.0, %v2007_v44 }
 0x1b5   : > { %2008 = vrcp.f32 %v1529_v46 }
 0x1b6   : > { %2010 = vrcp.f32 %v1530_v47 }
 0x1bf   : > { %v2009_v37 = vpop.eup %2008 }
 0x1c0   : > { %v2011_v48 = vpop.eup %2010  ;;  %v1535_v50 = vmul.f32 %v2009_v37, %v1521_v36 }
 0x1c1   : > { %v1536_v39 = vmul.f32 %v2011_v48, %v1522_v40 }
 0x1c3   : > { %v1812_v51 = vpack.c.bf16 %v1536_v39, %v1535_v50 }
 0x1c5   : > { %1813 = vst.sshfl [vmem:[%s773_s13] sm:$0x33 pattern:$0x76325410] %v1812_v51 }
 0x1c6 PF: > { %s15_s22 = sadd.s32 1, %s2050_s22   ;;  %s2510_s18 = smov %s2038_s19 }
 0x1c7   : > { %p12_p10 = scmp.ge.s32.totalorder %s15_s22, 4   ;;  %s2511_s19 = smov %s2122_s27 }
 0x1c8   : > { %s2512_s20 = smov %s2046_s21  ;;  %s2513_s21 = smov %s2515_s23 }
 0x1c9   :  { %14 = sbr.rel (!%p12_p10) target bundleno = 3 (0x3), region = 168 }

// kernel: seg_no_ffm_forward.48
= control target key start
LH: loop header
LB: loop body
LE: loop exit
PB: predicated region body
PF: predicated region fallthrough
CT: control target
= control target key end

     0   :  { %vm242_vm0 = vcmask 261120   ;;  %vm473_vm1 = vcmask 257024   ;;  %s854_s1 = inlined_call_operand.vmem [shape: bf16[288,32], index: 1, kind: input, shape index: {}]   ;;  %s855_s0 = inlined_call_operand.vmem [shape: bf16[64,288], index: 0, kind: input, shape index: {}]   ;;  %s856_s2 = inlined_call_operand.vmem [shape: f32[1,32], index: 2, kind: input, shape index: {}]   ;;  %s857_s3 = inlined_call_operand.vmem [shape: bf16[64,32], index: 3, kind: output, shape index: {}]  }
   0x1   :  { %v619_v0 = vld [vmem:[%s854_s1 + $0x40] sm:$0xff]   ;;  %v621_v2 = vld [vmem:[%s854_s1 + $0x48] sm:$0xff]   ;;  %v623_v4 = vld [vmem:[%s854_s1 + $0x50] sm:$0xff]  }
   0x2   :  { %v620_v1 = vld [vmem:[%s854_s1] sm:$0xff]   ;;  %545 = vmatprep.subr.bf16.mxu0 %v619_v0  ;;  %603 = vmatprep.subr.bf16.mxu1 %v619_v0  ;;  %v622_v3 = vld [vmem:[%s854_s1 + $0x8] sm:$0xff]   ;;  %v624_v5 = vld [vmem:[%s854_s1 + $0x10] sm:$0xff]  }
   0x3   :  { %546 = vmatpush3.bf16.msra.mxu0 %v620_v1  ;;  %611 = vmatpush3.bf16.msra.mxu1 %v620_v1  ;;  %v625_v6 = vld [vmem:[%s854_s1 + $0x58] sm:$0xff]   ;;  %v627_v8 = vld [vmem:[%s854_s1 + $0x60] sm:$0xff]   ;;  %v629_v10 = vld [vmem:[%s854_s1 + $0x68] sm:$0xff]  }
   0x4   :  { %547 = vmatprep.subr.bf16.mxu0 %v621_v2  ;;  %604 = vmatprep.subr.bf16.mxu1 %v621_v2  ;;  %v626_v7 = vld [vmem:[%s854_s1 + $0x18] sm:$0xff]   ;;  %v628_v9 = vld [vmem:[%s854_s1 + $0x20] sm:$0xff]   ;;  %v630_v13 = vld [vmem:[%s854_s1 + $0x28] sm:$0xff]  }
   0x5   :  { %v637_v11 = vld [vmem:[%s855_s0 + $0x4] ss:$12 sps:$4 sm:$0xff]   ;;  %v640_v12 = vld [vmem:[%s855_s0 + $0x4c] ss:$12 sps:$4 sm:$0xff]   ;;  %v638_v20 = vld [vmem:[%s855_s0 + $0x48] ss:$12 sps:$4 sm:$0xff]  }
   0x6   :  { %v631_v14 = vld [vmem:[%s854_s1 + $0x70] sm:$0xff]   ;;  %287 = vmatprep.mubr.bf16.mxu0 %v637_v11  ;;  %311 = vmatprep.mubr.bf16.mxu1 %v640_v12  ;;  %v633_v16 = vld [vmem:[%s854_s1 + $0x78] sm:$0xff]   ;;  %v641_v18 = vld [vmem:[%s854_s1 + $0x80] sm:$0xff]  }
   0x7   :  { %548 = vmatpush3.bf16.msra.mxu0 %v622_v3  ;;  %612 = vmatpush3.bf16.msra.mxu1 %v622_v3  ;;  %v632_v15 = vld [vmem:[%s854_s1 + $0x30] sm:$0xff]   ;;  %v634_v17 = vld [vmem:[%s854_s1 + $0x38] sm:$0xff]   ;;  %v635_v19 = vld [vmem:[%s855_s0] ss:$12 sps:$4 sm:$0xff]  }
   0x8   :  { %549 = vmatprep.subr.bf16.mxu0 %v623_v4  ;;  %605 = vmatprep.subr.bf16.mxu1 %v623_v4  ;;  %v643_v21 = vld [vmem:[%s855_s0 + $0x1c] ss:$12 sps:$4 sm:$0xff]   ;;  %v646_v24 = vld [vmem:[%s855_s0 + $0x18] ss:$12 sps:$4 sm:$0xff]   ;;  %v647_v25 = vld [vmem:[%s855_s0 + $0x20] ss:$12 sps:$4 sm:$0xff]  }
   0x9   :  { %v642_v22 = vld [vmem:[%s854_s1 + $0x88] sm:$0xff]   ;;  %v648_v26 = vld [vmem:[%s855_s0 + $0x34] ss:$12 sps:$4 sm:$0xff]   ;;  %v650_v27 = vld [vmem:[%s855_s0 + $0x38] ss:$12 sps:$4 sm:$0xff]  }
   0xa   :  { %v645_v23 = vld [vmem:[%s855_s0 + $0x8] ss:$12 sps:$4 sm:$0xff]   ;;  %v651_v28 = vld [vmem:[%s855_s0 + $0x30] ss:$12 sps:$4 sm:$0xff]   ;;  %v486_v42 = vld [vmem:[%s856_s2] ss:$0 sm:$0xff] }
   0xb   :  { %550 = vmatpush3.bf16.msra.mxu0 %v624_v5  ;;  %613 = vmatpush3.bf16.msra.mxu1 %v624_v5  ;;  %v652_v29 = vld [vmem:[%s855_s0 + $0x50] ss:$12 sps:$4 sm:$0xff]  }
   0xc   :  { %551 = vmatprep.subr.bf16.mxu0 %v625_v6  ;;  %606 = vmatprep.subr.bf16.mxu1 %v625_v6 }
   0xf   :  { %552 = vmatpush3.bf16.msra.mxu0 %v626_v7  ;;  %614 = vmatpush3.bf16.msra.mxu1 %v626_v7 }
  0x10   :  { %553 = vmatprep.subr.bf16.mxu0 %v627_v8  ;;  %607 = vmatprep.subr.bf16.mxu1 %v627_v8 }
  0x13   :  { %554 = vmatpush3.bf16.msra.mxu0 %v628_v9  ;;  %615 = vmatpush3.bf16.msra.mxu1 %v628_v9 }
  0x14   :  { %555 = vmatprep.subr.bf16.mxu0 %v629_v10  ;;  %608 = vmatprep.subr.bf16.mxu1 %v629_v10 }
  0x17   :  { %556 = vmatpush3.bf16.msra.mxu0 %v630_v13  ;;  %616 = vmatpush3.bf16.msra.mxu1 %v630_v13 }
  0x18   :  { %557 = vmatprep.subr.bf16.mxu0 %v631_v14  ;;  %609 = vmatprep.subr.bf16.mxu1 %v631_v14 }
  0x1b   :  { %558 = vmatpush3.bf16.msra.mxu0 %v632_v15  ;;  %617 = vmatpush3.bf16.msra.mxu1 %v632_v15 }
  0x1c   :  { %559 = vmatprep.subr.bf16.mxu0 %v633_v16  ;;  %610 = vmatprep.subr.bf16.mxu1 %v633_v16 }
  0x1f   :  { %560 = vmatpush3.bf16.msra.mxu0 %v634_v17  ;;  %618 = vmatpush3.bf16.msra.mxu1 %v634_v17 }
  0x20   :  { %591 = vmatprep.subr.bf16.mxu1 %v641_v18 }
  0x22   :  { %288 = vmatmul.mubr.bf16.vlgmr.msra.gmra.mrb[0].mxu0 %v635_v19  ;;  %312 = vmatmul.mubr.bf16.vlgmr.msra.gmra.mrb[0].mxu1 %v638_v20 }
  0x23   :  { %592 = vmatpush3.bf16.msra.mxu1 %v641_v18  ;;  %295 = vmatprep.mubr.bf16.mxu0 %v643_v21 }
  0x24   :  { %593 = vmatprep.subr.bf16.mxu1 %v642_v22  ;;  %595 = vmatprep.mubr.msk.bf16.mxu1 %vm242_vm0, %v645_v23 }
  0x27   :  { %594 = vmatpush3.bf16.msra.mxu1 %v642_v22 }
  0x2a   :  { %296 = vmatmul.mubr.bf16.gmra.mrb[4].mxu0 %v646_v24  ;;  %596 = vmatmul.mubr.msk.bf16.vlgmr.msra.gmra.mrb[4].mxu1 %vm242_vm0, %v647_v25 }
  0x2b   :  { %303 = vmatprep.mubr.bf16.mxu0 %v648_v26  ;;  %599 = vmatprep.mubr.msk.bf16.mxu1 %vm242_vm0, %v650_v27 }
  0x32   :  { %304 = vmatmul.mubr.bf16.gmra.mrb[8].mxu0 %v651_v28  ;;  %600 = vmatmul.mubr.msk.bf16.gmra.mrb[8].mxu1 %vm242_vm0, %v652_v29 }
  0xf5   :  { %v561_v30 = vpop.f32.mrb[0].mxu0  ;;  %v579_v31 = vpop.f32.mrb[0].mxu1 }
  0xf6   :  { %v562_v32 = vpop.f32.mrb[1].mxu0  ;;  %v580_v33 = vpop.f32.mrb[1].mxu1 }
  0xf7   :  { %v563_v34 = vadd.f32 %v562_v32, %v561_v30  ;;  %v564_v35 = vpop.f32.mrb[2].mxu0  ;;  %v581_v36 = vadd.f32 %v580_v33, %v579_v31  ;;  %v582_v37 = vpop.f32.mrb[2].mxu1 }
  0xf8   :  { %v565_v38 = vpop.f32.mrb[3].mxu0  ;;  %v583_v39 = vpop.f32.mrb[3].mxu1 }
  0xf9   :  { %v566_v40 = vadd.f32 %v565_v38, %v564_v35  ;;  %v584_v41 = vadd.f32 %v583_v39, %v582_v37  ;;  %v290_v45 = vadd.f32 %v563_v34, %v486_v42  ;;  %v314_v62 = vadd.f32 %v581_v36, %v486_v42 }
  0xfb   :  { %v293_v52 = vadd.f32 %v566_v40, %v486_v42  ;;  %v317_v6 = vadd.f32 %v584_v41, %v486_v42 }
  0xfd   :  { %v567_v43 = vpop.f32.mrb[4].mxu0  ;;  %v597_v44 = vpop.f32.mrb[4].mxu1 }
  0xfe   :  { %v568_v46 = vpop.f32.mrb[5].mxu0  ;;  %v354_v47 = vpop.f32.mrb[5].mxu1 }
  0xff   :  { %v569_v48 = vadd.f32 %v568_v46, %v567_v43  ;;  %v802_v49 = vadd.f32 %v354_v47, %v290_v45  ;;  %v570_v50 = vpop.f32.mrb[6].mxu0  ;;  %v598_v51 = vpop.f32.mrb[6].mxu1 }
 0x100   :  { %v571_v53 = vpop.f32.mrb[7].mxu0  ;;  %v357_v54 = vpop.f32.mrb[7].mxu1 }
 0x101   :  { %v298_v55 = vadd.f32 %v569_v48, %v486_v42  ;;  %v521_v56 = vmul.f32 -1.442695, %v802_v49  ;;  %v572_v57 = vadd.f32 %v571_v53, %v570_v50  ;;  %v805_v58 = vadd.f32 %v357_v54, %v293_v52 }
 0x103   :  { %v807_v59 = vadd.f32 %v597_v44, %v298_v55  ;;  %653 = vpow2.f32 %v521_v56  ;;  %v301_v60 = vadd.f32 %v572_v57, %v486_v42  ;;  %v522_v61 = vmul.f32 -1.442695, %v805_v58 }
 0x105   :  { %v523_v63 = vmul.f32 -1.442695, %v807_v59  ;;  %v811_v0 = vadd.f32 %v598_v51, %v301_v60  ;;  %655 = vpow2.f32 %v522_v61  ;;  %v573_v1 = vpop.f32.mrb[8].mxu0  ;;  %v601_v2 = vpop.f32.mrb[8].mxu1 }
 0x106   :  { %v813_v3 = vadd.f32 %v601_v2, %v314_v62  ;;  %v574_v4 = vpop.f32.mrb[9].mxu0  ;;  %v370_v5 = vpop.f32.mrb[9].mxu1 }
 0x107   :  { %657 = vpow2.f32 %v523_v63  ;;  %v524_v7 = vmul.f32 -1.442695, %v811_v0  ;;  %v575_v8 = vadd.f32 %v574_v4, %v573_v1  ;;  %v576_v9 = vpop.f32.mrb[10].mxu0  ;;  %v602_v10 = vpop.f32.mrb[10].mxu1 }
 0x108   :  { %v527_v11 = vmul.f32 -1.442695, %v813_v3  ;;  %v382_v12 = vadd.f32 %v602_v10, %v317_v6  ;;  %v577_v13 = vpop.f32.mrb[11].mxu0  ;;  %v373_v14 = vpop.f32.mrb[11].mxu1 }
 0x109   :  { %659 = vpow2.f32 %v524_v7  ;;  %v306_v15 = vadd.f32 %v575_v8, %v486_v42  ;;  %v578_v16 = vadd.f32 %v577_v13, %v576_v9 }
 0x10a   :  { %661 = vpow2.f32 %v527_v11  ;;  %v528_v17 = vmul.f32 -1.442695, %v382_v12 }
 0x10b   :  { %v371_v18 = vadd.f32 %v370_v5, %v306_v15  ;;  %v309_v19 = vadd.f32 %v578_v16, %v486_v42 }
 0x10c   :  { %663 = vpow2.f32 %v528_v17 }
 0x10d   :  { %v654_v20 = vpop.eup %653  ;;  %v525_v21 = vmul.f32 -1.442695, %v371_v18  ;;  %v374_v22 = vadd.f32 %v373_v14, %v309_v19 }
 0x10e   :  { %v409_v23 = vadd.f32 1.0, %v654_v20 }
 0x10f   :  { %v656_v24 = vpop.eup %655  ;;  %665 = vpow2.f32 %v525_v21  ;;  %v526_v25 = vmul.f32 -1.442695, %v374_v22 }
 0x110   :  { %667 = vrcp.f32 %v409_v23  ;;  %v410_v26 = vadd.f32 1.0, %v656_v24 }
 0x111   :  { %v658_v27 = vpop.eup %657  ;;  %669 = vpow2.f32 %v526_v25 }
 0x112   :  { %v411_v28 = vadd.f32 1.0, %v658_v27  ;;  %671 = vrcp.f32 %v410_v26 }
 0x113   :  { %v660_v29 = vpop.eup %659 }
 0x114   :  { %v662_v30 = vpop.eup %661  ;;  %673 = vrcp.f32 %v411_v28  ;;  %v412_v31 = vadd.f32 1.0, %v660_v29 }
 0x115   :  { %v415_v32 = vadd.f32 1.0, %v662_v30 }
 0x116   :  { %v664_v33 = vpop.eup %663  ;;  %675 = vrcp.f32 %v412_v31 }
 0x117   :  { %677 = vrcp.f32 %v415_v32  ;;  %v416_v34 = vadd.f32 1.0, %v664_v33 }
 0x119   :  { %v666_v35 = vpop.eup %665  ;;  %679 = vrcp.f32 %v416_v34 }
 0x11a   :  { %v668_v36 = vpop.eup %667  ;;  %v413_v37 = vadd.f32 1.0, %v666_v35 }
 0x11b   :  { %v670_v38 = vpop.eup %669  ;;  %v433_v39 = vmul.f32 %v668_v36, %v802_v49 }
 0x11c   :  { %v672_v40 = vpop.eup %671  ;;  %681 = vrcp.f32 %v413_v37  ;;  %v414_v41 = vadd.f32 1.0, %v670_v38 }
 0x11d   :  { %v537_v42 = vpack.c.bf16 %v433_v39, %v433_v39  ;;  %v434_v43 = vmul.f32 %v672_v40, %v805_v58 }
 0x11e   :  { %v674_v44 = vpop.eup %673  ;;  %683 = vrcp.f32 %v414_v41 }
 0x11f   :  { %v435_v45 = vmul.f32 %v674_v44, %v807_v59  ;;  %474 = vst.msk [vmem:[%s857_s3] sm:$0xf] %vm473_vm1, %v537_v42  ;;  %v538_v46 = vpack.c.bf16 %v434_v43, %v434_v43 }
 0x120   :  { %v676_v47 = vpop.eup %675 }
 0x121   :  { %v678_v48 = vpop.eup %677  ;;  %v539_v49 = vpack.c.bf16 %v435_v45, %v435_v45  ;;  %v436_v50 = vmul.f32 %v676_v47, %v811_v0  ;;  %475 = vst.msk [vmem:[%s857_s3 + $0x4] sm:$0xf] %vm473_vm1, %v538_v46 }
 0x122   :  { %v439_v51 = vmul.f32 %v678_v48, %v813_v3 }
 0x123   :  { %v680_v52 = vpop.eup %679  ;;  %476 = vst.msk [vmem:[%s857_s3 + $0x8] sm:$0xf] %vm473_vm1, %v539_v49  ;;  %v540_v53 = vpack.c.bf16 %v436_v50, %v436_v50 }
 0x124   :  { %v543_v54 = vpack.c.bf16 %v439_v51, %v439_v51  ;;  %v440_v55 = vmul.f32 %v680_v52, %v382_v12 }
 0x125   :  { %477 = vst.msk [vmem:[%s857_s3 + $0xc] sm:$0xf] %vm473_vm1, %v540_v53 }
 0x126   :  { %v682_v56 = vpop.eup %681  ;;  %480 = vst.msk [vmem:[%s857_s3 + $0x18] sm:$0xf] %vm473_vm1, %v543_v54  ;;  %v544_v57 = vpack.c.bf16 %v440_v55, %v440_v55 }
 0x127   :  { %v437_v58 = vmul.f32 %v682_v56, %v371_v18 }
 0x128   :  { %v684_v59 = vpop.eup %683  ;;  %481 = vst.msk [vmem:[%s857_s3 + $0x1c] sm:$0xf] %vm473_vm1, %v544_v57 }
 0x129   :  { %v541_v60 = vpack.c.bf16 %v437_v58, %v437_v58  ;;  %v438_v61 = vmul.f32 %v684_v59, %v374_v22 }
 0x12b   :  { %478 = vst.msk [vmem:[%s857_s3 + $0x10] sm:$0xf] %vm473_vm1, %v541_v60  ;;  %v542_v62 = vpack.c.bf16 %v438_v61, %v438_v61 }
 0x12d   :  { %479 = vst.msk [vmem:[%s857_s3 + $0x14] sm:$0xf] %vm473_vm1, %v542_v62 }

// kernel: seg_no_ffm_forward.49
= control target key start
LH: loop header
LB: loop body
LE: loop exit
PB: predicated region body
PF: predicated region fallthrough
CT: control target
= control target key end

     0   :  { %vm66_vm0 = vcmask 261120   ;;  %vm144_vm1 = vcmask 31744   ;;  %s269_s1 = inlined_call_operand.vmem [shape: bf16[32,4], index: 1, kind: input, shape index: {}]   ;;  %s270_s0 = inlined_call_operand.vmem [shape: bf16[64,32], index: 0, kind: input, shape index: {}]   ;;  %s271_s2 = inlined_call_operand.vmem [shape: f32[1,4], index: 2, kind: input, shape index: {}]   ;;  %s272_s3 = inlined_call_operand.vmem [shape: f32[64,4], index: 3, kind: output, shape index: {}]  }
   0x1   :  { %v190_v0 = vld [vmem:[%s269_s1] sm:$0xff]   ;;  %v191_v1 = vld [vmem:[%s269_s1 + $0x8] sm:$0xff]   ;;  %v193_v3 = vld [vmem:[%s270_s0 + $0x10] sm:$0xff]  }
   0x2   :  { %174 = vmatprep.subr.bf16.mxu0 %v190_v0  ;;  %186 = vmatprep.subr.bf16.mxu1 %v190_v0  ;;  %v192_v2 = vld [vmem:[%s270_s0] sm:$0xff]   ;;  %v194_v4 = vld [vmem:[%s270_s0 + $0x8] sm:$0xff]   ;;  %v195_v5 = vld [vmem:[%s270_s0 + $0x18] sm:$0xff]  }
   0x3   :  { %175 = vmatpush3.bf16.msra.mxu0 %v190_v0  ;;  %188 = vmatpush3.bf16.msra.mxu1 %v190_v0  ;;  %v157_v6 = vld [vmem:[%s271_s2] ss:$0 sm:$0xff] }
   0x4   :  { %176 = vmatprep.subr.bf16.mxu0 %v191_v1  ;;  %187 = vmatprep.subr.bf16.mxu1 %v191_v1 }
   0x5   :  { %178 = vmatprep.mubr.msk.bf16.mxu0 %vm66_vm0, %v192_v2  ;;  %182 = vmatprep.mubr.msk.bf16.mxu1 %vm66_vm0, %v193_v3 }
   0x7   :  { %177 = vmatpush3.bf16.msra.mxu0 %v191_v1  ;;  %189 = vmatpush3.bf16.msra.mxu1 %v191_v1 }
   0xa   :  { %179 = vmatmul.mubr.msk.bf16.vlgmr.msra.gmra.mrb[0].mxu0 %vm66_vm0, %v194_v4  ;;  %183 = vmatmul.mubr.msk.bf16.vlgmr.msra.gmra.mrb[0].mxu1 %vm66_vm0, %v195_v5 }
  0xdd   :  { %v180_v7 = vpop.f32.mrb[0].mxu0  ;;  %v184_v8 = vpop.f32.mrb[0].mxu1 }
  0xde   :  { %v122_v9 = vadd.f32 %v180_v7, %v157_v6  ;;  %v138_v10 = vadd.f32 %v184_v8, %v157_v6  ;;  %v113_v11 = vpop.f32.mrb[1].mxu0  ;;  %v129_v12 = vpop.f32.mrb[1].mxu1 }
  0xdf   :  { %v114_v13 = vadd.f32 %v157_v6, %v113_v11  ;;  %v130_v14 = vadd.f32 %v157_v6, %v129_v12  ;;  %v181_v15 = vpop.f32.mrb[2].mxu0  ;;  %v185_v16 = vpop.f32.mrb[2].mxu1 }
  0xe0   :  { %147 = vst.msk [vmem:[%s272_s3 + $0x10] sm:$0xff] %vm144_vm1, %v122_v9  ;;  %151 = vst.msk [vmem:[%s272_s3 + $0x30] sm:$0xff] %vm144_vm1, %v138_v10  ;;  %v125_v17 = vadd.f32 %v181_v15, %v157_v6  ;;  %v141_v18 = vadd.f32 %v185_v16, %v157_v6  ;;  %v116_v19 = vpop.f32.mrb[3].mxu0  ;;  %v132_v20 = vpop.f32.mrb[3].mxu1 }
  0xe1   :  { %145 = vst.msk [vmem:[%s272_s3] sm:$0xff] %vm144_vm1, %v114_v13  ;;  %149 = vst.msk [vmem:[%s272_s3 + $0x20] sm:$0xff] %vm144_vm1, %v130_v14  ;;  %v117_v21 = vadd.f32 %v157_v6, %v116_v19  ;;  %v133_v22 = vadd.f32 %v157_v6, %v132_v20 }
  0xe2   :  { %148 = vst.msk [vmem:[%s272_s3 + $0x18] sm:$0xff] %vm144_vm1, %v125_v17  ;;  %152 = vst.msk [vmem:[%s272_s3 + $0x38] sm:$0xff] %vm144_vm1, %v141_v18 }
  0xe3   :  { %146 = vst.msk [vmem:[%s272_s3 + $0x8] sm:$0xff] %vm144_vm1, %v117_v21  ;;  %150 = vst.msk [vmem:[%s272_s3 + $0x28] sm:$0xff] %vm144_vm1, %v133_v22 }

</bundles_post_ra>
